<compile_context>
chip_gen: v7x
topology: tpu7x:2x2x1
jax: 0.10.0
libtpu: 0.0.40
codegen_flags: <defaults>
</compile_context>

<pallas_src>
import functools

import jax
import jax.numpy as jnp
from jax import lax
from jax.experimental import pallas as pl
from jax.experimental.pallas import tpu as pltpu


# ----------------------------------------------------------------------------
# LSTM cell (input projection already hoisted: g_in = x_t @ W_ih)
# PyTorch gate order [i, f, g, o].
# ----------------------------------------------------------------------------
def _lstm_cell(g_in, h, c, whh, b, H):
    gates = g_in + jnp.dot(h, whh, preferred_element_type=jnp.float32) + b
    i = jax.nn.sigmoid(gates[:, 0:H])
    f = jax.nn.sigmoid(gates[:, H:2 * H])
    g = jnp.tanh(gates[:, 2 * H:3 * H])
    o = jax.nn.sigmoid(gates[:, 3 * H:4 * H])
    c_new = f * c + i * g
    h_new = o * jnp.tanh(c_new)
    return h_new, c_new


# ----------------------------------------------------------------------------
# Fused MTGVAE forward kernel (single invocation, everything in VMEM)
# ----------------------------------------------------------------------------
def mtgvae_kernel(*refs, B, T, L, H, INP):
    (x_ref, eps_ref,
     enc_wih_ref, enc_whh_f_ref, enc_b_f_ref, enc_whh_b_ref, enc_b_b_ref,
     wfc_f_ref, wfc_b_ref, bfc_ref,
     wh1_ref, bh1_ref, wh2_ref, bh2_ref, wh3_ref, bh3_ref,
     wmean_ref, bmean_ref, wvar_ref, bvar_ref,
     wdl_ref, bdl_ref, wout_a_ref, wout_z_ref, bout_ref,
     dec_wih_ref, dec_whh_f_ref, dec_b_f_ref, dec_whh_b_ref, dec_b_b_ref,
     w1_f_ref, w1_b_ref, bw1_ref,
     y_ref, mean_ref, logvar_ref) = refs

    f32 = jnp.float32

    # ====================== Encoder_LSTM =====================================
    # Hoisted input projection: one MXU matmul for both directions & all steps.
    x2d = x_ref[...].reshape(B * T, INP)                         # (B*T, INP)
    gx = jnp.dot(x2d, enc_wih_ref[...],
                 preferred_element_type=f32).reshape(B, T, 8 * H)

    enc_whh_f = enc_whh_f_ref[...]
    enc_whh_b = enc_whh_b_ref[...]
    enc_b_f = enc_b_f_ref[...]
    enc_b_b = enc_b_b_ref[...]

    zer = jnp.zeros((B, H), f32)
    h_f, c_f, h_b, c_b = zer, zer, zer, zer
    h_b_at_last = zer
    # Fused + fully unrolled forward/backward recurrence (two independent chains).
    for s in range(T):
        gf = gx[:, s, 0:4 * H]                 # fwd gates at position s
        gb = gx[:, T - 1 - s, 4 * H:8 * H]     # bwd gates at position T-1-s
        h_f, c_f = _lstm_cell(gf, h_f, c_f, enc_whh_f, enc_b_f, H)
        h_b, c_b = _lstm_cell(gb, h_b, c_b, enc_whh_b, enc_b_b, H)
        if s == 0:
            h_b_at_last = h_b                  # r_out[:, -1, H:2H]

    # fc(r_out[:, -1, :]) as a split matmul (no lane concatenate).
    eA = (jnp.dot(h_f, wfc_f_ref[...], preferred_element_type=f32)
          + jnp.dot(h_b_at_last, wfc_b_ref[...], preferred_element_type=f32)
          + bfc_ref[...])                                        # (B, E)

    # ====================== Encoder_latent ===================================
    # NOTE: nn.ReLU(inplace=True) aliases `residual` with the ReLU'd activation.
    h1 = jnp.dot(eA, wh1_ref[...], preferred_element_type=f32) + bh1_ref[...]
    resid = jnp.maximum(h1, 0.0)
    t2 = jnp.maximum(
        jnp.dot(resid, wh2_ref[...], preferred_element_type=f32) + bh2_ref[...], 0.0)
    t3 = jnp.maximum(
        jnp.dot(t2, wh3_ref[...], preferred_element_type=f32) + bh3_ref[...], 0.0)
    hfin = t3 + resid
    mean = jnp.dot(hfin, wmean_ref[...], preferred_element_type=f32) + bmean_ref[...]
    log_var = jnp.dot(hfin, wvar_ref[...], preferred_element_type=f32) + bvar_ref[...]
    var = jnp.exp(0.5 * log_var)
    z = mean + var * eps_ref[...]                                # reparameterization

    mean_ref[...] = mean.astype(mean_ref.dtype)
    logvar_ref[...] = log_var.astype(logvar_ref.dtype)

    # ====================== Decoder_latent ===================================
    wdl = wdl_ref[...]
    bdl = bdl_ref[...]
    a = jnp.maximum(jnp.dot(z, wdl, preferred_element_type=f32) + bdl, 0.0)
    a = jnp.maximum(jnp.dot(a, wdl, preferred_element_type=f32) + bdl, 0.0)
    a = jnp.maximum(jnp.dot(a, wdl, preferred_element_type=f32) + bdl, 0.0)
    # out(cat(eA, a)) as a split matmul (no lane concatenate).
    eB = (jnp.dot(eA, wout_a_ref[...], preferred_element_type=f32)
          + jnp.dot(a, wout_z_ref[...], preferred_element_type=f32)
          + bout_ref[...])                                       # (B, E)

    # ====================== Decoder_LSTM =====================================
    # Input sequence is eB repeated L times -> a single hoisted projection.
    gd = jnp.dot(eB, dec_wih_ref[...], preferred_element_type=f32)   # (B, 8H)
    gd_f = gd[:, 0:4 * H]
    gd_b = gd[:, 4 * H:8 * H]

    dec_whh_f = dec_whh_f_ref[...]
    dec_whh_b = dec_whh_b_ref[...]
    dec_b_f = dec_b_f_ref[...]
    dec_b_b = dec_b_b_ref[...]

    # Initial state = encoder (h_n, c_n): dir0 <- fwd final, dir1 <- bwd final.
    hd_f, cd_f = h_f, c_f
    hd_b, cd_b = h_b, c_b
    hf_pos = [None] * L      # forward hidden at position t
    hb_pos = [None] * L      # backward hidden at position t
    for s in range(L):
        hd_f, cd_f = _lstm_cell(gd_f, hd_f, cd_f, dec_whh_f, dec_b_f, H)
        hd_b, cd_b = _lstm_cell(gd_b, hd_b, cd_b, dec_whh_b, dec_b_b, H)
        hf_pos[s] = hd_f
        hb_pos[L - 1 - s] = hd_b

    # w1(r_out) per position; split matmul (no concat); independent of recurrence.
    w1_f = w1_f_ref[...]
    w1_b = w1_b_ref[...]
    bw1 = bw1_ref[...]
    for t in range(L):
        y_t = (jnp.dot(hf_pos[t], w1_f, preferred_element_type=f32)
               + jnp.dot(hb_pos[t], w1_b, preferred_element_type=f32)
               + bw1)                                            # (B, INP)
        y_ref[:, t:t + 1, :] = y_t[:, None, :].astype(y_ref.dtype)


# ----------------------------------------------------------------------------
# Wrapper
# ----------------------------------------------------------------------------
PARAM_ORDER = (
    "enc_wih", "enc_whh_f", "enc_b_f", "enc_whh_b", "enc_b_b",
    "wfc_f", "wfc_b", "bfc",
    "wh1", "bh1", "wh2", "bh2", "wh3", "bh3",
    "wmean", "bmean", "wvar", "bvar",
    "wdl", "bdl", "wout_a", "wout_z", "bout",
    "dec_wih", "dec_whh_f", "dec_b_f", "dec_whh_b", "dec_b_b",
    "w1_f", "w1_b", "bw1",
)


def mtgvae_forward(x, eps, params, out_len):
    """x: (B, T, inp) f32, eps: (B, E) f32 reparameterization noise.
    Returns (y (B, out_len, inp), mean (B, E), log_var (B, E))."""
    B, T, INP = x.shape
    H = params["enc_whh_f"].shape[0]
    E = params["wfc_f"].shape[1]
    L = out_len

    operands = [x, eps] + [params[k] for k in PARAM_ORDER]

    # VMEM budget: operands + outputs with generous headroom (raise at real size,
    # and on v7x keep below the 64 MiB physical cap).
    out_bytes = 4 * (B * L * INP + 2 * B * E)
    in_bytes = sum(int(a.size) * a.dtype.itemsize for a in operands)
    vmem_limit = max(4 * (in_bytes + out_bytes), 32 * 1024 * 1024)

    vmem = pl.BlockSpec(memory_space=pltpu.MemorySpace.VMEM)
    kernel = functools.partial(mtgvae_kernel, B=B, T=T, L=L, H=H, INP=INP)

    y, mean, log_var = pl.pallas_call(
        kernel,
        out_shape=(
            jax.ShapeDtypeStruct((B, L, INP), jnp.float32),
            jax.ShapeDtypeStruct((B, E), jnp.float32),
            jax.ShapeDtypeStruct((B, E), jnp.float32),
        ),
        in_specs=[vmem] * len(operands),
        out_specs=(vmem, vmem, vmem),
        compiler_params=pltpu.CompilerParams(vmem_limit_bytes=int(vmem_limit)),
    )(*operands)
    return y, mean, log_var


# ----------------------------------------------------------------------------
# Deterministic parameter init (PyTorch-style U(-1/sqrt(fan), 1/sqrt(fan)))
# Weights are stored pre-transposed as (in_features, out_features); concatenated
# 2H-input Linears are stored as split halves; both LSTM direction input
# projections are packed side by side as (in, 8H). Gate order [i, f, g, o].
# At the real model size store these in bfloat16.
# ----------------------------------------------------------------------------
def init_params(key, inp, H, E, Dh):
    keys = iter(jax.random.split(key, 48))

    def u(shape, scale):
        return jax.random.uniform(next(keys), shape, jnp.float32, -scale, scale)

    s_lstm = H ** -0.5
    s_fc = (2 * H) ** -0.5
    s_e = E ** -0.5
    s_dh = Dh ** -0.5
    s_2e = (2 * E) ** -0.5

    return {
        # Encoder_LSTM
        "enc_wih":   u((inp, 8 * H), s_lstm),
        "enc_whh_f": u((H, 4 * H), s_lstm),
        "enc_b_f":   u((1, 4 * H), s_lstm) + u((1, 4 * H), s_lstm),   # b_ih + b_hh
        "enc_whh_b": u((H, 4 * H), s_lstm),
        "enc_b_b":   u((1, 4 * H), s_lstm) + u((1, 4 * H), s_lstm),
        "wfc_f": u((H, E), s_fc), "wfc_b": u((H, E), s_fc), "bfc": u((1, E), s_fc),
        # Encoder_latent
        "wh1": u((E, Dh), s_e),   "bh1": u((1, Dh), s_e),
        "wh2": u((Dh, Dh), s_dh), "bh2": u((1, Dh), s_dh),
        "wh3": u((Dh, Dh), s_dh), "bh3": u((1, Dh), s_dh),
        "wmean": u((Dh, E), s_dh), "bmean": u((1, E), s_dh),
        "wvar":  u((Dh, E), s_dh), "bvar":  u((1, E), s_dh),
        # Decoder_latent (FC_hidden shared across the 3 applications)
        "wdl": u((E, E), s_e), "bdl": u((1, E), s_e),
        "wout_a": u((E, E), s_2e), "wout_z": u((E, E), s_2e), "bout": u((1, E), s_2e),
        # Decoder_LSTM
        "dec_wih":   u((E, 8 * H), s_lstm),
        "dec_whh_f": u((H, 4 * H), s_lstm),
        "dec_b_f":   u((1, 4 * H), s_lstm) + u((1, 4 * H), s_lstm),
        "dec_whh_b": u((H, 4 * H), s_lstm),
        "dec_b_b":   u((1, 4 * H), s_lstm) + u((1, 4 * H), s_lstm),
        "w1_f": u((H, inp), s_fc), "w1_b": u((H, inp), s_fc), "bw1": u((1, inp), s_fc),
    }


# ----------------------------------------------------------------------------
# Pure-JAX reference (correctness check)
# ----------------------------------------------------------------------------
def reference_forward(x, eps, params, out_len):
    B, T, INP = x.shape
    H = params["enc_whh_f"].shape[0]

    def run_lstm(gx_seq, h0, c0, whh, b):
        # gx_seq: (steps, B, 4H) hoisted input projections, in processing order.
        def step(carry, g):
            h, c = carry
            gates = g + h @ whh + b
            i = jax.nn.sigmoid(gates[:, 0:H])
            f = jax.nn.sigmoid(gates[:, H:2 * H])
            gg = jnp.tanh(gates[:, 2 * H:3 * H])
            o = jax.nn.sigmoid(gates[:, 3 * H:4 * H])
            c = f * c + i * gg
            h = o * jnp.tanh(c)
            return (h, c), h
        (h, c), hs = lax.scan(step, (h0, c0), gx_seq)
        return hs, h, c

    z0 = jnp.zeros((B, H), jnp.float32)

    # Encoder_LSTM
    x_tm = jnp.transpose(x, (1, 0, 2))                               # (T, B, INP)
    gx = jnp.einsum("tbi,ig->tbg", x_tm, params["enc_wih"])          # (T, B, 8H)
    hs_f, h_f, c_f = run_lstm(gx[..., :4 * H], z0, z0,
                              params["enc_whh_f"], params["enc_b_f"])
    hs_b, h_b, c_b = run_lstm(gx[::-1, :, 4 * H:], z0, z0,
                              params["enc_whh_b"], params["enc_b_b"])
    eA = hs_f[-1] @ params["wfc_f"] + hs_b[0] @ params["wfc_b"] + params["bfc"]

    # Encoder_latent (inplace ReLU => residual is the ReLU'd activation)
    resid = jax.nn.relu(eA @ params["wh1"] + params["bh1"])
    t2 = jax.nn.relu(resid @ params["wh2"] + params["bh2"])
    t3 = jax.nn.relu(t2 @ params["wh3"] + params["bh3"])
    hfin = t3 + resid
    mean = hfin @ params["wmean"] + params["bmean"]
    log_var = hfin @ params["wvar"] + params["bvar"]
    z = mean + jnp.exp(0.5 * log_var) * eps

    # Decoder_latent
    a = jax.nn.relu(z @ params["wdl"] + params["bdl"])
    a = jax.nn.relu(a @ params["wdl"] + params["bdl"])
    a = jax.nn.relu(a @ params["wdl"] + params["bdl"])
    eB = eA @ params["wout_a"] + a @ params["wout_z"] + params["bout"]

    # Decoder_LSTM (constant input eB, initial state = encoder state)
    gd = eB @ params["dec_wih"]                                      # (B, 8H)
    gd_f = jnp.broadcast_to(gd[:, :4 * H], (out_len, B, 4 * H))
    gd_b = jnp.broadcast_to(gd[:, 4 * H:], (out_len, B, 4 * H))
    hs_df, _, _ = run_lstm(gd_f, h_f, c_f, params["dec_whh_f"], params["dec_b_f"])
    hs_db, _, _ = run_lstm(gd_b, h_b, c_b, params["dec_whh_b"], params["dec_b_b"])
    hb_by_pos = hs_db[::-1]                                          # position order
    y_tm = (jnp.einsum("tbh,ho->tbo", hs_df, params["w1_f"])
            + jnp.einsum("tbh,ho->tbo", hb_by_pos, params["w1_b"])
            + params["bw1"])
    y = jnp.transpose(y_tm, (1, 0, 2))                               # (B, out_len, INP)
    return y, mean, log_var


if __name__ == "__main__":
    # Scaled shapes: inp=45 kept; hidden 1024->128; latent 512->64; out_len 30->6.
    B, T, INP = 2, 8, 45
    H, E, DH = 128, 64, 128
    OUT_LEN = 6

    key = jax.random.PRNGKey(0)
    kx, keps, kp = jax.random.split(key, 3)
    x = jax.random.normal(kx, (B, T, INP), jnp.float32)
    # Reparameterization noise passed explicitly for determinism
    # (PyTorch draws it with torch.FloatTensor(...).normal_()).
    eps = jax.random.normal(keps, (B, E), jnp.float32)
    params = init_params(kp, INP, H, E, DH)

    y, mean, log_var = mtgvae_forward(x, eps, params, OUT_LEN)
    jax.block_until_ready((y, mean, log_var))

    ry, rmean, rlogvar = reference_forward(x, eps, params, OUT_LEN)
    assert y.shape == (B, OUT_LEN, INP)
    assert mean.shape == (B, E) and log_var.shape == (B, E)
    assert jnp.allclose(y, ry, rtol=1e-2, atol=1e-2)
    assert jnp.allclose(mean, rmean, rtol=1e-2, atol=1e-2)
    assert jnp.allclose(log_var, rlogvar, rtol=1e-2, atol=1e-2)

    print("KERNEL_OK")
</pallas_src>

<mosaic_0001>
module attributes {stable_mosaic.version = 11 : i64} {
  func.func @mtgvae_kernel(%arg0: memref<2x8x45xf32, #tpu.memory_space<vmem>>, %arg1: memref<2x64xf32, #tpu.memory_space<vmem>>, %arg2: memref<45x1024xf32, #tpu.memory_space<vmem>>, %arg3: memref<128x512xf32, #tpu.memory_space<vmem>>, %arg4: memref<1x512xf32, #tpu.memory_space<vmem>>, %arg5: memref<128x512xf32, #tpu.memory_space<vmem>>, %arg6: memref<1x512xf32, #tpu.memory_space<vmem>>, %arg7: memref<128x64xf32, #tpu.memory_space<vmem>>, %arg8: memref<128x64xf32, #tpu.memory_space<vmem>>, %arg9: memref<1x64xf32, #tpu.memory_space<vmem>>, %arg10: memref<64x128xf32, #tpu.memory_space<vmem>>, %arg11: memref<1x128xf32, #tpu.memory_space<vmem>>, %arg12: memref<128x128xf32, #tpu.memory_space<vmem>>, %arg13: memref<1x128xf32, #tpu.memory_space<vmem>>, %arg14: memref<128x128xf32, #tpu.memory_space<vmem>>, %arg15: memref<1x128xf32, #tpu.memory_space<vmem>>, %arg16: memref<128x64xf32, #tpu.memory_space<vmem>>, %arg17: memref<1x64xf32, #tpu.memory_space<vmem>>, %arg18: memref<128x64xf32, #tpu.memory_space<vmem>>, %arg19: memref<1x64xf32, #tpu.memory_space<vmem>>, %arg20: memref<64x64xf32, #tpu.memory_space<vmem>>, %arg21: memref<1x64xf32, #tpu.memory_space<vmem>>, %arg22: memref<64x64xf32, #tpu.memory_space<vmem>>, %arg23: memref<64x64xf32, #tpu.memory_space<vmem>>, %arg24: memref<1x64xf32, #tpu.memory_space<vmem>>, %arg25: memref<64x1024xf32, #tpu.memory_space<vmem>>, %arg26: memref<128x512xf32, #tpu.memory_space<vmem>>, %arg27: memref<1x512xf32, #tpu.memory_space<vmem>>, %arg28: memref<128x512xf32, #tpu.memory_space<vmem>>, %arg29: memref<1x512xf32, #tpu.memory_space<vmem>>, %arg30: memref<128x45xf32, #tpu.memory_space<vmem>>, %arg31: memref<128x45xf32, #tpu.memory_space<vmem>>, %arg32: memref<1x45xf32, #tpu.memory_space<vmem>>, %arg33: memref<2x6x45xf32, #tpu.memory_space<vmem>>, %arg34: memref<2x64xf32, #tpu.memory_space<vmem>>, %arg35: memref<2x64xf32, #tpu.memory_space<vmem>>) attributes {dimension_semantics = [], scalar_prefetch = 0 : i64, scratch_operands = 0 : i64, tpu.core_type = #tpu.core_type<tc>} {
    %c0 = arith.constant 0 : index
    %c0_0 = arith.constant 0 : index
    %c0_1 = arith.constant 0 : index
    %0 = vector.load %arg0[%c0, %c0_0, %c0_1] : memref<2x8x45xf32, #tpu.memory_space<vmem>>, vector<2x8x45xf32>
    %1 = vector.shape_cast %0 : vector<2x8x45xf32> to vector<16x45xf32>
    %c0_2 = arith.constant 0 : index
    %c0_3 = arith.constant 0 : index
    %2 = vector.load %arg2[%c0_2, %c0_3] : memref<45x1024xf32, #tpu.memory_space<vmem>>, vector<45x1024xf32>
    %cst = arith.constant dense<0.000000e+00> : vector<16x1024xf32>
    %3 = tpu.matmul %1, %2, %cst {dimension_numbers = #tpu.dot_dimension_numbers<[1], [0], [0], [1], [0, 0, 1, 1], [], []>} : vector<16x45xf32>, vector<45x1024xf32>, vector<16x1024xf32> -> vector<16x1024xf32>
    %4 = vector.shape_cast %3 : vector<16x1024xf32> to vector<2x8x1024xf32>
    %c0_4 = arith.constant 0 : index
    %c0_5 = arith.constant 0 : index
    %5 = vector.load %arg3[%c0_4, %c0_5] : memref<128x512xf32, #tpu.memory_space<vmem>>, vector<128x512xf32>
    %c0_6 = arith.constant 0 : index
    %c0_7 = arith.constant 0 : index
    %6 = vector.load %arg5[%c0_6, %c0_7] : memref<128x512xf32, #tpu.memory_space<vmem>>, vector<128x512xf32>
    %c0_8 = arith.constant 0 : index
    %c0_9 = arith.constant 0 : index
    %7 = vector.load %arg4[%c0_8, %c0_9] : memref<1x512xf32, #tpu.memory_space<vmem>>, vector<1x512xf32>
    %c0_10 = arith.constant 0 : index
    %c0_11 = arith.constant 0 : index
    %8 = vector.load %arg6[%c0_10, %c0_11] : memref<1x512xf32, #tpu.memory_space<vmem>>, vector<1x512xf32>
    %cst_12 = arith.constant 0.000000e+00 : f32
    %9 = vector.broadcast %cst_12 : f32 to vector<2x128xf32>
    %10 = vector.extract_strided_slice %4 {offsets = [0, 0, 0], sizes = [2, 1, 512], strides = [1, 1, 1]} : vector<2x8x1024xf32> to vector<2x1x512xf32>
    %11 = vector.shape_cast %10 : vector<2x1x512xf32> to vector<2x512xf32>
    %12 = vector.extract_strided_slice %4 {offsets = [0, 7, 512], sizes = [2, 1, 512], strides = [1, 1, 1]} : vector<2x8x1024xf32> to vector<2x1x512xf32>
    %13 = vector.shape_cast %12 : vector<2x1x512xf32> to vector<2x512xf32>
    %cst_13 = arith.constant dense<0.000000e+00> : vector<2x512xf32>
    %14 = tpu.matmul %9, %5, %cst_13 {dimension_numbers = #tpu.dot_dimension_numbers<[1], [0], [0], [1], [0, 0, 1, 1], [], []>} : vector<2x128xf32>, vector<128x512xf32>, vector<2x512xf32> -> vector<2x512xf32>
    %15 = arith.addf %11, %14 : vector<2x512xf32>
    %16 = vector.broadcast %7 : vector<1x512xf32> to vector<2x512xf32>
    %17 = arith.addf %15, %16 : vector<2x512xf32>
    %18 = vector.extract_strided_slice %17 {offsets = [0, 0], sizes = [2, 128], strides = [1, 1]} : vector<2x512xf32> to vector<2x128xf32>
    %19 = arith.negf %18 : vector<2x128xf32>
    %20 = math.exp %19 : vector<2x128xf32>
    %cst_14 = arith.constant 1.000000e+00 : f32
    %21 = vector.broadcast %cst_14 : f32 to vector<2x128xf32>
    %22 = arith.addf %21, %20 : vector<2x128xf32>
    %23 = arith.divf %21, %22 : vector<2x128xf32>
    %24 = vector.extract_strided_slice %17 {offsets = [0, 128], sizes = [2, 128], strides = [1, 1]} : vector<2x512xf32> to vector<2x128xf32>
    %25 = arith.negf %24 : vector<2x128xf32>
    %26 = math.exp %25 : vector<2x128xf32>
    %cst_15 = arith.constant 1.000000e+00 : f32
    %27 = vector.broadcast %cst_15 : f32 to vector<2x128xf32>
    %28 = arith.addf %27, %26 : vector<2x128xf32>
    %29 = arith.divf %27, %28 : vector<2x128xf32>
    %30 = vector.extract_strided_slice %17 {offsets = [0, 256], sizes = [2, 128], strides = [1, 1]} : vector<2x512xf32> to vector<2x128xf32>
    %31 = math.tanh %30 : vector<2x128xf32>
    %32 = vector.extract_strided_slice %17 {offsets = [0, 384], sizes = [2, 128], strides = [1, 1]} : vector<2x512xf32> to vector<2x128xf32>
    %33 = arith.negf %32 : vector<2x128xf32>
    %34 = math.exp %33 : vector<2x128xf32>
    %cst_16 = arith.constant 1.000000e+00 : f32
    %35 = vector.broadcast %cst_16 : f32 to vector<2x128xf32>
    %36 = arith.addf %35, %34 : vector<2x128xf32>
    %37 = arith.divf %35, %36 : vector<2x128xf32>
    %38 = arith.mulf %29, %9 : vector<2x128xf32>
    %39 = arith.mulf %23, %31 : vector<2x128xf32>
    %40 = arith.addf %38, %39 : vector<2x128xf32>
    %41 = math.tanh %40 : vector<2x128xf32>
    %42 = arith.mulf %37, %41 : vector<2x128xf32>
    %cst_17 = arith.constant dense<0.000000e+00> : vector<2x512xf32>
    %43 = tpu.matmul %9, %6, %cst_17 {dimension_numbers = #tpu.dot_dimension_numbers<[1], [0], [0], [1], [0, 0, 1, 1], [], []>} : vector<2x128xf32>, vector<128x512xf32>, vector<2x512xf32> -> vector<2x512xf32>
    %44 = arith.addf %13, %43 : vector<2x512xf32>
    %45 = vector.broadcast %8 : vector<1x512xf32> to vector<2x512xf32>
    %46 = arith.addf %44, %45 : vector<2x512xf32>
    %47 = vector.extract_strided_slice %46 {offsets = [0, 0], sizes = [2, 128], strides = [1, 1]} : vector<2x512xf32> to vector<2x128xf32>
    %48 = arith.negf %47 : vector<2x128xf32>
    %49 = math.exp %48 : vector<2x128xf32>
    %cst_18 = arith.constant 1.000000e+00 : f32
    %50 = vector.broadcast %cst_18 : f32 to vector<2x128xf32>
    %51 = arith.addf %50, %49 : vector<2x128xf32>
    %52 = arith.divf %50, %51 : vector<2x128xf32>
    %53 = vector.extract_strided_slice %46 {offsets = [0, 128], sizes = [2, 128], strides = [1, 1]} : vector<2x512xf32> to vector<2x128xf32>
    %54 = arith.negf %53 : vector<2x128xf32>
    %55 = math.exp %54 : vector<2x128xf32>
    %cst_19 = arith.constant 1.000000e+00 : f32
    %56 = vector.broadcast %cst_19 : f32 to vector<2x128xf32>
    %57 = arith.addf %56, %55 : vector<2x128xf32>
    %58 = arith.divf %56, %57 : vector<2x128xf32>
    %59 = vector.extract_strided_slice %46 {offsets = [0, 256], sizes = [2, 128], strides = [1, 1]} : vector<2x512xf32> to vector<2x128xf32>
    %60 = math.tanh %59 : vector<2x128xf32>
    %61 = vector.extract_strided_slice %46 {offsets = [0, 384], sizes = [2, 128], strides = [1, 1]} : vector<2x512xf32> to vector<2x128xf32>
    %62 = arith.negf %61 : vector<2x128xf32>
    %63 = math.exp %62 : vector<2x128xf32>
    %cst_20 = arith.constant 1.000000e+00 : f32
    %64 = vector.broadcast %cst_20 : f32 to vector<2x128xf32>
    %65 = arith.addf %64, %63 : vector<2x128xf32>
    %66 = arith.divf %64, %65 : vector<2x128xf32>
    %67 = arith.mulf %58, %9 : vector<2x128xf32>
    %68 = arith.mulf %52, %60 : vector<2x128xf32>
    %69 = arith.addf %67, %68 : vector<2x128xf32>
    %70 = math.tanh %69 : vector<2x128xf32>
    %71 = arith.mulf %66, %70 : vector<2x128xf32>
    %72 = vector.extract_strided_slice %4 {offsets = [0, 1, 0], sizes = [2, 1, 512], strides = [1, 1, 1]} : vector<2x8x1024xf32> to vector<2x1x512xf32>
    %73 = vector.shape_cast %72 : vector<2x1x512xf32> to vector<2x512xf32>
    %74 = vector.extract_strided_slice %4 {offsets = [0, 6, 512], sizes = [2, 1, 512], strides = [1, 1, 1]} : vector<2x8x1024xf32> to vector<2x1x512xf32>
    %75 = vector.shape_cast %74 : vector<2x1x512xf32> to vector<2x512xf32>
    %cst_21 = arith.constant dense<0.000000e+00> : vector<2x512xf32>
    %76 = tpu.matmul %42, %5, %cst_21 {dimension_numbers = #tpu.dot_dimension_numbers<[1], [0], [0], [1], [0, 0, 1, 1], [], []>} : vector<2x128xf32>, vector<128x512xf32>, vector<2x512xf32> -> vector<2x512xf32>
    %77 = arith.addf %73, %76 : vector<2x512xf32>
    %78 = vector.broadcast %7 : vector<1x512xf32> to vector<2x512xf32>
    %79 = arith.addf %77, %78 : vector<2x512xf32>
    %80 = vector.extract_strided_slice %79 {offsets = [0, 0], sizes = [2, 128], strides = [1, 1]} : vector<2x512xf32> to vector<2x128xf32>
    %81 = arith.negf %80 : vector<2x128xf32>
    %82 = math.exp %81 : vector<2x128xf32>
    %cst_22 = arith.constant 1.000000e+00 : f32
    %83 = vector.broadcast %cst_22 : f32 to vector<2x128xf32>
    %84 = arith.addf %83, %82 : vector<2x128xf32>
    %85 = arith.divf %83, %84 : vector<2x128xf32>
    %86 = vector.extract_strided_slice %79 {offsets = [0, 128], sizes = [2, 128], strides = [1, 1]} : vector<2x512xf32> to vector<2x128xf32>
    %87 = arith.negf %86 : vector<2x128xf32>
    %88 = math.exp %87 : vector<2x128xf32>
    %cst_23 = arith.constant 1.000000e+00 : f32
    %89 = vector.broadcast %cst_23 : f32 to vector<2x128xf32>
    %90 = arith.addf %89, %88 : vector<2x128xf32>
    %91 = arith.divf %89, %90 : vector<2x128xf32>
    %92 = vector.extract_strided_slice %79 {offsets = [0, 256], sizes = [2, 128], strides = [1, 1]} : vector<2x512xf32> to vector<2x128xf32>
    %93 = math.tanh %92 : vector<2x128xf32>
    %94 = vector.extract_strided_slice %79 {offsets = [0, 384], sizes = [2, 128], strides = [1, 1]} : vector<2x512xf32> to vector<2x128xf32>
    %95 = arith.negf %94 : vector<2x128xf32>
    %96 = math.exp %95 : vector<2x128xf32>
    %cst_24 = arith.constant 1.000000e+00 : f32
    %97 = vector.broadcast %cst_24 : f32 to vector<2x128xf32>
    %98 = arith.addf %97, %96 : vector<2x128xf32>
    %99 = arith.divf %97, %98 : vector<2x128xf32>
    %100 = arith.mulf %91, %40 : vector<2x128xf32>
    %101 = arith.mulf %85, %93 : vector<2x128xf32>
    %102 = arith.addf %100, %101 : vector<2x128xf32>
    %103 = math.tanh %102 : vector<2x128xf32>
    %104 = arith.mulf %99, %103 : vector<2x128xf32>
    %cst_25 = arith.constant dense<0.000000e+00> : vector<2x512xf32>
    %105 = tpu.matmul %71, %6, %cst_25 {dimension_numbers = #tpu.dot_dimension_numbers<[1], [0], [0], [1], [0, 0, 1, 1], [], []>} : vector<2x128xf32>, vector<128x512xf32>, vector<2x512xf32> -> vector<2x512xf32>
    %106 = arith.addf %75, %105 : vector<2x512xf32>
    %107 = vector.broadcast %8 : vector<1x512xf32> to vector<2x512xf32>
    %108 = arith.addf %106, %107 : vector<2x512xf32>
    %109 = vector.extract_strided_slice %108 {offsets = [0, 0], sizes = [2, 128], strides = [1, 1]} : vector<2x512xf32> to vector<2x128xf32>
    %110 = arith.negf %109 : vector<2x128xf32>
    %111 = math.exp %110 : vector<2x128xf32>
    %cst_26 = arith.constant 1.000000e+00 : f32
    %112 = vector.broadcast %cst_26 : f32 to vector<2x128xf32>
    %113 = arith.addf %112, %111 : vector<2x128xf32>
    %114 = arith.divf %112, %113 : vector<2x128xf32>
    %115 = vector.extract_strided_slice %108 {offsets = [0, 128], sizes = [2, 128], strides = [1, 1]} : vector<2x512xf32> to vector<2x128xf32>
    %116 = arith.negf %115 : vector<2x128xf32>
    %117 = math.exp %116 : vector<2x128xf32>
    %cst_27 = arith.constant 1.000000e+00 : f32
    %118 = vector.broadcast %cst_27 : f32 to vector<2x128xf32>
    %119 = arith.addf %118, %117 : vector<2x128xf32>
    %120 = arith.divf %118, %119 : vector<2x128xf32>
    %121 = vector.extract_strided_slice %108 {offsets = [0, 256], sizes = [2, 128], strides = [1, 1]} : vector<2x512xf32> to vector<2x128xf32>
    %122 = math.tanh %121 : vector<2x128xf32>
    %123 = vector.extract_strided_slice %108 {offsets = [0, 384], sizes = [2, 128], strides = [1, 1]} : vector<2x512xf32> to vector<2x128xf32>
    %124 = arith.negf %123 : vector<2x128xf32>
    %125 = math.exp %124 : vector<2x128xf32>
    %cst_28 = arith.constant 1.000000e+00 : f32
    %126 = vector.broadcast %cst_28 : f32 to vector<2x128xf32>
    %127 = arith.addf %126, %125 : vector<2x128xf32>
    %128 = arith.divf %126, %127 : vector<2x128xf32>
    %129 = arith.mulf %120, %69 : vector<2x128xf32>
    %130 = arith.mulf %114, %122 : vector<2x128xf32>
    %131 = arith.addf %129, %130 : vector<2x128xf32>
    %132 = math.tanh %131 : vector<2x128xf32>
    %133 = arith.mulf %128, %132 : vector<2x128xf32>
    %134 = vector.extract_strided_slice %4 {offsets = [0, 2, 0], sizes = [2, 1, 512], strides = [1, 1, 1]} : vector<2x8x1024xf32> to vector<2x1x512xf32>
    %135 = vector.shape_cast %134 : vector<2x1x512xf32> to vector<2x512xf32>
    %136 = vector.extract_strided_slice %4 {offsets = [0, 5, 512], sizes = [2, 1, 512], strides = [1, 1, 1]} : vector<2x8x1024xf32> to vector<2x1x512xf32>
    %137 = vector.shape_cast %136 : vector<2x1x512xf32> to vector<2x512xf32>
    %cst_29 = arith.constant dense<0.000000e+00> : vector<2x512xf32>
    %138 = tpu.matmul %104, %5, %cst_29 {dimension_numbers = #tpu.dot_dimension_numbers<[1], [0], [0], [1], [0, 0, 1, 1], [], []>} : vector<2x128xf32>, vector<128x512xf32>, vector<2x512xf32> -> vector<2x512xf32>
    %139 = arith.addf %135, %138 : vector<2x512xf32>
    %140 = vector.broadcast %7 : vector<1x512xf32> to vector<2x512xf32>
    %141 = arith.addf %139, %140 : vector<2x512xf32>
    %142 = vector.extract_strided_slice %141 {offsets = [0, 0], sizes = [2, 128], strides = [1, 1]} : vector<2x512xf32> to vector<2x128xf32>
    %143 = arith.negf %142 : vector<2x128xf32>
    %144 = math.exp %143 : vector<2x128xf32>
    %cst_30 = arith.constant 1.000000e+00 : f32
    %145 = vector.broadcast %cst_30 : f32 to vector<2x128xf32>
    %146 = arith.addf %145, %144 : vector<2x128xf32>
    %147 = arith.divf %145, %146 : vector<2x128xf32>
    %148 = vector.extract_strided_slice %141 {offsets = [0, 128], sizes = [2, 128], strides = [1, 1]} : vector<2x512xf32> to vector<2x128xf32>
    %149 = arith.negf %148 : vector<2x128xf32>
    %150 = math.exp %149 : vector<2x128xf32>
    %cst_31 = arith.constant 1.000000e+00 : f32
    %151 = vector.broadcast %cst_31 : f32 to vector<2x128xf32>
    %152 = arith.addf %151, %150 : vector<2x128xf32>
    %153 = arith.divf %151, %152 : vector<2x128xf32>
    %154 = vector.extract_strided_slice %141 {offsets = [0, 256], sizes = [2, 128], strides = [1, 1]} : vector<2x512xf32> to vector<2x128xf32>
    %155 = math.tanh %154 : vector<2x128xf32>
    %156 = vector.extract_strided_slice %141 {offsets = [0, 384], sizes = [2, 128], strides = [1, 1]} : vector<2x512xf32> to vector<2x128xf32>
    %157 = arith.negf %156 : vector<2x128xf32>
    %158 = math.exp %157 : vector<2x128xf32>
    %cst_32 = arith.constant 1.000000e+00 : f32
    %159 = vector.broadcast %cst_32 : f32 to vector<2x128xf32>
    %160 = arith.addf %159, %158 : vector<2x128xf32>
    %161 = arith.divf %159, %160 : vector<2x128xf32>
    %162 = arith.mulf %153, %102 : vector<2x128xf32>
    %163 = arith.mulf %147, %155 : vector<2x128xf32>
    %164 = arith.addf %162, %163 : vector<2x128xf32>
    %165 = math.tanh %164 : vector<2x128xf32>
    %166 = arith.mulf %161, %165 : vector<2x128xf32>
    %cst_33 = arith.constant dense<0.000000e+00> : vector<2x512xf32>
    %167 = tpu.matmul %133, %6, %cst_33 {dimension_numbers = #tpu.dot_dimension_numbers<[1], [0], [0], [1], [0, 0, 1, 1], [], []>} : vector<2x128xf32>, vector<128x512xf32>, vector<2x512xf32> -> vector<2x512xf32>
    %168 = arith.addf %137, %167 : vector<2x512xf32>
    %169 = vector.broadcast %8 : vector<1x512xf32> to vector<2x512xf32>
    %170 = arith.addf %168, %169 : vector<2x512xf32>
    %171 = vector.extract_strided_slice %170 {offsets = [0, 0], sizes = [2, 128], strides = [1, 1]} : vector<2x512xf32> to vector<2x128xf32>
    %172 = arith.negf %171 : vector<2x128xf32>
    %173 = math.exp %172 : vector<2x128xf32>
    %cst_34 = arith.constant 1.000000e+00 : f32
    %174 = vector.broadcast %cst_34 : f32 to vector<2x128xf32>
    %175 = arith.addf %174, %173 : vector<2x128xf32>
    %176 = arith.divf %174, %175 : vector<2x128xf32>
    %177 = vector.extract_strided_slice %170 {offsets = [0, 128], sizes = [2, 128], strides = [1, 1]} : vector<2x512xf32> to vector<2x128xf32>
    %178 = arith.negf %177 : vector<2x128xf32>
    %179 = math.exp %178 : vector<2x128xf32>
    %cst_35 = arith.constant 1.000000e+00 : f32
    %180 = vector.broadcast %cst_35 : f32 to vector<2x128xf32>
    %181 = arith.addf %180, %179 : vector<2x128xf32>
    %182 = arith.divf %180, %181 : vector<2x128xf32>
    %183 = vector.extract_strided_slice %170 {offsets = [0, 256], sizes = [2, 128], strides = [1, 1]} : vector<2x512xf32> to vector<2x128xf32>
    %184 = math.tanh %183 : vector<2x128xf32>
    %185 = vector.extract_strided_slice %170 {offsets = [0, 384], sizes = [2, 128], strides = [1, 1]} : vector<2x512xf32> to vector<2x128xf32>
    %186 = arith.negf %185 : vector<2x128xf32>
    %187 = math.exp %186 : vector<2x128xf32>
    %cst_36 = arith.constant 1.000000e+00 : f32
    %188 = vector.broadcast %cst_36 : f32 to vector<2x128xf32>
    %189 = arith.addf %188, %187 : vector<2x128xf32>
    %190 = arith.divf %188, %189 : vector<2x128xf32>
    %191 = arith.mulf %182, %131 : vector<2x128xf32>
    %192 = arith.mulf %176, %184 : vector<2x128xf32>
    %193 = arith.addf %191, %192 : vector<2x128xf32>
    %194 = math.tanh %193 : vector<2x128xf32>
    %195 = arith.mulf %190, %194 : vector<2x128xf32>
    %196 = vector.extract_strided_slice %4 {offsets = [0, 3, 0], sizes = [2, 1, 512], strides = [1, 1, 1]} : vector<2x8x1024xf32> to vector<2x1x512xf32>
    %197 = vector.shape_cast %196 : vector<2x1x512xf32> to vector<2x512xf32>
    %198 = vector.extract_strided_slice %4 {offsets = [0, 4, 512], sizes = [2, 1, 512], strides = [1, 1, 1]} : vector<2x8x1024xf32> to vector<2x1x512xf32>
    %199 = vector.shape_cast %198 : vector<2x1x512xf32> to vector<2x512xf32>
    %cst_37 = arith.constant dense<0.000000e+00> : vector<2x512xf32>
    %200 = tpu.matmul %166, %5, %cst_37 {dimension_numbers = #tpu.dot_dimension_numbers<[1], [0], [0], [1], [0, 0, 1, 1], [], []>} : vector<2x128xf32>, vector<128x512xf32>, vector<2x512xf32> -> vector<2x512xf32>
    %201 = arith.addf %197, %200 : vector<2x512xf32>
    %202 = vector.broadcast %7 : vector<1x512xf32> to vector<2x512xf32>
    %203 = arith.addf %201, %202 : vector<2x512xf32>
    %204 = vector.extract_strided_slice %203 {offsets = [0, 0], sizes = [2, 128], strides = [1, 1]} : vector<2x512xf32> to vector<2x128xf32>
    %205 = arith.negf %204 : vector<2x128xf32>
    %206 = math.exp %205 : vector<2x128xf32>
    %cst_38 = arith.constant 1.000000e+00 : f32
    %207 = vector.broadcast %cst_38 : f32 to vector<2x128xf32>
    %208 = arith.addf %207, %206 : vector<2x128xf32>
    %209 = arith.divf %207, %208 : vector<2x128xf32>
    %210 = vector.extract_strided_slice %203 {offsets = [0, 128], sizes = [2, 128], strides = [1, 1]} : vector<2x512xf32> to vector<2x128xf32>
    %211 = arith.negf %210 : vector<2x128xf32>
    %212 = math.exp %211 : vector<2x128xf32>
    %cst_39 = arith.constant 1.000000e+00 : f32
    %213 = vector.broadcast %cst_39 : f32 to vector<2x128xf32>
    %214 = arith.addf %213, %212 : vector<2x128xf32>
    %215 = arith.divf %213, %214 : vector<2x128xf32>
    %216 = vector.extract_strided_slice %203 {offsets = [0, 256], sizes = [2, 128], strides = [1, 1]} : vector<2x512xf32> to vector<2x128xf32>
    %217 = math.tanh %216 : vector<2x128xf32>
    %218 = vector.extract_strided_slice %203 {offsets = [0, 384], sizes = [2, 128], strides = [1, 1]} : vector<2x512xf32> to vector<2x128xf32>
    %219 = arith.negf %218 : vector<2x128xf32>
    %220 = math.exp %219 : vector<2x128xf32>
    %cst_40 = arith.constant 1.000000e+00 : f32
    %221 = vector.broadcast %cst_40 : f32 to vector<2x128xf32>
    %222 = arith.addf %221, %220 : vector<2x128xf32>
    %223 = arith.divf %221, %222 : vector<2x128xf32>
    %224 = arith.mulf %215, %164 : vector<2x128xf32>
    %225 = arith.mulf %209, %217 : vector<2x128xf32>
    %226 = arith.addf %224, %225 : vector<2x128xf32>
    %227 = math.tanh %226 : vector<2x128xf32>
    %228 = arith.mulf %223, %227 : vector<2x128xf32>
    %cst_41 = arith.constant dense<0.000000e+00> : vector<2x512xf32>
    %229 = tpu.matmul %195, %6, %cst_41 {dimension_numbers = #tpu.dot_dimension_numbers<[1], [0], [0], [1], [0, 0, 1, 1], [], []>} : vector<2x128xf32>, vector<128x512xf32>, vector<2x512xf32> -> vector<2x512xf32>
    %230 = arith.addf %199, %229 : vector<2x512xf32>
    %231 = vector.broadcast %8 : vector<1x512xf32> to vector<2x512xf32>
    %232 = arith.addf %230, %231 : vector<2x512xf32>
    %233 = vector.extract_strided_slice %232 {offsets = [0, 0], sizes = [2, 128], strides = [1, 1]} : vector<2x512xf32> to vector<2x128xf32>
    %234 = arith.negf %233 : vector<2x128xf32>
    %235 = math.exp %234 : vector<2x128xf32>
    %cst_42 = arith.constant 1.000000e+00 : f32
    %236 = vector.broadcast %cst_42 : f32 to vector<2x128xf32>
    %237 = arith.addf %236, %235 : vector<2x128xf32>
    %238 = arith.divf %236, %237 : vector<2x128xf32>
    %239 = vector.extract_strided_slice %232 {offsets = [0, 128], sizes = [2, 128], strides = [1, 1]} : vector<2x512xf32> to vector<2x128xf32>
    %240 = arith.negf %239 : vector<2x128xf32>
    %241 = math.exp %240 : vector<2x128xf32>
    %cst_43 = arith.constant 1.000000e+00 : f32
    %242 = vector.broadcast %cst_43 : f32 to vector<2x128xf32>
    %243 = arith.addf %242, %241 : vector<2x128xf32>
    %244 = arith.divf %242, %243 : vector<2x128xf32>
    %245 = vector.extract_strided_slice %232 {offsets = [0, 256], sizes = [2, 128], strides = [1, 1]} : vector<2x512xf32> to vector<2x128xf32>
    %246 = math.tanh %245 : vector<2x128xf32>
    %247 = vector.extract_strided_slice %232 {offsets = [0, 384], sizes = [2, 128], strides = [1, 1]} : vector<2x512xf32> to vector<2x128xf32>
    %248 = arith.negf %247 : vector<2x128xf32>
    %249 = math.exp %248 : vector<2x128xf32>
    %cst_44 = arith.constant 1.000000e+00 : f32
    %250 = vector.broadcast %cst_44 : f32 to vector<2x128xf32>
    %251 = arith.addf %250, %249 : vector<2x128xf32>
    %252 = arith.divf %250, %251 : vector<2x128xf32>
    %253 = arith.mulf %244, %193 : vector<2x128xf32>
    %254 = arith.mulf %238, %246 : vector<2x128xf32>
    %255 = arith.addf %253, %254 : vector<2x128xf32>
    %256 = math.tanh %255 : vector<2x128xf32>
    %257 = arith.mulf %252, %256 : vector<2x128xf32>
    %258 = vector.extract_strided_slice %4 {offsets = [0, 4, 0], sizes = [2, 1, 512], strides = [1, 1, 1]} : vector<2x8x1024xf32> to vector<2x1x512xf32>
    %259 = vector.shape_cast %258 : vector<2x1x512xf32> to vector<2x512xf32>
    %260 = vector.extract_strided_slice %4 {offsets = [0, 3, 512], sizes = [2, 1, 512], strides = [1, 1, 1]} : vector<2x8x1024xf32> to vector<2x1x512xf32>
    %261 = vector.shape_cast %260 : vector<2x1x512xf32> to vector<2x512xf32>
    %cst_45 = arith.constant dense<0.000000e+00> : vector<2x512xf32>
    %262 = tpu.matmul %228, %5, %cst_45 {dimension_numbers = #tpu.dot_dimension_numbers<[1], [0], [0], [1], [0, 0, 1, 1], [], []>} : vector<2x128xf32>, vector<128x512xf32>, vector<2x512xf32> -> vector<2x512xf32>
    %263 = arith.addf %259, %262 : vector<2x512xf32>
    %264 = vector.broadcast %7 : vector<1x512xf32> to vector<2x512xf32>
    %265 = arith.addf %263, %264 : vector<2x512xf32>
    %266 = vector.extract_strided_slice %265 {offsets = [0, 0], sizes = [2, 128], strides = [1, 1]} : vector<2x512xf32> to vector<2x128xf32>
    %267 = arith.negf %266 : vector<2x128xf32>
    %268 = math.exp %267 : vector<2x128xf32>
    %cst_46 = arith.constant 1.000000e+00 : f32
    %269 = vector.broadcast %cst_46 : f32 to vector<2x128xf32>
    %270 = arith.addf %269, %268 : vector<2x128xf32>
    %271 = arith.divf %269, %270 : vector<2x128xf32>
    %272 = vector.extract_strided_slice %265 {offsets = [0, 128], sizes = [2, 128], strides = [1, 1]} : vector<2x512xf32> to vector<2x128xf32>
    %273 = arith.negf %272 : vector<2x128xf32>
    %274 = math.exp %273 : vector<2x128xf32>
    %cst_47 = arith.constant 1.000000e+00 : f32
    %275 = vector.broadcast %cst_47 : f32 to vector<2x128xf32>
    %276 = arith.addf %275, %274 : vector<2x128xf32>
    %277 = arith.divf %275, %276 : vector<2x128xf32>
    %278 = vector.extract_strided_slice %265 {offsets = [0, 256], sizes = [2, 128], strides = [1, 1]} : vector<2x512xf32> to vector<2x128xf32>
    %279 = math.tanh %278 : vector<2x128xf32>
    %280 = vector.extract_strided_slice %265 {offsets = [0, 384], sizes = [2, 128], strides = [1, 1]} : vector<2x512xf32> to vector<2x128xf32>
    %281 = arith.negf %280 : vector<2x128xf32>
    %282 = math.exp %281 : vector<2x128xf32>
    %cst_48 = arith.constant 1.000000e+00 : f32
    %283 = vector.broadcast %cst_48 : f32 to vector<2x128xf32>
    %284 = arith.addf %283, %282 : vector<2x128xf32>
    %285 = arith.divf %283, %284 : vector<2x128xf32>
    %286 = arith.mulf %277, %226 : vector<2x128xf32>
    %287 = arith.mulf %271, %279 : vector<2x128xf32>
    %288 = arith.addf %286, %287 : vector<2x128xf32>
    %289 = math.tanh %288 : vector<2x128xf32>
    %290 = arith.mulf %285, %289 : vector<2x128xf32>
    %cst_49 = arith.constant dense<0.000000e+00> : vector<2x512xf32>
    %291 = tpu.matmul %257, %6, %cst_49 {dimension_numbers = #tpu.dot_dimension_numbers<[1], [0], [0], [1], [0, 0, 1, 1], [], []>} : vector<2x128xf32>, vector<128x512xf32>, vector<2x512xf32> -> vector<2x512xf32>
    %292 = arith.addf %261, %291 : vector<2x512xf32>
    %293 = vector.broadcast %8 : vector<1x512xf32> to vector<2x512xf32>
    %294 = arith.addf %292, %293 : vector<2x512xf32>
    %295 = vector.extract_strided_slice %294 {offsets = [0, 0], sizes = [2, 128], strides = [1, 1]} : vector<2x512xf32> to vector<2x128xf32>
    %296 = arith.negf %295 : vector<2x128xf32>
    %297 = math.exp %296 : vector<2x128xf32>
    %cst_50 = arith.constant 1.000000e+00 : f32
    %298 = vector.broadcast %cst_50 : f32 to vector<2x128xf32>
    %299 = arith.addf %298, %297 : vector<2x128xf32>
    %300 = arith.divf %298, %299 : vector<2x128xf32>
    %301 = vector.extract_strided_slice %294 {offsets = [0, 128], sizes = [2, 128], strides = [1, 1]} : vector<2x512xf32> to vector<2x128xf32>
    %302 = arith.negf %301 : vector<2x128xf32>
    %303 = math.exp %302 : vector<2x128xf32>
    %cst_51 = arith.constant 1.000000e+00 : f32
    %304 = vector.broadcast %cst_51 : f32 to vector<2x128xf32>
    %305 = arith.addf %304, %303 : vector<2x128xf32>
    %306 = arith.divf %304, %305 : vector<2x128xf32>
    %307 = vector.extract_strided_slice %294 {offsets = [0, 256], sizes = [2, 128], strides = [1, 1]} : vector<2x512xf32> to vector<2x128xf32>
    %308 = math.tanh %307 : vector<2x128xf32>
    %309 = vector.extract_strided_slice %294 {offsets = [0, 384], sizes = [2, 128], strides = [1, 1]} : vector<2x512xf32> to vector<2x128xf32>
    %310 = arith.negf %309 : vector<2x128xf32>
    %311 = math.exp %310 : vector<2x128xf32>
    %cst_52 = arith.constant 1.000000e+00 : f32
    %312 = vector.broadcast %cst_52 : f32 to vector<2x128xf32>
    %313 = arith.addf %312, %311 : vector<2x128xf32>
    %314 = arith.divf %312, %313 : vector<2x128xf32>
    %315 = arith.mulf %306, %255 : vector<2x128xf32>
    %316 = arith.mulf %300, %308 : vector<2x128xf32>
    %317 = arith.addf %315, %316 : vector<2x128xf32>
    %318 = math.tanh %317 : vector<2x128xf32>
    %319 = arith.mulf %314, %318 : vector<2x128xf32>
    %320 = vector.extract_strided_slice %4 {offsets = [0, 5, 0], sizes = [2, 1, 512], strides = [1, 1, 1]} : vector<2x8x1024xf32> to vector<2x1x512xf32>
    %321 = vector.shape_cast %320 : vector<2x1x512xf32> to vector<2x512xf32>
    %322 = vector.extract_strided_slice %4 {offsets = [0, 2, 512], sizes = [2, 1, 512], strides = [1, 1, 1]} : vector<2x8x1024xf32> to vector<2x1x512xf32>
    %323 = vector.shape_cast %322 : vector<2x1x512xf32> to vector<2x512xf32>
    %cst_53 = arith.constant dense<0.000000e+00> : vector<2x512xf32>
    %324 = tpu.matmul %290, %5, %cst_53 {dimension_numbers = #tpu.dot_dimension_numbers<[1], [0], [0], [1], [0, 0, 1, 1], [], []>} : vector<2x128xf32>, vector<128x512xf32>, vector<2x512xf32> -> vector<2x512xf32>
    %325 = arith.addf %321, %324 : vector<2x512xf32>
    %326 = vector.broadcast %7 : vector<1x512xf32> to vector<2x512xf32>
    %327 = arith.addf %325, %326 : vector<2x512xf32>
    %328 = vector.extract_strided_slice %327 {offsets = [0, 0], sizes = [2, 128], strides = [1, 1]} : vector<2x512xf32> to vector<2x128xf32>
    %329 = arith.negf %328 : vector<2x128xf32>
    %330 = math.exp %329 : vector<2x128xf32>
    %cst_54 = arith.constant 1.000000e+00 : f32
    %331 = vector.broadcast %cst_54 : f32 to vector<2x128xf32>
    %332 = arith.addf %331, %330 : vector<2x128xf32>
    %333 = arith.divf %331, %332 : vector<2x128xf32>
    %334 = vector.extract_strided_slice %327 {offsets = [0, 128], sizes = [2, 128], strides = [1, 1]} : vector<2x512xf32> to vector<2x128xf32>
    %335 = arith.negf %334 : vector<2x128xf32>
    %336 = math.exp %335 : vector<2x128xf32>
    %cst_55 = arith.constant 1.000000e+00 : f32
    %337 = vector.broadcast %cst_55 : f32 to vector<2x128xf32>
    %338 = arith.addf %337, %336 : vector<2x128xf32>
    %339 = arith.divf %337, %338 : vector<2x128xf32>
    %340 = vector.extract_strided_slice %327 {offsets = [0, 256], sizes = [2, 128], strides = [1, 1]} : vector<2x512xf32> to vector<2x128xf32>
    %341 = math.tanh %340 : vector<2x128xf32>
    %342 = vector.extract_strided_slice %327 {offsets = [0, 384], sizes = [2, 128], strides = [1, 1]} : vector<2x512xf32> to vector<2x128xf32>
    %343 = arith.negf %342 : vector<2x128xf32>
    %344 = math.exp %343 : vector<2x128xf32>
    %cst_56 = arith.constant 1.000000e+00 : f32
    %345 = vector.broadcast %cst_56 : f32 to vector<2x128xf32>
    %346 = arith.addf %345, %344 : vector<2x128xf32>
    %347 = arith.divf %345, %346 : vector<2x128xf32>
    %348 = arith.mulf %339, %288 : vector<2x128xf32>
    %349 = arith.mulf %333, %341 : vector<2x128xf32>
    %350 = arith.addf %348, %349 : vector<2x128xf32>
    %351 = math.tanh %350 : vector<2x128xf32>
    %352 = arith.mulf %347, %351 : vector<2x128xf32>
    %cst_57 = arith.constant dense<0.000000e+00> : vector<2x512xf32>
    %353 = tpu.matmul %319, %6, %cst_57 {dimension_numbers = #tpu.dot_dimension_numbers<[1], [0], [0], [1], [0, 0, 1, 1], [], []>} : vector<2x128xf32>, vector<128x512xf32>, vector<2x512xf32> -> vector<2x512xf32>
    %354 = arith.addf %323, %353 : vector<2x512xf32>
    %355 = vector.broadcast %8 : vector<1x512xf32> to vector<2x512xf32>
    %356 = arith.addf %354, %355 : vector<2x512xf32>
    %357 = vector.extract_strided_slice %356 {offsets = [0, 0], sizes = [2, 128], strides = [1, 1]} : vector<2x512xf32> to vector<2x128xf32>
    %358 = arith.negf %357 : vector<2x128xf32>
    %359 = math.exp %358 : vector<2x128xf32>
    %cst_58 = arith.constant 1.000000e+00 : f32
    %360 = vector.broadcast %cst_58 : f32 to vector<2x128xf32>
    %361 = arith.addf %360, %359 : vector<2x128xf32>
    %362 = arith.divf %360, %361 : vector<2x128xf32>
    %363 = vector.extract_strided_slice %356 {offsets = [0, 128], sizes = [2, 128], strides = [1, 1]} : vector<2x512xf32> to vector<2x128xf32>
    %364 = arith.negf %363 : vector<2x128xf32>
    %365 = math.exp %364 : vector<2x128xf32>
    %cst_59 = arith.constant 1.000000e+00 : f32
    %366 = vector.broadcast %cst_59 : f32 to vector<2x128xf32>
    %367 = arith.addf %366, %365 : vector<2x128xf32>
    %368 = arith.divf %366, %367 : vector<2x128xf32>
    %369 = vector.extract_strided_slice %356 {offsets = [0, 256], sizes = [2, 128], strides = [1, 1]} : vector<2x512xf32> to vector<2x128xf32>
    %370 = math.tanh %369 : vector<2x128xf32>
    %371 = vector.extract_strided_slice %356 {offsets = [0, 384], sizes = [2, 128], strides = [1, 1]} : vector<2x512xf32> to vector<2x128xf32>
    %372 = arith.negf %371 : vector<2x128xf32>
    %373 = math.exp %372 : vector<2x128xf32>
    %cst_60 = arith.constant 1.000000e+00 : f32
    %374 = vector.broadcast %cst_60 : f32 to vector<2x128xf32>
    %375 = arith.addf %374, %373 : vector<2x128xf32>
    %376 = arith.divf %374, %375 : vector<2x128xf32>
    %377 = arith.mulf %368, %317 : vector<2x128xf32>
    %378 = arith.mulf %362, %370 : vector<2x128xf32>
    %379 = arith.addf %377, %378 : vector<2x128xf32>
    %380 = math.tanh %379 : vector<2x128xf32>
    %381 = arith.mulf %376, %380 : vector<2x128xf32>
    %382 = vector.extract_strided_slice %4 {offsets = [0, 6, 0], sizes = [2, 1, 512], strides = [1, 1, 1]} : vector<2x8x1024xf32> to vector<2x1x512xf32>
    %383 = vector.shape_cast %382 : vector<2x1x512xf32> to vector<2x512xf32>
    %384 = vector.extract_strided_slice %4 {offsets = [0, 1, 512], sizes = [2, 1, 512], strides = [1, 1, 1]} : vector<2x8x1024xf32> to vector<2x1x512xf32>
    %385 = vector.shape_cast %384 : vector<2x1x512xf32> to vector<2x512xf32>
    %cst_61 = arith.constant dense<0.000000e+00> : vector<2x512xf32>
    %386 = tpu.matmul %352, %5, %cst_61 {dimension_numbers = #tpu.dot_dimension_numbers<[1], [0], [0], [1], [0, 0, 1, 1], [], []>} : vector<2x128xf32>, vector<128x512xf32>, vector<2x512xf32> -> vector<2x512xf32>
    %387 = arith.addf %383, %386 : vector<2x512xf32>
    %388 = vector.broadcast %7 : vector<1x512xf32> to vector<2x512xf32>
    %389 = arith.addf %387, %388 : vector<2x512xf32>
    %390 = vector.extract_strided_slice %389 {offsets = [0, 0], sizes = [2, 128], strides = [1, 1]} : vector<2x512xf32> to vector<2x128xf32>
    %391 = arith.negf %390 : vector<2x128xf32>
    %392 = math.exp %391 : vector<2x128xf32>
    %cst_62 = arith.constant 1.000000e+00 : f32
    %393 = vector.broadcast %cst_62 : f32 to vector<2x128xf32>
    %394 = arith.addf %393, %392 : vector<2x128xf32>
    %395 = arith.divf %393, %394 : vector<2x128xf32>
    %396 = vector.extract_strided_slice %389 {offsets = [0, 128], sizes = [2, 128], strides = [1, 1]} : vector<2x512xf32> to vector<2x128xf32>
    %397 = arith.negf %396 : vector<2x128xf32>
    %398 = math.exp %397 : vector<2x128xf32>
    %cst_63 = arith.constant 1.000000e+00 : f32
    %399 = vector.broadcast %cst_63 : f32 to vector<2x128xf32>
    %400 = arith.addf %399, %398 : vector<2x128xf32>
    %401 = arith.divf %399, %400 : vector<2x128xf32>
    %402 = vector.extract_strided_slice %389 {offsets = [0, 256], sizes = [2, 128], strides = [1, 1]} : vector<2x512xf32> to vector<2x128xf32>
    %403 = math.tanh %402 : vector<2x128xf32>
    %404 = vector.extract_strided_slice %389 {offsets = [0, 384], sizes = [2, 128], strides = [1, 1]} : vector<2x512xf32> to vector<2x128xf32>
    %405 = arith.negf %404 : vector<2x128xf32>
    %406 = math.exp %405 : vector<2x128xf32>
    %cst_64 = arith.constant 1.000000e+00 : f32
    %407 = vector.broadcast %cst_64 : f32 to vector<2x128xf32>
    %408 = arith.addf %407, %406 : vector<2x128xf32>
    %409 = arith.divf %407, %408 : vector<2x128xf32>
    %410 = arith.mulf %401, %350 : vector<2x128xf32>
    %411 = arith.mulf %395, %403 : vector<2x128xf32>
    %412 = arith.addf %410, %411 : vector<2x128xf32>
    %413 = math.tanh %412 : vector<2x128xf32>
    %414 = arith.mulf %409, %413 : vector<2x128xf32>
    %cst_65 = arith.constant dense<0.000000e+00> : vector<2x512xf32>
    %415 = tpu.matmul %381, %6, %cst_65 {dimension_numbers = #tpu.dot_dimension_numbers<[1], [0], [0], [1], [0, 0, 1, 1], [], []>} : vector<2x128xf32>, vector<128x512xf32>, vector<2x512xf32> -> vector<2x512xf32>
    %416 = arith.addf %385, %415 : vector<2x512xf32>
    %417 = vector.broadcast %8 : vector<1x512xf32> to vector<2x512xf32>
    %418 = arith.addf %416, %417 : vector<2x512xf32>
    %419 = vector.extract_strided_slice %418 {offsets = [0, 0], sizes = [2, 128], strides = [1, 1]} : vector<2x512xf32> to vector<2x128xf32>
    %420 = arith.negf %419 : vector<2x128xf32>
    %421 = math.exp %420 : vector<2x128xf32>
    %cst_66 = arith.constant 1.000000e+00 : f32
    %422 = vector.broadcast %cst_66 : f32 to vector<2x128xf32>
    %423 = arith.addf %422, %421 : vector<2x128xf32>
    %424 = arith.divf %422, %423 : vector<2x128xf32>
    %425 = vector.extract_strided_slice %418 {offsets = [0, 128], sizes = [2, 128], strides = [1, 1]} : vector<2x512xf32> to vector<2x128xf32>
    %426 = arith.negf %425 : vector<2x128xf32>
    %427 = math.exp %426 : vector<2x128xf32>
    %cst_67 = arith.constant 1.000000e+00 : f32
    %428 = vector.broadcast %cst_67 : f32 to vector<2x128xf32>
    %429 = arith.addf %428, %427 : vector<2x128xf32>
    %430 = arith.divf %428, %429 : vector<2x128xf32>
    %431 = vector.extract_strided_slice %418 {offsets = [0, 256], sizes = [2, 128], strides = [1, 1]} : vector<2x512xf32> to vector<2x128xf32>
    %432 = math.tanh %431 : vector<2x128xf32>
    %433 = vector.extract_strided_slice %418 {offsets = [0, 384], sizes = [2, 128], strides = [1, 1]} : vector<2x512xf32> to vector<2x128xf32>
    %434 = arith.negf %433 : vector<2x128xf32>
    %435 = math.exp %434 : vector<2x128xf32>
    %cst_68 = arith.constant 1.000000e+00 : f32
    %436 = vector.broadcast %cst_68 : f32 to vector<2x128xf32>
    %437 = arith.addf %436, %435 : vector<2x128xf32>
    %438 = arith.divf %436, %437 : vector<2x128xf32>
    %439 = arith.mulf %430, %379 : vector<2x128xf32>
    %440 = arith.mulf %424, %432 : vector<2x128xf32>
    %441 = arith.addf %439, %440 : vector<2x128xf32>
    %442 = math.tanh %441 : vector<2x128xf32>
    %443 = arith.mulf %438, %442 : vector<2x128xf32>
    %444 = vector.extract_strided_slice %4 {offsets = [0, 7, 0], sizes = [2, 1, 512], strides = [1, 1, 1]} : vector<2x8x1024xf32> to vector<2x1x512xf32>
    %445 = vector.shape_cast %444 : vector<2x1x512xf32> to vector<2x512xf32>
    %446 = vector.extract_strided_slice %4 {offsets = [0, 0, 512], sizes = [2, 1, 512], strides = [1, 1, 1]} : vector<2x8x1024xf32> to vector<2x1x512xf32>
    %447 = vector.shape_cast %446 : vector<2x1x512xf32> to vector<2x512xf32>
    %cst_69 = arith.constant dense<0.000000e+00> : vector<2x512xf32>
    %448 = tpu.matmul %414, %5, %cst_69 {dimension_numbers = #tpu.dot_dimension_numbers<[1], [0], [0], [1], [0, 0, 1, 1], [], []>} : vector<2x128xf32>, vector<128x512xf32>, vector<2x512xf32> -> vector<2x512xf32>
    %449 = arith.addf %445, %448 : vector<2x512xf32>
    %450 = vector.broadcast %7 : vector<1x512xf32> to vector<2x512xf32>
    %451 = arith.addf %449, %450 : vector<2x512xf32>
    %452 = vector.extract_strided_slice %451 {offsets = [0, 0], sizes = [2, 128], strides = [1, 1]} : vector<2x512xf32> to vector<2x128xf32>
    %453 = arith.negf %452 : vector<2x128xf32>
    %454 = math.exp %453 : vector<2x128xf32>
    %cst_70 = arith.constant 1.000000e+00 : f32
    %455 = vector.broadcast %cst_70 : f32 to vector<2x128xf32>
    %456 = arith.addf %455, %454 : vector<2x128xf32>
    %457 = arith.divf %455, %456 : vector<2x128xf32>
    %458 = vector.extract_strided_slice %451 {offsets = [0, 128], sizes = [2, 128], strides = [1, 1]} : vector<2x512xf32> to vector<2x128xf32>
    %459 = arith.negf %458 : vector<2x128xf32>
    %460 = math.exp %459 : vector<2x128xf32>
    %cst_71 = arith.constant 1.000000e+00 : f32
    %461 = vector.broadcast %cst_71 : f32 to vector<2x128xf32>
    %462 = arith.addf %461, %460 : vector<2x128xf32>
    %463 = arith.divf %461, %462 : vector<2x128xf32>
    %464 = vector.extract_strided_slice %451 {offsets = [0, 256], sizes = [2, 128], strides = [1, 1]} : vector<2x512xf32> to vector<2x128xf32>
    %465 = math.tanh %464 : vector<2x128xf32>
    %466 = vector.extract_strided_slice %451 {offsets = [0, 384], sizes = [2, 128], strides = [1, 1]} : vector<2x512xf32> to vector<2x128xf32>
    %467 = arith.negf %466 : vector<2x128xf32>
    %468 = math.exp %467 : vector<2x128xf32>
    %cst_72 = arith.constant 1.000000e+00 : f32
    %469 = vector.broadcast %cst_72 : f32 to vector<2x128xf32>
    %470 = arith.addf %469, %468 : vector<2x128xf32>
    %471 = arith.divf %469, %470 : vector<2x128xf32>
    %472 = arith.mulf %463, %412 : vector<2x128xf32>
    %473 = arith.mulf %457, %465 : vector<2x128xf32>
    %474 = arith.addf %472, %473 : vector<2x128xf32>
    %475 = math.tanh %474 : vector<2x128xf32>
    %476 = arith.mulf %471, %475 : vector<2x128xf32>
    %cst_73 = arith.constant dense<0.000000e+00> : vector<2x512xf32>
    %477 = tpu.matmul %443, %6, %cst_73 {dimension_numbers = #tpu.dot_dimension_numbers<[1], [0], [0], [1], [0, 0, 1, 1], [], []>} : vector<2x128xf32>, vector<128x512xf32>, vector<2x512xf32> -> vector<2x512xf32>
    %478 = arith.addf %447, %477 : vector<2x512xf32>
    %479 = vector.broadcast %8 : vector<1x512xf32> to vector<2x512xf32>
    %480 = arith.addf %478, %479 : vector<2x512xf32>
    %481 = vector.extract_strided_slice %480 {offsets = [0, 0], sizes = [2, 128], strides = [1, 1]} : vector<2x512xf32> to vector<2x128xf32>
    %482 = arith.negf %481 : vector<2x128xf32>
    %483 = math.exp %482 : vector<2x128xf32>
    %cst_74 = arith.constant 1.000000e+00 : f32
    %484 = vector.broadcast %cst_74 : f32 to vector<2x128xf32>
    %485 = arith.addf %484, %483 : vector<2x128xf32>
    %486 = arith.divf %484, %485 : vector<2x128xf32>
    %487 = vector.extract_strided_slice %480 {offsets = [0, 128], sizes = [2, 128], strides = [1, 1]} : vector<2x512xf32> to vector<2x128xf32>
    %488 = arith.negf %487 : vector<2x128xf32>
    %489 = math.exp %488 : vector<2x128xf32>
    %cst_75 = arith.constant 1.000000e+00 : f32
    %490 = vector.broadcast %cst_75 : f32 to vector<2x128xf32>
    %491 = arith.addf %490, %489 : vector<2x128xf32>
    %492 = arith.divf %490, %491 : vector<2x128xf32>
    %493 = vector.extract_strided_slice %480 {offsets = [0, 256], sizes = [2, 128], strides = [1, 1]} : vector<2x512xf32> to vector<2x128xf32>
    %494 = math.tanh %493 : vector<2x128xf32>
    %495 = vector.extract_strided_slice %480 {offsets = [0, 384], sizes = [2, 128], strides = [1, 1]} : vector<2x512xf32> to vector<2x128xf32>
    %496 = arith.negf %495 : vector<2x128xf32>
    %497 = math.exp %496 : vector<2x128xf32>
    %cst_76 = arith.constant 1.000000e+00 : f32
    %498 = vector.broadcast %cst_76 : f32 to vector<2x128xf32>
    %499 = arith.addf %498, %497 : vector<2x128xf32>
    %500 = arith.divf %498, %499 : vector<2x128xf32>
    %501 = arith.mulf %492, %441 : vector<2x128xf32>
    %502 = arith.mulf %486, %494 : vector<2x128xf32>
    %503 = arith.addf %501, %502 : vector<2x128xf32>
    %504 = math.tanh %503 : vector<2x128xf32>
    %505 = arith.mulf %500, %504 : vector<2x128xf32>
    %c0_77 = arith.constant 0 : index
    %c0_78 = arith.constant 0 : index
    %506 = vector.load %arg7[%c0_77, %c0_78] : memref<128x64xf32, #tpu.memory_space<vmem>>, vector<128x64xf32>
    %cst_79 = arith.constant dense<0.000000e+00> : vector<2x64xf32>
    %507 = tpu.matmul %476, %506, %cst_79 {dimension_numbers = #tpu.dot_dimension_numbers<[1], [0], [0], [1], [0, 0, 1, 1], [], []>} : vector<2x128xf32>, vector<128x64xf32>, vector<2x64xf32> -> vector<2x64xf32>
    %c0_80 = arith.constant 0 : index
    %c0_81 = arith.constant 0 : index
    %508 = vector.load %arg8[%c0_80, %c0_81] : memref<128x64xf32, #tpu.memory_space<vmem>>, vector<128x64xf32>
    %cst_82 = arith.constant dense<0.000000e+00> : vector<2x64xf32>
    %509 = tpu.matmul %71, %508, %cst_82 {dimension_numbers = #tpu.dot_dimension_numbers<[1], [0], [0], [1], [0, 0, 1, 1], [], []>} : vector<2x128xf32>, vector<128x64xf32>, vector<2x64xf32> -> vector<2x64xf32>
    %510 = arith.addf %507, %509 : vector<2x64xf32>
    %c0_83 = arith.constant 0 : index
    %c0_84 = arith.constant 0 : index
    %511 = vector.load %arg9[%c0_83, %c0_84] : memref<1x64xf32, #tpu.memory_space<vmem>>, vector<1x64xf32>
    %512 = vector.broadcast %511 : vector<1x64xf32> to vector<2x64xf32>
    %513 = arith.addf %510, %512 : vector<2x64xf32>
    %c0_85 = arith.constant 0 : index
    %c0_86 = arith.constant 0 : index
    %514 = vector.load %arg10[%c0_85, %c0_86] : memref<64x128xf32, #tpu.memory_space<vmem>>, vector<64x128xf32>
    %cst_87 = arith.constant dense<0.000000e+00> : vector<2x128xf32>
    %515 = tpu.matmul %513, %514, %cst_87 {dimension_numbers = #tpu.dot_dimension_numbers<[1], [0], [0], [1], [0, 0, 1, 1], [], []>} : vector<2x64xf32>, vector<64x128xf32>, vector<2x128xf32> -> vector<2x128xf32>
    %c0_88 = arith.constant 0 : index
    %c0_89 = arith.constant 0 : index
    %516 = vector.load %arg11[%c0_88, %c0_89] : memref<1x128xf32, #tpu.memory_space<vmem>>, vector<1x128xf32>
    %517 = vector.broadcast %516 : vector<1x128xf32> to vector<2x128xf32>
    %518 = arith.addf %515, %517 : vector<2x128xf32>
    %cst_90 = arith.constant 0.000000e+00 : f32
    %519 = vector.broadcast %cst_90 : f32 to vector<2x128xf32>
    %520 = arith.maximumf %518, %519 : vector<2x128xf32>
    %c0_91 = arith.constant 0 : index
    %c0_92 = arith.constant 0 : index
    %521 = vector.load %arg12[%c0_91, %c0_92] : memref<128x128xf32, #tpu.memory_space<vmem>>, vector<128x128xf32>
    %cst_93 = arith.constant dense<0.000000e+00> : vector<2x128xf32>
    %522 = tpu.matmul %520, %521, %cst_93 {dimension_numbers = #tpu.dot_dimension_numbers<[1], [0], [0], [1], [0, 0, 1, 1], [], []>} : vector<2x128xf32>, vector<128x128xf32>, vector<2x128xf32> -> vector<2x128xf32>
    %c0_94 = arith.constant 0 : index
    %c0_95 = arith.constant 0 : index
    %523 = vector.load %arg13[%c0_94, %c0_95] : memref<1x128xf32, #tpu.memory_space<vmem>>, vector<1x128xf32>
    %524 = vector.broadcast %523 : vector<1x128xf32> to vector<2x128xf32>
    %525 = arith.addf %522, %524 : vector<2x128xf32>
    %cst_96 = arith.constant 0.000000e+00 : f32
    %526 = vector.broadcast %cst_96 : f32 to vector<2x128xf32>
    %527 = arith.maximumf %525, %526 : vector<2x128xf32>
    %c0_97 = arith.constant 0 : index
    %c0_98 = arith.constant 0 : index
    %528 = vector.load %arg14[%c0_97, %c0_98] : memref<128x128xf32, #tpu.memory_space<vmem>>, vector<128x128xf32>
    %cst_99 = arith.constant dense<0.000000e+00> : vector<2x128xf32>
    %529 = tpu.matmul %527, %528, %cst_99 {dimension_numbers = #tpu.dot_dimension_numbers<[1], [0], [0], [1], [0, 0, 1, 1], [], []>} : vector<2x128xf32>, vector<128x128xf32>, vector<2x128xf32> -> vector<2x128xf32>
    %c0_100 = arith.constant 0 : index
    %c0_101 = arith.constant 0 : index
    %530 = vector.load %arg15[%c0_100, %c0_101] : memref<1x128xf32, #tpu.memory_space<vmem>>, vector<1x128xf32>
    %531 = vector.broadcast %530 : vector<1x128xf32> to vector<2x128xf32>
    %532 = arith.addf %529, %531 : vector<2x128xf32>
    %cst_102 = arith.constant 0.000000e+00 : f32
    %533 = vector.broadcast %cst_102 : f32 to vector<2x128xf32>
    %534 = arith.maximumf %532, %533 : vector<2x128xf32>
    %535 = arith.addf %534, %520 : vector<2x128xf32>
    %c0_103 = arith.constant 0 : index
    %c0_104 = arith.constant 0 : index
    %536 = vector.load %arg16[%c0_103, %c0_104] : memref<128x64xf32, #tpu.memory_space<vmem>>, vector<128x64xf32>
    %cst_105 = arith.constant dense<0.000000e+00> : vector<2x64xf32>
    %537 = tpu.matmul %535, %536, %cst_105 {dimension_numbers = #tpu.dot_dimension_numbers<[1], [0], [0], [1], [0, 0, 1, 1], [], []>} : vector<2x128xf32>, vector<128x64xf32>, vector<2x64xf32> -> vector<2x64xf32>
    %c0_106 = arith.constant 0 : index
    %c0_107 = arith.constant 0 : index
    %538 = vector.load %arg17[%c0_106, %c0_107] : memref<1x64xf32, #tpu.memory_space<vmem>>, vector<1x64xf32>
    %539 = vector.broadcast %538 : vector<1x64xf32> to vector<2x64xf32>
    %540 = arith.addf %537, %539 : vector<2x64xf32>
    %c0_108 = arith.constant 0 : index
    %c0_109 = arith.constant 0 : index
    %541 = vector.load %arg18[%c0_108, %c0_109] : memref<128x64xf32, #tpu.memory_space<vmem>>, vector<128x64xf32>
    %cst_110 = arith.constant dense<0.000000e+00> : vector<2x64xf32>
    %542 = tpu.matmul %535, %541, %cst_110 {dimension_numbers = #tpu.dot_dimension_numbers<[1], [0], [0], [1], [0, 0, 1, 1], [], []>} : vector<2x128xf32>, vector<128x64xf32>, vector<2x64xf32> -> vector<2x64xf32>
    %c0_111 = arith.constant 0 : index
    %c0_112 = arith.constant 0 : index
    %543 = vector.load %arg19[%c0_111, %c0_112] : memref<1x64xf32, #tpu.memory_space<vmem>>, vector<1x64xf32>
    %544 = vector.broadcast %543 : vector<1x64xf32> to vector<2x64xf32>
    %545 = arith.addf %542, %544 : vector<2x64xf32>
    %cst_113 = arith.constant 5.000000e-01 : f32
    %546 = vector.broadcast %cst_113 : f32 to vector<2x64xf32>
    %547 = arith.mulf %546, %545 : vector<2x64xf32>
    %548 = math.exp %547 : vector<2x64xf32>
    %c0_114 = arith.constant 0 : index
    %c0_115 = arith.constant 0 : index
    %549 = vector.load %arg1[%c0_114, %c0_115] : memref<2x64xf32, #tpu.memory_space<vmem>>, vector<2x64xf32>
    %550 = arith.mulf %548, %549 : vector<2x64xf32>
    %551 = arith.addf %540, %550 : vector<2x64xf32>
    %c0_116 = arith.constant 0 : index
    %c0_117 = arith.constant 0 : index
    %552 = vector.load %arg34[%c0_116, %c0_117] : memref<2x64xf32, #tpu.memory_space<vmem>>, vector<2x64xf32>
    tpu.vector_store %arg34[%c0_116, %c0_117], %540 {strides = array<i32>} : memref<2x64xf32, #tpu.memory_space<vmem>>, vector<2x64xf32>,
    %c0_118 = arith.constant 0 : index
    %c0_119 = arith.constant 0 : index
    %553 = vector.load %arg35[%c0_118, %c0_119] : memref<2x64xf32, #tpu.memory_space<vmem>>, vector<2x64xf32>
    tpu.vector_store %arg35[%c0_118, %c0_119], %545 {strides = array<i32>} : memref<2x64xf32, #tpu.memory_space<vmem>>, vector<2x64xf32>,
    %c0_120 = arith.constant 0 : index
    %c0_121 = arith.constant 0 : index
    %554 = vector.load %arg20[%c0_120, %c0_121] : memref<64x64xf32, #tpu.memory_space<vmem>>, vector<64x64xf32>
    %c0_122 = arith.constant 0 : index
    %c0_123 = arith.constant 0 : index
    %555 = vector.load %arg21[%c0_122, %c0_123] : memref<1x64xf32, #tpu.memory_space<vmem>>, vector<1x64xf32>
    %cst_124 = arith.constant dense<0.000000e+00> : vector<2x64xf32>
    %556 = tpu.matmul %551, %554, %cst_124 {dimension_numbers = #tpu.dot_dimension_numbers<[1], [0], [0], [1], [0, 0, 1, 1], [], []>} : vector<2x64xf32>, vector<64x64xf32>, vector<2x64xf32> -> vector<2x64xf32>
    %557 = vector.broadcast %555 : vector<1x64xf32> to vector<2x64xf32>
    %558 = arith.addf %556, %557 : vector<2x64xf32>
    %cst_125 = arith.constant 0.000000e+00 : f32
    %559 = vector.broadcast %cst_125 : f32 to vector<2x64xf32>
    %560 = arith.maximumf %558, %559 : vector<2x64xf32>
    %cst_126 = arith.constant dense<0.000000e+00> : vector<2x64xf32>
    %561 = tpu.matmul %560, %554, %cst_126 {dimension_numbers = #tpu.dot_dimension_numbers<[1], [0], [0], [1], [0, 0, 1, 1], [], []>} : vector<2x64xf32>, vector<64x64xf32>, vector<2x64xf32> -> vector<2x64xf32>
    %562 = vector.broadcast %555 : vector<1x64xf32> to vector<2x64xf32>
    %563 = arith.addf %561, %562 : vector<2x64xf32>
    %cst_127 = arith.constant 0.000000e+00 : f32
    %564 = vector.broadcast %cst_127 : f32 to vector<2x64xf32>
    %565 = arith.maximumf %563, %564 : vector<2x64xf32>
    %cst_128 = arith.constant dense<0.000000e+00> : vector<2x64xf32>
    %566 = tpu.matmul %565, %554, %cst_128 {dimension_numbers = #tpu.dot_dimension_numbers<[1], [0], [0], [1], [0, 0, 1, 1], [], []>} : vector<2x64xf32>, vector<64x64xf32>, vector<2x64xf32> -> vector<2x64xf32>
    %567 = vector.broadcast %555 : vector<1x64xf32> to vector<2x64xf32>
    %568 = arith.addf %566, %567 : vector<2x64xf32>
    %cst_129 = arith.constant 0.000000e+00 : f32
    %569 = vector.broadcast %cst_129 : f32 to vector<2x64xf32>
    %570 = arith.maximumf %568, %569 : vector<2x64xf32>
    %c0_130 = arith.constant 0 : index
    %c0_131 = arith.constant 0 : index
    %571 = vector.load %arg22[%c0_130, %c0_131] : memref<64x64xf32, #tpu.memory_space<vmem>>, vector<64x64xf32>
    %cst_132 = arith.constant dense<0.000000e+00> : vector<2x64xf32>
    %572 = tpu.matmul %513, %571, %cst_132 {dimension_numbers = #tpu.dot_dimension_numbers<[1], [0], [0], [1], [0, 0, 1, 1], [], []>} : vector<2x64xf32>, vector<64x64xf32>, vector<2x64xf32> -> vector<2x64xf32>
    %c0_133 = arith.constant 0 : index
    %c0_134 = arith.constant 0 : index
    %573 = vector.load %arg23[%c0_133, %c0_134] : memref<64x64xf32, #tpu.memory_space<vmem>>, vector<64x64xf32>
    %cst_135 = arith.constant dense<0.000000e+00> : vector<2x64xf32>
    %574 = tpu.matmul %570, %573, %cst_135 {dimension_numbers = #tpu.dot_dimension_numbers<[1], [0], [0], [1], [0, 0, 1, 1], [], []>} : vector<2x64xf32>, vector<64x64xf32>, vector<2x64xf32> -> vector<2x64xf32>
    %575 = arith.addf %572, %574 : vector<2x64xf32>
    %c0_136 = arith.constant 0 : index
    %c0_137 = arith.constant 0 : index
    %576 = vector.load %arg24[%c0_136, %c0_137] : memref<1x64xf32, #tpu.memory_space<vmem>>, vector<1x64xf32>
    %577 = vector.broadcast %576 : vector<1x64xf32> to vector<2x64xf32>
    %578 = arith.addf %575, %577 : vector<2x64xf32>
    %c0_138 = arith.constant 0 : index
    %c0_139 = arith.constant 0 : index
    %579 = vector.load %arg25[%c0_138, %c0_139] : memref<64x1024xf32, #tpu.memory_space<vmem>>, vector<64x1024xf32>
    %cst_140 = arith.constant dense<0.000000e+00> : vector<2x1024xf32>
    %580 = tpu.matmul %578, %579, %cst_140 {dimension_numbers = #tpu.dot_dimension_numbers<[1], [0], [0], [1], [0, 0, 1, 1], [], []>} : vector<2x64xf32>, vector<64x1024xf32>, vector<2x1024xf32> -> vector<2x1024xf32>
    %581 = vector.extract_strided_slice %580 {offsets = [0, 0], sizes = [2, 512], strides = [1, 1]} : vector<2x1024xf32> to vector<2x512xf32>
    %582 = vector.extract_strided_slice %580 {offsets = [0, 512], sizes = [2, 512], strides = [1, 1]} : vector<2x1024xf32> to vector<2x512xf32>
    %c0_141 = arith.constant 0 : index
    %c0_142 = arith.constant 0 : index
    %583 = vector.load %arg26[%c0_141, %c0_142] : memref<128x512xf32, #tpu.memory_space<vmem>>, vector<128x512xf32>
    %c0_143 = arith.constant 0 : index
    %c0_144 = arith.constant 0 : index
    %584 = vector.load %arg28[%c0_143, %c0_144] : memref<128x512xf32, #tpu.memory_space<vmem>>, vector<128x512xf32>
    %c0_145 = arith.constant 0 : index
    %c0_146 = arith.constant 0 : index
    %585 = vector.load %arg27[%c0_145, %c0_146] : memref<1x512xf32, #tpu.memory_space<vmem>>, vector<1x512xf32>
    %c0_147 = arith.constant 0 : index
    %c0_148 = arith.constant 0 : index
    %586 = vector.load %arg29[%c0_147, %c0_148] : memref<1x512xf32, #tpu.memory_space<vmem>>, vector<1x512xf32>
    %cst_149 = arith.constant dense<0.000000e+00> : vector<2x512xf32>
    %587 = tpu.matmul %476, %583, %cst_149 {dimension_numbers = #tpu.dot_dimension_numbers<[1], [0], [0], [1], [0, 0, 1, 1], [], []>} : vector<2x128xf32>, vector<128x512xf32>, vector<2x512xf32> -> vector<2x512xf32>
    %588 = arith.addf %581, %587 : vector<2x512xf32>
    %589 = vector.broadcast %585 : vector<1x512xf32> to vector<2x512xf32>
    %590 = arith.addf %588, %589 : vector<2x512xf32>
    %591 = vector.extract_strided_slice %590 {offsets = [0, 0], sizes = [2, 128], strides = [1, 1]} : vector<2x512xf32> to vector<2x128xf32>
    %592 = arith.negf %591 : vector<2x128xf32>
    %593 = math.exp %592 : vector<2x128xf32>
    %cst_150 = arith.constant 1.000000e+00 : f32
    %594 = vector.broadcast %cst_150 : f32 to vector<2x128xf32>
    %595 = arith.addf %594, %593 : vector<2x128xf32>
    %596 = arith.divf %594, %595 : vector<2x128xf32>
    %597 = vector.extract_strided_slice %590 {offsets = [0, 128], sizes = [2, 128], strides = [1, 1]} : vector<2x512xf32> to vector<2x128xf32>
    %598 = arith.negf %597 : vector<2x128xf32>
    %599 = math.exp %598 : vector<2x128xf32>
    %cst_151 = arith.constant 1.000000e+00 : f32
    %600 = vector.broadcast %cst_151 : f32 to vector<2x128xf32>
    %601 = arith.addf %600, %599 : vector<2x128xf32>
    %602 = arith.divf %600, %601 : vector<2x128xf32>
    %603 = vector.extract_strided_slice %590 {offsets = [0, 256], sizes = [2, 128], strides = [1, 1]} : vector<2x512xf32> to vector<2x128xf32>
    %604 = math.tanh %603 : vector<2x128xf32>
    %605 = vector.extract_strided_slice %590 {offsets = [0, 384], sizes = [2, 128], strides = [1, 1]} : vector<2x512xf32> to vector<2x128xf32>
    %606 = arith.negf %605 : vector<2x128xf32>
    %607 = math.exp %606 : vector<2x128xf32>
    %cst_152 = arith.constant 1.000000e+00 : f32
    %608 = vector.broadcast %cst_152 : f32 to vector<2x128xf32>
    %609 = arith.addf %608, %607 : vector<2x128xf32>
    %610 = arith.divf %608, %609 : vector<2x128xf32>
    %611 = arith.mulf %602, %474 : vector<2x128xf32>
    %612 = arith.mulf %596, %604 : vector<2x128xf32>
    %613 = arith.addf %611, %612 : vector<2x128xf32>
    %614 = math.tanh %613 : vector<2x128xf32>
    %615 = arith.mulf %610, %614 : vector<2x128xf32>
    %cst_153 = arith.constant dense<0.000000e+00> : vector<2x512xf32>
    %616 = tpu.matmul %505, %584, %cst_153 {dimension_numbers = #tpu.dot_dimension_numbers<[1], [0], [0], [1], [0, 0, 1, 1], [], []>} : vector<2x128xf32>, vector<128x512xf32>, vector<2x512xf32> -> vector<2x512xf32>
    %617 = arith.addf %582, %616 : vector<2x512xf32>
    %618 = vector.broadcast %586 : vector<1x512xf32> to vector<2x512xf32>
    %619 = arith.addf %617, %618 : vector<2x512xf32>
    %620 = vector.extract_strided_slice %619 {offsets = [0, 0], sizes = [2, 128], strides = [1, 1]} : vector<2x512xf32> to vector<2x128xf32>
    %621 = arith.negf %620 : vector<2x128xf32>
    %622 = math.exp %621 : vector<2x128xf32>
    %cst_154 = arith.constant 1.000000e+00 : f32
    %623 = vector.broadcast %cst_154 : f32 to vector<2x128xf32>
    %624 = arith.addf %623, %622 : vector<2x128xf32>
    %625 = arith.divf %623, %624 : vector<2x128xf32>
    %626 = vector.extract_strided_slice %619 {offsets = [0, 128], sizes = [2, 128], strides = [1, 1]} : vector<2x512xf32> to vector<2x128xf32>
    %627 = arith.negf %626 : vector<2x128xf32>
    %628 = math.exp %627 : vector<2x128xf32>
    %cst_155 = arith.constant 1.000000e+00 : f32
    %629 = vector.broadcast %cst_155 : f32 to vector<2x128xf32>
    %630 = arith.addf %629, %628 : vector<2x128xf32>
    %631 = arith.divf %629, %630 : vector<2x128xf32>
    %632 = vector.extract_strided_slice %619 {offsets = [0, 256], sizes = [2, 128], strides = [1, 1]} : vector<2x512xf32> to vector<2x128xf32>
    %633 = math.tanh %632 : vector<2x128xf32>
    %634 = vector.extract_strided_slice %619 {offsets = [0, 384], sizes = [2, 128], strides = [1, 1]} : vector<2x512xf32> to vector<2x128xf32>
    %635 = arith.negf %634 : vector<2x128xf32>
    %636 = math.exp %635 : vector<2x128xf32>
    %cst_156 = arith.constant 1.000000e+00 : f32
    %637 = vector.broadcast %cst_156 : f32 to vector<2x128xf32>
    %638 = arith.addf %637, %636 : vector<2x128xf32>
    %639 = arith.divf %637, %638 : vector<2x128xf32>
    %640 = arith.mulf %631, %503 : vector<2x128xf32>
    %641 = arith.mulf %625, %633 : vector<2x128xf32>
    %642 = arith.addf %640, %641 : vector<2x128xf32>
    %643 = math.tanh %642 : vector<2x128xf32>
    %644 = arith.mulf %639, %643 : vector<2x128xf32>
    %cst_157 = arith.constant dense<0.000000e+00> : vector<2x512xf32>
    %645 = tpu.matmul %615, %583, %cst_157 {dimension_numbers = #tpu.dot_dimension_numbers<[1], [0], [0], [1], [0, 0, 1, 1], [], []>} : vector<2x128xf32>, vector<128x512xf32>, vector<2x512xf32> -> vector<2x512xf32>
    %646 = arith.addf %581, %645 : vector<2x512xf32>
    %647 = vector.broadcast %585 : vector<1x512xf32> to vector<2x512xf32>
    %648 = arith.addf %646, %647 : vector<2x512xf32>
    %649 = vector.extract_strided_slice %648 {offsets = [0, 0], sizes = [2, 128], strides = [1, 1]} : vector<2x512xf32> to vector<2x128xf32>
    %650 = arith.negf %649 : vector<2x128xf32>
    %651 = math.exp %650 : vector<2x128xf32>
    %cst_158 = arith.constant 1.000000e+00 : f32
    %652 = vector.broadcast %cst_158 : f32 to vector<2x128xf32>
    %653 = arith.addf %652, %651 : vector<2x128xf32>
    %654 = arith.divf %652, %653 : vector<2x128xf32>
    %655 = vector.extract_strided_slice %648 {offsets = [0, 128], sizes = [2, 128], strides = [1, 1]} : vector<2x512xf32> to vector<2x128xf32>
    %656 = arith.negf %655 : vector<2x128xf32>
    %657 = math.exp %656 : vector<2x128xf32>
    %cst_159 = arith.constant 1.000000e+00 : f32
    %658 = vector.broadcast %cst_159 : f32 to vector<2x128xf32>
    %659 = arith.addf %658, %657 : vector<2x128xf32>
    %660 = arith.divf %658, %659 : vector<2x128xf32>
    %661 = vector.extract_strided_slice %648 {offsets = [0, 256], sizes = [2, 128], strides = [1, 1]} : vector<2x512xf32> to vector<2x128xf32>
    %662 = math.tanh %661 : vector<2x128xf32>
    %663 = vector.extract_strided_slice %648 {offsets = [0, 384], sizes = [2, 128], strides = [1, 1]} : vector<2x512xf32> to vector<2x128xf32>
    %664 = arith.negf %663 : vector<2x128xf32>
    %665 = math.exp %664 : vector<2x128xf32>
    %cst_160 = arith.constant 1.000000e+00 : f32
    %666 = vector.broadcast %cst_160 : f32 to vector<2x128xf32>
    %667 = arith.addf %666, %665 : vector<2x128xf32>
    %668 = arith.divf %666, %667 : vector<2x128xf32>
    %669 = arith.mulf %660, %613 : vector<2x128xf32>
    %670 = arith.mulf %654, %662 : vector<2x128xf32>
    %671 = arith.addf %669, %670 : vector<2x128xf32>
    %672 = math.tanh %671 : vector<2x128xf32>
    %673 = arith.mulf %668, %672 : vector<2x128xf32>
    %cst_161 = arith.constant dense<0.000000e+00> : vector<2x512xf32>
    %674 = tpu.matmul %644, %584, %cst_161 {dimension_numbers = #tpu.dot_dimension_numbers<[1], [0], [0], [1], [0, 0, 1, 1], [], []>} : vector<2x128xf32>, vector<128x512xf32>, vector<2x512xf32> -> vector<2x512xf32>
    %675 = arith.addf %582, %674 : vector<2x512xf32>
    %676 = vector.broadcast %586 : vector<1x512xf32> to vector<2x512xf32>
    %677 = arith.addf %675, %676 : vector<2x512xf32>
    %678 = vector.extract_strided_slice %677 {offsets = [0, 0], sizes = [2, 128], strides = [1, 1]} : vector<2x512xf32> to vector<2x128xf32>
    %679 = arith.negf %678 : vector<2x128xf32>
    %680 = math.exp %679 : vector<2x128xf32>
    %cst_162 = arith.constant 1.000000e+00 : f32
    %681 = vector.broadcast %cst_162 : f32 to vector<2x128xf32>
    %682 = arith.addf %681, %680 : vector<2x128xf32>
    %683 = arith.divf %681, %682 : vector<2x128xf32>
    %684 = vector.extract_strided_slice %677 {offsets = [0, 128], sizes = [2, 128], strides = [1, 1]} : vector<2x512xf32> to vector<2x128xf32>
    %685 = arith.negf %684 : vector<2x128xf32>
    %686 = math.exp %685 : vector<2x128xf32>
    %cst_163 = arith.constant 1.000000e+00 : f32
    %687 = vector.broadcast %cst_163 : f32 to vector<2x128xf32>
    %688 = arith.addf %687, %686 : vector<2x128xf32>
    %689 = arith.divf %687, %688 : vector<2x128xf32>
    %690 = vector.extract_strided_slice %677 {offsets = [0, 256], sizes = [2, 128], strides = [1, 1]} : vector<2x512xf32> to vector<2x128xf32>
    %691 = math.tanh %690 : vector<2x128xf32>
    %692 = vector.extract_strided_slice %677 {offsets = [0, 384], sizes = [2, 128], strides = [1, 1]} : vector<2x512xf32> to vector<2x128xf32>
    %693 = arith.negf %692 : vector<2x128xf32>
    %694 = math.exp %693 : vector<2x128xf32>
    %cst_164 = arith.constant 1.000000e+00 : f32
    %695 = vector.broadcast %cst_164 : f32 to vector<2x128xf32>
    %696 = arith.addf %695, %694 : vector<2x128xf32>
    %697 = arith.divf %695, %696 : vector<2x128xf32>
    %698 = arith.mulf %689, %642 : vector<2x128xf32>
    %699 = arith.mulf %683, %691 : vector<2x128xf32>
    %700 = arith.addf %698, %699 : vector<2x128xf32>
    %701 = math.tanh %700 : vector<2x128xf32>
    %702 = arith.mulf %697, %701 : vector<2x128xf32>
    %cst_165 = arith.constant dense<0.000000e+00> : vector<2x512xf32>
    %703 = tpu.matmul %673, %583, %cst_165 {dimension_numbers = #tpu.dot_dimension_numbers<[1], [0], [0], [1], [0, 0, 1, 1], [], []>} : vector<2x128xf32>, vector<128x512xf32>, vector<2x512xf32> -> vector<2x512xf32>
    %704 = arith.addf %581, %703 : vector<2x512xf32>
    %705 = vector.broadcast %585 : vector<1x512xf32> to vector<2x512xf32>
    %706 = arith.addf %704, %705 : vector<2x512xf32>
    %707 = vector.extract_strided_slice %706 {offsets = [0, 0], sizes = [2, 128], strides = [1, 1]} : vector<2x512xf32> to vector<2x128xf32>
    %708 = arith.negf %707 : vector<2x128xf32>
    %709 = math.exp %708 : vector<2x128xf32>
    %cst_166 = arith.constant 1.000000e+00 : f32
    %710 = vector.broadcast %cst_166 : f32 to vector<2x128xf32>
    %711 = arith.addf %710, %709 : vector<2x128xf32>
    %712 = arith.divf %710, %711 : vector<2x128xf32>
    %713 = vector.extract_strided_slice %706 {offsets = [0, 128], sizes = [2, 128], strides = [1, 1]} : vector<2x512xf32> to vector<2x128xf32>
    %714 = arith.negf %713 : vector<2x128xf32>
    %715 = math.exp %714 : vector<2x128xf32>
    %cst_167 = arith.constant 1.000000e+00 : f32
    %716 = vector.broadcast %cst_167 : f32 to vector<2x128xf32>
    %717 = arith.addf %716, %715 : vector<2x128xf32>
    %718 = arith.divf %716, %717 : vector<2x128xf32>
    %719 = vector.extract_strided_slice %706 {offsets = [0, 256], sizes = [2, 128], strides = [1, 1]} : vector<2x512xf32> to vector<2x128xf32>
    %720 = math.tanh %719 : vector<2x128xf32>
    %721 = vector.extract_strided_slice %706 {offsets = [0, 384], sizes = [2, 128], strides = [1, 1]} : vector<2x512xf32> to vector<2x128xf32>
    %722 = arith.negf %721 : vector<2x128xf32>
    %723 = math.exp %722 : vector<2x128xf32>
    %cst_168 = arith.constant 1.000000e+00 : f32
    %724 = vector.broadcast %cst_168 : f32 to vector<2x128xf32>
    %725 = arith.addf %724, %723 : vector<2x128xf32>
    %726 = arith.divf %724, %725 : vector<2x128xf32>
    %727 = arith.mulf %718, %671 : vector<2x128xf32>
    %728 = arith.mulf %712, %720 : vector<2x128xf32>
    %729 = arith.addf %727, %728 : vector<2x128xf32>
    %730 = math.tanh %729 : vector<2x128xf32>
    %731 = arith.mulf %726, %730 : vector<2x128xf32>
    %cst_169 = arith.constant dense<0.000000e+00> : vector<2x512xf32>
    %732 = tpu.matmul %702, %584, %cst_169 {dimension_numbers = #tpu.dot_dimension_numbers<[1], [0], [0], [1], [0, 0, 1, 1], [], []>} : vector<2x128xf32>, vector<128x512xf32>, vector<2x512xf32> -> vector<2x512xf32>
    %733 = arith.addf %582, %732 : vector<2x512xf32>
    %734 = vector.broadcast %586 : vector<1x512xf32> to vector<2x512xf32>
    %735 = arith.addf %733, %734 : vector<2x512xf32>
    %736 = vector.extract_strided_slice %735 {offsets = [0, 0], sizes = [2, 128], strides = [1, 1]} : vector<2x512xf32> to vector<2x128xf32>
    %737 = arith.negf %736 : vector<2x128xf32>
    %738 = math.exp %737 : vector<2x128xf32>
    %cst_170 = arith.constant 1.000000e+00 : f32
    %739 = vector.broadcast %cst_170 : f32 to vector<2x128xf32>
    %740 = arith.addf %739, %738 : vector<2x128xf32>
    %741 = arith.divf %739, %740 : vector<2x128xf32>
    %742 = vector.extract_strided_slice %735 {offsets = [0, 128], sizes = [2, 128], strides = [1, 1]} : vector<2x512xf32> to vector<2x128xf32>
    %743 = arith.negf %742 : vector<2x128xf32>
    %744 = math.exp %743 : vector<2x128xf32>
    %cst_171 = arith.constant 1.000000e+00 : f32
    %745 = vector.broadcast %cst_171 : f32 to vector<2x128xf32>
    %746 = arith.addf %745, %744 : vector<2x128xf32>
    %747 = arith.divf %745, %746 : vector<2x128xf32>
    %748 = vector.extract_strided_slice %735 {offsets = [0, 256], sizes = [2, 128], strides = [1, 1]} : vector<2x512xf32> to vector<2x128xf32>
    %749 = math.tanh %748 : vector<2x128xf32>
    %750 = vector.extract_strided_slice %735 {offsets = [0, 384], sizes = [2, 128], strides = [1, 1]} : vector<2x512xf32> to vector<2x128xf32>
    %751 = arith.negf %750 : vector<2x128xf32>
    %752 = math.exp %751 : vector<2x128xf32>
    %cst_172 = arith.constant 1.000000e+00 : f32
    %753 = vector.broadcast %cst_172 : f32 to vector<2x128xf32>
    %754 = arith.addf %753, %752 : vector<2x128xf32>
    %755 = arith.divf %753, %754 : vector<2x128xf32>
    %756 = arith.mulf %747, %700 : vector<2x128xf32>
    %757 = arith.mulf %741, %749 : vector<2x128xf32>
    %758 = arith.addf %756, %757 : vector<2x128xf32>
    %759 = math.tanh %758 : vector<2x128xf32>
    %760 = arith.mulf %755, %759 : vector<2x128xf32>
    %cst_173 = arith.constant dense<0.000000e+00> : vector<2x512xf32>
    %761 = tpu.matmul %731, %583, %cst_173 {dimension_numbers = #tpu.dot_dimension_numbers<[1], [0], [0], [1], [0, 0, 1, 1], [], []>} : vector<2x128xf32>, vector<128x512xf32>, vector<2x512xf32> -> vector<2x512xf32>
    %762 = arith.addf %581, %761 : vector<2x512xf32>
    %763 = vector.broadcast %585 : vector<1x512xf32> to vector<2x512xf32>
    %764 = arith.addf %762, %763 : vector<2x512xf32>
    %765 = vector.extract_strided_slice %764 {offsets = [0, 0], sizes = [2, 128], strides = [1, 1]} : vector<2x512xf32> to vector<2x128xf32>
    %766 = arith.negf %765 : vector<2x128xf32>
    %767 = math.exp %766 : vector<2x128xf32>
    %cst_174 = arith.constant 1.000000e+00 : f32
    %768 = vector.broadcast %cst_174 : f32 to vector<2x128xf32>
    %769 = arith.addf %768, %767 : vector<2x128xf32>
    %770 = arith.divf %768, %769 : vector<2x128xf32>
    %771 = vector.extract_strided_slice %764 {offsets = [0, 128], sizes = [2, 128], strides = [1, 1]} : vector<2x512xf32> to vector<2x128xf32>
    %772 = arith.negf %771 : vector<2x128xf32>
    %773 = math.exp %772 : vector<2x128xf32>
    %cst_175 = arith.constant 1.000000e+00 : f32
    %774 = vector.broadcast %cst_175 : f32 to vector<2x128xf32>
    %775 = arith.addf %774, %773 : vector<2x128xf32>
    %776 = arith.divf %774, %775 : vector<2x128xf32>
    %777 = vector.extract_strided_slice %764 {offsets = [0, 256], sizes = [2, 128], strides = [1, 1]} : vector<2x512xf32> to vector<2x128xf32>
    %778 = math.tanh %777 : vector<2x128xf32>
    %779 = vector.extract_strided_slice %764 {offsets = [0, 384], sizes = [2, 128], strides = [1, 1]} : vector<2x512xf32> to vector<2x128xf32>
    %780 = arith.negf %779 : vector<2x128xf32>
    %781 = math.exp %780 : vector<2x128xf32>
    %cst_176 = arith.constant 1.000000e+00 : f32
    %782 = vector.broadcast %cst_176 : f32 to vector<2x128xf32>
    %783 = arith.addf %782, %781 : vector<2x128xf32>
    %784 = arith.divf %782, %783 : vector<2x128xf32>
    %785 = arith.mulf %776, %729 : vector<2x128xf32>
    %786 = arith.mulf %770, %778 : vector<2x128xf32>
    %787 = arith.addf %785, %786 : vector<2x128xf32>
    %788 = math.tanh %787 : vector<2x128xf32>
    %789 = arith.mulf %784, %788 : vector<2x128xf32>
    %cst_177 = arith.constant dense<0.000000e+00> : vector<2x512xf32>
    %790 = tpu.matmul %760, %584, %cst_177 {dimension_numbers = #tpu.dot_dimension_numbers<[1], [0], [0], [1], [0, 0, 1, 1], [], []>} : vector<2x128xf32>, vector<128x512xf32>, vector<2x512xf32> -> vector<2x512xf32>
    %791 = arith.addf %582, %790 : vector<2x512xf32>
    %792 = vector.broadcast %586 : vector<1x512xf32> to vector<2x512xf32>
    %793 = arith.addf %791, %792 : vector<2x512xf32>
    %794 = vector.extract_strided_slice %793 {offsets = [0, 0], sizes = [2, 128], strides = [1, 1]} : vector<2x512xf32> to vector<2x128xf32>
    %795 = arith.negf %794 : vector<2x128xf32>
    %796 = math.exp %795 : vector<2x128xf32>
    %cst_178 = arith.constant 1.000000e+00 : f32
    %797 = vector.broadcast %cst_178 : f32 to vector<2x128xf32>
    %798 = arith.addf %797, %796 : vector<2x128xf32>
    %799 = arith.divf %797, %798 : vector<2x128xf32>
    %800 = vector.extract_strided_slice %793 {offsets = [0, 128], sizes = [2, 128], strides = [1, 1]} : vector<2x512xf32> to vector<2x128xf32>
    %801 = arith.negf %800 : vector<2x128xf32>
    %802 = math.exp %801 : vector<2x128xf32>
    %cst_179 = arith.constant 1.000000e+00 : f32
    %803 = vector.broadcast %cst_179 : f32 to vector<2x128xf32>
    %804 = arith.addf %803, %802 : vector<2x128xf32>
    %805 = arith.divf %803, %804 : vector<2x128xf32>
    %806 = vector.extract_strided_slice %793 {offsets = [0, 256], sizes = [2, 128], strides = [1, 1]} : vector<2x512xf32> to vector<2x128xf32>
    %807 = math.tanh %806 : vector<2x128xf32>
    %808 = vector.extract_strided_slice %793 {offsets = [0, 384], sizes = [2, 128], strides = [1, 1]} : vector<2x512xf32> to vector<2x128xf32>
    %809 = arith.negf %808 : vector<2x128xf32>
    %810 = math.exp %809 : vector<2x128xf32>
    %cst_180 = arith.constant 1.000000e+00 : f32
    %811 = vector.broadcast %cst_180 : f32 to vector<2x128xf32>
    %812 = arith.addf %811, %810 : vector<2x128xf32>
    %813 = arith.divf %811, %812 : vector<2x128xf32>
    %814 = arith.mulf %805, %758 : vector<2x128xf32>
    %815 = arith.mulf %799, %807 : vector<2x128xf32>
    %816 = arith.addf %814, %815 : vector<2x128xf32>
    %817 = math.tanh %816 : vector<2x128xf32>
    %818 = arith.mulf %813, %817 : vector<2x128xf32>
    %cst_181 = arith.constant dense<0.000000e+00> : vector<2x512xf32>
    %819 = tpu.matmul %789, %583, %cst_181 {dimension_numbers = #tpu.dot_dimension_numbers<[1], [0], [0], [1], [0, 0, 1, 1], [], []>} : vector<2x128xf32>, vector<128x512xf32>, vector<2x512xf32> -> vector<2x512xf32>
    %820 = arith.addf %581, %819 : vector<2x512xf32>
    %821 = vector.broadcast %585 : vector<1x512xf32> to vector<2x512xf32>
    %822 = arith.addf %820, %821 : vector<2x512xf32>
    %823 = vector.extract_strided_slice %822 {offsets = [0, 0], sizes = [2, 128], strides = [1, 1]} : vector<2x512xf32> to vector<2x128xf32>
    %824 = arith.negf %823 : vector<2x128xf32>
    %825 = math.exp %824 : vector<2x128xf32>
    %cst_182 = arith.constant 1.000000e+00 : f32
    %826 = vector.broadcast %cst_182 : f32 to vector<2x128xf32>
    %827 = arith.addf %826, %825 : vector<2x128xf32>
    %828 = arith.divf %826, %827 : vector<2x128xf32>
    %829 = vector.extract_strided_slice %822 {offsets = [0, 128], sizes = [2, 128], strides = [1, 1]} : vector<2x512xf32> to vector<2x128xf32>
    %830 = arith.negf %829 : vector<2x128xf32>
    %831 = math.exp %830 : vector<2x128xf32>
    %cst_183 = arith.constant 1.000000e+00 : f32
    %832 = vector.broadcast %cst_183 : f32 to vector<2x128xf32>
    %833 = arith.addf %832, %831 : vector<2x128xf32>
    %834 = arith.divf %832, %833 : vector<2x128xf32>
    %835 = vector.extract_strided_slice %822 {offsets = [0, 256], sizes = [2, 128], strides = [1, 1]} : vector<2x512xf32> to vector<2x128xf32>
    %836 = math.tanh %835 : vector<2x128xf32>
    %837 = vector.extract_strided_slice %822 {offsets = [0, 384], sizes = [2, 128], strides = [1, 1]} : vector<2x512xf32> to vector<2x128xf32>
    %838 = arith.negf %837 : vector<2x128xf32>
    %839 = math.exp %838 : vector<2x128xf32>
    %cst_184 = arith.constant 1.000000e+00 : f32
    %840 = vector.broadcast %cst_184 : f32 to vector<2x128xf32>
    %841 = arith.addf %840, %839 : vector<2x128xf32>
    %842 = arith.divf %840, %841 : vector<2x128xf32>
    %843 = arith.mulf %834, %787 : vector<2x128xf32>
    %844 = arith.mulf %828, %836 : vector<2x128xf32>
    %845 = arith.addf %843, %844 : vector<2x128xf32>
    %846 = math.tanh %845 : vector<2x128xf32>
    %847 = arith.mulf %842, %846 : vector<2x128xf32>
    %cst_185 = arith.constant dense<0.000000e+00> : vector<2x512xf32>
    %848 = tpu.matmul %818, %584, %cst_185 {dimension_numbers = #tpu.dot_dimension_numbers<[1], [0], [0], [1], [0, 0, 1, 1], [], []>} : vector<2x128xf32>, vector<128x512xf32>, vector<2x512xf32> -> vector<2x512xf32>
    %849 = arith.addf %582, %848 : vector<2x512xf32>
    %850 = vector.broadcast %586 : vector<1x512xf32> to vector<2x512xf32>
    %851 = arith.addf %849, %850 : vector<2x512xf32>
    %852 = vector.extract_strided_slice %851 {offsets = [0, 0], sizes = [2, 128], strides = [1, 1]} : vector<2x512xf32> to vector<2x128xf32>
    %853 = arith.negf %852 : vector<2x128xf32>
    %854 = math.exp %853 : vector<2x128xf32>
    %cst_186 = arith.constant 1.000000e+00 : f32
    %855 = vector.broadcast %cst_186 : f32 to vector<2x128xf32>
    %856 = arith.addf %855, %854 : vector<2x128xf32>
    %857 = arith.divf %855, %856 : vector<2x128xf32>
    %858 = vector.extract_strided_slice %851 {offsets = [0, 128], sizes = [2, 128], strides = [1, 1]} : vector<2x512xf32> to vector<2x128xf32>
    %859 = arith.negf %858 : vector<2x128xf32>
    %860 = math.exp %859 : vector<2x128xf32>
    %cst_187 = arith.constant 1.000000e+00 : f32
    %861 = vector.broadcast %cst_187 : f32 to vector<2x128xf32>
    %862 = arith.addf %861, %860 : vector<2x128xf32>
    %863 = arith.divf %861, %862 : vector<2x128xf32>
    %864 = vector.extract_strided_slice %851 {offsets = [0, 256], sizes = [2, 128], strides = [1, 1]} : vector<2x512xf32> to vector<2x128xf32>
    %865 = math.tanh %864 : vector<2x128xf32>
    %866 = vector.extract_strided_slice %851 {offsets = [0, 384], sizes = [2, 128], strides = [1, 1]} : vector<2x512xf32> to vector<2x128xf32>
    %867 = arith.negf %866 : vector<2x128xf32>
    %868 = math.exp %867 : vector<2x128xf32>
    %cst_188 = arith.constant 1.000000e+00 : f32
    %869 = vector.broadcast %cst_188 : f32 to vector<2x128xf32>
    %870 = arith.addf %869, %868 : vector<2x128xf32>
    %871 = arith.divf %869, %870 : vector<2x128xf32>
    %872 = arith.mulf %863, %816 : vector<2x128xf32>
    %873 = arith.mulf %857, %865 : vector<2x128xf32>
    %874 = arith.addf %872, %873 : vector<2x128xf32>
    %875 = math.tanh %874 : vector<2x128xf32>
    %876 = arith.mulf %871, %875 : vector<2x128xf32>
    %cst_189 = arith.constant dense<0.000000e+00> : vector<2x512xf32>
    %877 = tpu.matmul %847, %583, %cst_189 {dimension_numbers = #tpu.dot_dimension_numbers<[1], [0], [0], [1], [0, 0, 1, 1], [], []>} : vector<2x128xf32>, vector<128x512xf32>, vector<2x512xf32> -> vector<2x512xf32>
    %878 = arith.addf %581, %877 : vector<2x512xf32>
    %879 = vector.broadcast %585 : vector<1x512xf32> to vector<2x512xf32>
    %880 = arith.addf %878, %879 : vector<2x512xf32>
    %881 = vector.extract_strided_slice %880 {offsets = [0, 0], sizes = [2, 128], strides = [1, 1]} : vector<2x512xf32> to vector<2x128xf32>
    %882 = arith.negf %881 : vector<2x128xf32>
    %883 = math.exp %882 : vector<2x128xf32>
    %cst_190 = arith.constant 1.000000e+00 : f32
    %884 = vector.broadcast %cst_190 : f32 to vector<2x128xf32>
    %885 = arith.addf %884, %883 : vector<2x128xf32>
    %886 = arith.divf %884, %885 : vector<2x128xf32>
    %887 = vector.extract_strided_slice %880 {offsets = [0, 128], sizes = [2, 128], strides = [1, 1]} : vector<2x512xf32> to vector<2x128xf32>
    %888 = arith.negf %887 : vector<2x128xf32>
    %889 = math.exp %888 : vector<2x128xf32>
    %cst_191 = arith.constant 1.000000e+00 : f32
    %890 = vector.broadcast %cst_191 : f32 to vector<2x128xf32>
    %891 = arith.addf %890, %889 : vector<2x128xf32>
    %892 = arith.divf %890, %891 : vector<2x128xf32>
    %893 = vector.extract_strided_slice %880 {offsets = [0, 256], sizes = [2, 128], strides = [1, 1]} : vector<2x512xf32> to vector<2x128xf32>
    %894 = math.tanh %893 : vector<2x128xf32>
    %895 = vector.extract_strided_slice %880 {offsets = [0, 384], sizes = [2, 128], strides = [1, 1]} : vector<2x512xf32> to vector<2x128xf32>
    %896 = arith.negf %895 : vector<2x128xf32>
    %897 = math.exp %896 : vector<2x128xf32>
    %cst_192 = arith.constant 1.000000e+00 : f32
    %898 = vector.broadcast %cst_192 : f32 to vector<2x128xf32>
    %899 = arith.addf %898, %897 : vector<2x128xf32>
    %900 = arith.divf %898, %899 : vector<2x128xf32>
    %901 = arith.mulf %892, %845 : vector<2x128xf32>
    %902 = arith.mulf %886, %894 : vector<2x128xf32>
    %903 = arith.addf %901, %902 : vector<2x128xf32>
    %904 = math.tanh %903 : vector<2x128xf32>
    %905 = arith.mulf %900, %904 : vector<2x128xf32>
    %cst_193 = arith.constant dense<0.000000e+00> : vector<2x512xf32>
    %906 = tpu.matmul %876, %584, %cst_193 {dimension_numbers = #tpu.dot_dimension_numbers<[1], [0], [0], [1], [0, 0, 1, 1], [], []>} : vector<2x128xf32>, vector<128x512xf32>, vector<2x512xf32> -> vector<2x512xf32>
    %907 = arith.addf %582, %906 : vector<2x512xf32>
    %908 = vector.broadcast %586 : vector<1x512xf32> to vector<2x512xf32>
    %909 = arith.addf %907, %908 : vector<2x512xf32>
    %910 = vector.extract_strided_slice %909 {offsets = [0, 0], sizes = [2, 128], strides = [1, 1]} : vector<2x512xf32> to vector<2x128xf32>
    %911 = arith.negf %910 : vector<2x128xf32>
    %912 = math.exp %911 : vector<2x128xf32>
    %cst_194 = arith.constant 1.000000e+00 : f32
    %913 = vector.broadcast %cst_194 : f32 to vector<2x128xf32>
    %914 = arith.addf %913, %912 : vector<2x128xf32>
    %915 = arith.divf %913, %914 : vector<2x128xf32>
    %916 = vector.extract_strided_slice %909 {offsets = [0, 128], sizes = [2, 128], strides = [1, 1]} : vector<2x512xf32> to vector<2x128xf32>
    %917 = arith.negf %916 : vector<2x128xf32>
    %918 = math.exp %917 : vector<2x128xf32>
    %cst_195 = arith.constant 1.000000e+00 : f32
    %919 = vector.broadcast %cst_195 : f32 to vector<2x128xf32>
    %920 = arith.addf %919, %918 : vector<2x128xf32>
    %921 = arith.divf %919, %920 : vector<2x128xf32>
    %922 = vector.extract_strided_slice %909 {offsets = [0, 256], sizes = [2, 128], strides = [1, 1]} : vector<2x512xf32> to vector<2x128xf32>
    %923 = math.tanh %922 : vector<2x128xf32>
    %924 = vector.extract_strided_slice %909 {offsets = [0, 384], sizes = [2, 128], strides = [1, 1]} : vector<2x512xf32> to vector<2x128xf32>
    %925 = arith.negf %924 : vector<2x128xf32>
    %926 = math.exp %925 : vector<2x128xf32>
    %cst_196 = arith.constant 1.000000e+00 : f32
    %927 = vector.broadcast %cst_196 : f32 to vector<2x128xf32>
    %928 = arith.addf %927, %926 : vector<2x128xf32>
    %929 = arith.divf %927, %928 : vector<2x128xf32>
    %930 = arith.mulf %921, %874 : vector<2x128xf32>
    %931 = arith.mulf %915, %923 : vector<2x128xf32>
    %932 = arith.addf %930, %931 : vector<2x128xf32>
    %933 = math.tanh %932 : vector<2x128xf32>
    %934 = arith.mulf %929, %933 : vector<2x128xf32>
    %c0_197 = arith.constant 0 : index
    %c0_198 = arith.constant 0 : index
    %935 = vector.load %arg30[%c0_197, %c0_198] : memref<128x45xf32, #tpu.memory_space<vmem>>, vector<128x45xf32>
    %c0_199 = arith.constant 0 : index
    %c0_200 = arith.constant 0 : index
    %936 = vector.load %arg31[%c0_199, %c0_200] : memref<128x45xf32, #tpu.memory_space<vmem>>, vector<128x45xf32>
    %c0_201 = arith.constant 0 : index
    %c0_202 = arith.constant 0 : index
    %937 = vector.load %arg32[%c0_201, %c0_202] : memref<1x45xf32, #tpu.memory_space<vmem>>, vector<1x45xf32>
    %cst_203 = arith.constant dense<0.000000e+00> : vector<2x45xf32>
    %938 = tpu.matmul %615, %935, %cst_203 {dimension_numbers = #tpu.dot_dimension_numbers<[1], [0], [0], [1], [0, 0, 1, 1], [], []>} : vector<2x128xf32>, vector<128x45xf32>, vector<2x45xf32> -> vector<2x45xf32>
    %cst_204 = arith.constant dense<0.000000e+00> : vector<2x45xf32>
    %939 = tpu.matmul %934, %936, %cst_204 {dimension_numbers = #tpu.dot_dimension_numbers<[1], [0], [0], [1], [0, 0, 1, 1], [], []>} : vector<2x128xf32>, vector<128x45xf32>, vector<2x45xf32> -> vector<2x45xf32>
    %940 = arith.addf %938, %939 : vector<2x45xf32>
    %941 = vector.broadcast %937 : vector<1x45xf32> to vector<2x45xf32>
    %942 = arith.addf %940, %941 : vector<2x45xf32>
    %943 = vector.shape_cast %942 : vector<2x45xf32> to vector<2x1x45xf32>
    %c0_205 = arith.constant 0 : index
    %c0_206 = arith.constant 0 : index
    %c0_207 = arith.constant 0 : index
    %944 = vector.load %arg33[%c0_205, %c0_206, %c0_207] : memref<2x6x45xf32, #tpu.memory_space<vmem>>, vector<2x1x45xf32>
    tpu.vector_store %arg33[%c0_205, %c0_206, %c0_207], %943 {strides = array<i32>} : memref<2x6x45xf32, #tpu.memory_space<vmem>>, vector<2x1x45xf32>,
    %cst_208 = arith.constant dense<0.000000e+00> : vector<2x45xf32>
    %945 = tpu.matmul %673, %935, %cst_208 {dimension_numbers = #tpu.dot_dimension_numbers<[1], [0], [0], [1], [0, 0, 1, 1], [], []>} : vector<2x128xf32>, vector<128x45xf32>, vector<2x45xf32> -> vector<2x45xf32>
    %cst_209 = arith.constant dense<0.000000e+00> : vector<2x45xf32>
    %946 = tpu.matmul %876, %936, %cst_209 {dimension_numbers = #tpu.dot_dimension_numbers<[1], [0], [0], [1], [0, 0, 1, 1], [], []>} : vector<2x128xf32>, vector<128x45xf32>, vector<2x45xf32> -> vector<2x45xf32>
    %947 = arith.addf %945, %946 : vector<2x45xf32>
    %948 = vector.broadcast %937 : vector<1x45xf32> to vector<2x45xf32>
    %949 = arith.addf %947, %948 : vector<2x45xf32>
    %950 = vector.shape_cast %949 : vector<2x45xf32> to vector<2x1x45xf32>
    %c0_210 = arith.constant 0 : index
    %c1 = arith.constant 1 : index
    %c0_211 = arith.constant 0 : index
    %951 = vector.load %arg33[%c0_210, %c1, %c0_211] : memref<2x6x45xf32, #tpu.memory_space<vmem>>, vector<2x1x45xf32>
    tpu.vector_store %arg33[%c0_210, %c1, %c0_211], %950 {strides = array<i32>} : memref<2x6x45xf32, #tpu.memory_space<vmem>>, vector<2x1x45xf32>,
    %cst_212 = arith.constant dense<0.000000e+00> : vector<2x45xf32>
    %952 = tpu.matmul %731, %935, %cst_212 {dimension_numbers = #tpu.dot_dimension_numbers<[1], [0], [0], [1], [0, 0, 1, 1], [], []>} : vector<2x128xf32>, vector<128x45xf32>, vector<2x45xf32> -> vector<2x45xf32>
    %cst_213 = arith.constant dense<0.000000e+00> : vector<2x45xf32>
    %953 = tpu.matmul %818, %936, %cst_213 {dimension_numbers = #tpu.dot_dimension_numbers<[1], [0], [0], [1], [0, 0, 1, 1], [], []>} : vector<2x128xf32>, vector<128x45xf32>, vector<2x45xf32> -> vector<2x45xf32>
    %954 = arith.addf %952, %953 : vector<2x45xf32>
    %955 = vector.broadcast %937 : vector<1x45xf32> to vector<2x45xf32>
    %956 = arith.addf %954, %955 : vector<2x45xf32>
    %957 = vector.shape_cast %956 : vector<2x45xf32> to vector<2x1x45xf32>
    %c0_214 = arith.constant 0 : index
    %c2 = arith.constant 2 : index
    %c0_215 = arith.constant 0 : index
    %958 = vector.load %arg33[%c0_214, %c2, %c0_215] : memref<2x6x45xf32, #tpu.memory_space<vmem>>, vector<2x1x45xf32>
    tpu.vector_store %arg33[%c0_214, %c2, %c0_215], %957 {strides = array<i32>} : memref<2x6x45xf32, #tpu.memory_space<vmem>>, vector<2x1x45xf32>,
    %cst_216 = arith.constant dense<0.000000e+00> : vector<2x45xf32>
    %959 = tpu.matmul %789, %935, %cst_216 {dimension_numbers = #tpu.dot_dimension_numbers<[1], [0], [0], [1], [0, 0, 1, 1], [], []>} : vector<2x128xf32>, vector<128x45xf32>, vector<2x45xf32> -> vector<2x45xf32>
    %cst_217 = arith.constant dense<0.000000e+00> : vector<2x45xf32>
    %960 = tpu.matmul %760, %936, %cst_217 {dimension_numbers = #tpu.dot_dimension_numbers<[1], [0], [0], [1], [0, 0, 1, 1], [], []>} : vector<2x128xf32>, vector<128x45xf32>, vector<2x45xf32> -> vector<2x45xf32>
    %961 = arith.addf %959, %960 : vector<2x45xf32>
    %962 = vector.broadcast %937 : vector<1x45xf32> to vector<2x45xf32>
    %963 = arith.addf %961, %962 : vector<2x45xf32>
    %964 = vector.shape_cast %963 : vector<2x45xf32> to vector<2x1x45xf32>
    %c0_218 = arith.constant 0 : index
    %c3 = arith.constant 3 : index
    %c0_219 = arith.constant 0 : index
    %965 = vector.load %arg33[%c0_218, %c3, %c0_219] : memref<2x6x45xf32, #tpu.memory_space<vmem>>, vector<2x1x45xf32>
    tpu.vector_store %arg33[%c0_218, %c3, %c0_219], %964 {strides = array<i32>} : memref<2x6x45xf32, #tpu.memory_space<vmem>>, vector<2x1x45xf32>,
    %cst_220 = arith.constant dense<0.000000e+00> : vector<2x45xf32>
    %966 = tpu.matmul %847, %935, %cst_220 {dimension_numbers = #tpu.dot_dimension_numbers<[1], [0], [0], [1], [0, 0, 1, 1], [], []>} : vector<2x128xf32>, vector<128x45xf32>, vector<2x45xf32> -> vector<2x45xf32>
    %cst_221 = arith.constant dense<0.000000e+00> : vector<2x45xf32>
    %967 = tpu.matmul %702, %936, %cst_221 {dimension_numbers = #tpu.dot_dimension_numbers<[1], [0], [0], [1], [0, 0, 1, 1], [], []>} : vector<2x128xf32>, vector<128x45xf32>, vector<2x45xf32> -> vector<2x45xf32>
    %968 = arith.addf %966, %967 : vector<2x45xf32>
    %969 = vector.broadcast %937 : vector<1x45xf32> to vector<2x45xf32>
    %970 = arith.addf %968, %969 : vector<2x45xf32>
    %971 = vector.shape_cast %970 : vector<2x45xf32> to vector<2x1x45xf32>
    %c0_222 = arith.constant 0 : index
    %c4 = arith.constant 4 : index
    %c0_223 = arith.constant 0 : index
    %972 = vector.load %arg33[%c0_222, %c4, %c0_223] : memref<2x6x45xf32, #tpu.memory_space<vmem>>, vector<2x1x45xf32>
    tpu.vector_store %arg33[%c0_222, %c4, %c0_223], %971 {strides = array<i32>} : memref<2x6x45xf32, #tpu.memory_space<vmem>>, vector<2x1x45xf32>,
    %cst_224 = arith.constant dense<0.000000e+00> : vector<2x45xf32>
    %973 = tpu.matmul %905, %935, %cst_224 {dimension_numbers = #tpu.dot_dimension_numbers<[1], [0], [0], [1], [0, 0, 1, 1], [], []>} : vector<2x128xf32>, vector<128x45xf32>, vector<2x45xf32> -> vector<2x45xf32>
    %cst_225 = arith.constant dense<0.000000e+00> : vector<2x45xf32>
    %974 = tpu.matmul %644, %936, %cst_225 {dimension_numbers = #tpu.dot_dimension_numbers<[1], [0], [0], [1], [0, 0, 1, 1], [], []>} : vector<2x128xf32>, vector<128x45xf32>, vector<2x45xf32> -> vector<2x45xf32>
    %975 = arith.addf %973, %974 : vector<2x45xf32>
    %976 = vector.broadcast %937 : vector<1x45xf32> to vector<2x45xf32>
    %977 = arith.addf %975, %976 : vector<2x45xf32>
    %978 = vector.shape_cast %977 : vector<2x45xf32> to vector<2x1x45xf32>
    %c0_226 = arith.constant 0 : index
    %c5 = arith.constant 5 : index
    %c0_227 = arith.constant 0 : index
    %979 = vector.load %arg33[%c0_226, %c5, %c0_227] : memref<2x6x45xf32, #tpu.memory_space<vmem>>, vector<2x1x45xf32>
    tpu.vector_store %arg33[%c0_226, %c5, %c0_227], %978 {strides = array<i32>} : memref<2x6x45xf32, #tpu.memory_space<vmem>>, vector<2x1x45xf32>,
    return
  }
}

</mosaic_0001>

<bundles_post_ra>
// kernel: tpu_custom_call.1
= control target key start
LH: loop header
LB: loop body
LE: loop exit
PB: predicated region body
PF: predicated region fallthrough
CT: control target
= control target key end

     0   :  { %s14474_s6 = smov 1   ;;  %s14475_s10 = smov 2   ;;  %s17495_s0 = inlined_call_operand.smem [shape: u32[36], index: -1, kind: input, shape index: {}] }
   0x1   :  { %s14549_s5 = sld [smem:[%s17495_s0]]   ;;  %s14476_s14 = smov 3  }
   0x2   :  { %s14554_s9 = sld [smem:[%s17495_s0 + %s14474_s6]]   ;;  %s14477_s18 = smov 4  }
   0x3   :  { %s14559_s13 = sld [smem:[%s17495_s0 + %s14475_s10]]   ;;  %s14478_s22 = smov 5  }
   0x4   :  { %s14564_s17 = sld [smem:[%s17495_s0 + %s14476_s14]]   ;;  %s14479_s26 = smov 6  }
   0x5   :  { %s14569_s21 = sld [smem:[%s17495_s0 + %s14477_s18]]   ;;  %s14480_s30 = smov 7  }
   0x6   :  { %s14574_s25 = sld [smem:[%s17495_s0 + %s14478_s22]]   ;;  %s14481_s4 = smov 8  }
   0x7   :  { %s14579_s29 = sld [smem:[%s17495_s0 + %s14479_s26]]   ;;  %s14482_s10 = smov 9  }
   0x8   :  { %17807 = sst [smem:[#allocation47_spill]] %s14554_s9  ;;  %s14483_s15 = smov 10  }
   0x9   :  { %s14584_s3 = sld [smem:[%s17495_s0 + %s14480_s30]]   ;;  %s14484_s20 = smov 11  }
   0xa   :  { %17808 = sst [smem:[#allocation48_spill]] %s14564_s17  ;;  %s14485_s26 = smov 12  }
   0xb   :  { %17809 = sst [smem:[#allocation49_spill]] %s14569_s21  ;;  %s14486_s1 = smov 13  }
   0xc   :  { %17810 = sst [smem:[#allocation50_spill]] %s14574_s25  ;;  %s14487_s7 = smov 14  }
   0xd   :  { %17811 = sst [smem:[#allocation51_spill]] %s14579_s29  ;;  %s14489_s22 = smov 16  }
   0xe   :  { %s14589_s8 = sld [smem:[%s17495_s0 + %s14481_s4]]   ;;  %s14490_s28 = smov 17  }
   0xf   :  { %17812 = sst [smem:[#allocation52_spill]] %s14584_s3 }
  0x10   :  { %s14594_s14 = sld [smem:[%s17495_s0 + %s14482_s10]]  }
  0x11   :  { %s14599_s19 = sld [smem:[%s17495_s0 + %s14483_s15]]   ;;  %s14488_s15 = smov 15  }
  0x12   :  { %s14604_s24 = sld [smem:[%s17495_s0 + %s14484_s20]]  }
  0x13   :  { %s14609_s30 = sld [smem:[%s17495_s0 + %s14485_s26]]  }
  0x14   :  { %17813 = sst [smem:[#allocation53_spill]] %s14589_s8 }
  0x15   :  { %s14614_s6 = sld [smem:[%s17495_s0 + %s14486_s1]]  }
  0x16   :  { %s14619_s12 = sld [smem:[%s17495_s0 + %s14487_s7]]   ;;  %s14491_s7 = smov 18  }
  0x17   :  { %s14624_s20 = sld [smem:[%s17495_s0 + %s14488_s15]]   ;;  %s14492_s15 = smov 19  }
  0x18   :  { %s14629_s27 = sld [smem:[%s17495_s0 + %s14489_s22]]   ;;  %s14493_s22 = smov 20  }
  0x19   :  { %17814 = sst [smem:[#allocation54_spill]] %s14609_s30 }
  0x1a   :  { %s14634_s4 = sld [smem:[%s17495_s0 + %s14490_s28]]   ;;  %s14494_s28 = smov 21  }
  0x1b   :  { %s14639_s9 = sld [smem:[%s17495_s0 + %s14491_s7]]   ;;  %s14495_s7 = smov 22  }
  0x1c   :  { %s14644_s30 = sld [smem:[%s17495_s0 + %s14492_s15]]   ;;  %s14496_s15 = smov 23  }
  0x1d   :  { %s14654_s3 = sld [smem:[%s17495_s0 + %s14494_s28]]   ;;  %s14498_s28 = smov 25  }
  0x1e   :  { %17815 = sst [smem:[#allocation55_spill]] %s14629_s27 }
  0x1f   :  { %s14649_s27 = sld [smem:[%s17495_s0 + %s14493_s22]]   ;;  %s14497_s22 = smov 24  }
  0x20   :  { %s14664_s8 = sld [smem:[%s17495_s0 + %s14496_s15]]   ;;  %s14500_s15 = smov 27  }
  0x21   :  { %17816 = sst [smem:[#allocation56_spill]] %s14639_s9 }
  0x22   :  { %s14659_s9 = sld [smem:[%s17495_s0 + %s14495_s7]]   ;;  %s14499_s7 = smov 26  }
  0x23   :  { %s14669_s29 = sld [smem:[%s17495_s0 + %s14497_s22]]   ;;  %s14501_s22 = smov 28  }
  0x24   :  { %s14674_s21 = sld [smem:[%s17495_s0 + %s14498_s28]]   ;;  %s14502_s28 = smov 29  }
  0x25   :  { %17817 = sst [smem:[#allocation57_spill]] %s14649_s27 }
  0x26   :  { %s14679_s25 = sld [smem:[%s17495_s0 + %s14499_s7]]   ;;  %s14503_s7 = smov 30  }
  0x27   :  { %s14684_s17 = sld [smem:[%s17495_s0 + %s14500_s15]]   ;;  %s14504_s15 = smov 31  }
  0x28   :  { %17818 = sst [smem:[#allocation58_spill]] %s14659_s9 }
  0x29   :  { %17819 = sst [smem:[#allocation59_spill]] %s14669_s29 }
  0x2a   :  { %s14689_s29 = sld [smem:[%s17495_s0 + %s14501_s22]]   ;;  %s14505_s22 = smov 32  }
  0x2b   :  { %s14694_s9 = sld [smem:[%s17495_s0 + %s14502_s28]]   ;;  %s14506_s28 = smov 33  }
  0x2c   :  { %17820 = sst [smem:[#allocation60_spill]] %s14679_s25 }
  0x2d   :  { %s14699_s25 = sld [smem:[%s17495_s0 + %s14503_s7]]   ;;  %s14507_s7 = smov 34  }
  0x2e   :  { %s14704_s27 = sld [smem:[%s17495_s0 + %s14504_s15]]   ;;  %s14508_s15 = smov 35  }
  0x30   :  { %17821 = sst [smem:[#allocation61_spill]] %s14689_s29 }
  0x31   :  { %17822 = sst [smem:[#allocation62_spill]] %s14694_s9 }
  0x32   :  { %s14709_s29 = sld [smem:[%s17495_s0 + %s14505_s22]]  }
  0x33   :  { %17823 = sst [smem:[#allocation63_spill]] %s14699_s25 }
  0x34   :  { %17824 = sst [smem:[#allocation64_spill]] %s14704_s27 }
  0x35   :  { %s14714_s9 = sld [smem:[%s17495_s0 + %s14506_s28]]  }
  0x36   :  { %s14719_s25 = sld [smem:[%s17495_s0 + %s14507_s7]]  }
  0x37   :  { %s14724_s27 = sld [smem:[%s17495_s0 + %s14508_s15]]  }
  0x38   :  { %77 = vsyncpa [#allocation3], 0 }
  0x39   :  { %78 = vsyncpa [#allocation6], 0 }
  0x3a   :  { %79 = vsyncpa [#allocation9], 0 }
  0x3b   :  { %80 = vsyncpa [#allocation12], 0 }
  0x3c   :  { %81 = vsyncpa [#allocation15], 0 }
  0x3d   :  { %82 = vsyncpa [#allocation18], 0 }
  0x3e   :  { %83 = vsyncpa [#allocation21], 0 }
  0x3f   :  { %84 = vsyncpa [#allocation24], 0 }
  0x40   :  { %85 = vsyncpa [#allocation27], 0 }
  0x41   :  { %86 = vsyncpa [#allocation30], 0 }
  0x42   :  { %87 = vsyncpa [#allocation4], 0 }
  0x43   :  { %88 = vsyncpa [#allocation34], 0  ;;  %s14509_s22 = smov [#allocation5]   ;;  %s13988_s0 = scalar_lea.hbm %s14559_s13, 6144 }
  0x44   :  { %s108_s23 = sshll.u32 %s14509_s22, 4  ;;  %p13989_p0 = scmp.ne.s32.totalorder %s14559_s13, %s13988_s0  ;;  %s109_s23 = int_to_ptr.vmem [resolvable:$true] %s108_s23 }
  0x45   :  { %p13992_p1 = scmp.lt.u32.totalorder %s13988_s0, %s14559_s13 }
  0x47   :  { %p13994_p2 = pnand %p13992_p1, %p13989_p0 }
  0x49   :  { %13997 = shalt.err (!%p13994_p2)
}
  0x4a   :  { %s13998_s26 = scalar_lea.vmem %s109_s23, 6144  ;;  %p14003_p4 = scmp.lt.s32.totalorder %s109_s23, %s109_s23 }
  0x4b   :  { %p13999_p3 = scmp.ne.s32.totalorder %s109_s23, %s13998_s26  ;;  %p14004_p5 = scmp.lt.s32.totalorder %s13998_s26, %s13998_s26 }
  0x4d   :  { %p14005_p6 = por %p14004_p5, %p14003_p4 }
  0x4f   :  { %p14006_p7 = pnand %p14005_p6, %p13999_p3 }
  0x51   :  { %14009 = shalt.err (!%p14006_p7)
}
  0x52   :  { %s14510_s28 = smov 1024   ;;  %s14511_s1 = smov 64  }
  0x53   :  { %114 = dma.hbm_to_vmem [thread:$0]  %s14559_s13, 6144, %s109_s23, [#allocation6], %s14510_s28, %s14510_s28, %s14511_s1  }
  0x54   :  { %s14512_s2 = smov [#allocation8]   ;;  %s14513_s10 = smov [#allocation11]  }
  0x55   :  { %s142_s7 = sshll.u32 %s14512_s2, 4  ;;  %s167_s11 = sshll.u32 %s14513_s10, 4  ;;  %s143_s7 = int_to_ptr.vmem [resolvable:$true] %s142_s7  ;;  %s168_s11 = int_to_ptr.vmem [resolvable:$true] %s167_s11 }
  0x56   :  { %s14010_s15 = scalar_lea.hbm %s14599_s19, 1024 }
  0x57   :  { %p14011_p8 = scmp.ne.s32.totalorder %s14599_s19, %s14010_s15  ;;  %p14014_p9 = scmp.lt.u32.totalorder %s14010_s15, %s14599_s19 }
  0x59   :  { %p14016_p10 = pnand %p14014_p9, %p14011_p8 }
  0x5b   :  { %14019 = shalt.err (!%p14016_p10)
}
  0x5c   :  { %s14020_s16 = scalar_lea.vmem %s143_s7, 1024  ;;  %p14025_p12 = scmp.lt.s32.totalorder %s143_s7, %s143_s7 }
  0x5d   :  { %p14021_p11 = scmp.ne.s32.totalorder %s143_s7, %s14020_s16  ;;  %p14026_p13 = scmp.lt.s32.totalorder %s14020_s16, %s14020_s16 }
  0x5f   :  { %p14027_p0 = por %p14026_p13, %p14025_p12 }
  0x61   :  { %p14028_p1 = pnand %p14027_p0, %p14021_p11 }
  0x63   :  { %14031 = shalt.err (!%p14028_p1)
}
  0x64   :  { %s14514_s18 = smov 128   ;;  %s14515_s13 = smov 8  }
  0x65   :  { %148 = dma.hbm_to_vmem [thread:$0]  %s14599_s19, 1024, %s143_s7, [#allocation9], %s14514_s18, %s14514_s18, %s14515_s13  }
  0x66   :  { %s14032_s22 = scalar_lea.hbm %s14614_s6, 16 }
  0x67   :  { %p14033_p2 = scmp.ne.s32.totalorder %s14614_s6, %s14032_s22  ;;  %p14036_p3 = scmp.lt.u32.totalorder %s14032_s22, %s14614_s6 }
  0x69   :  { %p14038_p4 = pnand %p14036_p3, %p14033_p2 }
  0x6b   :  { %14041 = shalt.err (!%p14038_p4)
}
  0x6c   :  { %s14042_s23 = scalar_lea.vmem %s168_s11, 16  ;;  %s14046_s0 = scalar_lea.vmem %s168_s11, 32 }
  0x6d   :  { %p14043_p5 = scmp.ne.s32.totalorder %s168_s11, %s14042_s23  ;;  %p14047_p6 = scmp.lt.s32.totalorder %s168_s11, %s168_s11 }
  0x6e   :  { %p14048_p7 = scmp.lt.s32.totalorder %s14046_s0, %s14042_s23 }
  0x70   :  { %p14049_p8 = por %p14048_p7, %p14047_p6 }
  0x72   :  { %p14050_p9 = pnand %p14049_p8, %p14043_p5 }
  0x74   :  { %14053 = shalt.err (!%p14050_p9)
}
  0x75   :  { %170 = dma.hbm_to_vmem [thread:$0]  %s14614_s6, 16, %s168_s11, [#allocation12]  }
  0x76   :  { %s14516_s19 = smov [#allocation14]   ;;  %s14517_s2 = smov [#allocation17]  }
  0x77   :  { %s189_s26 = sshll.u32 %s14516_s19, 4  ;;  %s213_s7 = sshll.u32 %s14517_s2, 4  ;;  %s190_s26 = int_to_ptr.vmem [resolvable:$true] %s189_s26  ;;  %s214_s7 = int_to_ptr.vmem [resolvable:$true] %s213_s7 }
  0x78   :  { %s14054_s10 = scalar_lea.hbm %s14624_s20, 16 }
  0x79   :  { %p14055_p10 = scmp.ne.s32.totalorder %s14624_s20, %s14054_s10  ;;  %p14058_p11 = scmp.lt.u32.totalorder %s14054_s10, %s14624_s20 }
  0x7b   :  { %p14060_p12 = pnand %p14058_p11, %p14055_p10 }
  0x7d   :  { %14063 = shalt.err (!%p14060_p12)
}
  0x7e   :  { %s14064_s15 = scalar_lea.vmem %s190_s26, 16  ;;  %s14068_s16 = scalar_lea.vmem %s190_s26, 32 }
  0x7f   :  { %p14065_p13 = scmp.ne.s32.totalorder %s190_s26, %s14064_s15  ;;  %p14069_p0 = scmp.lt.s32.totalorder %s190_s26, %s190_s26 }
  0x80   :  { %p14070_p1 = scmp.lt.s32.totalorder %s14068_s16, %s14064_s15 }
  0x82   :  { %p14071_p2 = por %p14070_p1, %p14069_p0 }
  0x84   :  { %p14072_p3 = pnand %p14071_p2, %p14065_p13 }
  0x86   :  { %14075 = shalt.err (!%p14072_p3)
}
  0x87   :  { %192 = dma.hbm_to_vmem [thread:$0]  %s14624_s20, 16, %s190_s26, [#allocation15]  }
  0x88   :  { %s14076_s6 = scalar_lea.hbm %s14644_s30, 16 }
  0x89   :  { %p14077_p4 = scmp.ne.s32.totalorder %s14644_s30, %s14076_s6  ;;  %p14080_p5 = scmp.lt.u32.totalorder %s14076_s6, %s14644_s30 }
  0x8b   :  { %p14082_p6 = pnand %p14080_p5, %p14077_p4 }
  0x8d   :  { %14085 = shalt.err (!%p14082_p6)
}
  0x8e   :  { %s14086_s11 = scalar_lea.vmem %s214_s7, 16  ;;  %s14090_s22 = scalar_lea.vmem %s214_s7, 32 }
  0x8f   :  { %p14087_p7 = scmp.ne.s32.totalorder %s214_s7, %s14086_s11  ;;  %p14091_p8 = scmp.lt.s32.totalorder %s214_s7, %s214_s7 }
  0x90   :  { %p14092_p9 = scmp.lt.s32.totalorder %s14090_s22, %s14086_s11 }
  0x92   :  { %p14093_p10 = por %p14092_p9, %p14091_p8 }
  0x94   :  { %p14094_p11 = pnand %p14093_p10, %p14087_p7 }
  0x96   :  { %14097 = shalt.err (!%p14094_p11)
}
  0x97   :  { %216 = dma.hbm_to_vmem [thread:$0]  %s14644_s30, 16, %s214_s7, [#allocation18]  }
  0x98   :  { %s14518_s20 = smov [#allocation20]   ;;  %s14519_s0 = smov [#allocation23]  }
  0x99   :  { %s235_s23 = sshll.u32 %s14518_s20, 4  ;;  %s256_s19 = sshll.u32 %s14519_s0, 4  ;;  %s236_s23 = int_to_ptr.vmem [resolvable:$true] %s235_s23  ;;  %s257_s19 = int_to_ptr.vmem [resolvable:$true] %s256_s19 }
  0x9a   :  { %s14098_s26 = scalar_lea.hbm %s14654_s3, 16 }
  0x9b   :  { %p14099_p12 = scmp.ne.s32.totalorder %s14654_s3, %s14098_s26  ;;  %p14102_p13 = scmp.lt.u32.totalorder %s14098_s26, %s14654_s3 }
  0x9d   :  { %p14104_p0 = pnand %p14102_p13, %p14099_p12 }
  0x9f   :  { %14107 = shalt.err (!%p14104_p0)
}
  0xa0   :  { %s14108_s2 = scalar_lea.vmem %s236_s23, 16  ;;  %s14112_s10 = scalar_lea.vmem %s236_s23, 32 }
  0xa1   :  { %p14109_p1 = scmp.ne.s32.totalorder %s236_s23, %s14108_s2  ;;  %p14113_p2 = scmp.lt.s32.totalorder %s236_s23, %s236_s23 }
  0xa2   :  { %p14114_p3 = scmp.lt.s32.totalorder %s14112_s10, %s14108_s2 }
  0xa4   :  { %p14115_p4 = por %p14114_p3, %p14113_p2 }
  0xa6   :  { %p14116_p5 = pnand %p14115_p4, %p14109_p1 }
  0xa8   :  { %14119 = shalt.err (!%p14116_p5)
}
  0xa9   :  { %238 = dma.hbm_to_vmem [thread:$0]  %s14654_s3, 16, %s236_s23, [#allocation21]  }
  0xaa   :  { %s14120_s30 = scalar_lea.hbm %s14664_s8, 1024 }
  0xab   :  { %p14121_p6 = scmp.ne.s32.totalorder %s14664_s8, %s14120_s30  ;;  %p14124_p7 = scmp.lt.u32.totalorder %s14120_s30, %s14664_s8 }
  0xad   :  { %p14126_p8 = pnand %p14124_p7, %p14121_p6 }
  0xaf   :  { %14129 = shalt.err (!%p14126_p8)
}
  0xb0   :  { %s14130_s7 = scalar_lea.vmem %s257_s19, 1024  ;;  %p14135_p10 = scmp.lt.s32.totalorder %s257_s19, %s257_s19 }
  0xb1   :  { %p14131_p9 = scmp.ne.s32.totalorder %s257_s19, %s14130_s7  ;;  %p14136_p11 = scmp.lt.s32.totalorder %s14130_s7, %s14130_s7 }
  0xb3   :  { %p14137_p12 = por %p14136_p11, %p14135_p10 }
  0xb5   :  { %p14138_p13 = pnand %p14137_p12, %p14131_p9 }
  0xb7   :  { %14141 = shalt.err (!%p14138_p13)
}
  0xb8   :  { %262 = dma.hbm_to_vmem [thread:$0]  %s14664_s8, 1024, %s257_s19, [#allocation24], %s14514_s18, %s14514_s18, %s14515_s13  }
  0xb9   :  { %s14520_s3 = smov [#allocation26]   ;;  %s14521_s16 = smov [#allocation29]  }
  0xba   :  { %s278_s15 = sshll.u32 %s14520_s3, 4  ;;  %s303_s6 = sshll.u32 %s14521_s16, 4  ;;  %s279_s15 = int_to_ptr.vmem [resolvable:$true] %s278_s15  ;;  %s304_s6 = int_to_ptr.vmem [resolvable:$true] %s303_s6 }
  0xbb   :  { %s14142_s11 = scalar_lea.hbm %s14674_s21, 8192 }
  0xbc   :  { %p14143_p0 = scmp.ne.s32.totalorder %s14674_s21, %s14142_s11  ;;  %p14146_p1 = scmp.lt.u32.totalorder %s14142_s11, %s14674_s21 }
  0xbe   :  { %p14148_p2 = pnand %p14146_p1, %p14143_p0 }
  0xc0   :  { %14151 = shalt.err (!%p14148_p2)
}
  0xc1   :  { %s14152_s22 = scalar_lea.vmem %s279_s15, 8192  ;;  %p14157_p4 = scmp.lt.s32.totalorder %s279_s15, %s279_s15 }
  0xc2   :  { %p14153_p3 = scmp.ne.s32.totalorder %s279_s15, %s14152_s22  ;;  %p14158_p5 = scmp.lt.s32.totalorder %s14152_s22, %s14152_s22 }
  0xc4   :  { %p14159_p6 = por %p14158_p5, %p14157_p4 }
  0xc6   :  { %p14160_p7 = pnand %p14159_p6, %p14153_p3 }
  0xc8   :  { %14163 = shalt.err (!%p14160_p7)
}
  0xc9   :  { %284 = dma.hbm_to_vmem [thread:$0]  %s14674_s21, 8192, %s279_s15, [#allocation27], %s14510_s28, %s14510_s28, %s14511_s1  }
  0xca   :  { %s14164_s8 = scalar_lea.hbm %s14684_s17, 64 }
  0xcb   :  { %p14165_p8 = scmp.ne.s32.totalorder %s14684_s17, %s14164_s8  ;;  %p14168_p9 = scmp.lt.u32.totalorder %s14164_s8, %s14684_s17 }
  0xcd   :  { %p14170_p10 = pnand %p14168_p9, %p14165_p8 }
  0xcf   :  { %14173 = shalt.err (!%p14170_p10)
}
  0xd0   :  { %s14174_s20 = scalar_lea.vmem %s304_s6, 64  ;;  %p14179_p12 = scmp.lt.s32.totalorder %s304_s6, %s304_s6 }
  0xd1   :  { %p14175_p11 = scmp.ne.s32.totalorder %s304_s6, %s14174_s20  ;;  %p14180_p13 = scmp.lt.s32.totalorder %s14174_s20, %s14174_s20 }
  0xd3   :  { %p14181_p0 = por %p14180_p13, %p14179_p12 }
  0xd5   :  { %p14182_p1 = pnand %p14181_p0, %p14175_p11 }
  0xd7   :  { %14185 = shalt.err (!%p14182_p1)
}
  0xd8   :  { %306 = dma.hbm_to_vmem [thread:$0]  %s14684_s17, 64, %s304_s6, [#allocation30]  }
  0xd9   :  { %s14522_s23 = smov [#allocation2]   ;;  %s14523_s28 = smov [#allocation7]  }
  0xda   :  { %s94_s21 = sshll.u32 %s14522_s23, 4  ;;  %s133_s1 = sshll.u32 %s14523_s28, 4  ;;  %s95_s21 = int_to_ptr.vmem [resolvable:$true] %s94_s21  ;;  %s134_s1 = int_to_ptr.vmem [resolvable:$true] %s133_s1 }
  0xdb   :  { %s14186_s0 = scalar_lea.hbm %s14549_s5, 256 }
  0xdc   :  { %p14187_p2 = scmp.ne.s32.totalorder %s14549_s5, %s14186_s0  ;;  %p14190_p3 = scmp.lt.u32.totalorder %s14186_s0, %s14549_s5 }
  0xde   :  { %p14192_p4 = pnand %p14190_p3, %p14187_p2 }
  0xe0   :  { %14195 = shalt.err (!%p14192_p4)
}
  0xe1   :  { %s14196_s19 = scalar_lea.vmem %s95_s21, 256  ;;  %p14201_p6 = scmp.lt.s32.totalorder %s95_s21, %s95_s21 }
  0xe2   :  { %p14197_p5 = scmp.ne.s32.totalorder %s95_s21, %s14196_s19  ;;  %p14202_p7 = scmp.lt.s32.totalorder %s14196_s19, %s14196_s19 }
  0xe4   :  { %p14203_p8 = por %p14202_p7, %p14201_p6 }
  0xe6   :  { %p14204_p9 = pnand %p14203_p8, %p14197_p5 }
  0xe8   :  { %14207 = shalt.err (!%p14204_p9)
}
  0xe9   :  { %100 = dma.hbm_to_vmem [thread:$0]  %s14549_s5, 256, %s95_s21, [#allocation3], %s14514_s18, %s14514_s18, %s14515_s13  }
  0xea   :  { %s14208_s17 = scalar_lea.hbm %s14594_s14, 16 }
  0xeb   :  { %p14209_p10 = scmp.ne.s32.totalorder %s14594_s14, %s14208_s17  ;;  %p14212_p11 = scmp.lt.u32.totalorder %s14208_s17, %s14594_s14 }
  0xed   :  { %p14214_p12 = pnand %p14212_p11, %p14209_p10 }
  0xef   :  { %14217 = shalt.err (!%p14214_p12)
}
  0xf0   :  { %s14218_s26 = scalar_lea.vmem %s134_s1, 16  ;;  %s14222_s2 = scalar_lea.vmem %s134_s1, 32 }
  0xf1   :  { %p14219_p13 = scmp.ne.s32.totalorder %s134_s1, %s14218_s26  ;;  %p14223_p0 = scmp.lt.s32.totalorder %s134_s1, %s134_s1 }
  0xf2   :  { %p14224_p1 = scmp.lt.s32.totalorder %s14222_s2, %s14218_s26 }
  0xf4   :  { %p14225_p2 = por %p14224_p1, %p14223_p0 }
  0xf6   :  { %p14226_p3 = pnand %p14225_p2, %p14219_p13 }
  0xf8   :  { %14229 = shalt.err (!%p14226_p3)
}
  0xf9   :  { %136 = dma.hbm_to_vmem [thread:$0]  %s14594_s14, 16, %s134_s1, [#allocation6]  }
  0xfa   :  { %s14524_s5 = smov [#allocation10]   ;;  %s14525_s30 = smov [#allocation13]  }
  0xfb   :  { %s155_s10 = sshll.u32 %s14524_s5, 4  ;;  %s176_s7 = sshll.u32 %s14525_s30, 4  ;;  %s156_s10 = int_to_ptr.vmem [resolvable:$true] %s155_s10  ;;  %s177_s7 = int_to_ptr.vmem [resolvable:$true] %s176_s7 }
  0xfc   :  { %s14230_s3 = scalar_lea.hbm %s14604_s24, 16 }
  0xfd   :  { %p14231_p4 = scmp.ne.s32.totalorder %s14604_s24, %s14230_s3  ;;  %p14234_p5 = scmp.lt.u32.totalorder %s14230_s3, %s14604_s24 }
  0xff   :  { %p14236_p6 = pnand %p14234_p5, %p14231_p4 }
 0x101   :  { %14239 = shalt.err (!%p14236_p6)
}
 0x102   :  { %s14240_s15 = scalar_lea.vmem %s156_s10, 16  ;;  %s14244_s16 = scalar_lea.vmem %s156_s10, 32 }
 0x103   :  { %p14241_p7 = scmp.ne.s32.totalorder %s156_s10, %s14240_s15  ;;  %p14245_p8 = scmp.lt.s32.totalorder %s156_s10, %s156_s10 }
 0x104   :  { %p14246_p9 = scmp.lt.s32.totalorder %s14244_s16, %s14240_s15 }
 0x106   :  { %p14247_p10 = por %p14246_p9, %p14245_p8 }
 0x108   :  { %p14248_p11 = pnand %p14247_p10, %p14241_p7 }
 0x10a   :  { %14251 = shalt.err (!%p14248_p11)
}
 0x10b   :  { %158 = dma.hbm_to_vmem [thread:$0]  %s14604_s24, 16, %s156_s10, [#allocation9]  }
 0x10c   :  { %s14252_s14 = scalar_lea.hbm %s14619_s12, 2048 }
 0x10d   :  { %p14253_p12 = scmp.ne.s32.totalorder %s14619_s12, %s14252_s14  ;;  %p14256_p13 = scmp.lt.u32.totalorder %s14252_s14, %s14619_s12 }
 0x10f   :  { %p14258_p0 = pnand %p14256_p13, %p14253_p12 }
 0x111   :  { %14261 = shalt.err (!%p14258_p0)
}
 0x112   :  { %s14262_s6 = scalar_lea.vmem %s177_s7, 2048  ;;  %p14267_p2 = scmp.lt.s32.totalorder %s177_s7, %s177_s7 }
 0x113   :  { %p14263_p1 = scmp.ne.s32.totalorder %s177_s7, %s14262_s6  ;;  %p14268_p3 = scmp.lt.s32.totalorder %s14262_s6, %s14262_s6 }
 0x115   :  { %p14269_p4 = por %p14268_p3, %p14267_p2 }
 0x117   :  { %p14270_p5 = pnand %p14269_p4, %p14263_p1 }
 0x119   :  { %14273 = shalt.err (!%p14270_p5)
}
 0x11a   :  { %182 = dma.hbm_to_vmem [thread:$0]  %s14619_s12, 2048, %s177_s7, [#allocation12], %s14514_s18, %s14514_s18, %s14515_s13  }
 0x11b   :  { %s14526_s24 = smov [#allocation16]   ;;  %s14527_s22 = smov [#allocation19]  }
 0x11c   :  { %s201_s11 = sshll.u32 %s14526_s24, 4  ;;  %s222_s8 = sshll.u32 %s14527_s22, 4  ;;  %s202_s11 = int_to_ptr.vmem [resolvable:$true] %s201_s11  ;;  %s223_s8 = int_to_ptr.vmem [resolvable:$true] %s222_s8 }
 0x11d   :  { %s14274_s20 = scalar_lea.hbm %s14634_s4, 16 }
 0x11e   :  { %p14275_p6 = scmp.ne.s32.totalorder %s14634_s4, %s14274_s20  ;;  %p14278_p7 = scmp.lt.u32.totalorder %s14274_s20, %s14634_s4 }
 0x120   :  { %p14280_p8 = pnand %p14278_p7, %p14275_p6 }
 0x122   :  { %14283 = shalt.err (!%p14280_p8)
}
 0x123   :  { %s14284_s23 = scalar_lea.vmem %s202_s11, 16  ;;  %s14288_s21 = scalar_lea.vmem %s202_s11, 32 }
 0x124   :  { %p14285_p9 = scmp.ne.s32.totalorder %s202_s11, %s14284_s23  ;;  %p14289_p10 = scmp.lt.s32.totalorder %s202_s11, %s202_s11 }
 0x125   :  { %p14290_p11 = scmp.lt.s32.totalorder %s14288_s21, %s14284_s23 }
 0x127   :  { %p14291_p12 = por %p14290_p11, %p14289_p10 }
 0x129   :  { %p14292_p13 = pnand %p14291_p12, %p14285_p9 }
 0x12b   :  { %14295 = shalt.err (!%p14292_p13)
}
 0x12c   :  { %s17825_s12 = sld [smem:[#allocation57_spill]] }
 0x12d   :  { %204 = dma.hbm_to_vmem [thread:$0]  %s14634_s4, 16, %s202_s11, [#allocation15]  }
 0x132   :  { %s14296_s28 = scalar_lea.hbm %s17825_s12, 1024 }
 0x133   :  { %p14297_p0 = scmp.ne.s32.totalorder %s17825_s12, %s14296_s28  ;;  %p14300_p1 = scmp.lt.u32.totalorder %s14296_s28, %s17825_s12 }
 0x135   :  { %p14302_p2 = pnand %p14300_p1, %p14297_p0 }
 0x137   :  { %14305 = shalt.err (!%p14302_p2)
}
 0x138   :  { %s14306_s1 = scalar_lea.vmem %s223_s8, 1024  ;;  %p14311_p4 = scmp.lt.s32.totalorder %s223_s8, %s223_s8 }
 0x139   :  { %p14307_p3 = scmp.ne.s32.totalorder %s223_s8, %s14306_s1  ;;  %p14312_p5 = scmp.lt.s32.totalorder %s14306_s1, %s14306_s1 }
 0x13b   :  { %p14313_p6 = por %p14312_p5, %p14311_p4 }
 0x13d   :  { %p14314_p7 = pnand %p14313_p6, %p14307_p3 }
 0x13f   :  { %14317 = shalt.err (!%p14314_p7)
}
 0x140   :  { %s17826_s0 = sld [smem:[#allocation58_spill]]  ;;  %s14528_s4 = smov [#allocation22]  }
 0x141   :  { %228 = dma.hbm_to_vmem [thread:$0]  %s17825_s12, 1024, %s223_s8, [#allocation18], %s14514_s18, %s14514_s18, %s14515_s13  }
 0x142   :  { %s244_s19 = sshll.u32 %s14528_s4, 4  ;;  %s14529_s17 = smov [#allocation25]   ;;  %s245_s19 = int_to_ptr.vmem [resolvable:$true] %s244_s19 }
 0x143   :  { %s269_s26 = sshll.u32 %s14529_s17, 4  ;;  %s270_s26 = int_to_ptr.vmem [resolvable:$true] %s269_s26 }
 0x146   :  { %s14318_s2 = scalar_lea.hbm %s17826_s0, 1024 }
 0x147   :  { %p14319_p8 = scmp.ne.s32.totalorder %s17826_s0, %s14318_s2  ;;  %p14322_p9 = scmp.lt.u32.totalorder %s14318_s2, %s17826_s0 }
 0x149   :  { %p14324_p10 = pnand %p14322_p9, %p14319_p8 }
 0x14b   :  { %14327 = shalt.err (!%p14324_p10)
}
 0x14c   :  { %s14328_s5 = scalar_lea.vmem %s245_s19, 1024  ;;  %p14333_p12 = scmp.lt.s32.totalorder %s245_s19, %s245_s19 }
 0x14d   :  { %p14329_p11 = scmp.ne.s32.totalorder %s245_s19, %s14328_s5  ;;  %p14334_p13 = scmp.lt.s32.totalorder %s14328_s5, %s14328_s5 }
 0x14f   :  { %p14335_p0 = por %p14334_p13, %p14333_p12 }
 0x151   :  { %p14336_p1 = pnand %p14335_p0, %p14329_p11 }
 0x153   :  { %14339 = shalt.err (!%p14336_p1)
}
 0x154   :  { %s17827_s10 = sld [smem:[#allocation59_spill]] }
 0x155   :  { %250 = dma.hbm_to_vmem [thread:$0]  %s17826_s0, 1024, %s245_s19, [#allocation21], %s14514_s18, %s14514_s18, %s14515_s13  }
 0x15a   :  { %s14340_s30 = scalar_lea.hbm %s17827_s10, 16 }
 0x15b   :  { %p14341_p2 = scmp.ne.s32.totalorder %s17827_s10, %s14340_s30  ;;  %p14344_p3 = scmp.lt.u32.totalorder %s14340_s30, %s17827_s10 }
 0x15d   :  { %p14346_p4 = pnand %p14344_p3, %p14341_p2 }
 0x15f   :  { %14349 = shalt.err (!%p14346_p4)
}
 0x160   :  { %s14350_s7 = scalar_lea.vmem %s270_s26, 16  ;;  %s14354_s3 = scalar_lea.vmem %s270_s26, 32 }
 0x161   :  { %p14351_p5 = scmp.ne.s32.totalorder %s270_s26, %s14350_s7  ;;  %p14355_p6 = scmp.lt.s32.totalorder %s270_s26, %s270_s26 }
 0x162   :  { %p14356_p7 = scmp.lt.s32.totalorder %s14354_s3, %s14350_s7 }
 0x164   :  { %p14357_p8 = por %p14356_p7, %p14355_p6 }
 0x166   :  { %p14358_p9 = pnand %p14357_p8, %p14351_p5 }
 0x168   :  { %14361 = shalt.err (!%p14358_p9)
}
 0x169   :  { %s17828_s15 = sld [smem:[#allocation60_spill]]  ;;  %s14530_s18 = smov [#allocation28]  }
 0x16a   :  { %272 = dma.hbm_to_vmem [thread:$0]  %s17827_s10, 16, %s270_s26, [#allocation24]  }
 0x16b   :  { %s290_s13 = sshll.u32 %s14530_s18, 4  ;;  %s291_s13 = int_to_ptr.vmem [resolvable:$true] %s290_s13 }
 0x16f   :  { %s14362_s16 = scalar_lea.hbm %s17828_s15, 8192 }
 0x170   :  { %p14363_p10 = scmp.ne.s32.totalorder %s17828_s15, %s14362_s16  ;;  %p14366_p11 = scmp.lt.u32.totalorder %s14362_s16, %s17828_s15 }
 0x172   :  { %p14368_p12 = pnand %p14366_p11, %p14363_p10 }
 0x174   :  { %14371 = shalt.err (!%p14368_p12)
}
 0x175   :  { %s14372_s14 = scalar_lea.vmem %s291_s13, 8192  ;;  %p14377_p0 = scmp.lt.s32.totalorder %s291_s13, %s291_s13 }
 0x176   :  { %p14373_p13 = scmp.ne.s32.totalorder %s291_s13, %s14372_s14  ;;  %p14378_p1 = scmp.lt.s32.totalorder %s14372_s14, %s14372_s14 }
 0x178   :  { %p14379_p2 = por %p14378_p1, %p14377_p0 }
 0x17a   :  { %p14380_p3 = pnand %p14379_p2, %p14373_p13 }
 0x17c   :  { %14383 = shalt.err (!%p14380_p3)
}
 0x17d   :  { %s14531_s6 = smov 512   ;;  %s17829_s24 = sld [smem:[#allocation61_spill]] }
 0x17e   :  { %s14532_s11 = smov 32   ;;  %s14533_s22 = smov [#allocation31]  }
 0x17f   :  { %296 = dma.hbm_to_vmem [thread:$0]  %s17828_s15, 8192, %s291_s13, [#allocation27], %s14531_s6, %s14531_s6, %s14532_s11  }
 0x180   :  { %s312_s8 = sshll.u32 %s14533_s22, 4  ;;  %s313_s8 = int_to_ptr.vmem [resolvable:$true] %s312_s8 }
 0x183   :  { %s14384_s20 = scalar_lea.hbm %s17829_s24, 8192 }
 0x184   :  { %p14385_p4 = scmp.ne.s32.totalorder %s17829_s24, %s14384_s20  ;;  %p14388_p5 = scmp.lt.u32.totalorder %s14384_s20, %s17829_s24 }
 0x186   :  { %p14390_p6 = pnand %p14388_p5, %p14385_p4 }
 0x188   :  { %14393 = shalt.err (!%p14390_p6)
}
 0x189   :  { %s14394_s23 = scalar_lea.vmem %s313_s8, 8192  ;;  %p14399_p8 = scmp.lt.s32.totalorder %s313_s8, %s313_s8 }
 0x18a   :  { %p14395_p7 = scmp.ne.s32.totalorder %s313_s8, %s14394_s23  ;;  %p14400_p9 = scmp.lt.s32.totalorder %s14394_s23, %s14394_s23 }
 0x18c   :  { %p14401_p10 = por %p14400_p9, %p14399_p8 }
 0x18e   :  { %p14402_p11 = pnand %p14401_p10, %p14395_p7 }
 0x190   :  { %14405 = shalt.err (!%p14402_p11)
}
 0x191   :  { %318 = dma.hbm_to_vmem [thread:$0]  %s17829_s24, 8192, %s313_s8, [#allocation30], %s14531_s6, %s14531_s6, %s14532_s11  }
 0x192   :  { %14450 = dma.done.wait [#allocation3], 256  }
 0x193   :  { %14451 = vsyncadd [#allocation3], 4294967040 }
 0x194   :  { %14452 = dma.done.wait [#allocation6], 6160  }
 0x195   :  { %14453 = vsyncadd [#allocation6], 4294961136 }
 0x196   :  { %14454 = dma.done.wait [#allocation9], 1040  }
 0x197   :  { %14455 = vsyncadd [#allocation9], 4294966256 }
 0x198   :  { %14456 = dma.done.wait [#allocation12], 2064  }
 0x199   :  { %14457 = vsyncadd [#allocation12], 4294965232 }
 0x19a   :  { %14458 = dma.done.wait [#allocation15], 32  }
 0x19b   :  { %14459 = vsyncadd [#allocation15], 4294967264 }
 0x19c   :  { %14460 = dma.done.wait [#allocation18], 1040  }
 0x19d   :  { %14461 = vsyncadd [#allocation18], 4294966256 }
 0x19e   :  { %14462 = dma.done.wait [#allocation21], 1040  }
 0x19f   :  { %14463 = vsyncadd [#allocation21], 4294966256 }
 0x1a0   :  { %14464 = dma.done.wait [#allocation24], 1040  }
 0x1a1   :  { %14465 = vsyncadd [#allocation24], 4294966256 }
 0x1a2   :  { %14466 = dma.done.wait [#allocation27], 16384  }
 0x1a3   :  { %14467 = vsyncadd [#allocation27], 4294950912 }
 0x1a4   :  { %14468 = dma.done.wait [#allocation30], 8256  }
 0x1a5   :  { %14469 = vsyncadd [#allocation30], 4294959040  ;;  %v17510_v0 = vmov 0.0   ;;  %vm441_vm0 = vcmask 1044480   ;;  %vm14535_vm1 = vmmov 1   ;;  %v387_v2 = vld [vmem:[#allocation5 + $0x8] sm:$0xff] }
 0x1a6   :  { %530 = vmatprep.mubr.f32.mxu0 %v17510_v0  ;;  %607 = vmatprep.mubr.f32.mxu1 %v17510_v0  ;;  %vm14828_vm2 = vmpackc.low %vm441_vm0, %vm14535_vm1  ;;  %v395_v3 = vld [vmem:[#allocation5 + $0x48] sm:$0xff]  ;;  %v389_v4 = vld [vmem:[#allocation5 + $0x18] sm:$0xff]  ;;  %vm434_vm3 = vcmask 367616   ;;  %s17832_s21 = sld [smem:[#allocation48_spill]]  ;;  %s17859_s12 = sld [smem:[#allocation50_spill]]  ;;  %vm1397_vm4 = vcmask 1041409  }
 0x1a7   :  { %v10799_v5 = vpack.c.bf16 %v395_v3, %v387_v2  ;;  %v397_v6 = vld [vmem:[#allocation5 + $0x58] sm:$0xff]  ;;  %v386_v7 = vld [vmem:[#allocation5] sm:$0xff]  ;;  %v388_v11 = vld [vmem:[#allocation5 + $0x10] sm:$0xff]  ;;  %s17892_s28 = sld [smem:[#allocation49_spill]]  ;;  %s17911_s1 = sld [smem:[#allocation51_spill]]  ;;  %vm14537_vm5 = vmmov 0  }
 0x1a8   :  { %v394_v8 = vld [vmem:[#allocation5 + $0x40] sm:$0xff]  ;;  %v10813_v9 = vpack.c.bf16 %v397_v6, %v389_v4  ;;  %v396_v12 = vld [vmem:[#allocation5 + $0x50] sm:$0xff]  ;;  %v403_v13 = vld [vmem:[#allocation5 + $0x88] sm:$0xff]  ;;  %s18231_s0 = sld [smem:[#allocation53_spill]]  ;;  %s18241_s4 = sld [smem:[#allocation52_spill]]  ;;  %vm4913_vm6 = vcmask 523264  }
 0x1a9   :  { %v10801_v10 = vpack.c.bf16 %v394_v8, %v386_v7  ;;  %10800 = vmatprep.subr.bf16.mxu0 %v10799_v5  ;;  %v10815_v14 = vpack.c.bf16 %v396_v12, %v388_v11  ;;  %v411_v15 = vld [vmem:[#allocation5 + $0xc8] sm:$0xff]  ;;  %v405_v16 = vld [vmem:[#allocation5 + $0x98] sm:$0xff]  ;;  %v402_v20 = vld [vmem:[#allocation5 + $0x80] sm:$0xff]  ;;  %s18253_s19 = sld [smem:[#allocation54_spill]]  ;;  %s18255_s17 = sld [smem:[#allocation55_spill]]  ;;  %vm5369_vm7 = vcmask 517120  }
 0x1aa   :  { %v413_v17 = vld [vmem:[#allocation5 + $0xd8] sm:$0xff]  ;;  %10814 = vmatprep.subr.bf16.mxu1 %v10813_v9  ;;  %v10803_v18 = vpack.c.bf16 %v411_v15, %v403_v13  ;;  %v410_v21 = vld [vmem:[#allocation5 + $0xc0] sm:$0xff]  ;;  %v404_v22 = vld [vmem:[#allocation5 + $0x90] sm:$0xff]  ;;  %s18256_s26 = sld [smem:[#allocation56_spill]]  ;;  %s18257_s2 = sld [smem:[#allocation47_spill]]  ;;  %vm8608_vm8 = vcmask 360448  }
 0x1ab   :  { %10802 = vmatpush1.bf16.msra.mxu0 %v10801_v10  ;;  %v10817_v19 = vpack.c.bf16 %v413_v17, %v405_v16  ;;  %10816 = vmatpush1.bf16.msra.mxu1 %v10815_v14  ;;  %v10805_v23 = vpack.c.bf16 %v410_v21, %v402_v20  ;;  %v412_v24 = vld [vmem:[#allocation5 + $0xd0] sm:$0xff]  ;;  %v419_v25 = vld [vmem:[#allocation5 + $0x108] sm:$0xff]  ;;  %v421_v29 = vld [vmem:[#allocation5 + $0x118] sm:$0xff]  ;;  %s18314_s5 = sld [smem:[#allocation62_spill]]  ;;  %s18468_s10 = sld [smem:[#allocation63_spill]] }
 0x1ac   :  { %v427_v26 = vld [vmem:[#allocation5 + $0x148] sm:$0x1f]  ;;  %10804 = vmatprep.subr.bf16.mxu0 %v10803_v18  ;;  %v10819_v27 = vpack.c.bf16 %v412_v24, %v404_v22  ;;  %v429_v30 = vld [vmem:[#allocation5 + $0x158] sm:$0x1f]  ;;  %v418_v31 = vld [vmem:[#allocation5 + $0x100] sm:$0xff]  ;;  %s18472_s30 = sld [smem:[#allocation64_spill]] }
 0x1ad   :  { %10818 = vmatprep.subr.bf16.mxu1 %v10817_v19  ;;  %v10807_v28 = vpack.c.bf16 %v427_v26, %v419_v25  ;;  %v10821_v32 = vpack.c.bf16 %v429_v30, %v421_v29  ;;  %v426_v33 = vld [vmem:[#allocation5 + $0x140] sm:$0x1f]  ;;  %v420_v34 = vld [vmem:[#allocation5 + $0x110] sm:$0xff]  ;;  %v391_v37 = vld [vmem:[#allocation5 + $0x28] sm:$0xff]  ;;  %s14540_s3 = smov [#allocation33]  }
 0x1ae   :  { %v428_v35 = vld [vmem:[#allocation5 + $0x150] sm:$0x1f]  ;;  %v10810_v36 = vpack.c.bf16 %v426_v33, %v418_v31  ;;  %v399_v38 = vld [vmem:[#allocation5 + $0x68] sm:$0xff]  ;;  %v393_v41 = vld [vmem:[#allocation5 + $0x38] sm:$0xff]  ;;  %s9469_s15 = sshll.u32 %s14540_s3, 4  ;;  %s9470_s15 = int_to_ptr.vmem [resolvable:$true] %s9469_s15 }
 0x1af   :  { %10806 = vmatpush1.bf16.msra.mxu0 %v10805_v23  ;;  %10820 = vmatpush1.bf16.msra.mxu1 %v10819_v27  ;;  %v10824_v39 = vpack.c.bf16 %v428_v35, %v420_v34  ;;  %v10827_v40 = vpack.c.bf16 %v399_v38, %v391_v37  ;;  %v401_v42 = vld [vmem:[#allocation5 + $0x78] sm:$0xff]  ;;  %v390_v43 = vld [vmem:[#allocation5 + $0x20] sm:$0xff]  ;;  %v392_v46 = vld [vmem:[#allocation5 + $0x30] sm:$0xff] }
 0x1b0   :  { %10809 = vmatprep.subr.msk.bf16.mxu0 %vm14828_vm2, %v10807_v28  ;;  %10823 = vmatprep.subr.msk.bf16.mxu1 %vm14828_vm2, %v10821_v32  ;;  %v10841_v44 = vpack.c.bf16 %v401_v42, %v393_v41  ;;  %v398_v45 = vld [vmem:[#allocation5 + $0x60] sm:$0xff]  ;;  %v400_v47 = vld [vmem:[#allocation5 + $0x70] sm:$0xff]  ;;  %v407_v48 = vld [vmem:[#allocation5 + $0xa8] sm:$0xff] }
 0x1b1   :  { %v415_v49 = vld [vmem:[#allocation5 + $0xe8] sm:$0xff]  ;;  %v409_v50 = vld [vmem:[#allocation5 + $0xb8] sm:$0xff]  ;;  %v14838_v51 = vld [vmem:[#allocation2] sm:$0xff]  ;;  %v10829_v52 = vpack.c.bf16 %v398_v45, %v390_v43  ;;  %v10843_v54 = vpack.c.bf16 %v400_v47, %v392_v46 }
 0x1b2   :  { %v417_v53 = vld [vmem:[#allocation5 + $0xf8] sm:$0xff]  ;;  %v10831_v55 = vpack.c.bf16 %v415_v49, %v407_v48  ;;  %v406_v56 = vld [vmem:[#allocation5 + $0xa0] sm:$0xff]  ;;  %v408_v58 = vld [vmem:[#allocation5 + $0xb0] sm:$0xff] }
 0x1b3   :  { %10812 = vmatpush1.bf16.msk.msra.mxu0 %vm14828_vm2, %v10810_v36  ;;  %10826 = vmatpush1.bf16.msk.msra.mxu1 %vm14828_vm2, %v10824_v39  ;;  %v414_v57 = vld [vmem:[#allocation5 + $0xe0] sm:$0xff]  ;;  %v10845_v59 = vpack.c.bf16 %v417_v53, %v409_v50  ;;  %v416_v60 = vld [vmem:[#allocation5 + $0xf0] sm:$0xff]  ;;  %v423_v61 = vld [vmem:[#allocation5 + $0x128] sm:$0xff] }
 0x1b4   :  { %10828 = vmatprep.subr.bf16.mxu0 %v10827_v40  ;;  %10842 = vmatprep.subr.bf16.mxu1 %v10841_v44  ;;  %v431_v62 = vld [vmem:[#allocation5 + $0x168] sm:$0x1f]  ;;  %v425_v63 = vld [vmem:[#allocation5 + $0x138] sm:$0xff]  ;;  %v10833_v3 = vpack.c.bf16 %v414_v57, %v406_v56  ;;  %v10847_v5 = vpack.c.bf16 %v416_v60, %v408_v58  ;;  %v422_v7 = vld [vmem:[#allocation5 + $0x120] sm:$0xff] }
 0x1b5   :  { %v433_v2 = vld [vmem:[#allocation5 + $0x178] sm:$0x1f]  ;;  %v10835_v6 = vpack.c.bf16 %v431_v62, %v423_v61  ;;  %v430_v8 = vld [vmem:[#allocation5 + $0x160] sm:$0x1f]  ;;  %v424_v9 = vld [vmem:[#allocation5 + $0x130] sm:$0xff] }
 0x1b6   :  { %9530 = vmatmul.mubr.msk.f32.vlgmr.msra.gmra.mrb[0].mxu0 %vm434_vm3, %v14838_v51  ;;  %9534 = vmatmul.mubr.msk.f32.vlgmr.msra.gmra.mrb[0].mxu1 %vm434_vm3, %v14838_v51  ;;  %v14846_v4 = vld [vmem:[#allocation2 + $0x8] sm:$0xff]  ;;  %v10849_v10 = vpack.c.bf16 %v433_v2, %v425_v63  ;;  %v432_v11 = vld [vmem:[#allocation5 + $0x170] sm:$0x1f]  ;;  %v777_v14 = vld [vmem:[%s17832_s21 + $0x18] sm:$0xff]  ;;  %v10838_v16 = vpack.c.bf16 %v430_v8, %v422_v7 }
 0x1b7   :  { %10830 = vmatpush1.bf16.msra.mxu0 %v10829_v52  ;;  %10844 = vmatpush1.bf16.msra.mxu1 %v10843_v54  ;;  %v775_v12 = vld [vmem:[%s17832_s21 + $0x8] sm:$0xff]  ;;  %v781_v15 = vld [vmem:[%s17832_s21 + $0x38] sm:$0xff]  ;;  %v10852_v17 = vpack.c.bf16 %v432_v11, %v424_v9  ;;  %v774_v19 = vld [vmem:[%s17832_s21] sm:$0xff] }
 0x1b8   :  { %10832 = vmatprep.subr.bf16.mxu0 %v10831_v55  ;;  %10846 = vmatprep.subr.bf16.mxu1 %v10845_v59  ;;  %v779_v13 = vld [vmem:[%s17832_s21 + $0x28] sm:$0xff]  ;;  %v778_v20 = vld [vmem:[%s17832_s21 + $0x20] sm:$0xff]  ;;  %v776_v21 = vld [vmem:[%s17832_s21 + $0x10] sm:$0xff]  ;;  %v14868_v22 = vpack.c.bf16 %v781_v15, %v777_v14 }
 0x1b9   :  { %536 = vmatprep.mubr.f32.mxu0 %v17510_v0  ;;  %613 = vmatprep.mubr.f32.mxu1 %v17510_v0  ;;  %v14860_v18 = vpack.c.bf16 %v779_v13, %v775_v12  ;;  %v780_v23 = vld [vmem:[%s17832_s21 + $0x30] sm:$0xff]  ;;  %v783_v24 = vld [vmem:[%s17832_s21 + $0x48] sm:$0xff]  ;;  %v785_v26 = vld [vmem:[%s17832_s21 + $0x58] sm:$0xff]  ;;  %v14878_v28 = vpack.c.bf16 %v778_v20, %v774_v19 }
 0x1ba   :  { %9531 = vmatmul.mubr.msk.f32.gmra.mrb[2].mxu0 %vm434_vm3, %v14846_v4  ;;  %9535 = vmatmul.mubr.msk.f32.gmra.mrb[2].mxu1 %vm434_vm3, %v14846_v4  ;;  %17834 = vst [vmem:[#allocation66_spill] sm:$0xff] %v14868_v22  ;;  %v787_v25 = vld [vmem:[%s17832_s21 + $0x68] sm:$0xff]  ;;  %v789_v27 = vld [vmem:[%s17832_s21 + $0x78] sm:$0xff]  ;;  %v14883_v29 = vpack.c.bf16 %v780_v23, %v776_v21  ;;  %v782_v31 = vld [vmem:[%s17832_s21 + $0x40] sm:$0xff] }
 0x1bb   :  { %10834 = vmatpush1.bf16.msra.mxu0 %v10833_v3  ;;  %10848 = vmatpush1.bf16.msra.mxu1 %v10847_v5  ;;  %17833 = vst [vmem:[#allocation65_spill] sm:$0xff] %v14860_v18  ;;  %17835 = vst [vmem:[#allocation67_spill] sm:$0xff] %v14878_v28  ;;  %v14885_v30 = vpack.c.bf16 %v787_v25, %v783_v24  ;;  %v786_v32 = vld [vmem:[%s17832_s21 + $0x60] sm:$0xff]  ;;  %v784_v33 = vld [vmem:[%s17832_s21 + $0x50] sm:$0xff]  ;;  %v14891_v34 = vpack.c.bf16 %v789_v27, %v785_v26 }
 0x1bc   :  { %10837 = vmatprep.subr.msk.bf16.mxu0 %vm14828_vm2, %v10835_v6  ;;  %10851 = vmatprep.subr.msk.bf16.mxu1 %vm14828_vm2, %v10849_v10  ;;  %17836 = vst [vmem:[#allocation68_spill] sm:$0xff] %v14883_v29  ;;  %v788_v35 = vld [vmem:[%s17832_s21 + $0x70] sm:$0xff]  ;;  %v791_v36 = vld [vmem:[%s17832_s21 + $0x88] sm:$0xff]  ;;  %v793_v37 = vld [vmem:[%s17832_s21 + $0x98] sm:$0xff]  ;;  %v14903_v39 = vpack.c.bf16 %v786_v32, %v782_v31 }
 0x1bd   :  { %684 = vmatprep.mubr.f32.mxu0 %v17510_v0  ;;  %761 = vmatprep.mubr.f32.mxu1 %v17510_v0  ;;  %17837 = vst [vmem:[#allocation69_spill] sm:$0xff] %v14885_v30  ;;  %17838 = vst [vmem:[#allocation70_spill] sm:$0xff] %v14891_v34  ;;  %v795_v1 = vld [vmem:[%s17832_s21 + $0xa8] sm:$0xff]  ;;  %v797_v38 = vld [vmem:[%s17832_s21 + $0xb8] sm:$0xff]  ;;  %v14907_v40 = vpack.c.bf16 %v788_v35, %v784_v33 }
 0x1be   :  { %17839 = vst [vmem:[#allocation71_spill] sm:$0xff] %v14903_v39  ;;  %v14909_v41 = vpack.c.bf16 %v795_v1, %v791_v36  ;;  %v790_v42 = vld [vmem:[%s17832_s21 + $0x80] sm:$0xff]  ;;  %v792_v44 = vld [vmem:[%s17832_s21 + $0x90] sm:$0xff]  ;;  %v14915_v45 = vpack.c.bf16 %v797_v38, %v793_v37  ;;  %v799_v47 = vld [vmem:[%s17832_s21 + $0xc8] sm:$0xff] }
 0x1bf   :  { %10840 = vmatpush1.bf16.msk.msra.mxu0 %vm14828_vm2, %v10838_v16  ;;  %10854 = vmatpush1.bf16.msk.msra.mxu1 %vm14828_vm2, %v10852_v17  ;;  %17840 = vst [vmem:[#allocation72_spill] sm:$0xff] %v14907_v40  ;;  %v794_v43 = vld [vmem:[%s17832_s21 + $0xa0] sm:$0xff]  ;;  %v796_v46 = vld [vmem:[%s17832_s21 + $0xb0] sm:$0xff]  ;;  %v803_v48 = vld [vmem:[%s17832_s21 + $0xe8] sm:$0xff] }
 0x1c0   :  { %10856 = vmatprep.subr.bf16.mxu0 %v14860_v18  ;;  %10888 = vmatprep.subr.bf16.mxu1 %v14868_v22  ;;  %17841 = vst [vmem:[#allocation73_spill] sm:$0xff] %v14909_v41  ;;  %17842 = vst [vmem:[#allocation74_spill] sm:$0xff] %v14915_v45  ;;  %v801_v49 = vld [vmem:[%s17832_s21 + $0xd8] sm:$0xff]  ;;  %v14933_v52 = vpack.c.bf16 %v796_v46, %v792_v44  ;;  %v14935_v53 = vpack.c.bf16 %v803_v48, %v799_v47  ;;  %v798_v54 = vld [vmem:[%s17832_s21 + $0xc0] sm:$0xff] }
 0x1c1   :  { %v805_v50 = vld [vmem:[%s17832_s21 + $0xf8] sm:$0xff]  ;;  %v802_v55 = vld [vmem:[%s17832_s21 + $0xe0] sm:$0xff]  ;;  %v800_v56 = vld [vmem:[%s17832_s21 + $0xd0] sm:$0xff] }
 0x1c2   :  { %9538 = vmatmul.mubr.msk.f32.vlgmr.msra.gmra.mrb[4].mxu0 %vm434_vm3, %v14838_v51  ;;  %9542 = vmatmul.mubr.msk.f32.vlgmr.msra.gmra.mrb[4].mxu1 %vm434_vm3, %v14838_v51  ;;  %v14927_v51 = vpack.c.bf16 %v794_v43, %v790_v42  ;;  %17844 = vst [vmem:[#allocation76_spill] sm:$0xff] %v14933_v52  ;;  %17845 = vst [vmem:[#allocation77_spill] sm:$0xff] %v14935_v53  ;;  %v14941_v57 = vpack.c.bf16 %v805_v50, %v801_v49  ;;  %v804_v58 = vld [vmem:[%s17832_s21 + $0xf0] sm:$0xff]  ;;  %v807_v59 = vld [vmem:[%s17832_s21 + $0x108] sm:$0xff] }
 0x1c3   :  { %10858 = vmatpush1.bf16.msra.mxu0 %v14878_v28  ;;  %10890 = vmatpush1.bf16.msra.mxu1 %v14883_v29  ;;  %v811_v60 = vld [vmem:[%s17832_s21 + $0x128] sm:$0xff]  ;;  %v809_v61 = vld [vmem:[%s17832_s21 + $0x118] sm:$0xff]  ;;  %v14951_v63 = vpack.c.bf16 %v802_v55, %v798_v54  ;;  %v14955_v2 = vpack.c.bf16 %v804_v58, %v800_v56  ;;  %v810_v5 = vld [vmem:[%s17832_s21 + $0x120] sm:$0xff] }
 0x1c4   :  { %10860 = vmatprep.subr.bf16.mxu0 %v14885_v30  ;;  %10892 = vmatprep.subr.bf16.mxu1 %v14891_v34  ;;  %17843 = vst [vmem:[#allocation75_spill] sm:$0xff] %v14927_v51  ;;  %17846 = vst [vmem:[#allocation78_spill] sm:$0xff] %v14941_v57  ;;  %v813_v62 = vld [vmem:[%s17832_s21 + $0x138] sm:$0xff]  ;;  %v14957_v3 = vpack.c.bf16 %v811_v60, %v807_v59  ;;  %v808_v6 = vld [vmem:[%s17832_s21 + $0x110] sm:$0xff] }
 0x1c5   :  { %690 = vmatprep.mubr.f32.mxu0 %v17510_v0  ;;  %767 = vmatprep.mubr.f32.mxu1 %v17510_v0  ;;  %17847 = vst [vmem:[#allocation79_spill] sm:$0xff] %v14951_v63  ;;  %17848 = vst [vmem:[#allocation80_spill] sm:$0xff] %v14955_v2  ;;  %v14963_v7 = vpack.c.bf16 %v813_v62, %v809_v61  ;;  %v812_v8 = vld [vmem:[%s17832_s21 + $0x130] sm:$0xff]  ;;  %v815_v9 = vld [vmem:[%s17832_s21 + $0x148] sm:$0xff] }
 0x1c6   :  { %9539 = vmatmul.mubr.msk.f32.gmra.mrb[6].mxu0 %vm434_vm3, %v14846_v4  ;;  %9543 = vmatmul.mubr.msk.f32.gmra.mrb[6].mxu1 %vm434_vm3, %v14846_v4  ;;  %17849 = vst [vmem:[#allocation81_spill] sm:$0xff] %v14957_v3  ;;  %v806_v4 = vld [vmem:[%s17832_s21 + $0x100] sm:$0xff]  ;;  %v819_v10 = vld [vmem:[%s17832_s21 + $0x168] sm:$0xff]  ;;  %v817_v11 = vld [vmem:[%s17832_s21 + $0x158] sm:$0xff]  ;;  %v14975_v14 = vpack.c.bf16 %v812_v8, %v808_v6 }
 0x1c7   :  { %10862 = vmatpush1.bf16.msra.mxu0 %v14903_v39  ;;  %10894 = vmatpush1.bf16.msra.mxu1 %v14907_v40  ;;  %17850 = vst [vmem:[#allocation82_spill] sm:$0xff] %v14963_v7  ;;  %v821_v12 = vld [vmem:[%s17832_s21 + $0x178] sm:$0xff]  ;;  %v14971_v13 = vpack.c.bf16 %v810_v5, %v806_v4  ;;  %v14977_v15 = vpack.c.bf16 %v819_v10, %v815_v9  ;;  %v814_v16 = vld [vmem:[%s17832_s21 + $0x140] sm:$0xff]  ;;  %v816_v19 = vld [vmem:[%s17832_s21 + $0x150] sm:$0xff] }
 0x1c8   :  { %10864 = vmatprep.subr.bf16.mxu0 %v14909_v41  ;;  %10896 = vmatprep.subr.bf16.mxu1 %v14915_v45  ;;  %17852 = vst [vmem:[#allocation84_spill] sm:$0xff] %v14975_v14  ;;  %v818_v17 = vld [vmem:[%s17832_s21 + $0x160] sm:$0xff]  ;;  %v14983_v20 = vpack.c.bf16 %v821_v12, %v817_v11  ;;  %v820_v21 = vld [vmem:[%s17832_s21 + $0x170] sm:$0xff]  ;;  %v823_v23 = vld [vmem:[%s17832_s21 + $0x188] sm:$0xff] }
 0x1c9   :  { %968 = vmatprep.mubr.f32.mxu0 %v17510_v0  ;;  %1039 = vmatprep.mubr.f32.mxu1 %v17510_v0  ;;  %17851 = vst [vmem:[#allocation83_spill] sm:$0xff] %v14971_v13  ;;  %17853 = vst [vmem:[#allocation85_spill] sm:$0xff] %v14977_v15  ;;  %v827_v24 = vld [vmem:[%s17832_s21 + $0x1a8] sm:$0xff]  ;;  %v825_v25 = vld [vmem:[%s17832_s21 + $0x198] sm:$0xff]  ;;  %v14991_v27 = vpack.c.bf16 %v818_v17, %v814_v16  ;;  %v14995_v31 = vpack.c.bf16 %v820_v21, %v816_v19 }
 0x1ca   :  { %17854 = vst [vmem:[#allocation86_spill] sm:$0xff] %v14983_v20  ;;  %v829_v26 = vld [vmem:[%s17832_s21 + $0x1b8] sm:$0xff]  ;;  %v14997_v32 = vpack.c.bf16 %v827_v24, %v823_v23  ;;  %v822_v33 = vld [vmem:[%s17832_s21 + $0x180] sm:$0xff]  ;;  %v824_v36 = vld [vmem:[%s17832_s21 + $0x190] sm:$0xff] }
 0x1cb   :  { %10866 = vmatpush1.bf16.msra.mxu0 %v14927_v51  ;;  %10898 = vmatpush1.bf16.msra.mxu1 %v14933_v52  ;;  %17855 = vst [vmem:[#allocation87_spill] sm:$0xff] %v14991_v27  ;;  %17856 = vst [vmem:[#allocation88_spill] sm:$0xff] %v14995_v31  ;;  %v826_v35 = vld [vmem:[%s17832_s21 + $0x1a0] sm:$0xff]  ;;  %v15003_v1 = vpack.c.bf16 %v829_v26, %v825_v25  ;;  %v828_v37 = vld [vmem:[%s17832_s21 + $0x1b0] sm:$0xff] }
 0x1cc   :  { %10868 = vmatprep.subr.bf16.mxu0 %v14935_v53  ;;  %10900 = vmatprep.subr.bf16.mxu1 %v14941_v57  ;;  %17857 = vst [vmem:[#allocation89_spill] sm:$0xff] %v14997_v32  ;;  %v831_v38 = vld [vmem:[%s17832_s21 + $0x1c8] sm:$0xff]  ;;  %v833_v43 = vld [vmem:[%s17832_s21 + $0x1d8] sm:$0xff]  ;;  %v15011_v46 = vpack.c.bf16 %v826_v35, %v822_v33  ;;  %v15015_v47 = vpack.c.bf16 %v828_v37, %v824_v36  ;;  %v830_v49 = vld [vmem:[%s17832_s21 + $0x1c0] sm:$0xff] }
 0x1cd   :  { %17858 = vst [vmem:[#allocation90_spill] sm:$0xff] %v15003_v1  ;;  %v835_v42 = vld [vmem:[%s17832_s21 + $0x1e8] sm:$0xff]  ;;  %v837_v44 = vld [vmem:[%s17832_s21 + $0x1f8] sm:$0xff]  ;;  %v834_v50 = vld [vmem:[%s17832_s21 + $0x1e0] sm:$0xff] }
 0x1ce   :  { %17860 = vst [vmem:[#allocation91_spill] sm:$0xff] %v15011_v46  ;;  %17861 = vst [vmem:[#allocation92_spill] sm:$0xff] %v15015_v47  ;;  %v15017_v48 = vpack.c.bf16 %v835_v42, %v831_v38  ;;  %v832_v54 = vld [vmem:[%s17832_s21 + $0x1d0] sm:$0xff]  ;;  %v15023_v55 = vpack.c.bf16 %v837_v44, %v833_v43  ;;  %v839_v58 = vld [vmem:[%s17859_s12 + $0x8] sm:$0xff]  ;;  %v15031_v62 = vpack.c.bf16 %v834_v50, %v830_v49 }
 0x1cf   :  { %10870 = vmatpush1.bf16.msra.mxu0 %v14951_v63  ;;  %10902 = vmatpush1.bf16.msra.mxu1 %v14955_v2  ;;  %v836_v56 = vld [vmem:[%s17832_s21 + $0x1f0] sm:$0xff]  ;;  %v843_v59 = vld [vmem:[%s17859_s12 + $0x28] sm:$0xff]  ;;  %v841_v60 = vld [vmem:[%s17859_s12 + $0x18] sm:$0xff] }
 0x1d0   :  { %10872 = vmatprep.subr.bf16.mxu0 %v14957_v3  ;;  %10904 = vmatprep.subr.bf16.mxu1 %v14963_v7  ;;  %17862 = vst [vmem:[#allocation93_spill] sm:$0xff] %v15017_v48  ;;  %17863 = vst [vmem:[#allocation94_spill] sm:$0xff] %v15023_v55  ;;  %v845_v61 = vld [vmem:[%s17859_s12 + $0x38] sm:$0xff]  ;;  %v15035_v4 = vpack.c.bf16 %v836_v56, %v832_v54  ;;  %v15037_v5 = vpack.c.bf16 %v843_v59, %v839_v58  ;;  %v838_v6 = vld [vmem:[%s17859_s12] sm:$0xff] }
 0x1d1   :  { %17864 = vst [vmem:[#allocation95_spill] sm:$0xff] %v15031_v62  ;;  %v842_v8 = vld [vmem:[%s17859_s12 + $0x20] sm:$0xff]  ;;  %v840_v9 = vld [vmem:[%s17859_s12 + $0x10] sm:$0xff]  ;;  %v15043_v10 = vpack.c.bf16 %v845_v61, %v841_v60  ;;  %v847_v12 = vld [vmem:[%s17859_s12 + $0x48] sm:$0xff] }
 0x1d2   :  { %17865 = vst [vmem:[#allocation96_spill] sm:$0xff] %v15035_v4  ;;  %17866 = vst [vmem:[#allocation97_spill] sm:$0xff] %v15037_v5  ;;  %v844_v11 = vld [vmem:[%s17859_s12 + $0x30] sm:$0xff]  ;;  %v851_v16 = vld [vmem:[%s17859_s12 + $0x68] sm:$0xff]  ;;  %v15051_v21 = vpack.c.bf16 %v842_v8, %v838_v6 }
 0x1d3   :  { %10874 = vmatpush1.bf16.msra.mxu0 %v14971_v13  ;;  %10906 = vmatpush1.bf16.msra.mxu1 %v14975_v14  ;;  %17867 = vst [vmem:[#allocation98_spill] sm:$0xff] %v15043_v10  ;;  %v849_v17 = vld [vmem:[%s17859_s12 + $0x58] sm:$0xff]  ;;  %v15055_v23 = vpack.c.bf16 %v844_v11, %v840_v9  ;;  %v15057_v24 = vpack.c.bf16 %v851_v16, %v847_v12  ;;  %v846_v25 = vld [vmem:[%s17859_s12 + $0x40] sm:$0xff]  ;;  %v848_v33 = vld [vmem:[%s17859_s12 + $0x50] sm:$0xff] }
 0x1d4   :  { %10876 = vmatprep.subr.bf16.mxu0 %v14977_v15  ;;  %10908 = vmatprep.subr.bf16.mxu1 %v14983_v20  ;;  %v853_v19 = vld [vmem:[%s17859_s12 + $0x78] sm:$0xff]  ;;  %v850_v26 = vld [vmem:[%s17859_s12 + $0x60] sm:$0xff]  ;;  %v852_v36 = vld [vmem:[%s17859_s12 + $0x70] sm:$0xff] }
 0x1d5   :  { %v15063_v35 = vpack.c.bf16 %v853_v19, %v849_v17  ;;  %v855_v37 = vld [vmem:[%s17859_s12 + $0x88] sm:$0xff]  ;;  %v857_v42 = vld [vmem:[%s17859_s12 + $0x98] sm:$0xff]  ;;  %v15073_v44 = vpack.c.bf16 %v850_v26, %v846_v25  ;;  %v15077_v49 = vpack.c.bf16 %v852_v36, %v848_v33  ;;  %v854_v54 = vld [vmem:[%s17859_s12 + $0x80] sm:$0xff] }
 0x1d6   :  { %v859_v38 = vld [vmem:[%s17859_s12 + $0xa8] sm:$0xff]  ;;  %v861_v43 = vld [vmem:[%s17859_s12 + $0xb8] sm:$0xff]  ;;  %v858_v56 = vld [vmem:[%s17859_s12 + $0xa0] sm:$0xff] }
 0x1d7   :  { %10878 = vmatpush1.bf16.msra.mxu0 %v14991_v27  ;;  %10910 = vmatpush1.bf16.msra.mxu1 %v14995_v31  ;;  %v15079_v50 = vpack.c.bf16 %v859_v38, %v855_v37  ;;  %v856_v58 = vld [vmem:[%s17859_s12 + $0x90] sm:$0xff]  ;;  %v15085_v59 = vpack.c.bf16 %v861_v43, %v857_v42  ;;  %v863_v61 = vld [vmem:[%s17859_s12 + $0xc8] sm:$0xff]  ;;  %v865_v8 = vld [vmem:[%s17859_s12 + $0xd8] sm:$0xff]  ;;  %v15095_v11 = vpack.c.bf16 %v858_v56, %v854_v54 }
 0x1d8   :  { %10880 = vmatprep.subr.bf16.mxu0 %v14997_v32  ;;  %10912 = vmatprep.subr.bf16.mxu1 %v15003_v1  ;;  %v860_v60 = vld [vmem:[%s17859_s12 + $0xb0] sm:$0xff]  ;;  %v867_v6 = vld [vmem:[%s17859_s12 + $0xe8] sm:$0xff]  ;;  %v869_v9 = vld [vmem:[%s17859_s12 + $0xf8] sm:$0xff] }
 0x1d9   :  { %v15099_v12 = vpack.c.bf16 %v860_v60, %v856_v58  ;;  %v15101_v16 = vpack.c.bf16 %v867_v6, %v863_v61  ;;  %v862_v17 = vld [vmem:[%s17859_s12 + $0xc0] sm:$0xff]  ;;  %v864_v25 = vld [vmem:[%s17859_s12 + $0xd0] sm:$0xff]  ;;  %v15107_v26 = vpack.c.bf16 %v869_v9, %v865_v8  ;;  %v871_v36 = vld [vmem:[%s17859_s12 + $0x108] sm:$0xff] }
 0x1da   :  { %v866_v19 = vld [vmem:[%s17859_s12 + $0xe0] sm:$0xff]  ;;  %v868_v33 = vld [vmem:[%s17859_s12 + $0xf0] sm:$0xff]  ;;  %v875_v37 = vld [vmem:[%s17859_s12 + $0x128] sm:$0xff] }
 0x1db   :  { %10882 = vmatpush1.bf16.msra.mxu0 %v15011_v46  ;;  %10914 = vmatpush1.bf16.msra.mxu1 %v15015_v47  ;;  %17868 = vst [vmem:[#allocation99_spill] sm:$0xff] %v15101_v16  ;;  %17869 = vst [vmem:[#allocation100_spill] sm:$0xff] %v15107_v26  ;;  %v873_v38 = vld [vmem:[%s17859_s12 + $0x118] sm:$0xff]  ;;  %v15115_v43 = vpack.c.bf16 %v866_v19, %v862_v17  ;;  %v15119_v54 = vpack.c.bf16 %v868_v33, %v864_v25  ;;  %v870_v58 = vld [vmem:[%s17859_s12 + $0x100] sm:$0xff] }
 0x1dc   :  { %10884 = vmatprep.subr.bf16.mxu0 %v15017_v48  ;;  %10916 = vmatprep.subr.bf16.mxu1 %v15023_v55  ;;  %v877_v42 = vld [vmem:[%s17859_s12 + $0x138] sm:$0xff]  ;;  %v15121_v56 = vpack.c.bf16 %v875_v37, %v871_v36  ;;  %v874_v60 = vld [vmem:[%s17859_s12 + $0x120] sm:$0xff]  ;;  %v872_v61 = vld [vmem:[%s17859_s12 + $0x110] sm:$0xff] }
 0x1dd   :  { %17870 = vst [vmem:[#allocation101_spill] sm:$0xff] %v15115_v43  ;;  %17871 = vst [vmem:[#allocation102_spill] sm:$0xff] %v15119_v54  ;;  %v15127_v6 = vpack.c.bf16 %v877_v42, %v873_v38  ;;  %v876_v8 = vld [vmem:[%s17859_s12 + $0x130] sm:$0xff]  ;;  %v879_v9 = vld [vmem:[%s17859_s12 + $0x148] sm:$0xff]  ;;  %v15135_v33 = vpack.c.bf16 %v874_v60, %v870_v58 }
 0x1de   :  { %17872 = vst [vmem:[#allocation103_spill] sm:$0xff] %v15121_v56  ;;  %v883_v17 = vld [vmem:[%s17859_s12 + $0x168] sm:$0xff]  ;;  %v881_v19 = vld [vmem:[%s17859_s12 + $0x158] sm:$0xff]  ;;  %v15139_v36 = vpack.c.bf16 %v876_v8, %v872_v61  ;;  %v878_v38 = vld [vmem:[%s17859_s12 + $0x140] sm:$0xff] }
 0x1df   :  { %10886 = vmatpush1.bf16.msra.mxu0 %v15031_v62  ;;  %10918 = vmatpush1.bf16.msra.mxu1 %v15035_v4  ;;  %17873 = vst [vmem:[#allocation104_spill] sm:$0xff] %v15127_v6  ;;  %v885_v25 = vld [vmem:[%s17859_s12 + $0x178] sm:$0xff]  ;;  %17874 = vst [vmem:[#allocation105_spill] sm:$0xff] %v15135_v33  ;;  %v15141_v37 = vpack.c.bf16 %v883_v17, %v879_v9  ;;  %v882_v42 = vld [vmem:[%s17859_s12 + $0x160] sm:$0xff] }
 0x1e0   :  { %10920 = vmatprep.subr.bf16.mxu0 %v15037_v5  ;;  %10952 = vmatprep.subr.bf16.mxu1 %v15043_v10  ;;  %17875 = vst [vmem:[#allocation106_spill] sm:$0xff] %v15139_v36  ;;  %v884_v58 = vld [vmem:[%s17859_s12 + $0x170] sm:$0xff]  ;;  %v887_v60 = vld [vmem:[%s17859_s12 + $0x188] sm:$0xff]  ;;  %v889_v61 = vld [vmem:[%s17859_s12 + $0x198] sm:$0xff]  ;;  %v15155_v9 = vpack.c.bf16 %v882_v42, %v878_v38 }
 0x1e1   :  { %17876 = vst [vmem:[#allocation107_spill] sm:$0xff] %v15141_v37  ;;  %v893_v8 = vld [vmem:[%s17859_s12 + $0x1b8] sm:$0xff]  ;;  %v892_v38 = vld [vmem:[%s17859_s12 + $0x1b0] sm:$0xff]  ;;  %v895_v42 = vld [vmem:[%s17859_s12 + $0x1c8] sm:$0xff] }
 0x1e2   :  { %969 = vmatmul.mubr.f32.vlgmr.msra.gmra.mrb[8].mxu0 %v17510_v0  ;;  %1040 = vmatmul.mubr.f32.vlgmr.msra.gmra.mrb[8].mxu1 %v17510_v0 }
 0x1e3   :  { %10922 = vmatpush1.bf16.msra.mxu0 %v15051_v21  ;;  %10954 = vmatpush1.bf16.msra.mxu1 %v15055_v23 }
 0x1e4   :  { %10924 = vmatprep.subr.bf16.mxu0 %v15057_v24  ;;  %10956 = vmatprep.subr.bf16.mxu1 %v15063_v35 }
 0x1e5   :  { %1211 = vmatprep.mubr.f32.mxu0 %v17510_v0  ;;  %1282 = vmatprep.mubr.f32.mxu1 %v17510_v0  ;;  %v880_v0 = vld [vmem:[%s17859_s12 + $0x150] sm:$0xff] }
 0x1e6   :  { %v15159_v17 = vpack.c.bf16 %v884_v58, %v880_v0 }
 0x1e7   :  { %10926 = vmatpush1.bf16.msra.mxu0 %v15073_v44  ;;  %10958 = vmatpush1.bf16.msra.mxu1 %v15077_v49 }
 0x1e8   :  { %10928 = vmatprep.subr.bf16.mxu0 %v15079_v50  ;;  %10960 = vmatprep.subr.bf16.mxu1 %v15085_v59  ;;  %17878 = vst [vmem:[#allocation109_spill] sm:$0xff] %v15159_v17 }
 0x1eb   :  { %10930 = vmatpush1.bf16.msra.mxu0 %v15095_v11  ;;  %10962 = vmatpush1.bf16.msra.mxu1 %v15099_v12 }
 0x1ec   :  { %10932 = vmatprep.subr.bf16.mxu0 %v15101_v16  ;;  %10964 = vmatprep.subr.bf16.mxu1 %v15107_v26  ;;  %v15147_v26 = vpack.c.bf16 %v885_v25, %v881_v19  ;;  %v886_v25 = vld [vmem:[%s17859_s12 + $0x180] sm:$0xff]  ;;  %v900_v16 = vld [vmem:[%s17859_s12 + $0x1f0] sm:$0xff] }
 0x1ee   :  { %17877 = vst [vmem:[#allocation108_spill] sm:$0xff] %v15147_v26 }
 0x1ef   :  { %10934 = vmatpush1.bf16.msra.mxu0 %v15115_v43  ;;  %10966 = vmatpush1.bf16.msra.mxu1 %v15119_v54  ;;  %v891_v54 = vld [vmem:[%s17859_s12 + $0x1a8] sm:$0xff]  ;;  %v15167_v43 = vpack.c.bf16 %v893_v8, %v889_v61  ;;  %v898_v61 = vld [vmem:[%s17859_s12 + $0x1e0] sm:$0xff] }
 0x1f0   :  { %10936 = vmatprep.subr.bf16.mxu0 %v15121_v56  ;;  %10968 = vmatprep.subr.bf16.mxu1 %v15127_v6  ;;  %v15161_v19 = vpack.c.bf16 %v891_v54, %v887_v60  ;;  %v890_v6 = vld [vmem:[%s17859_s12 + $0x1a0] sm:$0xff]  ;;  %v888_v56 = vld [vmem:[%s17859_s12 + $0x190] sm:$0xff] }
 0x1f1   :  { %17880 = vst [vmem:[#allocation111_spill] sm:$0xff] %v15167_v43  ;;  %v15175_v0 = vpack.c.bf16 %v890_v6, %v886_v25  ;;  %v15179_v54 = vpack.c.bf16 %v892_v38, %v888_v56  ;;  %v894_v60 = vld [vmem:[%s17859_s12 + $0x1c0] sm:$0xff] }
 0x1f2   :  { %17879 = vst [vmem:[#allocation110_spill] sm:$0xff] %v15161_v19  ;;  %v15191_v6 = vpack.c.bf16 %v898_v61, %v894_v60 }
 0x1f3   :  { %10938 = vmatpush1.bf16.msra.mxu0 %v15135_v33  ;;  %10970 = vmatpush1.bf16.msra.mxu1 %v15139_v36  ;;  %v899_v36 = vld [vmem:[%s17859_s12 + $0x1e8] sm:$0xff]  ;;  %v897_v33 = vld [vmem:[%s17859_s12 + $0x1d8] sm:$0xff]  ;;  %17881 = vst [vmem:[#allocation112_spill] sm:$0xff] %v15175_v0  ;;  %17882 = vst [vmem:[#allocation113_spill] sm:$0xff] %v15179_v54 }
 0x1f4   :  { %10940 = vmatprep.subr.bf16.mxu0 %v15141_v37  ;;  %10972 = vmatprep.subr.bf16.mxu1 %v15147_v26  ;;  %v901_v37 = vld [vmem:[%s17859_s12 + $0x1f8] sm:$0xff]  ;;  %v15181_v58 = vpack.c.bf16 %v899_v36, %v895_v42  ;;  %v896_v26 = vld [vmem:[%s17859_s12 + $0x1d0] sm:$0xff]  ;;  %17885 = vst [vmem:[#allocation116_spill] sm:$0xff] %v15191_v6 }
 0x1f5   :  { %v15186_v8 = vpack.c.bf16 %v901_v37, %v897_v33  ;;  %v15195_v56 = vpack.c.bf16 %v900_v16, %v896_v26  ;;  %v17887_v33 = vmov 0.0  }
 0x1f6   :  { %17883 = vst [vmem:[#allocation114_spill] sm:$0xff] %v15181_v58 }
 0x1f7   :  { %10942 = vmatpush1.bf16.msra.mxu0 %v15155_v9  ;;  %10974 = vmatpush1.bf16.msra.mxu1 %v15159_v17  ;;  %17884 = vst [vmem:[#allocation115_spill] sm:$0xff] %v15186_v8  ;;  %17886 = vst [vmem:[#allocation117_spill] sm:$0xff] %v15195_v56 }
 0x1f8   :  { %10944 = vmatprep.subr.bf16.mxu0 %v15161_v19  ;;  %10976 = vmatprep.subr.bf16.mxu1 %v15167_v43 }
 0x1fb   :  { %10946 = vmatpush1.bf16.msra.mxu0 %v15175_v0  ;;  %10978 = vmatpush1.bf16.msra.mxu1 %v15179_v54 }
 0x1fc   :  { %10948 = vmatprep.subr.bf16.mxu0 %v15181_v58  ;;  %10980 = vmatprep.subr.bf16.mxu1 %v15186_v8 }
 0x1ff   :  { %10950 = vmatpush1.bf16.msra.mxu0 %v15191_v6  ;;  %10982 = vmatpush1.bf16.msra.mxu1 %v15195_v56 }
 0x200   :  { %10984 = vmatprep.subr.bf16.mxu0 %v14860_v18  ;;  %11016 = vmatprep.subr.bf16.mxu1 %v14868_v22 }
 0x202   :  { %1212 = vmatmul.mubr.f32.vlgmr.msra.gmra.mrb[10].mxu0 %v17887_v33  ;;  %1283 = vmatmul.mubr.f32.vlgmr.msra.gmra.mrb[10].mxu1 %v17887_v33 }
 0x203   :  { %10986 = vmatpush1.bf16.msra.mxu0 %v14878_v28  ;;  %11018 = vmatpush1.bf16.msra.mxu1 %v14883_v29 }
 0x204   :  { %10988 = vmatprep.subr.bf16.mxu0 %v14885_v30  ;;  %11020 = vmatprep.subr.bf16.mxu1 %v14891_v34 }
 0x205   :  { %1464 = vmatprep.mubr.f32.mxu0 %v17887_v33  ;;  %1535 = vmatprep.mubr.f32.mxu1 %v17887_v33 }
 0x207   :  { %10990 = vmatpush1.bf16.msra.mxu0 %v14903_v39  ;;  %11022 = vmatpush1.bf16.msra.mxu1 %v14907_v40 }
 0x208   :  { %10992 = vmatprep.subr.bf16.mxu0 %v14909_v41  ;;  %11024 = vmatprep.subr.bf16.mxu1 %v14915_v45 }
 0x20b   :  { %10994 = vmatpush1.bf16.msra.mxu0 %v14927_v51  ;;  %11026 = vmatpush1.bf16.msra.mxu1 %v14933_v52 }
 0x20c   :  { %10996 = vmatprep.subr.bf16.mxu0 %v14935_v53  ;;  %11028 = vmatprep.subr.bf16.mxu1 %v14941_v57 }
 0x20f   :  { %10998 = vmatpush1.bf16.msra.mxu0 %v14951_v63  ;;  %11030 = vmatpush1.bf16.msra.mxu1 %v14955_v2 }
 0x210   :  { %11000 = vmatprep.subr.bf16.mxu0 %v14957_v3  ;;  %11032 = vmatprep.subr.bf16.mxu1 %v14963_v7 }
 0x213   :  { %11002 = vmatpush1.bf16.msra.mxu0 %v14971_v13  ;;  %11034 = vmatpush1.bf16.msra.mxu1 %v14975_v14 }
 0x214   :  { %11004 = vmatprep.subr.bf16.mxu0 %v14977_v15  ;;  %11036 = vmatprep.subr.bf16.mxu1 %v14983_v20 }
 0x217   :  { %11006 = vmatpush1.bf16.msra.mxu0 %v14991_v27  ;;  %11038 = vmatpush1.bf16.msra.mxu1 %v14995_v31  ;;  %v902_v31 = vld [vmem:[%s17892_s28] sm:$0xf] }
 0x218   :  { %11008 = vmatprep.subr.bf16.mxu0 %v14997_v32  ;;  %11040 = vmatprep.subr.bf16.mxu1 %v15003_v1 }
 0x21b   :  { %11010 = vmatpush1.bf16.msra.mxu0 %v15011_v46  ;;  %11042 = vmatpush1.bf16.msra.mxu1 %v15015_v47  ;;  %v1071_v46 = vlaneseq }
 0x21c   :  { %11012 = vmatprep.subr.bf16.mxu0 %v15017_v48  ;;  %11044 = vmatprep.subr.bf16.mxu1 %v15023_v55 }
 0x21d   :  { %v15270_v1 = vshrl.u32 %v1071_v46, 7 }
 0x21f   :  { %11014 = vmatpush1.bf16.msra.mxu0 %v15031_v62  ;;  %11046 = vmatpush1.bf16.msra.mxu1 %v15035_v4  ;;  %17902 = vst [vmem:[#allocation131_spill] sm:$0xff] %v15270_v1  ;;  %v15273_v32 = vsub.s32 0, %v15270_v1  ;;  %v15277_v27 = vsub.s32 1, %v15270_v1  ;;  %v15280_v20 = vsub.s32 3, %v15270_v1 }
 0x220   :  { %11048 = vmatprep.subr.bf16.mxu0 %v15037_v5  ;;  %11080 = vmatprep.subr.bf16.mxu1 %v15043_v10 }
 0x221   :  { %17903 = vst [vmem:[#allocation132_spill] sm:$0xff] %v15273_v32  ;;  %17904 = vst [vmem:[#allocation133_spill] sm:$0xff] %v15277_v27  ;;  %v15283_v15 = vrot.slane %v902_v31, %v15273_v32  ;;  %v15286_v13 = vrot.slane %v902_v31, %v15277_v27  ;;  %v15290_v63 = vrot.slane %v902_v31, %v15280_v20 }
 0x222   :  { %17905 = vst [vmem:[#allocation134_spill] sm:$0xff] %v15280_v20 }
 0x223   :  { %17906 = vst [vmem:[#allocation135_spill] sm:$0xff] %v15283_v15  ;;  %17907 = vst [vmem:[#allocation136_spill] sm:$0xff] %v15286_v13 }
 0x224   :  { %17908 = vst [vmem:[#allocation137_spill] sm:$0xff] %v15290_v63 }
 0x289   :  { %v15238_v16 = vpop.f32.mrb[0].mxu0  ;;  %v15242_v36 = vpop.f32.mrb[0].mxu1 }
 0x28a   :  { %17888 = vst [vmem:[#allocation118_spill] sm:$0xff] %v15238_v16  ;;  %v15240_v26 = vpop.f32.mrb[1].mxu0  ;;  %17890 = vst [vmem:[#allocation120_spill] sm:$0xff] %v15242_v36  ;;  %v15244_v37 = vpop.f32.mrb[1].mxu1 }
 0x28b   :  { %17889 = vst [vmem:[#allocation119_spill] sm:$0xff] %v15240_v26  ;;  %17891 = vst [vmem:[#allocation121_spill] sm:$0xff] %v15244_v37 }
 0x28d   :  { %v15246_v25 = vpop.f32.mrb[2].mxu0  ;;  %v15250_v42 = vpop.f32.mrb[2].mxu1 }
 0x28e   :  { %17893 = vst [vmem:[#allocation122_spill] sm:$0xff] %v15246_v25  ;;  %v15248_v38 = vpop.f32.mrb[3].mxu0  ;;  %17895 = vst [vmem:[#allocation124_spill] sm:$0xff] %v15250_v42  ;;  %v15252_v60 = vpop.f32.mrb[3].mxu1 }
 0x28f   :  { %17894 = vst [vmem:[#allocation123_spill] sm:$0xff] %v15248_v38  ;;  %17896 = vst [vmem:[#allocation125_spill] sm:$0xff] %v15252_v60 }
 0x295   :  { %v15254_v61 = vpop.f32.mrb[4].mxu0  ;;  %v15258_v5 = vpop.f32.mrb[4].mxu1 }
 0x296   :  { %v15256_v10 = vpop.f32.mrb[5].mxu0  ;;  %17898 = vst [vmem:[#allocation127_spill] sm:$0xff] %v15258_v5  ;;  %v15260_v4 = vpop.f32.mrb[5].mxu1 }
 0x297   :  { %17897 = vst [vmem:[#allocation126_spill] sm:$0xff] %v15256_v10 }
 0x299   :  { %v15262_v62 = vpop.f32.mrb[6].mxu0  ;;  %v15266_v48 = vpop.f32.mrb[6].mxu1 }
 0x29a   :  { %17899 = vst [vmem:[#allocation128_spill] sm:$0xff] %v15262_v62  ;;  %v15264_v55 = vpop.f32.mrb[7].mxu0  ;;  %17901 = vst [vmem:[#allocation130_spill] sm:$0xff] %v15266_v48  ;;  %v15268_v47 = vpop.f32.mrb[7].mxu1 }
 0x29b   :  { %17900 = vst [vmem:[#allocation129_spill] sm:$0xff] %v15264_v55 }
 0x2b5   :  { %v970_v14 = vpop.f32.mrb[8].mxu0  ;;  %v1041_v3 = vpop.f32.mrb[8].mxu1 }
 0x2b6   :  { %v1050_v7 = vrot.slane %v970_v14, 1  ;;  %v1062_v46 = vadd.f32 %v970_v14, %v15238_v16  ;;  %v972_v2 = vpop.f32.mrb[9].mxu0  ;;  %v1052_v57 = vrot.slane %v1041_v3, 1  ;;  %v1064_v53 = vadd.f32 %v1041_v3, %v15242_v36  ;;  %v1043_v45 = vpop.f32.mrb[9].mxu1 }
 0x2b7   :  { %v1051_v52 = vrot.slane %v972_v2, 1  ;;  %v1063_v51 = vadd.f32 %v972_v2, %v15240_v26  ;;  %v1053_v39 = vrot.slane %v1043_v45, 1  ;;  %v1065_v34 = vadd.f32 %v1043_v45, %v15244_v37 }
 0x2b8   :  { %v1066_v41 = vadd.f32 %v1050_v7, %v15246_v25  ;;  %v1091_v40 = vadd.f32 %v15283_v15, %v1062_v46  ;;  %v1068_v14 = vadd.f32 %v1052_v57, %v15250_v42  ;;  %v15304_v46 = vsub.s32 2, %v15270_v1 }
 0x2b9   :  { %v1067_v16 = vadd.f32 %v1051_v52, %v15248_v38  ;;  %v1092_v30 = vadd.f32 %v15286_v13, %v1063_v51  ;;  %v1069_v36 = vadd.f32 %v1053_v39, %v15252_v60  ;;  %v1094_v45 = vadd.f32 %v15290_v63, %v1065_v34 }
 0x2ba   :  { %v1095_v29 = vadd.f32 %v15283_v15, %v1066_v41  ;;  %v9544_v3 = vmul.f32 -1.442695, %v1091_v40  ;;  %17909 = vst [vmem:[#allocation138_spill] sm:$0xff] %v15304_v46  ;;  %v15309_v41 = vrot.slane %v902_v31, %v15304_v46 }
 0x2bb   :  { %v1096_v2 = vadd.f32 %v15286_v13, %v1067_v16  ;;  %v9546_v26 = vmul.f32 -1.442695, %v1092_v30  ;;  %v1098_v52 = vadd.f32 %v15290_v63, %v1069_v36  ;;  %v9548_v39 = vmul.f32 -1.442695, %v1094_v45 }
 0x2bc   :  { %13282 = vpow2.f32 %v9544_v3  ;;  %v9545_v7 = vmul.f32 -1.442695, %v1095_v29  ;;  %17910 = vst [vmem:[#allocation139_spill] sm:$0xff] %v15309_v41  ;;  %v1093_v30 = vadd.f32 %v15309_v41, %v1064_v53  ;;  %v1097_v51 = vadd.f32 %v15309_v41, %v1068_v14  ;;  %v903_v14 = vld [vmem:[%s17911_s1] sm:$0xf] }
 0x2bd   :  { %v9547_v57 = vmul.f32 -1.442695, %v1096_v2  ;;  %v9549_v40 = vmul.f32 -1.442695, %v1098_v52 }
 0x2be   :  { %13284 = vpow2.f32 %v9545_v7 }
 0x2bf   :  { %13286 = vpow2.f32 %v9546_v26 }
 0x2c0   :  { %13288 = vpow2.f32 %v9547_v57 }
 0x2c1   :  { %13290 = vpow2.f32 %v9548_v39 }
 0x2c2   :  { %13292 = vpow2.f32 %v9549_v40 }
 0x2c3   :  { %13294 = vtanh.f32 %v1093_v30 }
 0x2c6   :  { %v13283_v29 = vpop.eup %13282 }
 0x2c7   :  { %v1105_v16 = vadd.f32 1.0, %v13283_v29 }
 0x2c8   :  { %v13285_v34 = vpop.eup %13284 }
 0x2c9   :  { %v13287_v36 = vpop.eup %13286  ;;  %v1106_v3 = vadd.f32 1.0, %v13285_v34  ;;  %13296 = vrcp.f32 %v1105_v16  ;;  %v15315_v16 = vrot.slane %v903_v14, %v15273_v32 }
 0x2ca   :  { %v13289_v26 = vpop.eup %13288  ;;  %13298 = vtanh.f32 %v1097_v51  ;;  %v1117_v31 = vadd.f32 1.0, %v13287_v36  ;;  %v15318_v51 = vrot.slane %v903_v14, %v15277_v27 }
 0x2cb   :  { %13300 = vrcp.f32 %v1106_v3  ;;  %v1118_v2 = vadd.f32 1.0, %v13289_v26  ;;  %v13291_v53 = vpop.eup %13290  ;;  %17912 = vst [vmem:[#allocation140_spill] sm:$0xff] %v15315_v16 }
 0x2cc   :  { %13302 = vrcp.f32 %v1117_v31  ;;  %v13293_v7 = vpop.eup %13292  ;;  %v1131_v45 = vadd.f32 1.0, %v13291_v53 }
 0x2cd   :  { %13304 = vrcp.f32 %v1118_v2  ;;  %v13295_v57 = vpop.eup %13294  ;;  %v1132_v52 = vadd.f32 1.0, %v13293_v7 }
 0x2ce   :  { %13306 = vrcp.f32 %v1131_v45 }
 0x2cf   :  { %13308 = vrcp.f32 %v1132_v52 }
 0x2d3   :  { %v13297_v39 = vpop.eup %13296 }
 0x2d4   :  { %v13299_v40 = vpop.eup %13298  ;;  %v1139_v30 = vmul.f32 %v13297_v39, %v13295_v57 }
 0x2d5   :  { %v13301_v29 = vpop.eup %13300  ;;  %v1213_v34 = vpop.f32.mrb[10].mxu0 }
 0x2d6   :  { %v13303_v36 = vpop.eup %13302  ;;  %v1140_v3 = vmul.f32 %v13301_v29, %v13299_v40  ;;  %v1293_v26 = vrot.slane %v1213_v34, 1  ;;  %v1297_v31 = vrot.slane %v1213_v34, 2  ;;  %v1284_v2 = vpop.f32.mrb[10].mxu1 }
 0x2d7   :  { %v1215_v53 = vpop.f32.mrb[11].mxu0  ;;  %v13305_v7 = vpop.eup %13304  ;;  %v1137_v1 = vmul.f32 0.0, %v13303_v36  ;;  %v1295_v63 = vrot.slane %v1284_v2, 1  ;;  %v1299_v57 = vrot.slane %v1284_v2, 2 }
 0x2d8   :  { %v1294_v39 = vrot.slane %v1215_v53, 1  ;;  %v1286_v45 = vpop.f32.mrb[11].mxu1  ;;  %v1138_v41 = vmul.f32 0.0, %v13305_v7  ;;  %v1309_v32 = vadd.f32 %v1293_v26, %v15254_v61  ;;  %v1313_v37 = vadd.f32 %v1297_v31, %v15262_v62 }
 0x2d9   :  { %v1298_v27 = vrot.slane %v1215_v53, 2  ;;  %v15322_v13 = vadd.f32 %v1139_v30, %v1137_v1  ;;  %v1311_v52 = vadd.f32 %v1295_v63, %v15258_v5  ;;  %v1315_v40 = vadd.f32 %v1299_v57, %v15266_v48 }
 0x2da   :  { %v1310_v29 = vadd.f32 %v1294_v39, %v15256_v10  ;;  %v15327_v34 = vadd.f32 %v1140_v3, %v1138_v41  ;;  %v1338_v36 = vadd.f32 %v15315_v16, %v1309_v32  ;;  %v1342_v2 = vadd.f32 %v15315_v16, %v1313_v37 }
 0x2db   :  { %v1314_v7 = vadd.f32 %v1298_v27, %v15264_v55  ;;  %13310 = vtanh.f32 %v15322_v13  ;;  %v1296_v31 = vrot.slane %v1286_v45, 1  ;;  %v15337_v41 = vrot.slane %v903_v14, %v15280_v20  ;;  %v13307_v27 = vpop.eup %13306 }
 0x2dc   :  { %13312 = vtanh.f32 %v15327_v34  ;;  %v9550_v1 = vmul.f32 -1.442695, %v1338_v36  ;;  %v9551_v30 = vmul.f32 -1.442695, %v1342_v2  ;;  %v1339_v63 = vadd.f32 %v15318_v51, %v1310_v29  ;;  %v13309_v39 = vpop.eup %13308 }
 0x2dd   :  { %v1343_v26 = vadd.f32 %v15318_v51, %v1314_v7  ;;  %v15340_v32 = vrot.slane %v903_v14, %v15304_v46  ;;  %v1300_v37 = vrot.slane %v1286_v45, 2  ;;  %v1312_v57 = vadd.f32 %v1296_v31, %v15260_v4 }
 0x2de   :  { %13314 = vpow2.f32 %v9550_v1  ;;  %v9552_v3 = vmul.f32 -1.442695, %v1339_v63 }
 0x2df   :  { %13316 = vpow2.f32 %v9551_v30  ;;  %v9553_v53 = vmul.f32 -1.442695, %v1343_v26  ;;  %v1316_v29 = vadd.f32 %v1300_v37, %v15268_v47  ;;  %v1341_v36 = vadd.f32 %v15337_v41, %v1312_v57 }
 0x2e0   :  { %13318 = vpow2.f32 %v9552_v3  ;;  %v1340_v7 = vadd.f32 %v15340_v32, %v1311_v52  ;;  %v1344_v14 = vadd.f32 %v15340_v32, %v1315_v40 }
 0x2e1   :  { %13320 = vpow2.f32 %v9553_v53  ;;  %v1345_v2 = vadd.f32 %v15337_v41, %v1316_v29  ;;  %v9554_v1 = vmul.f32 -1.442695, %v1341_v36 }
 0x2e2   :  { %13322 = vtanh.f32 %v1340_v7 }
 0x2e3   :  { %v9555_v63 = vmul.f32 -1.442695, %v1345_v2  ;;  %13324 = vtanh.f32 %v1344_v14 }
 0x2e4   :  { %13326 = vpow2.f32 %v9554_v1 }
 0x2e5   :  { %v13311_v45 = vpop.eup %13310  ;;  %13328 = vpow2.f32 %v9555_v63  ;;  %v17914_v63 = vld [vmem:[#allocation100_spill] sm:$0xff] }
 0x2e6   :  { %v13313_v30 = vpop.eup %13312  ;;  %v1145_v26 = vmul.f32 %v13311_v45, %v13307_v27 }
 0x2e7   :  { %v1146_v31 = vmul.f32 %v13313_v30, %v13309_v39  ;;  %v17913_v30 = vld [vmem:[#allocation99_spill] sm:$0xff] }
 0x2e8   :  { %v13315_v46 = vpop.eup %13314 }
 0x2e9   :  { %v13317_v37 = vpop.eup %13316  ;;  %v1352_v3 = vadd.f32 1.0, %v13315_v46  ;;  %v1396_v53 = vrot.slane %v1146_v31, 7 }
 0x2ea   :  { %v1353_v57 = vadd.f32 1.0, %v13317_v37  ;;  %v13319_v29 = vpop.eup %13318 }
 0x2eb   :  { %13330 = vrcp.f32 %v1352_v3  ;;  %v1398_v52 = vsel %vm1397_vm4, %v1396_v53, %v1145_v26  ;;  %v13321_v40 = vpop.eup %13320  ;;  %v1364_v36 = vadd.f32 1.0, %v13319_v29  ;;  %v17915_v29 = vld [vmem:[#allocation101_spill] sm:$0xff] }
 0x2ec   :  { %13332 = vrcp.f32 %v1353_v57  ;;  %1465 = vmatmul.mubr.f32.vlgmr.msra.gmra.mrb[12].mxu0 %v1398_v52  ;;  %1536 = vmatmul.mubr.f32.vlgmr.msra.gmra.mrb[12].mxu1 %v1398_v52  ;;  %v1365_v27 = vadd.f32 1.0, %v13321_v40  ;;  %v13323_v46 = vpop.eup %13322  ;;  %v17916_v52 = vld [vmem:[#allocation102_spill] sm:$0xff] }
 0x2ed   :  { %11050 = vmatpush1.bf16.msra.mxu0 %v15051_v21  ;;  %11082 = vmatpush1.bf16.msra.mxu1 %v15055_v23  ;;  %13334 = vrcp.f32 %v1364_v36  ;;  %v13325_v39 = vpop.eup %13324  ;;  %v17917_v36 = vld [vmem:[#allocation103_spill] sm:$0xff] }
 0x2ee   :  { %11052 = vmatprep.subr.bf16.mxu0 %v15057_v24  ;;  %11084 = vmatprep.subr.bf16.mxu1 %v15063_v35  ;;  %13336 = vrcp.f32 %v1365_v27  ;;  %v13327_v2 = vpop.eup %13326  ;;  %v17918_v27 = vld [vmem:[#allocation104_spill] sm:$0xff] }
 0x2ef   :  { %1698 = vmatprep.mubr.f32.mxu0 %v17887_v33  ;;  %1769 = vmatprep.mubr.f32.mxu1 %v17887_v33  ;;  %v13329_v7 = vpop.eup %13328  ;;  %v1378_v31 = vadd.f32 1.0, %v13327_v2  ;;  %v17920_v2 = vld [vmem:[#allocation106_spill] sm:$0xff] }
 0x2f0   :  { %v1379_v3 = vadd.f32 1.0, %v13329_v7  ;;  %v17921_v7 = vld [vmem:[#allocation107_spill] sm:$0xff] }
 0x2f1   :  { %11054 = vmatpush1.bf16.msra.mxu0 %v15073_v44  ;;  %11086 = vmatpush1.bf16.msra.mxu1 %v15077_v49  ;;  %13338 = vrcp.f32 %v1378_v31 }
 0x2f2   :  { %11056 = vmatprep.subr.bf16.mxu0 %v15079_v50  ;;  %11088 = vmatprep.subr.bf16.mxu1 %v15085_v59  ;;  %13340 = vrcp.f32 %v1379_v3 }
 0x2f5   :  { %v13331_v14 = vpop.eup %13330  ;;  %11058 = vmatpush1.bf16.msra.mxu0 %v15095_v11  ;;  %11090 = vmatpush1.bf16.msra.mxu1 %v15099_v12 }
 0x2f6   :  { %v13333_v45 = vpop.eup %13332  ;;  %v1386_v1 = vmul.f32 %v13331_v14, %v13323_v46  ;;  %11060 = vmatprep.subr.bf16.mxu0 %v17913_v30  ;;  %11092 = vmatprep.subr.bf16.mxu1 %v17914_v63 }
 0x2f7   :  { %v1387_v26 = vmul.f32 %v13333_v45, %v13325_v39  ;;  %v13335_v37 = vpop.eup %13334  ;;  %v17919_v39 = vld [vmem:[#allocation105_spill] sm:$0xff]  ;;  %v17922_v45 = vld [vmem:[#allocation108_spill] sm:$0xff] }
 0x2f8   :  { %v13337_v53 = vpop.eup %13336  ;;  %v1384_v57 = vmul.f32 0.0, %v13335_v37 }
 0x2f9   :  { %11062 = vmatpush1.bf16.msra.mxu0 %v17915_v29  ;;  %11094 = vmatpush1.bf16.msra.mxu1 %v17916_v52  ;;  %v1385_v40 = vmul.f32 0.0, %v13337_v53 }
 0x2fa   :  { %11064 = vmatprep.subr.bf16.mxu0 %v17917_v36  ;;  %11096 = vmatprep.subr.bf16.mxu1 %v17918_v27  ;;  %v15367_v46 = vadd.f32 %v1386_v1, %v1384_v57 }
 0x2fb   :  { %v15369_v14 = vadd.f32 %v1387_v26, %v1385_v40  ;;  %v13339_v1 = vpop.eup %13338 }
 0x2fc   :  { %13342 = vtanh.f32 %v15367_v46  ;;  %v13341_v26 = vpop.eup %13340 }
 0x2fd   :  { %11066 = vmatpush1.bf16.msra.mxu0 %v17919_v39  ;;  %11098 = vmatpush1.bf16.msra.mxu1 %v17920_v2  ;;  %13344 = vtanh.f32 %v15369_v14 }
 0x2fe   :  { %11068 = vmatprep.subr.bf16.mxu0 %v17921_v7  ;;  %11100 = vmatprep.subr.bf16.mxu1 %v17922_v45 }
 0x301   :  { %11070 = vmatpush1.bf16.msra.mxu0 %v15155_v9  ;;  %11102 = vmatpush1.bf16.msra.mxu1 %v15159_v17 }
 0x302   :  { %11072 = vmatprep.subr.bf16.mxu0 %v15161_v19  ;;  %11104 = vmatprep.subr.bf16.mxu1 %v15167_v43  ;;  %v17959_v19 = vld [vmem:[#allocation121_spill] sm:$0xff] }
 0x305   :  { %11074 = vmatpush1.bf16.msra.mxu0 %v15175_v0  ;;  %11106 = vmatpush1.bf16.msra.mxu1 %v15179_v54  ;;  %v17957_v0 = vld [vmem:[#allocation119_spill] sm:$0xff] }
 0x306   :  { %11076 = vmatprep.subr.bf16.mxu0 %v15181_v58  ;;  %11108 = vmatprep.subr.bf16.mxu1 %v15186_v8  ;;  %v13343_v31 = vpop.eup %13342  ;;  %v17955_v8 = vld [vmem:[#allocation118_spill] sm:$0xff]  ;;  %v17956_v58 = vld [vmem:[#allocation120_spill] sm:$0xff] }
 0x307   :  { %v13345_v37 = vpop.eup %13344  ;;  %v1392_v3 = vmul.f32 %v13343_v31, %v13339_v1  ;;  %v17924_v1 = vld [vmem:[#allocation68_spill] sm:$0xff]  ;;  %v17925_v31 = vld [vmem:[#allocation69_spill] sm:$0xff] }
 0x308   :  { %v1393_v53 = vmul.f32 %v13345_v37, %v13341_v26  ;;  %v17926_v26 = vld [vmem:[#allocation70_spill] sm:$0xff]  ;;  %v17927_v37 = vld [vmem:[#allocation71_spill] sm:$0xff] }
 0x309   :  { %11078 = vmatpush1.bf16.msra.mxu0 %v15191_v6  ;;  %11110 = vmatpush1.bf16.msra.mxu1 %v15195_v56  ;;  %v1630_v57 = vrot.slane %v1392_v3, 7  ;;  %v17928_v3 = vld [vmem:[#allocation72_spill] sm:$0xff] }
 0x30a   :  { %11112 = vmatprep.subr.bf16.mxu0 %v14860_v18  ;;  %11144 = vmatprep.subr.bf16.mxu1 %v14868_v22  ;;  %v1631_v40 = vrot.slane %v1393_v53, 6  ;;  %v17929_v53 = vld [vmem:[#allocation73_spill] sm:$0xff] }
 0x30b   :  { %v17937_v22 = vld [vmem:[#allocation81_spill] sm:$0xff] }
 0x30c   :  { %v15390_v20 = vsel %vm1397_vm4, %v1631_v40, %v1630_v57  ;;  %v17930_v57 = vld [vmem:[#allocation74_spill] sm:$0xff]  ;;  %v17931_v40 = vld [vmem:[#allocation75_spill] sm:$0xff] }
 0x30d   :  { %17923 = vst [vmem:[#allocation99_spill] sm:$0xff] %v15390_v20  ;;  %1699 = vmatmul.mubr.f32.vlgmr.msra.gmra.mrb[14].mxu0 %v15390_v20  ;;  %1770 = vmatmul.mubr.f32.vlgmr.msra.gmra.mrb[14].mxu1 %v15390_v20  ;;  %v17932_v20 = vld [vmem:[#allocation76_spill] sm:$0xff] }
 0x30e   :  { %11114 = vmatpush1.bf16.msra.mxu0 %v14878_v28  ;;  %11146 = vmatpush1.bf16.msra.mxu1 %v17924_v1  ;;  %v17933_v1 = vld [vmem:[#allocation77_spill] sm:$0xff]  ;;  %v17936_v28 = vld [vmem:[#allocation80_spill] sm:$0xff] }
 0x30f   :  { %11116 = vmatprep.subr.bf16.mxu0 %v17925_v31  ;;  %11148 = vmatprep.subr.bf16.mxu1 %v17926_v26  ;;  %v17934_v31 = vld [vmem:[#allocation78_spill] sm:$0xff]  ;;  %v17935_v26 = vld [vmem:[#allocation79_spill] sm:$0xff] }
 0x310   :  { %1935 = vmatprep.mubr.f32.mxu0 %v17887_v33  ;;  %2006 = vmatprep.mubr.f32.mxu1 %v17887_v33 }
 0x312   :  { %11118 = vmatpush1.bf16.msra.mxu0 %v17927_v37  ;;  %11150 = vmatpush1.bf16.msra.mxu1 %v17928_v3  ;;  %v17938_v37 = vld [vmem:[#allocation82_spill] sm:$0xff]  ;;  %v17939_v3 = vld [vmem:[#allocation83_spill] sm:$0xff] }
 0x313   :  { %11120 = vmatprep.subr.bf16.mxu0 %v17929_v53  ;;  %11152 = vmatprep.subr.bf16.mxu1 %v17930_v57  ;;  %v17940_v53 = vld [vmem:[#allocation84_spill] sm:$0xff]  ;;  %v17941_v57 = vld [vmem:[#allocation85_spill] sm:$0xff] }
 0x316   :  { %11122 = vmatpush1.bf16.msra.mxu0 %v17931_v40  ;;  %11154 = vmatpush1.bf16.msra.mxu1 %v17932_v20  ;;  %v17942_v40 = vld [vmem:[#allocation86_spill] sm:$0xff]  ;;  %v17943_v20 = vld [vmem:[#allocation87_spill] sm:$0xff] }
 0x317   :  { %11124 = vmatprep.subr.bf16.mxu0 %v17933_v1  ;;  %11156 = vmatprep.subr.bf16.mxu1 %v17934_v31  ;;  %v17944_v1 = vld [vmem:[#allocation88_spill] sm:$0xff]  ;;  %v17945_v31 = vld [vmem:[#allocation89_spill] sm:$0xff] }
 0x31a   :  { %11126 = vmatpush1.bf16.msra.mxu0 %v17935_v26  ;;  %11158 = vmatpush1.bf16.msra.mxu1 %v17936_v28  ;;  %v17946_v26 = vld [vmem:[#allocation90_spill] sm:$0xff]  ;;  %v17947_v28 = vld [vmem:[#allocation91_spill] sm:$0xff] }
 0x31b   :  { %11128 = vmatprep.subr.bf16.mxu0 %v17937_v22  ;;  %11160 = vmatprep.subr.bf16.mxu1 %v17938_v37  ;;  %v17948_v22 = vld [vmem:[#allocation92_spill] sm:$0xff]  ;;  %v17949_v37 = vld [vmem:[#allocation93_spill] sm:$0xff] }
 0x31e   :  { %11130 = vmatpush1.bf16.msra.mxu0 %v17939_v3  ;;  %11162 = vmatpush1.bf16.msra.mxu1 %v17940_v53  ;;  %v17950_v3 = vld [vmem:[#allocation94_spill] sm:$0xff]  ;;  %v17951_v53 = vld [vmem:[#allocation95_spill] sm:$0xff] }
 0x31f   :  { %11132 = vmatprep.subr.bf16.mxu0 %v17941_v57  ;;  %11164 = vmatprep.subr.bf16.mxu1 %v17942_v40  ;;  %v17952_v57 = vld [vmem:[#allocation96_spill] sm:$0xff]  ;;  %v17953_v40 = vld [vmem:[#allocation97_spill] sm:$0xff] }
 0x322   :  { %11134 = vmatpush1.bf16.msra.mxu0 %v17943_v20  ;;  %11166 = vmatpush1.bf16.msra.mxu1 %v17944_v1  ;;  %v17954_v20 = vld [vmem:[#allocation98_spill] sm:$0xff] }
 0x323   :  { %11136 = vmatprep.subr.bf16.mxu0 %v17945_v31  ;;  %11168 = vmatprep.subr.bf16.mxu1 %v17946_v26 }
 0x326   :  { %11138 = vmatpush1.bf16.msra.mxu0 %v17947_v28  ;;  %11170 = vmatpush1.bf16.msra.mxu1 %v17948_v22 }
 0x327   :  { %11140 = vmatprep.subr.bf16.mxu0 %v17949_v37  ;;  %11172 = vmatprep.subr.bf16.mxu1 %v17950_v3 }
 0x32a   :  { %11142 = vmatpush1.bf16.msra.mxu0 %v17951_v53  ;;  %11174 = vmatpush1.bf16.msra.mxu1 %v17952_v57 }
 0x32b   :  { %11176 = vmatprep.subr.bf16.mxu0 %v17953_v40  ;;  %11208 = vmatprep.subr.bf16.mxu1 %v17954_v20 }
 0x3bf   :  { %v1466_v1 = vpop.f32.mrb[12].mxu0  ;;  %v1537_v31 = vpop.f32.mrb[12].mxu1 }
 0x3c0   :  { %v1546_v18 = vrot.slane %v1466_v1, 7  ;;  %v1562_v26 = vadd.f32 %v1466_v1, %v15246_v25  ;;  %v1548_v28 = vrot.slane %v1537_v31, 7  ;;  %v1564_v22 = vadd.f32 %v1537_v31, %v15250_v42  ;;  %v1468_v56 = vpop.f32.mrb[13].mxu0  ;;  %v1539_v37 = vpop.f32.mrb[13].mxu1  ;;  %v17958_v1 = vld [vmem:[#allocation136_spill] sm:$0xff] }
 0x3c1   :  { %v1547_v6 = vrot.slane %v1468_v56, 7  ;;  %v1563_v3 = vadd.f32 %v1468_v56, %v15248_v38  ;;  %v1549_v53 = vrot.slane %v1539_v37, 7  ;;  %v1565_v57 = vadd.f32 %v1539_v37, %v15252_v60 }
 0x3c2   :  { %v1558_v40 = vadd.f32 %v1546_v18, %v17955_v8  ;;  %v1570_v20 = vadd.f32 %v1562_v26, %v15283_v15  ;;  %v1560_v54 = vadd.f32 %v1548_v28, %v17956_v58  ;;  %v17960_v18 = vld [vmem:[#allocation139_spill] sm:$0xff] }
 0x3c3   :  { %v1559_v43 = vadd.f32 %v1547_v6, %v17957_v0  ;;  %v1571_v25 = vadd.f32 %v1563_v3, %v17958_v1  ;;  %v1561_v31 = vadd.f32 %v1549_v53, %v17959_v19  ;;  %v1572_v28 = vadd.f32 %v1564_v22, %v17960_v18 }
 0x3c4   :  { %v1566_v42 = vadd.f32 %v1558_v40, %v15283_v15  ;;  %v9557_v17 = vmul.f32 -1.442695, %v1570_v20  ;;  %v1568_v6 = vadd.f32 %v1560_v54, %v17960_v18 }
 0x3c5   :  { %v1567_v56 = vadd.f32 %v1559_v43, %v17958_v1  ;;  %v9559_v37 = vmul.f32 -1.442695, %v1571_v25  ;;  %v17961_v25 = vld [vmem:[#allocation137_spill] sm:$0xff] }
 0x3c6   :  { %v9556_v38 = vmul.f32 -1.442695, %v1566_v42  ;;  %13346 = vpow2.f32 %v9557_v17  ;;  %v1573_v42 = vadd.f32 %v1565_v57, %v17961_v25 }
 0x3c7   :  { %v9558_v60 = vmul.f32 -1.442695, %v1567_v56 }
 0x3c8   :  { %13348 = vpow2.f32 %v9556_v38  ;;  %v1569_v38 = vadd.f32 %v1561_v31, %v17961_v25 }
 0x3c9   :  { %13350 = vpow2.f32 %v9558_v60  ;;  %v9561_v60 = vmul.f32 -1.442695, %v1573_v42 }
 0x3ca   :  { %13352 = vpow2.f32 %v9559_v37  ;;  %v9560_v22 = vmul.f32 -1.442695, %v1569_v38 }
 0x3cb   :  { %13354 = vtanh.f32 %v1572_v28 }
 0x3d0   :  { %v13347_v26 = vpop.eup %13346 }
 0x3d1   :  { %v1581_v3 = vadd.f32 1.0, %v13347_v26  ;;  %v1614_v26 = vrot.slane %v15322_v13, 7 }
 0x3d2   :  { %v13349_v0 = vpop.eup %13348 }
 0x3d3   :  { %v13351_v53 = vpop.eup %13350  ;;  %v1580_v40 = vadd.f32 1.0, %v13349_v0  ;;  %13356 = vrcp.f32 %v1581_v3  ;;  %v1615_v3 = vrot.slane %v15327_v34, 7 }
 0x3d4   :  { %v13353_v20 = vpop.eup %13352  ;;  %13358 = vtanh.f32 %v1568_v6  ;;  %v1592_v43 = vadd.f32 1.0, %v13351_v53 }
 0x3d5   :  { %13360 = vrcp.f32 %v1580_v40  ;;  %v1593_v17 = vadd.f32 1.0, %v13353_v20  ;;  %v13355_v54 = vpop.eup %13354 }
 0x3d6   :  { %13362 = vrcp.f32 %v1592_v43 }
 0x3d7   :  { %13364 = vrcp.f32 %v1593_v17 }
 0x3d8   :  { %13366 = vpow2.f32 %v9560_v22 }
 0x3d9   :  { %13368 = vpow2.f32 %v9561_v60 }
 0x3dd   :  { %v13357_v56 = vpop.eup %13356 }
 0x3de   :  { %v13359_v37 = vpop.eup %13358  ;;  %v1621_v28 = vmul.f32 %v13357_v56, %v13355_v54 }
 0x3df   :  { %v13361_v0 = vpop.eup %13360 }
 0x3e0   :  { %v13363_v6 = vpop.eup %13362  ;;  %v1620_v53 = vmul.f32 %v13361_v0, %v13359_v37  ;;  %v1700_v20 = vpop.f32.mrb[14].mxu0 }
 0x3e1   :  { %v13365_v31 = vpop.eup %13364  ;;  %v1618_v40 = vmul.f32 %v13363_v6, %v1614_v26  ;;  %v1771_v57 = vpop.f32.mrb[14].mxu1  ;;  %v1780_v17 = vrot.slane %v1700_v20, 2  ;;  %v1784_v38 = vrot.slane %v1700_v20, 3 }
 0x3e2   :  { %v1619_v43 = vmul.f32 %v13365_v31, %v1615_v3  ;;  %v1782_v42 = vrot.slane %v1771_v57, 2  ;;  %v1702_v25 = vpop.f32.mrb[15].mxu0  ;;  %v1773_v22 = vpop.f32.mrb[15].mxu1  ;;  %v1786_v18 = vrot.slane %v1771_v57, 3 }
 0x3e3   :  { %v1781_v54 = vrot.slane %v1702_v25, 2  ;;  %v1785_v60 = vrot.slane %v1702_v25, 3  ;;  %v1783_v56 = vrot.slane %v1773_v22, 2  ;;  %v1796_v13 = vadd.f32 %v1780_v17, %v15254_v61  ;;  %v13367_v57 = vpop.eup %13366 }
 0x3e4   :  { %v1800_v1 = vadd.f32 %v1784_v38, %v15262_v62  ;;  %v1798_v34 = vadd.f32 %v1782_v42, %v15258_v5  ;;  %v1787_v37 = vrot.slane %v1773_v22, 3  ;;  %v1802_v0 = vadd.f32 %v1786_v18, %v15266_v48  ;;  %v13369_v42 = vpop.eup %13368 }
 0x3e5   :  { %v1797_v26 = vadd.f32 %v1781_v54, %v15256_v10  ;;  %v1801_v6 = vadd.f32 %v1785_v60, %v15264_v55  ;;  %v1799_v3 = vadd.f32 %v1783_v56, %v15260_v4  ;;  %v1804_v31 = vadd.f32 %v1796_v13, %v15315_v16 }
 0x3e6   :  { %v1808_v25 = vadd.f32 %v1800_v1, %v15315_v16  ;;  %v1803_v20 = vadd.f32 %v1787_v37, %v15268_v47  ;;  %v1606_v10 = vadd.f32 1.0, %v13367_v57  ;;  %v15458_v60 = vadd.f32 %v1620_v53, %v1618_v40 }
 0x3e7   :  { %v1805_v17 = vadd.f32 %v1797_v26, %v15318_v51  ;;  %v1809_v38 = vadd.f32 %v1801_v6, %v15318_v51  ;;  %v9562_v22 = vmul.f32 -1.442695, %v1804_v31  ;;  %v15460_v56 = vadd.f32 %v1621_v28, %v1619_v43 }
 0x3e8   :  { %v9563_v18 = vmul.f32 -1.442695, %v1808_v25  ;;  %v1607_v13 = vadd.f32 1.0, %v13369_v42  ;;  %v1807_v1 = vadd.f32 %v1799_v3, %v15337_v41  ;;  %v1811_v37 = vadd.f32 %v1803_v20, %v15337_v41 }
 0x3e9   :  { %v9564_v48 = vmul.f32 -1.442695, %v1805_v17  ;;  %v9565_v54 = vmul.f32 -1.442695, %v1809_v38  ;;  %13370 = vpow2.f32 %v9562_v22  ;;  %v1806_v26 = vadd.f32 %v1798_v34, %v15340_v32 }
 0x3ea   :  { %13372 = vpow2.f32 %v9563_v18  ;;  %v1810_v6 = vadd.f32 %v1802_v0, %v15340_v32  ;;  %v9566_v53 = vmul.f32 -1.442695, %v1807_v1  ;;  %v9567_v28 = vmul.f32 -1.442695, %v1811_v37 }
 0x3eb   :  { %13374 = vpow2.f32 %v9564_v48 }
 0x3ec   :  { %13376 = vpow2.f32 %v9565_v54 }
 0x3ed   :  { %13378 = vrcp.f32 %v1606_v10 }
 0x3ee   :  { %13380 = vrcp.f32 %v1607_v13 }
 0x3ef   :  { %13382 = vtanh.f32 %v15458_v60 }
 0x3f0   :  { %13384 = vtanh.f32 %v15460_v56 }
 0x3f1   :  { %13386 = vtanh.f32 %v1806_v26 }
 0x3f2   :  { %13388 = vtanh.f32 %v1810_v6 }
 0x3f3   :  { %v13371_v40 = vpop.eup %13370  ;;  %13390 = vpow2.f32 %v9566_v53  ;;  %v1852_v53 = vrot.slane %v15367_v46, 1 }
 0x3f4   :  { %v13373_v48 = vpop.eup %13372  ;;  %v1818_v43 = vadd.f32 1.0, %v13371_v40  ;;  %13392 = vpow2.f32 %v9567_v28 }
 0x3f5   :  { %v13375_v10 = vpop.eup %13374  ;;  %v1819_v3 = vadd.f32 1.0, %v13373_v48 }
 0x3f6   :  { %v13377_v31 = vpop.eup %13376  ;;  %13394 = vrcp.f32 %v1818_v43  ;;  %v1830_v34 = vadd.f32 1.0, %v13375_v10  ;;  %v1853_v43 = vrot.slane %v15369_v14, 1 }
 0x3f7   :  { %v13379_v25 = vpop.eup %13378  ;;  %13396 = vrcp.f32 %v1819_v3  ;;  %v1831_v0 = vadd.f32 1.0, %v13377_v31 }
 0x3f8   :  { %v13381_v20 = vpop.eup %13380  ;;  %13398 = vrcp.f32 %v1830_v34 }
 0x3f9   :  { %v13383_v57 = vpop.eup %13382  ;;  %13400 = vrcp.f32 %v1831_v0 }
 0x3fa   :  { %v13385_v17 = vpop.eup %13384  ;;  %v1626_v38 = vmul.f32 %v13383_v57, %v13379_v25 }
 0x3fb   :  { %v1627_v42 = vmul.f32 %v13385_v17, %v13381_v20  ;;  %v13387_v22 = vpop.eup %13386 }
 0x3fc   :  { %v1868_v18 = vrot.slane %v1626_v38, 1  ;;  %v13389_v54 = vpop.eup %13388 }
 0x3fd   :  { %v13391_v13 = vpop.eup %13390 }
 0x3fe   :  { %v1869_v1 = vsel %vm1397_vm4, %v1627_v42, %v1868_v18  ;;  %v13393_v37 = vpop.eup %13392  ;;  %v1844_v40 = vadd.f32 1.0, %v13391_v13  ;;  %v17964_v13 = vld [vmem:[#allocation111_spill] sm:$0xff] }
 0x3ff   :  { %1936 = vmatmul.mubr.f32.vlgmr.msra.gmra.mrb[16].mxu0 %v1869_v1  ;;  %2007 = vmatmul.mubr.f32.vlgmr.msra.gmra.mrb[16].mxu1 %v1869_v1  ;;  %v1845_v3 = vadd.f32 1.0, %v13393_v37 }
 0x400   :  { %v13395_v26 = vpop.eup %13394  ;;  %11178 = vmatpush1.bf16.msra.mxu0 %v15051_v21  ;;  %11210 = vmatpush1.bf16.msra.mxu1 %v15055_v23  ;;  %13402 = vrcp.f32 %v1844_v40  ;;  %v17969_v40 = vld [vmem:[#allocation116_spill] sm:$0xff] }
 0x401   :  { %v13397_v6 = vpop.eup %13396  ;;  %v1858_v28 = vmul.f32 %v13395_v26, %v13387_v22  ;;  %11180 = vmatprep.subr.bf16.mxu0 %v15057_v24  ;;  %11212 = vmatprep.subr.bf16.mxu1 %v15063_v35  ;;  %13404 = vrcp.f32 %v1845_v3  ;;  %v17962_v22 = vld [vmem:[#allocation109_spill] sm:$0xff]  ;;  %v17965_v26 = vld [vmem:[#allocation112_spill] sm:$0xff]  ;;  %v17973_v3 = vld [vmem:[#allocation67_spill] sm:$0xff] }
 0x402   :  { %v13399_v48 = vpop.eup %13398  ;;  %v1859_v10 = vmul.f32 %v13397_v6, %v13389_v54  ;;  %2173 = vmatprep.mubr.f32.mxu0 %v17887_v33  ;;  %2244 = vmatprep.mubr.f32.mxu1 %v17887_v33  ;;  %v17963_v54 = vld [vmem:[#allocation110_spill] sm:$0xff]  ;;  %v17966_v6 = vld [vmem:[#allocation113_spill] sm:$0xff] }
 0x403   :  { %v13401_v31 = vpop.eup %13400  ;;  %v1856_v34 = vmul.f32 %v13399_v48, %v1852_v53  ;;  %v17967_v53 = vld [vmem:[#allocation114_spill] sm:$0xff]  ;;  %v17970_v48 = vld [vmem:[#allocation117_spill] sm:$0xff] }
 0x404   :  { %v1857_v25 = vmul.f32 %v13401_v31, %v1853_v43  ;;  %11182 = vmatpush1.bf16.msra.mxu0 %v15073_v44  ;;  %11214 = vmatpush1.bf16.msra.mxu1 %v15077_v49  ;;  %v17971_v43 = vld [vmem:[#allocation65_spill] sm:$0xff]  ;;  %v17974_v31 = vld [vmem:[#allocation68_spill] sm:$0xff] }
 0x405   :  { %11184 = vmatprep.subr.bf16.mxu0 %v15079_v50  ;;  %11216 = vmatprep.subr.bf16.mxu1 %v15085_v59  ;;  %v15481_v46 = vadd.f32 %v1858_v28, %v1856_v34  ;;  %v17968_v28 = vld [vmem:[#allocation115_spill] sm:$0xff]  ;;  %v17975_v34 = vld [vmem:[#allocation69_spill] sm:$0xff] }
 0x406   :  { %v15483_v14 = vadd.f32 %v1859_v10, %v1857_v25  ;;  %v17972_v10 = vld [vmem:[#allocation66_spill] sm:$0xff] }
 0x407   :  { %13406 = vtanh.f32 %v15481_v46  ;;  %v17976_v25 = vld [vmem:[#allocation70_spill] sm:$0xff] }
 0x408   :  { %11186 = vmatpush1.bf16.msra.mxu0 %v15095_v11  ;;  %11218 = vmatpush1.bf16.msra.mxu1 %v15099_v12  ;;  %13408 = vtanh.f32 %v15483_v14 }
 0x409   :  { %11188 = vmatprep.subr.bf16.mxu0 %v17913_v30  ;;  %11220 = vmatprep.subr.bf16.mxu1 %v17914_v63 }
 0x40a   :  { %v13403_v0 = vpop.eup %13402 }
 0x40b   :  { %v13405_v20 = vpop.eup %13404 }
 0x40c   :  { %11190 = vmatpush1.bf16.msra.mxu0 %v17915_v29  ;;  %11222 = vmatpush1.bf16.msra.mxu1 %v17916_v52 }
 0x40d   :  { %11192 = vmatprep.subr.bf16.mxu0 %v17917_v36  ;;  %11224 = vmatprep.subr.bf16.mxu1 %v17918_v27 }
 0x410   :  { %11194 = vmatpush1.bf16.msra.mxu0 %v17919_v39  ;;  %11226 = vmatpush1.bf16.msra.mxu1 %v17920_v2 }
 0x411   :  { %v13407_v57 = vpop.eup %13406  ;;  %11196 = vmatprep.subr.bf16.mxu0 %v17921_v7  ;;  %11228 = vmatprep.subr.bf16.mxu1 %v17922_v45 }
 0x412   :  { %v13409_v17 = vpop.eup %13408  ;;  %v1864_v38 = vmul.f32 %v13407_v57, %v13403_v0  ;;  %v17977_v0 = vld [vmem:[#allocation71_spill] sm:$0xff]  ;;  %v17979_v57 = vld [vmem:[#allocation73_spill] sm:$0xff] }
 0x413   :  { %v1865_v42 = vmul.f32 %v13409_v17, %v13405_v20  ;;  %v17978_v20 = vld [vmem:[#allocation72_spill] sm:$0xff]  ;;  %v17980_v17 = vld [vmem:[#allocation74_spill] sm:$0xff] }
 0x414   :  { %11198 = vmatpush1.bf16.msra.mxu0 %v15155_v9  ;;  %11230 = vmatpush1.bf16.msra.mxu1 %v17962_v22  ;;  %v2105_v18 = vrot.slane %v1864_v38, 6  ;;  %v17981_v38 = vld [vmem:[#allocation75_spill] sm:$0xff]  ;;  %v18010_v22 = vld [vmem:[#allocation136_spill] sm:$0xff] }
 0x415   :  { %11200 = vmatprep.subr.bf16.mxu0 %v17963_v54  ;;  %11232 = vmatprep.subr.bf16.mxu1 %v17964_v13  ;;  %v2106_v1 = vrot.slane %v1865_v42, 5  ;;  %v17982_v42 = vld [vmem:[#allocation76_spill] sm:$0xff]  ;;  %v18009_v13 = vld [vmem:[#allocation125_spill] sm:$0xff] }
 0x417   :  { %v2107_v37 = vsel %vm1397_vm4, %v2106_v1, %v2105_v18  ;;  %v17983_v18 = vld [vmem:[#allocation77_spill] sm:$0xff]  ;;  %v17984_v1 = vld [vmem:[#allocation78_spill] sm:$0xff] }
 0x418   :  { %11202 = vmatpush1.bf16.msra.mxu0 %v17965_v26  ;;  %11234 = vmatpush1.bf16.msra.mxu1 %v17966_v6  ;;  %v18008_v26 = vld [vmem:[#allocation123_spill] sm:$0xff] }
 0x419   :  { %11204 = vmatprep.subr.bf16.mxu0 %v17967_v53  ;;  %11236 = vmatprep.subr.bf16.mxu1 %v17968_v28  ;;  %v18006_v28 = vld [vmem:[#allocation124_spill] sm:$0xff]  ;;  %v18007_v53 = vld [vmem:[#allocation119_spill] sm:$0xff] }
 0x41c   :  { %11206 = vmatpush1.bf16.msra.mxu0 %v17969_v40  ;;  %11238 = vmatpush1.bf16.msra.mxu1 %v17970_v48  ;;  %v18005_v40 = vld [vmem:[#allocation122_spill] sm:$0xff] }
 0x41d   :  { %11240 = vmatprep.subr.bf16.mxu0 %v17971_v43  ;;  %11272 = vmatprep.subr.bf16.mxu1 %v17972_v10 }
 0x41f   :  { %2174 = vmatmul.mubr.f32.vlgmr.msra.gmra.mrb[18].mxu0 %v2107_v37  ;;  %2245 = vmatmul.mubr.f32.vlgmr.msra.gmra.mrb[18].mxu1 %v2107_v37  ;;  %v17985_v37 = vld [vmem:[#allocation79_spill] sm:$0xff] }
 0x420   :  { %11242 = vmatpush1.bf16.msra.mxu0 %v17973_v3  ;;  %11274 = vmatpush1.bf16.msra.mxu1 %v17974_v31 }
 0x421   :  { %11244 = vmatprep.subr.bf16.mxu0 %v17975_v34  ;;  %11276 = vmatprep.subr.bf16.mxu1 %v17976_v25  ;;  %v17986_v25 = vld [vmem:[#allocation80_spill] sm:$0xff]  ;;  %v17987_v34 = vld [vmem:[#allocation81_spill] sm:$0xff] }
 0x422   :  { %2411 = vmatprep.mubr.f32.mxu0 %v17887_v33  ;;  %2482 = vmatprep.mubr.f32.mxu1 %v17887_v33 }
 0x424   :  { %11246 = vmatpush1.bf16.msra.mxu0 %v17977_v0  ;;  %11278 = vmatpush1.bf16.msra.mxu1 %v17978_v20  ;;  %v17988_v0 = vld [vmem:[#allocation82_spill] sm:$0xff]  ;;  %v17989_v20 = vld [vmem:[#allocation83_spill] sm:$0xff] }
 0x425   :  { %11248 = vmatprep.subr.bf16.mxu0 %v17979_v57  ;;  %11280 = vmatprep.subr.bf16.mxu1 %v17980_v17  ;;  %v17990_v57 = vld [vmem:[#allocation84_spill] sm:$0xff]  ;;  %v17991_v17 = vld [vmem:[#allocation85_spill] sm:$0xff] }
 0x428   :  { %11250 = vmatpush1.bf16.msra.mxu0 %v17981_v38  ;;  %11282 = vmatpush1.bf16.msra.mxu1 %v17982_v42  ;;  %v17992_v38 = vld [vmem:[#allocation86_spill] sm:$0xff]  ;;  %v17993_v42 = vld [vmem:[#allocation87_spill] sm:$0xff] }
 0x429   :  { %11252 = vmatprep.subr.bf16.mxu0 %v17983_v18  ;;  %11284 = vmatprep.subr.bf16.mxu1 %v17984_v1  ;;  %v17994_v18 = vld [vmem:[#allocation88_spill] sm:$0xff]  ;;  %v17995_v1 = vld [vmem:[#allocation89_spill] sm:$0xff] }
 0x42c   :  { %11254 = vmatpush1.bf16.msra.mxu0 %v17985_v37  ;;  %11286 = vmatpush1.bf16.msra.mxu1 %v17986_v25  ;;  %v17996_v37 = vld [vmem:[#allocation90_spill] sm:$0xff]  ;;  %v17997_v25 = vld [vmem:[#allocation91_spill] sm:$0xff] }
 0x42d   :  { %11256 = vmatprep.subr.bf16.mxu0 %v17987_v34  ;;  %11288 = vmatprep.subr.bf16.mxu1 %v17988_v0  ;;  %v17998_v34 = vld [vmem:[#allocation92_spill] sm:$0xff]  ;;  %v17999_v0 = vld [vmem:[#allocation93_spill] sm:$0xff] }
 0x430   :  { %11258 = vmatpush1.bf16.msra.mxu0 %v17989_v20  ;;  %11290 = vmatpush1.bf16.msra.mxu1 %v17990_v57  ;;  %v18000_v20 = vld [vmem:[#allocation94_spill] sm:$0xff]  ;;  %v18001_v57 = vld [vmem:[#allocation95_spill] sm:$0xff] }
 0x431   :  { %11260 = vmatprep.subr.bf16.mxu0 %v17991_v17  ;;  %11292 = vmatprep.subr.bf16.mxu1 %v17992_v38  ;;  %v18002_v17 = vld [vmem:[#allocation96_spill] sm:$0xff]  ;;  %v18003_v38 = vld [vmem:[#allocation97_spill] sm:$0xff] }
 0x434   :  { %11262 = vmatpush1.bf16.msra.mxu0 %v17993_v42  ;;  %11294 = vmatpush1.bf16.msra.mxu1 %v17994_v18  ;;  %v18004_v42 = vld [vmem:[#allocation98_spill] sm:$0xff] }
 0x435   :  { %11264 = vmatprep.subr.bf16.mxu0 %v17995_v1  ;;  %11296 = vmatprep.subr.bf16.mxu1 %v17996_v37 }
 0x438   :  { %11266 = vmatpush1.bf16.msra.mxu0 %v17997_v25  ;;  %11298 = vmatpush1.bf16.msra.mxu1 %v17998_v34 }
 0x439   :  { %11268 = vmatprep.subr.bf16.mxu0 %v17999_v0  ;;  %11300 = vmatprep.subr.bf16.mxu1 %v18000_v20 }
 0x43c   :  { %11270 = vmatpush1.bf16.msra.mxu0 %v18001_v57  ;;  %11302 = vmatpush1.bf16.msra.mxu1 %v18002_v17 }
 0x43d   :  { %11304 = vmatprep.subr.bf16.mxu0 %v18003_v38  ;;  %11336 = vmatprep.subr.bf16.mxu1 %v18004_v42 }
 0x4d2   :  { %v1937_v18 = vpop.f32.mrb[16].mxu0  ;;  %v2008_v1 = vpop.f32.mrb[16].mxu1 }
 0x4d3   :  { %v2017_v31 = vrot.slane %v1937_v18, 6  ;;  %v2021_v37 = vrot.slane %v1937_v18, 7  ;;  %v2019_v3 = vrot.slane %v2008_v1, 6  ;;  %v2023_v25 = vrot.slane %v2008_v1, 7  ;;  %v1939_v10 = vpop.f32.mrb[17].mxu0  ;;  %v2010_v34 = vpop.f32.mrb[17].mxu1 }
 0x4d4   :  { %v2018_v43 = vrot.slane %v1939_v10, 6  ;;  %v2022_v0 = vrot.slane %v1939_v10, 7  ;;  %v2020_v48 = vrot.slane %v2010_v34, 6  ;;  %v2024_v20 = vrot.slane %v2010_v34, 7 }
 0x4d5   :  { %v2033_v57 = vadd.f32 %v2017_v31, %v17955_v8  ;;  %v2037_v17 = vadd.f32 %v2021_v37, %v18005_v40  ;;  %v2035_v38 = vadd.f32 %v2019_v3, %v17956_v58  ;;  %v2039_v42 = vadd.f32 %v2023_v25, %v18006_v28 }
 0x4d6   :  { %v2034_v6 = vadd.f32 %v2018_v43, %v18007_v53  ;;  %v2038_v18 = vadd.f32 %v2022_v0, %v18008_v26  ;;  %v2036_v1 = vadd.f32 %v2020_v48, %v17959_v19  ;;  %v2040_v54 = vadd.f32 %v2024_v20, %v18009_v13  ;;  %v18011_v43 = vld [vmem:[#allocation139_spill] sm:$0xff] }
 0x4d7   :  { %v2041_v10 = vadd.f32 %v2033_v57, %v15283_v15  ;;  %v2045_v34 = vadd.f32 %v2037_v17, %v15283_v15  ;;  %v2043_v48 = vadd.f32 %v2035_v38, %v18011_v43  ;;  %v2047_v0 = vadd.f32 %v2039_v42, %v18011_v43  ;;  %v18012_v17 = vld [vmem:[#allocation137_spill] sm:$0xff] }
 0x4d8   :  { %v2042_v31 = vadd.f32 %v2034_v6, %v18010_v22  ;;  %v2046_v37 = vadd.f32 %v2038_v18, %v18010_v22  ;;  %v2044_v6 = vadd.f32 %v2036_v1, %v18012_v17  ;;  %v2089_v1 = vrot.slane %v15458_v60, 7 }
 0x4d9   :  { %v9568_v40 = vmul.f32 -1.442695, %v2041_v10  ;;  %v9569_v3 = vmul.f32 -1.442695, %v2045_v34  ;;  %v2048_v10 = vadd.f32 %v2040_v54, %v18012_v17 }
 0x4da   :  { %v9570_v58 = vmul.f32 -1.442695, %v2042_v31  ;;  %v9571_v25 = vmul.f32 -1.442695, %v2046_v37  ;;  %v9572_v38 = vmul.f32 -1.442695, %v2044_v6 }
 0x4db   :  { %13410 = vpow2.f32 %v9568_v40  ;;  %v9573_v42 = vmul.f32 -1.442695, %v2048_v10 }
 0x4dc   :  { %13412 = vpow2.f32 %v9569_v3 }
 0x4dd   :  { %13414 = vpow2.f32 %v9570_v58 }
 0x4de   :  { %13416 = vpow2.f32 %v9571_v25  ;;  %v2090_v25 = vrot.slane %v15460_v56, 7 }
 0x4df   :  { %13418 = vtanh.f32 %v2043_v48 }
 0x4e0   :  { %13420 = vtanh.f32 %v2047_v0 }
 0x4e5   :  { %v13411_v20 = vpop.eup %13410 }
 0x4e6   :  { %v13413_v57 = vpop.eup %13412  ;;  %v2055_v13 = vadd.f32 1.0, %v13411_v20 }
 0x4e7   :  { %v13415_v15 = vpop.eup %13414  ;;  %v2056_v18 = vadd.f32 1.0, %v13413_v57 }
 0x4e8   :  { %v13417_v34 = vpop.eup %13416  ;;  %13422 = vrcp.f32 %v2055_v13  ;;  %v2067_v40 = vadd.f32 1.0, %v13415_v15 }
 0x4e9   :  { %13424 = vrcp.f32 %v2056_v18  ;;  %v2068_v58 = vadd.f32 1.0, %v13417_v34  ;;  %v13419_v31 = vpop.eup %13418 }
 0x4ea   :  { %13426 = vrcp.f32 %v2067_v40  ;;  %v13421_v37 = vpop.eup %13420 }
 0x4eb   :  { %13428 = vrcp.f32 %v2068_v58 }
 0x4ec   :  { %13430 = vpow2.f32 %v9572_v38 }
 0x4ed   :  { %13432 = vpow2.f32 %v9573_v42 }
 0x4f2   :  { %v13423_v3 = vpop.eup %13422  ;;  %v2175_v48 = vpop.f32.mrb[18].mxu0 }
 0x4f3   :  { %v2246_v54 = vpop.f32.mrb[18].mxu1  ;;  %v13425_v0 = vpop.eup %13424  ;;  %v2095_v13 = vmul.f32 %v13423_v3, %v13419_v31  ;;  %v2255_v15 = vrot.slane %v2175_v48, 3  ;;  %v2259_v20 = vrot.slane %v2175_v48, 4  ;;  %v18013_v31 = vld [vmem:[#allocation130_spill] sm:$0xff] }
 0x4f4   :  { %v2257_v57 = vrot.slane %v2246_v54, 3  ;;  %v2177_v18 = vpop.f32.mrb[19].mxu0  ;;  %v2248_v6 = vpop.f32.mrb[19].mxu1  ;;  %v2096_v10 = vmul.f32 %v13425_v0, %v13421_v37  ;;  %v2261_v40 = vrot.slane %v2246_v54, 4  ;;  %v18014_v48 = vld [vmem:[#allocation126_spill] sm:$0xff] }
 0x4f5   :  { %v13427_v34 = vpop.eup %13426  ;;  %v2256_v58 = vrot.slane %v2177_v18, 3  ;;  %v2260_v38 = vrot.slane %v2177_v18, 4  ;;  %v2271_v60 = vadd.f32 %v2255_v15, %v15254_v61  ;;  %v2275_v56 = vadd.f32 %v2259_v20, %v15262_v62 }
 0x4f6   :  { %v13429_v42 = vpop.eup %13428  ;;  %v2093_v17 = vmul.f32 %v13427_v34, %v2089_v1  ;;  %v2273_v43 = vadd.f32 %v2257_v57, %v15258_v5  ;;  %v2277_v3 = vadd.f32 %v2261_v40, %v18013_v31  ;;  %v2258_v0 = vrot.slane %v2248_v6, 3 }
 0x4f7   :  { %v2094_v22 = vmul.f32 %v13429_v42, %v2090_v25  ;;  %v2272_v19 = vadd.f32 %v2256_v58, %v18014_v48  ;;  %v2276_v26 = vadd.f32 %v2260_v38, %v15264_v55  ;;  %v2279_v37 = vadd.f32 %v2271_v60, %v15315_v16  ;;  %v13431_v18 = vpop.eup %13430 }
 0x4f8   :  { %v2283_v54 = vadd.f32 %v2275_v56, %v15315_v16  ;;  %v2262_v20 = vrot.slane %v2248_v6, 4  ;;  %v13433_v34 = vpop.eup %13432  ;;  %v2274_v40 = vadd.f32 %v2258_v0, %v15260_v4  ;;  %v2081_v55 = vadd.f32 1.0, %v13431_v18 }
 0x4f9   :  { %v2280_v1 = vadd.f32 %v2272_v19, %v15318_v51  ;;  %v2284_v15 = vadd.f32 %v2276_v26, %v15318_v51  ;;  %v9574_v57 = vmul.f32 -1.442695, %v2279_v37  ;;  %v15576_v60 = vadd.f32 %v2095_v13, %v2093_v17 }
 0x4fa   :  { %v9575_v25 = vmul.f32 -1.442695, %v2283_v54  ;;  %v2278_v38 = vadd.f32 %v2262_v20, %v15268_v47  ;;  %v15578_v56 = vadd.f32 %v2096_v10, %v2094_v22  ;;  %v2082_v16 = vadd.f32 1.0, %v13433_v34 }
 0x4fb   :  { %v9576_v42 = vmul.f32 -1.442695, %v2280_v1  ;;  %v9577_v58 = vmul.f32 -1.442695, %v2284_v15  ;;  %13434 = vpow2.f32 %v9574_v57  ;;  %v2282_v19 = vadd.f32 %v2274_v40, %v15337_v41 }
 0x4fc   :  { %13436 = vpow2.f32 %v9575_v25  ;;  %v2286_v26 = vadd.f32 %v2278_v38, %v15337_v41  ;;  %v2281_v6 = vadd.f32 %v2273_v43, %v15340_v32  ;;  %v2285_v37 = vadd.f32 %v2277_v3, %v15340_v32 }
 0x4fd   :  { %13438 = vpow2.f32 %v9576_v42  ;;  %v9578_v17 = vmul.f32 -1.442695, %v2282_v19 }
 0x4fe   :  { %13440 = vpow2.f32 %v9577_v58  ;;  %v9579_v22 = vmul.f32 -1.442695, %v2286_v26 }
 0x4ff   :  { %13442 = vrcp.f32 %v2081_v55 }
 0x500   :  { %13444 = vrcp.f32 %v2082_v16 }
 0x501   :  { %13446 = vtanh.f32 %v15576_v60 }
 0x502   :  { %13448 = vtanh.f32 %v15578_v56 }
 0x503   :  { %13450 = vtanh.f32 %v2281_v6 }
 0x504   :  { %13452 = vtanh.f32 %v2285_v37 }
 0x505   :  { %v13435_v13 = vpop.eup %13434  ;;  %13454 = vpow2.f32 %v9578_v17 }
 0x506   :  { %v13437_v10 = vpop.eup %13436  ;;  %v2293_v54 = vadd.f32 1.0, %v13435_v13  ;;  %13456 = vpow2.f32 %v9579_v22  ;;  %v2327_v22 = vrot.slane %v15481_v46, 1 }
 0x507   :  { %v13439_v55 = vpop.eup %13438  ;;  %v2294_v0 = vadd.f32 1.0, %v13437_v10 }
 0x508   :  { %v13441_v16 = vpop.eup %13440  ;;  %13458 = vrcp.f32 %v2293_v54  ;;  %v2305_v43 = vadd.f32 1.0, %v13439_v55  ;;  %v2328_v55 = vrot.slane %v15483_v14, 1 }
 0x509   :  { %v13443_v18 = vpop.eup %13442  ;;  %13460 = vrcp.f32 %v2294_v0  ;;  %v2306_v3 = vadd.f32 1.0, %v13441_v16 }
 0x50a   :  { %v13445_v1 = vpop.eup %13444  ;;  %13462 = vrcp.f32 %v2305_v43 }
 0x50b   :  { %v13447_v15 = vpop.eup %13446  ;;  %13464 = vrcp.f32 %v2306_v3 }
 0x50c   :  { %v13449_v20 = vpop.eup %13448  ;;  %v2101_v34 = vmul.f32 %v13447_v15, %v13443_v18 }
 0x50d   :  { %v2102_v57 = vmul.f32 %v13449_v20, %v13445_v1  ;;  %v13451_v25 = vpop.eup %13450 }
 0x50e   :  { %v2343_v40 = vrot.slane %v2101_v34, 2  ;;  %v13453_v42 = vpop.eup %13452 }
 0x50f   :  { %v2344_v58 = vrot.slane %v2102_v57, 1  ;;  %v13455_v38 = vpop.eup %13454 }
 0x510   :  { %v13457_v19 = vpop.eup %13456  ;;  %v2319_v13 = vadd.f32 1.0, %v13455_v38  ;;  %v18017_v38 = vld [vmem:[#allocation111_spill] sm:$0xff] }
 0x511   :  { %v2345_v26 = vsel %vm1397_vm4, %v2344_v58, %v2343_v40  ;;  %v2320_v0 = vadd.f32 1.0, %v13457_v19  ;;  %v18015_v40 = vld [vmem:[#allocation109_spill] sm:$0xff]  ;;  %v18016_v58 = vld [vmem:[#allocation110_spill] sm:$0xff] }
 0x512   :  { %v13459_v6 = vpop.eup %13458  ;;  %2412 = vmatmul.mubr.f32.vlgmr.msra.gmra.mrb[20].mxu0 %v2345_v26  ;;  %2483 = vmatmul.mubr.f32.vlgmr.msra.gmra.mrb[20].mxu1 %v2345_v26  ;;  %13466 = vrcp.f32 %v2319_v13  ;;  %v18018_v26 = vld [vmem:[#allocation112_spill] sm:$0xff]  ;;  %v18023_v13 = vld [vmem:[#allocation117_spill] sm:$0xff] }
 0x513   :  { %v13461_v37 = vpop.eup %13460  ;;  %v2333_v17 = vmul.f32 %v13459_v6, %v13451_v25  ;;  %11306 = vmatpush1.bf16.msra.mxu0 %v15051_v21  ;;  %11338 = vmatpush1.bf16.msra.mxu1 %v15055_v23  ;;  %13468 = vrcp.f32 %v2320_v0  ;;  %v18019_v6 = vld [vmem:[#allocation113_spill] sm:$0xff]  ;;  %v18027_v0 = vld [vmem:[#allocation68_spill] sm:$0xff] }
 0x514   :  { %v13463_v10 = vpop.eup %13462  ;;  %v2334_v54 = vmul.f32 %v13461_v37, %v13453_v42  ;;  %11308 = vmatprep.subr.bf16.mxu0 %v15057_v24  ;;  %11340 = vmatprep.subr.bf16.mxu1 %v15063_v35  ;;  %v18020_v37 = vld [vmem:[#allocation114_spill] sm:$0xff] }
 0x515   :  { %v13465_v16 = vpop.eup %13464  ;;  %v2331_v43 = vmul.f32 %v13463_v10, %v2327_v22  ;;  %2649 = vmatprep.mubr.f32.mxu0 %v17887_v33  ;;  %2720 = vmatprep.mubr.f32.mxu1 %v17887_v33  ;;  %v18022_v22 = vld [vmem:[#allocation116_spill] sm:$0xff]  ;;  %v18024_v10 = vld [vmem:[#allocation65_spill] sm:$0xff] }
 0x516   :  { %v2332_v46 = vmul.f32 %v13465_v16, %v2328_v55  ;;  %v18026_v55 = vld [vmem:[#allocation67_spill] sm:$0xff]  ;;  %v18028_v16 = vld [vmem:[#allocation69_spill] sm:$0xff] }
 0x517   :  { %11310 = vmatpush1.bf16.msra.mxu0 %v15073_v44  ;;  %11342 = vmatpush1.bf16.msra.mxu1 %v15077_v49  ;;  %v15597_v18 = vadd.f32 %v2333_v17, %v2331_v43  ;;  %v18021_v17 = vld [vmem:[#allocation115_spill] sm:$0xff]  ;;  %v18029_v43 = vld [vmem:[#allocation70_spill] sm:$0xff] }
 0x518   :  { %11312 = vmatprep.subr.bf16.mxu0 %v15079_v50  ;;  %11344 = vmatprep.subr.bf16.mxu1 %v15085_v59  ;;  %v15601_v14 = vadd.f32 %v2334_v54, %v2332_v46  ;;  %v18025_v54 = vld [vmem:[#allocation66_spill] sm:$0xff]  ;;  %v18030_v46 = vld [vmem:[#allocation71_spill] sm:$0xff] }
 0x519   :  { %13470 = vtanh.f32 %v15597_v18 }
 0x51a   :  { %13472 = vtanh.f32 %v15601_v14 }
 0x51b   :  { %11314 = vmatpush1.bf16.msra.mxu0 %v15095_v11  ;;  %11346 = vmatpush1.bf16.msra.mxu1 %v15099_v12 }
 0x51c   :  { %11316 = vmatprep.subr.bf16.mxu0 %v17913_v30  ;;  %11348 = vmatprep.subr.bf16.mxu1 %v17914_v63  ;;  %v13467_v3 = vpop.eup %13466 }
 0x51d   :  { %v13469_v1 = vpop.eup %13468 }
 0x51f   :  { %11318 = vmatpush1.bf16.msra.mxu0 %v17915_v29  ;;  %11350 = vmatpush1.bf16.msra.mxu1 %v17916_v52 }
 0x520   :  { %11320 = vmatprep.subr.bf16.mxu0 %v17917_v36  ;;  %11352 = vmatprep.subr.bf16.mxu1 %v17918_v27 }
 0x523   :  { %v13471_v15 = vpop.eup %13470  ;;  %11322 = vmatpush1.bf16.msra.mxu0 %v17919_v39  ;;  %11354 = vmatpush1.bf16.msra.mxu1 %v17920_v2 }
 0x524   :  { %v13473_v20 = vpop.eup %13472  ;;  %11324 = vmatprep.subr.bf16.mxu0 %v17921_v7  ;;  %11356 = vmatprep.subr.bf16.mxu1 %v17922_v45  ;;  %v2339_v34 = vmul.f32 %v13471_v15, %v13467_v3  ;;  %v18031_v3 = vld [vmem:[#allocation72_spill] sm:$0xff]  ;;  %v18033_v15 = vld [vmem:[#allocation74_spill] sm:$0xff] }
 0x525   :  { %v2340_v57 = vmul.f32 %v13473_v20, %v13469_v1  ;;  %v18032_v1 = vld [vmem:[#allocation73_spill] sm:$0xff]  ;;  %v18034_v20 = vld [vmem:[#allocation75_spill] sm:$0xff] }
 0x526   :  { %v2581_v25 = vrot.slane %v2339_v34, 5  ;;  %v18035_v34 = vld [vmem:[#allocation76_spill] sm:$0xff] }
 0x527   :  { %11326 = vmatpush1.bf16.msra.mxu0 %v15155_v9  ;;  %11358 = vmatpush1.bf16.msra.mxu1 %v18015_v40  ;;  %v2582_v42 = vrot.slane %v2340_v57, 4  ;;  %v18036_v57 = vld [vmem:[#allocation77_spill] sm:$0xff]  ;;  %v18064_v40 = vld [vmem:[#allocation136_spill] sm:$0xff] }
 0x528   :  { %11328 = vmatprep.subr.bf16.mxu0 %v18016_v58  ;;  %11360 = vmatprep.subr.bf16.mxu1 %v18017_v38  ;;  %v18063_v58 = vld [vmem:[#allocation135_spill] sm:$0xff] }
 0x529   :  { %v2583_v19 = vsel %vm1397_vm4, %v2582_v42, %v2581_v25  ;;  %v18037_v25 = vld [vmem:[#allocation78_spill] sm:$0xff]  ;;  %v18038_v42 = vld [vmem:[#allocation79_spill] sm:$0xff] }
 0x52b   :  { %11330 = vmatpush1.bf16.msra.mxu0 %v18018_v26  ;;  %11362 = vmatpush1.bf16.msra.mxu1 %v18019_v6  ;;  %v18061_v6 = vld [vmem:[#allocation121_spill] sm:$0xff] }
 0x52c   :  { %11332 = vmatprep.subr.bf16.mxu0 %v18020_v37  ;;  %11364 = vmatprep.subr.bf16.mxu1 %v18021_v17  ;;  %v18060_v37 = vld [vmem:[#allocation123_spill] sm:$0xff]  ;;  %v18062_v26 = vld [vmem:[#allocation125_spill] sm:$0xff] }
 0x52f   :  { %11334 = vmatpush1.bf16.msra.mxu0 %v18022_v22  ;;  %11366 = vmatpush1.bf16.msra.mxu1 %v18023_v13  ;;  %v18058_v13 = vld [vmem:[#allocation122_spill] sm:$0xff]  ;;  %v18059_v22 = vld [vmem:[#allocation120_spill] sm:$0xff] }
 0x530   :  { %11368 = vmatprep.subr.bf16.mxu0 %v18024_v10  ;;  %11400 = vmatprep.subr.bf16.mxu1 %v18025_v54 }
 0x532   :  { %2650 = vmatmul.mubr.f32.vlgmr.msra.gmra.mrb[22].mxu0 %v2583_v19  ;;  %2721 = vmatmul.mubr.f32.vlgmr.msra.gmra.mrb[22].mxu1 %v2583_v19  ;;  %v18039_v19 = vld [vmem:[#allocation80_spill] sm:$0xff] }
 0x533   :  { %11370 = vmatpush1.bf16.msra.mxu0 %v18026_v55  ;;  %11402 = vmatpush1.bf16.msra.mxu1 %v18027_v0 }
 0x534   :  { %11372 = vmatprep.subr.bf16.mxu0 %v18028_v16  ;;  %11404 = vmatprep.subr.bf16.mxu1 %v18029_v43  ;;  %v18040_v43 = vld [vmem:[#allocation81_spill] sm:$0xff] }
 0x535   :  { %2887 = vmatprep.mubr.f32.mxu0 %v17887_v33  ;;  %2958 = vmatprep.mubr.f32.mxu1 %v17887_v33 }
 0x537   :  { %11374 = vmatpush1.bf16.msra.mxu0 %v18030_v46  ;;  %11406 = vmatpush1.bf16.msra.mxu1 %v18031_v3  ;;  %v18041_v46 = vld [vmem:[#allocation82_spill] sm:$0xff]  ;;  %v18042_v3 = vld [vmem:[#allocation83_spill] sm:$0xff] }
 0x538   :  { %11376 = vmatprep.subr.bf16.mxu0 %v18032_v1  ;;  %11408 = vmatprep.subr.bf16.mxu1 %v18033_v15  ;;  %v18043_v1 = vld [vmem:[#allocation84_spill] sm:$0xff]  ;;  %v18044_v15 = vld [vmem:[#allocation85_spill] sm:$0xff] }
 0x53b   :  { %11378 = vmatpush1.bf16.msra.mxu0 %v18034_v20  ;;  %11410 = vmatpush1.bf16.msra.mxu1 %v18035_v34  ;;  %v18045_v20 = vld [vmem:[#allocation86_spill] sm:$0xff]  ;;  %v18046_v34 = vld [vmem:[#allocation87_spill] sm:$0xff] }
 0x53c   :  { %11380 = vmatprep.subr.bf16.mxu0 %v18036_v57  ;;  %11412 = vmatprep.subr.bf16.mxu1 %v18037_v25  ;;  %v18047_v57 = vld [vmem:[#allocation88_spill] sm:$0xff]  ;;  %v18048_v25 = vld [vmem:[#allocation89_spill] sm:$0xff] }
 0x53f   :  { %11382 = vmatpush1.bf16.msra.mxu0 %v18038_v42  ;;  %11414 = vmatpush1.bf16.msra.mxu1 %v18039_v19  ;;  %v18049_v42 = vld [vmem:[#allocation90_spill] sm:$0xff]  ;;  %v18050_v19 = vld [vmem:[#allocation91_spill] sm:$0xff] }
 0x540   :  { %11384 = vmatprep.subr.bf16.mxu0 %v18040_v43  ;;  %11416 = vmatprep.subr.bf16.mxu1 %v18041_v46  ;;  %v18051_v43 = vld [vmem:[#allocation92_spill] sm:$0xff]  ;;  %v18052_v46 = vld [vmem:[#allocation93_spill] sm:$0xff] }
 0x543   :  { %11386 = vmatpush1.bf16.msra.mxu0 %v18042_v3  ;;  %11418 = vmatpush1.bf16.msra.mxu1 %v18043_v1  ;;  %v18053_v3 = vld [vmem:[#allocation94_spill] sm:$0xff]  ;;  %v18054_v1 = vld [vmem:[#allocation95_spill] sm:$0xff] }
 0x544   :  { %11388 = vmatprep.subr.bf16.mxu0 %v18044_v15  ;;  %11420 = vmatprep.subr.bf16.mxu1 %v18045_v20  ;;  %v18055_v15 = vld [vmem:[#allocation96_spill] sm:$0xff]  ;;  %v18056_v20 = vld [vmem:[#allocation97_spill] sm:$0xff] }
 0x547   :  { %11390 = vmatpush1.bf16.msra.mxu0 %v18046_v34  ;;  %11422 = vmatpush1.bf16.msra.mxu1 %v18047_v57  ;;  %v18057_v34 = vld [vmem:[#allocation98_spill] sm:$0xff] }
 0x548   :  { %11392 = vmatprep.subr.bf16.mxu0 %v18048_v25  ;;  %11424 = vmatprep.subr.bf16.mxu1 %v18049_v42 }
 0x54b   :  { %11394 = vmatpush1.bf16.msra.mxu0 %v18050_v19  ;;  %11426 = vmatpush1.bf16.msra.mxu1 %v18051_v43 }
 0x54c   :  { %11396 = vmatprep.subr.bf16.mxu0 %v18052_v46  ;;  %11428 = vmatprep.subr.bf16.mxu1 %v18053_v3 }
 0x54f   :  { %11398 = vmatpush1.bf16.msra.mxu0 %v18054_v1  ;;  %11430 = vmatpush1.bf16.msra.mxu1 %v18055_v15 }
 0x550   :  { %11432 = vmatprep.subr.bf16.mxu0 %v18056_v20  ;;  %11464 = vmatprep.subr.bf16.mxu1 %v18057_v34 }
 0x5e5   :  { %v2413_v57 = vpop.f32.mrb[20].mxu0  ;;  %v2484_v25 = vpop.f32.mrb[20].mxu1 }
 0x5e6   :  { %v2493_v16 = vrot.slane %v2413_v57, 5  ;;  %v2497_v42 = vrot.slane %v2413_v57, 6  ;;  %v2495_v0 = vrot.slane %v2484_v25, 5  ;;  %v2499_v19 = vrot.slane %v2484_v25, 6  ;;  %v2415_v55 = vpop.f32.mrb[21].mxu0  ;;  %v2486_v43 = vpop.f32.mrb[21].mxu1 }
 0x5e7   :  { %v2494_v54 = vrot.slane %v2415_v55, 5  ;;  %v2498_v46 = vrot.slane %v2415_v55, 6  ;;  %v2496_v10 = vrot.slane %v2486_v43, 5  ;;  %v2500_v3 = vrot.slane %v2486_v43, 6 }
 0x5e8   :  { %v2509_v1 = vadd.f32 %v2493_v16, %v17955_v8  ;;  %v2513_v15 = vadd.f32 %v2497_v42, %v18058_v13  ;;  %v2511_v20 = vadd.f32 %v2495_v0, %v18059_v22  ;;  %v2515_v34 = vadd.f32 %v2499_v19, %v18006_v28 }
 0x5e9   :  { %v2510_v17 = vadd.f32 %v2494_v54, %v18007_v53  ;;  %v2514_v57 = vadd.f32 %v2498_v46, %v18060_v37  ;;  %v2512_v25 = vadd.f32 %v2496_v10, %v18061_v6  ;;  %v2516_v38 = vadd.f32 %v2500_v3, %v18062_v26  ;;  %v18065_v54 = vld [vmem:[#allocation139_spill] sm:$0xff]  ;;  %v18068_v37 = vld [vmem:[#allocation140_spill] sm:$0xff] }
 0x5ea   :  { %v2517_v55 = vadd.f32 %v2509_v1, %v18063_v58  ;;  %v2521_v43 = vadd.f32 %v2513_v15, %v18063_v58  ;;  %v2519_v10 = vadd.f32 %v2511_v20, %v18065_v54  ;;  %v2523_v46 = vadd.f32 %v2515_v34, %v18065_v54  ;;  %v18066_v15 = vld [vmem:[#allocation137_spill] sm:$0xff] }
 0x5eb   :  { %v2518_v16 = vadd.f32 %v2510_v17, %v18064_v40  ;;  %v2522_v42 = vadd.f32 %v2514_v57, %v18064_v40  ;;  %v2520_v17 = vadd.f32 %v2512_v25, %v18066_v15  ;;  %v2565_v25 = vrot.slane %v15576_v60, 7 }
 0x5ec   :  { %v9580_v13 = vmul.f32 -1.442695, %v2517_v55  ;;  %v9581_v0 = vmul.f32 -1.442695, %v2521_v43  ;;  %v2524_v55 = vadd.f32 %v2516_v38, %v18066_v15 }
 0x5ed   :  { %v9582_v22 = vmul.f32 -1.442695, %v2518_v16  ;;  %v9583_v19 = vmul.f32 -1.442695, %v2522_v42  ;;  %v9584_v20 = vmul.f32 -1.442695, %v2520_v17 }
 0x5ee   :  { %13474 = vpow2.f32 %v9580_v13  ;;  %v9585_v34 = vmul.f32 -1.442695, %v2524_v55 }
 0x5ef   :  { %13476 = vpow2.f32 %v9581_v0 }
 0x5f0   :  { %13478 = vpow2.f32 %v9582_v22 }
 0x5f1   :  { %13480 = vpow2.f32 %v9583_v19  ;;  %v2566_v19 = vrot.slane %v15578_v56, 7 }
 0x5f2   :  { %13482 = vtanh.f32 %v2519_v10 }
 0x5f3   :  { %13484 = vtanh.f32 %v2523_v46 }
 0x5f8   :  { %v13475_v3 = vpop.eup %13474 }
 0x5f9   :  { %v13477_v1 = vpop.eup %13476  ;;  %v2531_v26 = vadd.f32 1.0, %v13475_v3 }
 0x5fa   :  { %v13479_v58 = vpop.eup %13478  ;;  %v2532_v57 = vadd.f32 1.0, %v13477_v1 }
 0x5fb   :  { %v13481_v43 = vpop.eup %13480  ;;  %13486 = vrcp.f32 %v2531_v26  ;;  %v2543_v13 = vadd.f32 1.0, %v13479_v58 }
 0x5fc   :  { %13488 = vrcp.f32 %v2532_v57  ;;  %v2544_v22 = vadd.f32 1.0, %v13481_v43  ;;  %v13483_v16 = vpop.eup %13482 }
 0x5fd   :  { %13490 = vrcp.f32 %v2543_v13  ;;  %v13485_v42 = vpop.eup %13484 }
 0x5fe   :  { %13492 = vrcp.f32 %v2544_v22 }
 0x5ff   :  { %13494 = vpow2.f32 %v9584_v20 }
 0x600   :  { %13496 = vpow2.f32 %v9585_v34 }
 0x605   :  { %v13487_v0 = vpop.eup %13486  ;;  %v2651_v10 = vpop.f32.mrb[22].mxu0 }
 0x606   :  { %v2722_v38 = vpop.f32.mrb[22].mxu1  ;;  %v13489_v46 = vpop.eup %13488  ;;  %v2571_v26 = vmul.f32 %v13487_v0, %v13483_v16  ;;  %v2731_v58 = vrot.slane %v2651_v10, 4  ;;  %v2735_v3 = vrot.slane %v2651_v10, 5  ;;  %v18067_v10 = vld [vmem:[#allocation129_spill] sm:$0xff] }
 0x607   :  { %v2733_v1 = vrot.slane %v2722_v38, 4  ;;  %v2653_v57 = vpop.f32.mrb[23].mxu0  ;;  %v2724_v17 = vpop.f32.mrb[23].mxu1  ;;  %v2572_v55 = vmul.f32 %v13489_v46, %v13485_v42  ;;  %v2737_v13 = vrot.slane %v2722_v38, 5 }
 0x608   :  { %v13491_v43 = vpop.eup %13490  ;;  %v2732_v22 = vrot.slane %v2653_v57, 4  ;;  %v2736_v20 = vrot.slane %v2653_v57, 5  ;;  %v2747_v60 = vadd.f32 %v2731_v58, %v15254_v61  ;;  %v2751_v56 = vadd.f32 %v2735_v3, %v15262_v62 }
 0x609   :  { %v13493_v34 = vpop.eup %13492  ;;  %v2569_v15 = vmul.f32 %v13491_v43, %v2565_v25  ;;  %v2749_v54 = vadd.f32 %v2733_v1, %v15258_v5  ;;  %v2753_v16 = vadd.f32 %v2737_v13, %v18013_v31  ;;  %v2734_v46 = vrot.slane %v2724_v17, 4 }
 0x60a   :  { %v2570_v40 = vmul.f32 %v13493_v34, %v2566_v19  ;;  %v2748_v0 = vadd.f32 %v2732_v22, %v18014_v48  ;;  %v2752_v6 = vadd.f32 %v2736_v20, %v18067_v10  ;;  %v2755_v42 = vadd.f32 %v2747_v60, %v18068_v37  ;;  %v13495_v57 = vpop.eup %13494 }
 0x60b   :  { %v2759_v38 = vadd.f32 %v2751_v56, %v18068_v37  ;;  %v2738_v3 = vrot.slane %v2724_v17, 5  ;;  %v13497_v43 = vpop.eup %13496  ;;  %v2750_v13 = vadd.f32 %v2734_v46, %v15260_v4  ;;  %v2557_v10 = vadd.f32 1.0, %v13495_v57 }
 0x60c   :  { %v2756_v25 = vadd.f32 %v2748_v0, %v15318_v51  ;;  %v2760_v58 = vadd.f32 %v2752_v6, %v15318_v51  ;;  %v9586_v1 = vmul.f32 -1.442695, %v2755_v42  ;;  %v15694_v60 = vadd.f32 %v2571_v26, %v2569_v15 }
 0x60d   :  { %v9587_v19 = vmul.f32 -1.442695, %v2759_v38  ;;  %v2754_v20 = vadd.f32 %v2738_v3, %v15268_v47  ;;  %v15696_v56 = vadd.f32 %v2572_v55, %v2570_v40  ;;  %v2558_v37 = vadd.f32 1.0, %v13497_v43 }
 0x60e   :  { %v9588_v34 = vmul.f32 -1.442695, %v2756_v25  ;;  %v9589_v22 = vmul.f32 -1.442695, %v2760_v58  ;;  %13498 = vpow2.f32 %v9586_v1  ;;  %v2758_v6 = vadd.f32 %v2750_v13, %v15337_v41 }
 0x60f   :  { %13500 = vpow2.f32 %v9587_v19  ;;  %v2762_v17 = vadd.f32 %v2754_v20, %v15337_v41  ;;  %v2757_v0 = vadd.f32 %v2749_v54, %v15340_v32  ;;  %v2761_v42 = vadd.f32 %v2753_v16, %v15340_v32 }
 0x610   :  { %13502 = vpow2.f32 %v9588_v34  ;;  %v9590_v15 = vmul.f32 -1.442695, %v2758_v6 }
 0x611   :  { %13504 = vpow2.f32 %v9589_v22  ;;  %v9591_v40 = vmul.f32 -1.442695, %v2762_v17 }
 0x612   :  { %13506 = vrcp.f32 %v2557_v10 }
 0x613   :  { %13508 = vrcp.f32 %v2558_v37 }
 0x614   :  { %13510 = vtanh.f32 %v15694_v60 }
 0x615   :  { %13512 = vtanh.f32 %v15696_v56 }
 0x616   :  { %13514 = vtanh.f32 %v2757_v0 }
 0x617   :  { %13516 = vtanh.f32 %v2761_v42 }
 0x618   :  { %v13499_v26 = vpop.eup %13498  ;;  %13518 = vpow2.f32 %v9590_v15 }
 0x619   :  { %v13501_v55 = vpop.eup %13500  ;;  %v2769_v38 = vadd.f32 1.0, %v13499_v26  ;;  %13520 = vpow2.f32 %v9591_v40  ;;  %v2803_v40 = vrot.slane %v15597_v18, 1 }
 0x61a   :  { %v13503_v10 = vpop.eup %13502  ;;  %v2770_v46 = vadd.f32 1.0, %v13501_v55 }
 0x61b   :  { %v13505_v37 = vpop.eup %13504  ;;  %13522 = vrcp.f32 %v2769_v38  ;;  %v2781_v54 = vadd.f32 1.0, %v13503_v10  ;;  %v2804_v10 = vrot.slane %v15601_v14, 1 }
 0x61c   :  { %v13507_v57 = vpop.eup %13506  ;;  %13524 = vrcp.f32 %v2770_v46  ;;  %v2782_v16 = vadd.f32 1.0, %v13505_v37 }
 0x61d   :  { %v13509_v25 = vpop.eup %13508  ;;  %13526 = vrcp.f32 %v2781_v54 }
 0x61e   :  { %v13511_v58 = vpop.eup %13510  ;;  %13528 = vrcp.f32 %v2782_v16 }
 0x61f   :  { %v13513_v3 = vpop.eup %13512  ;;  %v2577_v43 = vmul.f32 %v13511_v58, %v13507_v57 }
 0x620   :  { %v2578_v1 = vmul.f32 %v13513_v3, %v13509_v25  ;;  %v13515_v19 = vpop.eup %13514 }
 0x621   :  { %v2819_v13 = vrot.slane %v2577_v43, 3  ;;  %v13517_v34 = vpop.eup %13516 }
 0x622   :  { %v2820_v22 = vrot.slane %v2578_v1, 2  ;;  %v13519_v20 = vpop.eup %13518 }
 0x623   :  { %v13521_v6 = vpop.eup %13520  ;;  %v2795_v26 = vadd.f32 1.0, %v13519_v20  ;;  %v18071_v20 = vld [vmem:[#allocation111_spill] sm:$0xff] }
 0x624   :  { %v2821_v17 = vsel %vm1397_vm4, %v2820_v22, %v2819_v13  ;;  %v2796_v46 = vadd.f32 1.0, %v13521_v6  ;;  %v18069_v13 = vld [vmem:[#allocation109_spill] sm:$0xff]  ;;  %v18070_v22 = vld [vmem:[#allocation110_spill] sm:$0xff] }
 0x625   :  { %v13523_v0 = vpop.eup %13522  ;;  %2888 = vmatmul.mubr.f32.vlgmr.msra.gmra.mrb[24].mxu0 %v2821_v17  ;;  %2959 = vmatmul.mubr.f32.vlgmr.msra.gmra.mrb[24].mxu1 %v2821_v17  ;;  %13530 = vrcp.f32 %v2795_v26  ;;  %v18072_v17 = vld [vmem:[#allocation112_spill] sm:$0xff]  ;;  %v18077_v26 = vld [vmem:[#allocation117_spill] sm:$0xff] }
 0x626   :  { %v13525_v42 = vpop.eup %13524  ;;  %v2809_v15 = vmul.f32 %v13523_v0, %v13515_v19  ;;  %11434 = vmatpush1.bf16.msra.mxu0 %v15051_v21  ;;  %11466 = vmatpush1.bf16.msra.mxu1 %v15055_v23  ;;  %13532 = vrcp.f32 %v2796_v46  ;;  %v18073_v0 = vld [vmem:[#allocation113_spill] sm:$0xff]  ;;  %v18081_v46 = vld [vmem:[#allocation68_spill] sm:$0xff] }
 0x627   :  { %v13527_v55 = vpop.eup %13526  ;;  %v2810_v38 = vmul.f32 %v13525_v42, %v13517_v34  ;;  %11436 = vmatprep.subr.bf16.mxu0 %v15057_v24  ;;  %11468 = vmatprep.subr.bf16.mxu1 %v15063_v35  ;;  %v18074_v42 = vld [vmem:[#allocation114_spill] sm:$0xff] }
 0x628   :  { %v13529_v37 = vpop.eup %13528  ;;  %v2807_v54 = vmul.f32 %v13527_v55, %v2803_v40  ;;  %3125 = vmatprep.mubr.f32.mxu0 %v17887_v33  ;;  %3196 = vmatprep.mubr.f32.mxu1 %v17887_v33  ;;  %v18076_v40 = vld [vmem:[#allocation116_spill] sm:$0xff]  ;;  %v18078_v55 = vld [vmem:[#allocation65_spill] sm:$0xff] }
 0x629   :  { %v2808_v18 = vmul.f32 %v13529_v37, %v2804_v10  ;;  %v18080_v10 = vld [vmem:[#allocation67_spill] sm:$0xff]  ;;  %v18082_v37 = vld [vmem:[#allocation69_spill] sm:$0xff] }
 0x62a   :  { %11438 = vmatpush1.bf16.msra.mxu0 %v15073_v44  ;;  %11470 = vmatpush1.bf16.msra.mxu1 %v15077_v49  ;;  %v15715_v57 = vadd.f32 %v2809_v15, %v2807_v54  ;;  %v18075_v15 = vld [vmem:[#allocation115_spill] sm:$0xff]  ;;  %v18083_v54 = vld [vmem:[#allocation70_spill] sm:$0xff] }
 0x62b   :  { %11440 = vmatprep.subr.bf16.mxu0 %v15079_v50  ;;  %11472 = vmatprep.subr.bf16.mxu1 %v15085_v59  ;;  %v15719_v14 = vadd.f32 %v2810_v38, %v2808_v18  ;;  %v18079_v38 = vld [vmem:[#allocation66_spill] sm:$0xff]  ;;  %v18084_v18 = vld [vmem:[#allocation71_spill] sm:$0xff] }
 0x62c   :  { %13534 = vtanh.f32 %v15715_v57 }
 0x62d   :  { %13536 = vtanh.f32 %v15719_v14 }
 0x62e   :  { %11442 = vmatpush1.bf16.msra.mxu0 %v15095_v11  ;;  %11474 = vmatpush1.bf16.msra.mxu1 %v15099_v12 }
 0x62f   :  { %11444 = vmatprep.subr.bf16.mxu0 %v17913_v30  ;;  %11476 = vmatprep.subr.bf16.mxu1 %v17914_v63  ;;  %v13531_v16 = vpop.eup %13530 }
 0x630   :  { %v13533_v25 = vpop.eup %13532 }
 0x632   :  { %11446 = vmatpush1.bf16.msra.mxu0 %v17915_v29  ;;  %11478 = vmatpush1.bf16.msra.mxu1 %v17916_v52 }
 0x633   :  { %11448 = vmatprep.subr.bf16.mxu0 %v17917_v36  ;;  %11480 = vmatprep.subr.bf16.mxu1 %v17918_v27 }
 0x636   :  { %v13535_v58 = vpop.eup %13534  ;;  %11450 = vmatpush1.bf16.msra.mxu0 %v17919_v39  ;;  %11482 = vmatpush1.bf16.msra.mxu1 %v17920_v2 }
 0x637   :  { %v13537_v3 = vpop.eup %13536  ;;  %11452 = vmatprep.subr.bf16.mxu0 %v17921_v7  ;;  %11484 = vmatprep.subr.bf16.mxu1 %v17922_v45  ;;  %v2815_v43 = vmul.f32 %v13535_v58, %v13531_v16  ;;  %v18085_v16 = vld [vmem:[#allocation72_spill] sm:$0xff]  ;;  %v18087_v58 = vld [vmem:[#allocation74_spill] sm:$0xff] }
 0x638   :  { %v2816_v1 = vmul.f32 %v13537_v3, %v13533_v25  ;;  %v18086_v25 = vld [vmem:[#allocation73_spill] sm:$0xff]  ;;  %v18088_v3 = vld [vmem:[#allocation75_spill] sm:$0xff] }
 0x639   :  { %v3057_v19 = vrot.slane %v2815_v43, 4  ;;  %v18089_v43 = vld [vmem:[#allocation76_spill] sm:$0xff] }
 0x63a   :  { %11454 = vmatpush1.bf16.msra.mxu0 %v15155_v9  ;;  %11486 = vmatpush1.bf16.msra.mxu1 %v18069_v13  ;;  %v3058_v34 = vrot.slane %v2816_v1, 3  ;;  %v18090_v1 = vld [vmem:[#allocation77_spill] sm:$0xff]  ;;  %v18118_v13 = vld [vmem:[#allocation136_spill] sm:$0xff] }
 0x63b   :  { %11456 = vmatprep.subr.bf16.mxu0 %v18070_v22  ;;  %11488 = vmatprep.subr.bf16.mxu1 %v18071_v20  ;;  %v18117_v22 = vld [vmem:[#allocation135_spill] sm:$0xff] }
 0x63c   :  { %v3059_v6 = vsel %vm1397_vm4, %v3058_v34, %v3057_v19  ;;  %v18091_v19 = vld [vmem:[#allocation78_spill] sm:$0xff]  ;;  %v18092_v34 = vld [vmem:[#allocation79_spill] sm:$0xff] }
 0x63e   :  { %11458 = vmatpush1.bf16.msra.mxu0 %v18072_v17  ;;  %11490 = vmatpush1.bf16.msra.mxu1 %v18073_v0  ;;  %v18115_v0 = vld [vmem:[#allocation121_spill] sm:$0xff] }
 0x63f   :  { %11460 = vmatprep.subr.bf16.mxu0 %v18074_v42  ;;  %11492 = vmatprep.subr.bf16.mxu1 %v18075_v15  ;;  %v18114_v42 = vld [vmem:[#allocation123_spill] sm:$0xff]  ;;  %v18116_v17 = vld [vmem:[#allocation125_spill] sm:$0xff] }
 0x642   :  { %11462 = vmatpush1.bf16.msra.mxu0 %v18076_v40  ;;  %11494 = vmatpush1.bf16.msra.mxu1 %v18077_v26  ;;  %v18112_v26 = vld [vmem:[#allocation122_spill] sm:$0xff]  ;;  %v18113_v40 = vld [vmem:[#allocation120_spill] sm:$0xff] }
 0x643   :  { %11496 = vmatprep.subr.bf16.mxu0 %v18078_v55  ;;  %11528 = vmatprep.subr.bf16.mxu1 %v18079_v38 }
 0x645   :  { %3126 = vmatmul.mubr.f32.vlgmr.msra.gmra.mrb[26].mxu0 %v3059_v6  ;;  %3197 = vmatmul.mubr.f32.vlgmr.msra.gmra.mrb[26].mxu1 %v3059_v6  ;;  %v18093_v6 = vld [vmem:[#allocation80_spill] sm:$0xff] }
 0x646   :  { %11498 = vmatpush1.bf16.msra.mxu0 %v18080_v10  ;;  %11530 = vmatpush1.bf16.msra.mxu1 %v18081_v46 }
 0x647   :  { %11500 = vmatprep.subr.bf16.mxu0 %v18082_v37  ;;  %11532 = vmatprep.subr.bf16.mxu1 %v18083_v54  ;;  %v18094_v54 = vld [vmem:[#allocation81_spill] sm:$0xff] }
 0x648   :  { %3363 = vmatprep.mubr.f32.mxu0 %v17887_v33  ;;  %3434 = vmatprep.mubr.f32.mxu1 %v17887_v33 }
 0x64a   :  { %11502 = vmatpush1.bf16.msra.mxu0 %v18084_v18  ;;  %11534 = vmatpush1.bf16.msra.mxu1 %v18085_v16  ;;  %v18095_v18 = vld [vmem:[#allocation82_spill] sm:$0xff]  ;;  %v18096_v16 = vld [vmem:[#allocation83_spill] sm:$0xff] }
 0x64b   :  { %11504 = vmatprep.subr.bf16.mxu0 %v18086_v25  ;;  %11536 = vmatprep.subr.bf16.mxu1 %v18087_v58  ;;  %v18097_v25 = vld [vmem:[#allocation84_spill] sm:$0xff]  ;;  %v18098_v58 = vld [vmem:[#allocation85_spill] sm:$0xff] }
 0x64e   :  { %11506 = vmatpush1.bf16.msra.mxu0 %v18088_v3  ;;  %11538 = vmatpush1.bf16.msra.mxu1 %v18089_v43  ;;  %v18099_v3 = vld [vmem:[#allocation86_spill] sm:$0xff]  ;;  %v18100_v43 = vld [vmem:[#allocation87_spill] sm:$0xff] }
 0x64f   :  { %11508 = vmatprep.subr.bf16.mxu0 %v18090_v1  ;;  %11540 = vmatprep.subr.bf16.mxu1 %v18091_v19  ;;  %v18101_v1 = vld [vmem:[#allocation88_spill] sm:$0xff]  ;;  %v18102_v19 = vld [vmem:[#allocation89_spill] sm:$0xff] }
 0x652   :  { %11510 = vmatpush1.bf16.msra.mxu0 %v18092_v34  ;;  %11542 = vmatpush1.bf16.msra.mxu1 %v18093_v6  ;;  %v18103_v34 = vld [vmem:[#allocation90_spill] sm:$0xff]  ;;  %v18104_v6 = vld [vmem:[#allocation91_spill] sm:$0xff] }
 0x653   :  { %11512 = vmatprep.subr.bf16.mxu0 %v18094_v54  ;;  %11544 = vmatprep.subr.bf16.mxu1 %v18095_v18  ;;  %v18105_v54 = vld [vmem:[#allocation92_spill] sm:$0xff]  ;;  %v18106_v18 = vld [vmem:[#allocation93_spill] sm:$0xff] }
 0x656   :  { %11514 = vmatpush1.bf16.msra.mxu0 %v18096_v16  ;;  %11546 = vmatpush1.bf16.msra.mxu1 %v18097_v25  ;;  %v18107_v16 = vld [vmem:[#allocation94_spill] sm:$0xff]  ;;  %v18108_v25 = vld [vmem:[#allocation95_spill] sm:$0xff] }
 0x657   :  { %11516 = vmatprep.subr.bf16.mxu0 %v18098_v58  ;;  %11548 = vmatprep.subr.bf16.mxu1 %v18099_v3  ;;  %v18109_v58 = vld [vmem:[#allocation96_spill] sm:$0xff]  ;;  %v18110_v3 = vld [vmem:[#allocation97_spill] sm:$0xff] }
 0x65a   :  { %11518 = vmatpush1.bf16.msra.mxu0 %v18100_v43  ;;  %11550 = vmatpush1.bf16.msra.mxu1 %v18101_v1  ;;  %v18111_v43 = vld [vmem:[#allocation98_spill] sm:$0xff] }
 0x65b   :  { %11520 = vmatprep.subr.bf16.mxu0 %v18102_v19  ;;  %11552 = vmatprep.subr.bf16.mxu1 %v18103_v34 }
 0x65e   :  { %11522 = vmatpush1.bf16.msra.mxu0 %v18104_v6  ;;  %11554 = vmatpush1.bf16.msra.mxu1 %v18105_v54 }
 0x65f   :  { %11524 = vmatprep.subr.bf16.mxu0 %v18106_v18  ;;  %11556 = vmatprep.subr.bf16.mxu1 %v18107_v16 }
 0x662   :  { %11526 = vmatpush1.bf16.msra.mxu0 %v18108_v25  ;;  %11558 = vmatpush1.bf16.msra.mxu1 %v18109_v58 }
 0x663   :  { %11560 = vmatprep.subr.bf16.mxu0 %v18110_v3  ;;  %11592 = vmatprep.subr.bf16.mxu1 %v18111_v43 }
 0x6f8   :  { %v2889_v1 = vpop.f32.mrb[24].mxu0  ;;  %v2960_v19 = vpop.f32.mrb[24].mxu1 }
 0x6f9   :  { %v2969_v37 = vrot.slane %v2889_v1, 4  ;;  %v2973_v34 = vrot.slane %v2889_v1, 5  ;;  %v2971_v46 = vrot.slane %v2960_v19, 4  ;;  %v2975_v6 = vrot.slane %v2960_v19, 5  ;;  %v2891_v10 = vpop.f32.mrb[25].mxu0  ;;  %v2962_v54 = vpop.f32.mrb[25].mxu1 }
 0x6fa   :  { %v2970_v38 = vrot.slane %v2891_v10, 4  ;;  %v2974_v18 = vrot.slane %v2891_v10, 5  ;;  %v2972_v55 = vrot.slane %v2962_v54, 4  ;;  %v2976_v16 = vrot.slane %v2962_v54, 5 }
 0x6fb   :  { %v2985_v25 = vadd.f32 %v2969_v37, %v17955_v8  ;;  %v2989_v58 = vadd.f32 %v2973_v34, %v18112_v26  ;;  %v2987_v3 = vadd.f32 %v2971_v46, %v18113_v40  ;;  %v2991_v43 = vadd.f32 %v2975_v6, %v18006_v28 }
 0x6fc   :  { %v2986_v15 = vadd.f32 %v2970_v38, %v18007_v53  ;;  %v2990_v1 = vadd.f32 %v2974_v18, %v18114_v42  ;;  %v2988_v19 = vadd.f32 %v2972_v55, %v18115_v0  ;;  %v2992_v20 = vadd.f32 %v2976_v16, %v18116_v17  ;;  %v18119_v38 = vld [vmem:[#allocation139_spill] sm:$0xff]  ;;  %v18122_v42 = vld [vmem:[#allocation140_spill] sm:$0xff] }
 0x6fd   :  { %v2993_v10 = vadd.f32 %v2985_v25, %v18117_v22  ;;  %v2997_v54 = vadd.f32 %v2989_v58, %v18117_v22  ;;  %v2995_v55 = vadd.f32 %v2987_v3, %v18119_v38  ;;  %v2999_v18 = vadd.f32 %v2991_v43, %v18119_v38  ;;  %v18120_v58 = vld [vmem:[#allocation137_spill] sm:$0xff] }
 0x6fe   :  { %v2994_v37 = vadd.f32 %v2986_v15, %v18118_v13  ;;  %v2998_v34 = vadd.f32 %v2990_v1, %v18118_v13  ;;  %v2996_v15 = vadd.f32 %v2988_v19, %v18120_v58  ;;  %v3041_v19 = vrot.slane %v15694_v60, 7 }
 0x6ff   :  { %v9592_v26 = vmul.f32 -1.442695, %v2993_v10  ;;  %v9593_v46 = vmul.f32 -1.442695, %v2997_v54  ;;  %v3000_v10 = vadd.f32 %v2992_v20, %v18120_v58 }
 0x700   :  { %v9594_v40 = vmul.f32 -1.442695, %v2994_v37  ;;  %v9595_v6 = vmul.f32 -1.442695, %v2998_v34  ;;  %v9596_v3 = vmul.f32 -1.442695, %v2996_v15 }
 0x701   :  { %13538 = vpow2.f32 %v9592_v26  ;;  %v9597_v43 = vmul.f32 -1.442695, %v3000_v10 }
 0x702   :  { %13540 = vpow2.f32 %v9593_v46 }
 0x703   :  { %13542 = vpow2.f32 %v9594_v40 }
 0x704   :  { %13544 = vpow2.f32 %v9595_v6  ;;  %v3042_v6 = vrot.slane %v15696_v56, 7 }
 0x705   :  { %13546 = vtanh.f32 %v2995_v55 }
 0x706   :  { %13548 = vtanh.f32 %v2999_v18 }
 0x70b   :  { %v13539_v16 = vpop.eup %13538 }
 0x70c   :  { %v13541_v25 = vpop.eup %13540  ;;  %v3007_v17 = vadd.f32 1.0, %v13539_v16 }
 0x70d   :  { %v13543_v22 = vpop.eup %13542  ;;  %v3008_v1 = vadd.f32 1.0, %v13541_v25 }
 0x70e   :  { %v13545_v54 = vpop.eup %13544  ;;  %13550 = vrcp.f32 %v3007_v17  ;;  %v3019_v26 = vadd.f32 1.0, %v13543_v22 }
 0x70f   :  { %13552 = vrcp.f32 %v3008_v1  ;;  %v3020_v40 = vadd.f32 1.0, %v13545_v54  ;;  %v13547_v37 = vpop.eup %13546 }
 0x710   :  { %13554 = vrcp.f32 %v3019_v26  ;;  %v13549_v34 = vpop.eup %13548 }
 0x711   :  { %13556 = vrcp.f32 %v3020_v40 }
 0x712   :  { %13558 = vpow2.f32 %v9596_v3 }
 0x713   :  { %13560 = vpow2.f32 %v9597_v43 }
 0x718   :  { %v13551_v46 = vpop.eup %13550  ;;  %v3127_v55 = vpop.f32.mrb[26].mxu0 }
 0x719   :  { %v3198_v20 = vpop.f32.mrb[26].mxu1  ;;  %v13553_v18 = vpop.eup %13552  ;;  %v3047_v17 = vmul.f32 %v13551_v46, %v13547_v37  ;;  %v3207_v22 = vrot.slane %v3127_v55, 5  ;;  %v3211_v16 = vrot.slane %v3127_v55, 6  ;;  %v18121_v55 = vld [vmem:[#allocation129_spill] sm:$0xff] }
 0x71a   :  { %v3209_v25 = vrot.slane %v3198_v20, 5  ;;  %v3129_v1 = vpop.f32.mrb[27].mxu0  ;;  %v3200_v15 = vpop.f32.mrb[27].mxu1  ;;  %v3048_v10 = vmul.f32 %v13553_v18, %v13549_v34  ;;  %v3213_v26 = vrot.slane %v3198_v20, 6 }
 0x71b   :  { %v13555_v54 = vpop.eup %13554  ;;  %v3208_v40 = vrot.slane %v3129_v1, 5  ;;  %v3212_v3 = vrot.slane %v3129_v1, 6  ;;  %v3223_v60 = vadd.f32 %v3207_v22, %v15254_v61  ;;  %v3227_v56 = vadd.f32 %v3211_v16, %v15262_v62 }
 0x71c   :  { %v13557_v43 = vpop.eup %13556  ;;  %v3045_v58 = vmul.f32 %v13555_v54, %v3041_v19  ;;  %v3225_v38 = vadd.f32 %v3209_v25, %v15258_v5  ;;  %v3229_v37 = vadd.f32 %v3213_v26, %v18013_v31  ;;  %v3210_v18 = vrot.slane %v3200_v15, 5 }
 0x71d   :  { %v3046_v13 = vmul.f32 %v13557_v43, %v3042_v6  ;;  %v3224_v46 = vadd.f32 %v3208_v40, %v18014_v48  ;;  %v3228_v0 = vadd.f32 %v3212_v3, %v18121_v55  ;;  %v3231_v34 = vadd.f32 %v3223_v60, %v18122_v42  ;;  %v13559_v1 = vpop.eup %13558 }
 0x71e   :  { %v3235_v20 = vadd.f32 %v3227_v56, %v18122_v42  ;;  %v3214_v16 = vrot.slane %v3200_v15, 6  ;;  %v13561_v54 = vpop.eup %13560  ;;  %v3226_v26 = vadd.f32 %v3210_v18, %v15260_v4  ;;  %v3033_v55 = vadd.f32 1.0, %v13559_v1 }
 0x71f   :  { %v3232_v19 = vadd.f32 %v3224_v46, %v15318_v51  ;;  %v3236_v22 = vadd.f32 %v3228_v0, %v15318_v51  ;;  %v9598_v25 = vmul.f32 -1.442695, %v3231_v34  ;;  %v15812_v60 = vadd.f32 %v3047_v17, %v3045_v58 }
 0x720   :  { %v9599_v6 = vmul.f32 -1.442695, %v3235_v20  ;;  %v3230_v3 = vadd.f32 %v3214_v16, %v15268_v47  ;;  %v15814_v56 = vadd.f32 %v3048_v10, %v3046_v13  ;;  %v3034_v42 = vadd.f32 1.0, %v13561_v54 }
 0x721   :  { %v9600_v43 = vmul.f32 -1.442695, %v3232_v19  ;;  %v9601_v40 = vmul.f32 -1.442695, %v3236_v22  ;;  %13562 = vpow2.f32 %v9598_v25  ;;  %v3234_v0 = vadd.f32 %v3226_v26, %v15337_v41 }
 0x722   :  { %13564 = vpow2.f32 %v9599_v6  ;;  %v3238_v15 = vadd.f32 %v3230_v3, %v15337_v41  ;;  %v3233_v46 = vadd.f32 %v3225_v38, %v15340_v32  ;;  %v3237_v34 = vadd.f32 %v3229_v37, %v15340_v32 }
 0x723   :  { %13566 = vpow2.f32 %v9600_v43  ;;  %v9602_v58 = vmul.f32 -1.442695, %v3234_v0 }
 0x724   :  { %13568 = vpow2.f32 %v9601_v40  ;;  %v9603_v13 = vmul.f32 -1.442695, %v3238_v15 }
 0x725   :  { %13570 = vrcp.f32 %v3033_v55 }
 0x726   :  { %13572 = vrcp.f32 %v3034_v42 }
 0x727   :  { %13574 = vtanh.f32 %v15812_v60 }
 0x728   :  { %13576 = vtanh.f32 %v15814_v56 }
 0x729   :  { %13578 = vtanh.f32 %v3233_v46 }
 0x72a   :  { %13580 = vtanh.f32 %v3237_v34 }
 0x72b   :  { %v13563_v17 = vpop.eup %13562  ;;  %13582 = vpow2.f32 %v9602_v58 }
 0x72c   :  { %v13565_v10 = vpop.eup %13564  ;;  %v3245_v20 = vadd.f32 1.0, %v13563_v17  ;;  %13584 = vpow2.f32 %v9603_v13  ;;  %v3279_v13 = vrot.slane %v15715_v57, 1 }
 0x72d   :  { %v13567_v55 = vpop.eup %13566  ;;  %v3246_v18 = vadd.f32 1.0, %v13565_v10 }
 0x72e   :  { %v13569_v42 = vpop.eup %13568  ;;  %13586 = vrcp.f32 %v3245_v20  ;;  %v3257_v38 = vadd.f32 1.0, %v13567_v55  ;;  %v3280_v55 = vrot.slane %v15719_v14, 1 }
 0x72f   :  { %v13571_v1 = vpop.eup %13570  ;;  %13588 = vrcp.f32 %v3246_v18  ;;  %v3258_v37 = vadd.f32 1.0, %v13569_v42 }
 0x730   :  { %v13573_v19 = vpop.eup %13572  ;;  %13590 = vrcp.f32 %v3257_v38 }
 0x731   :  { %v13575_v22 = vpop.eup %13574  ;;  %13592 = vrcp.f32 %v3258_v37 }
 0x732   :  { %v13577_v16 = vpop.eup %13576  ;;  %v3053_v54 = vmul.f32 %v13575_v22, %v13571_v1 }
 0x733   :  { %v3054_v25 = vmul.f32 %v13577_v16, %v13573_v19  ;;  %v13579_v6 = vpop.eup %13578 }
 0x734   :  { %v3295_v26 = vrot.slane %v3053_v54, 4  ;;  %v13581_v43 = vpop.eup %13580 }
 0x735   :  { %v3296_v40 = vrot.slane %v3054_v25, 3  ;;  %v13583_v3 = vpop.eup %13582 }
 0x736   :  { %v13585_v0 = vpop.eup %13584  ;;  %v3271_v17 = vadd.f32 1.0, %v13583_v3  ;;  %v18125_v3 = vld [vmem:[#allocation111_spill] sm:$0xff] }
 0x737   :  { %v3297_v15 = vsel %vm1397_vm4, %v3296_v40, %v3295_v26  ;;  %v3272_v18 = vadd.f32 1.0, %v13585_v0  ;;  %v18123_v26 = vld [vmem:[#allocation109_spill] sm:$0xff]  ;;  %v18124_v40 = vld [vmem:[#allocation110_spill] sm:$0xff] }
 0x738   :  { %v13587_v46 = vpop.eup %13586  ;;  %3364 = vmatmul.mubr.f32.vlgmr.msra.gmra.mrb[28].mxu0 %v3297_v15  ;;  %3435 = vmatmul.mubr.f32.vlgmr.msra.gmra.mrb[28].mxu1 %v3297_v15  ;;  %13594 = vrcp.f32 %v3271_v17  ;;  %v18126_v15 = vld [vmem:[#allocation112_spill] sm:$0xff]  ;;  %v18131_v17 = vld [vmem:[#allocation117_spill] sm:$0xff] }
 0x739   :  { %v13589_v34 = vpop.eup %13588  ;;  %v3285_v58 = vmul.f32 %v13587_v46, %v13579_v6  ;;  %11562 = vmatpush1.bf16.msra.mxu0 %v15051_v21  ;;  %11594 = vmatpush1.bf16.msra.mxu1 %v15055_v23  ;;  %13596 = vrcp.f32 %v3272_v18  ;;  %v18127_v46 = vld [vmem:[#allocation113_spill] sm:$0xff]  ;;  %v18135_v18 = vld [vmem:[#allocation68_spill] sm:$0xff] }
 0x73a   :  { %v13591_v10 = vpop.eup %13590  ;;  %v3286_v20 = vmul.f32 %v13589_v34, %v13581_v43  ;;  %11564 = vmatprep.subr.bf16.mxu0 %v15057_v24  ;;  %11596 = vmatprep.subr.bf16.mxu1 %v15063_v35  ;;  %v18128_v34 = vld [vmem:[#allocation114_spill] sm:$0xff] }
 0x73b   :  { %v13593_v42 = vpop.eup %13592  ;;  %v3283_v38 = vmul.f32 %v13591_v10, %v3279_v13  ;;  %3601 = vmatprep.mubr.f32.mxu0 %v17887_v33  ;;  %3672 = vmatprep.mubr.f32.mxu1 %v17887_v33  ;;  %v18130_v13 = vld [vmem:[#allocation116_spill] sm:$0xff]  ;;  %v18132_v10 = vld [vmem:[#allocation65_spill] sm:$0xff] }
 0x73c   :  { %v3284_v57 = vmul.f32 %v13593_v42, %v3280_v55  ;;  %v18134_v55 = vld [vmem:[#allocation67_spill] sm:$0xff]  ;;  %v18136_v42 = vld [vmem:[#allocation69_spill] sm:$0xff] }
 0x73d   :  { %11566 = vmatpush1.bf16.msra.mxu0 %v15073_v44  ;;  %11598 = vmatpush1.bf16.msra.mxu1 %v15077_v49  ;;  %v15833_v1 = vadd.f32 %v3285_v58, %v3283_v38  ;;  %v18129_v58 = vld [vmem:[#allocation115_spill] sm:$0xff]  ;;  %v18137_v38 = vld [vmem:[#allocation70_spill] sm:$0xff] }
 0x73e   :  { %11568 = vmatprep.subr.bf16.mxu0 %v15079_v50  ;;  %11600 = vmatprep.subr.bf16.mxu1 %v15085_v59  ;;  %v15837_v14 = vadd.f32 %v3286_v20, %v3284_v57  ;;  %v18133_v20 = vld [vmem:[#allocation66_spill] sm:$0xff]  ;;  %v18138_v57 = vld [vmem:[#allocation71_spill] sm:$0xff] }
 0x73f   :  { %13598 = vtanh.f32 %v15833_v1 }
 0x740   :  { %13600 = vtanh.f32 %v15837_v14 }
 0x741   :  { %11570 = vmatpush1.bf16.msra.mxu0 %v15095_v11  ;;  %11602 = vmatpush1.bf16.msra.mxu1 %v15099_v12 }
 0x742   :  { %11572 = vmatprep.subr.bf16.mxu0 %v17913_v30  ;;  %11604 = vmatprep.subr.bf16.mxu1 %v17914_v63  ;;  %v13595_v37 = vpop.eup %13594 }
 0x743   :  { %v13597_v19 = vpop.eup %13596 }
 0x745   :  { %11574 = vmatpush1.bf16.msra.mxu0 %v17915_v29  ;;  %11606 = vmatpush1.bf16.msra.mxu1 %v17916_v52 }
 0x746   :  { %11576 = vmatprep.subr.bf16.mxu0 %v17917_v36  ;;  %11608 = vmatprep.subr.bf16.mxu1 %v17918_v27 }
 0x749   :  { %v13599_v22 = vpop.eup %13598  ;;  %11578 = vmatpush1.bf16.msra.mxu0 %v17919_v39  ;;  %11610 = vmatpush1.bf16.msra.mxu1 %v17920_v2 }
 0x74a   :  { %v13601_v16 = vpop.eup %13600  ;;  %11580 = vmatprep.subr.bf16.mxu0 %v17921_v7  ;;  %11612 = vmatprep.subr.bf16.mxu1 %v17922_v45  ;;  %v3291_v54 = vmul.f32 %v13599_v22, %v13595_v37  ;;  %v18139_v37 = vld [vmem:[#allocation72_spill] sm:$0xff]  ;;  %v18141_v22 = vld [vmem:[#allocation74_spill] sm:$0xff] }
 0x74b   :  { %v3292_v25 = vmul.f32 %v13601_v16, %v13597_v19  ;;  %v18140_v19 = vld [vmem:[#allocation73_spill] sm:$0xff]  ;;  %v18142_v16 = vld [vmem:[#allocation75_spill] sm:$0xff] }
 0x74c   :  { %v3533_v6 = vrot.slane %v3291_v54, 3  ;;  %v18143_v54 = vld [vmem:[#allocation76_spill] sm:$0xff] }
 0x74d   :  { %11582 = vmatpush1.bf16.msra.mxu0 %v15155_v9  ;;  %11614 = vmatpush1.bf16.msra.mxu1 %v18123_v26  ;;  %v3534_v43 = vrot.slane %v3292_v25, 2  ;;  %v18144_v25 = vld [vmem:[#allocation77_spill] sm:$0xff]  ;;  %v18172_v26 = vld [vmem:[#allocation136_spill] sm:$0xff] }
 0x74e   :  { %11584 = vmatprep.subr.bf16.mxu0 %v18124_v40  ;;  %11616 = vmatprep.subr.bf16.mxu1 %v18125_v3  ;;  %v18171_v40 = vld [vmem:[#allocation135_spill] sm:$0xff] }
 0x74f   :  { %v3535_v0 = vsel %vm1397_vm4, %v3534_v43, %v3533_v6  ;;  %v18145_v6 = vld [vmem:[#allocation78_spill] sm:$0xff]  ;;  %v18146_v43 = vld [vmem:[#allocation79_spill] sm:$0xff] }
 0x751   :  { %11586 = vmatpush1.bf16.msra.mxu0 %v18126_v15  ;;  %11618 = vmatpush1.bf16.msra.mxu1 %v18127_v46  ;;  %v18169_v46 = vld [vmem:[#allocation121_spill] sm:$0xff] }
 0x752   :  { %11588 = vmatprep.subr.bf16.mxu0 %v18128_v34  ;;  %11620 = vmatprep.subr.bf16.mxu1 %v18129_v58  ;;  %v18168_v34 = vld [vmem:[#allocation123_spill] sm:$0xff]  ;;  %v18170_v15 = vld [vmem:[#allocation125_spill] sm:$0xff] }
 0x755   :  { %11590 = vmatpush1.bf16.msra.mxu0 %v18130_v13  ;;  %11622 = vmatpush1.bf16.msra.mxu1 %v18131_v17  ;;  %v18166_v17 = vld [vmem:[#allocation122_spill] sm:$0xff]  ;;  %v18167_v13 = vld [vmem:[#allocation120_spill] sm:$0xff] }
 0x756   :  { %11624 = vmatprep.subr.bf16.mxu0 %v18132_v10  ;;  %11656 = vmatprep.subr.bf16.mxu1 %v18133_v20 }
 0x758   :  { %3602 = vmatmul.mubr.f32.vlgmr.msra.gmra.mrb[30].mxu0 %v3535_v0  ;;  %3673 = vmatmul.mubr.f32.vlgmr.msra.gmra.mrb[30].mxu1 %v3535_v0  ;;  %v18147_v0 = vld [vmem:[#allocation80_spill] sm:$0xff] }
 0x759   :  { %11626 = vmatpush1.bf16.msra.mxu0 %v18134_v55  ;;  %11658 = vmatpush1.bf16.msra.mxu1 %v18135_v18 }
 0x75a   :  { %11628 = vmatprep.subr.bf16.mxu0 %v18136_v42  ;;  %11660 = vmatprep.subr.bf16.mxu1 %v18137_v38  ;;  %v18148_v38 = vld [vmem:[#allocation81_spill] sm:$0xff] }
 0x75b   :  { %3839 = vmatprep.mubr.f32.mxu0 %v17887_v33  ;;  %3910 = vmatprep.mubr.f32.mxu1 %v17887_v33 }
 0x75d   :  { %11630 = vmatpush1.bf16.msra.mxu0 %v18138_v57  ;;  %11662 = vmatpush1.bf16.msra.mxu1 %v18139_v37  ;;  %v18149_v57 = vld [vmem:[#allocation82_spill] sm:$0xff]  ;;  %v18150_v37 = vld [vmem:[#allocation83_spill] sm:$0xff] }
 0x75e   :  { %11632 = vmatprep.subr.bf16.mxu0 %v18140_v19  ;;  %11664 = vmatprep.subr.bf16.mxu1 %v18141_v22  ;;  %v18151_v19 = vld [vmem:[#allocation84_spill] sm:$0xff]  ;;  %v18152_v22 = vld [vmem:[#allocation85_spill] sm:$0xff] }
 0x761   :  { %11634 = vmatpush1.bf16.msra.mxu0 %v18142_v16  ;;  %11666 = vmatpush1.bf16.msra.mxu1 %v18143_v54  ;;  %v18153_v16 = vld [vmem:[#allocation86_spill] sm:$0xff]  ;;  %v18154_v54 = vld [vmem:[#allocation87_spill] sm:$0xff] }
 0x762   :  { %11636 = vmatprep.subr.bf16.mxu0 %v18144_v25  ;;  %11668 = vmatprep.subr.bf16.mxu1 %v18145_v6  ;;  %v18155_v25 = vld [vmem:[#allocation88_spill] sm:$0xff]  ;;  %v18156_v6 = vld [vmem:[#allocation89_spill] sm:$0xff] }
 0x765   :  { %11638 = vmatpush1.bf16.msra.mxu0 %v18146_v43  ;;  %11670 = vmatpush1.bf16.msra.mxu1 %v18147_v0  ;;  %v18157_v43 = vld [vmem:[#allocation90_spill] sm:$0xff]  ;;  %v18158_v0 = vld [vmem:[#allocation91_spill] sm:$0xff] }
 0x766   :  { %11640 = vmatprep.subr.bf16.mxu0 %v18148_v38  ;;  %11672 = vmatprep.subr.bf16.mxu1 %v18149_v57  ;;  %v18159_v38 = vld [vmem:[#allocation92_spill] sm:$0xff]  ;;  %v18160_v57 = vld [vmem:[#allocation93_spill] sm:$0xff] }
 0x769   :  { %11642 = vmatpush1.bf16.msra.mxu0 %v18150_v37  ;;  %11674 = vmatpush1.bf16.msra.mxu1 %v18151_v19  ;;  %v18161_v37 = vld [vmem:[#allocation94_spill] sm:$0xff]  ;;  %v18162_v19 = vld [vmem:[#allocation95_spill] sm:$0xff] }
 0x76a   :  { %11644 = vmatprep.subr.bf16.mxu0 %v18152_v22  ;;  %11676 = vmatprep.subr.bf16.mxu1 %v18153_v16  ;;  %v18163_v22 = vld [vmem:[#allocation96_spill] sm:$0xff]  ;;  %v18164_v16 = vld [vmem:[#allocation97_spill] sm:$0xff] }
 0x76d   :  { %11646 = vmatpush1.bf16.msra.mxu0 %v18154_v54  ;;  %11678 = vmatpush1.bf16.msra.mxu1 %v18155_v25  ;;  %v18165_v54 = vld [vmem:[#allocation98_spill] sm:$0xff] }
 0x76e   :  { %11648 = vmatprep.subr.bf16.mxu0 %v18156_v6  ;;  %11680 = vmatprep.subr.bf16.mxu1 %v18157_v43 }
 0x771   :  { %11650 = vmatpush1.bf16.msra.mxu0 %v18158_v0  ;;  %11682 = vmatpush1.bf16.msra.mxu1 %v18159_v38 }
 0x772   :  { %11652 = vmatprep.subr.bf16.mxu0 %v18160_v57  ;;  %11684 = vmatprep.subr.bf16.mxu1 %v18161_v37 }
 0x775   :  { %11654 = vmatpush1.bf16.msra.mxu0 %v18162_v19  ;;  %11686 = vmatpush1.bf16.msra.mxu1 %v18163_v22 }
 0x776   :  { %11688 = vmatprep.subr.bf16.mxu0 %v18164_v16  ;;  %11720 = vmatprep.subr.bf16.mxu1 %v18165_v54 }
 0x80b   :  { %v3365_v25 = vpop.f32.mrb[28].mxu0  ;;  %v3436_v6 = vpop.f32.mrb[28].mxu1 }
 0x80c   :  { %v3445_v42 = vrot.slane %v3365_v25, 3  ;;  %v3449_v43 = vrot.slane %v3365_v25, 4  ;;  %v3447_v18 = vrot.slane %v3436_v6, 3  ;;  %v3451_v0 = vrot.slane %v3436_v6, 4  ;;  %v3367_v55 = vpop.f32.mrb[29].mxu0  ;;  %v3438_v38 = vpop.f32.mrb[29].mxu1 }
 0x80d   :  { %v3446_v20 = vrot.slane %v3367_v55, 3  ;;  %v3450_v57 = vrot.slane %v3367_v55, 4  ;;  %v3448_v10 = vrot.slane %v3438_v38, 3  ;;  %v3452_v37 = vrot.slane %v3438_v38, 4 }
 0x80e   :  { %v3461_v19 = vadd.f32 %v3445_v42, %v17955_v8  ;;  %v3465_v22 = vadd.f32 %v3449_v43, %v18166_v17  ;;  %v3463_v16 = vadd.f32 %v3447_v18, %v18167_v13  ;;  %v3467_v54 = vadd.f32 %v3451_v0, %v18006_v28 }
 0x80f   :  { %v3462_v58 = vadd.f32 %v3446_v20, %v18007_v53  ;;  %v3466_v25 = vadd.f32 %v3450_v57, %v18168_v34  ;;  %v3464_v6 = vadd.f32 %v3448_v10, %v18169_v46  ;;  %v3468_v3 = vadd.f32 %v3452_v37, %v18170_v15  ;;  %v18173_v20 = vld [vmem:[#allocation139_spill] sm:$0xff]  ;;  %v18176_v34 = vld [vmem:[#allocation140_spill] sm:$0xff] }
 0x810   :  { %v3469_v55 = vadd.f32 %v3461_v19, %v18171_v40  ;;  %v3473_v38 = vadd.f32 %v3465_v22, %v18171_v40  ;;  %v3471_v10 = vadd.f32 %v3463_v16, %v18173_v20  ;;  %v3475_v57 = vadd.f32 %v3467_v54, %v18173_v20  ;;  %v18174_v22 = vld [vmem:[#allocation137_spill] sm:$0xff] }
 0x811   :  { %v3470_v42 = vadd.f32 %v3462_v58, %v18172_v26  ;;  %v3474_v43 = vadd.f32 %v3466_v25, %v18172_v26  ;;  %v3472_v58 = vadd.f32 %v3464_v6, %v18174_v22  ;;  %v3517_v6 = vrot.slane %v15812_v60, 7 }
 0x812   :  { %v9604_v17 = vmul.f32 -1.442695, %v3469_v55  ;;  %v9605_v18 = vmul.f32 -1.442695, %v3473_v38  ;;  %v3476_v55 = vadd.f32 %v3468_v3, %v18174_v22 }
 0x813   :  { %v9606_v13 = vmul.f32 -1.442695, %v3470_v42  ;;  %v9607_v0 = vmul.f32 -1.442695, %v3474_v43  ;;  %v9608_v16 = vmul.f32 -1.442695, %v3472_v58 }
 0x814   :  { %13602 = vpow2.f32 %v9604_v17  ;;  %v9609_v54 = vmul.f32 -1.442695, %v3476_v55 }
 0x815   :  { %13604 = vpow2.f32 %v9605_v18 }
 0x816   :  { %13606 = vpow2.f32 %v9606_v13 }
 0x817   :  { %13608 = vpow2.f32 %v9607_v0  ;;  %v3518_v0 = vrot.slane %v15814_v56, 7 }
 0x818   :  { %13610 = vtanh.f32 %v3471_v10 }
 0x819   :  { %13612 = vtanh.f32 %v3475_v57 }
 0x81e   :  { %v13603_v37 = vpop.eup %13602 }
 0x81f   :  { %v13605_v19 = vpop.eup %13604  ;;  %v3483_v15 = vadd.f32 1.0, %v13603_v37 }
 0x820   :  { %v13607_v40 = vpop.eup %13606  ;;  %v3484_v25 = vadd.f32 1.0, %v13605_v19 }
 0x821   :  { %v13609_v38 = vpop.eup %13608  ;;  %13614 = vrcp.f32 %v3483_v15  ;;  %v3495_v17 = vadd.f32 1.0, %v13607_v40 }
 0x822   :  { %13616 = vrcp.f32 %v3484_v25  ;;  %v3496_v13 = vadd.f32 1.0, %v13609_v38  ;;  %v13611_v42 = vpop.eup %13610 }
 0x823   :  { %13618 = vrcp.f32 %v3495_v17  ;;  %v13613_v43 = vpop.eup %13612 }
 0x824   :  { %13620 = vrcp.f32 %v3496_v13 }
 0x825   :  { %13622 = vpow2.f32 %v9608_v16 }
 0x826   :  { %13624 = vpow2.f32 %v9609_v54 }
 0x82b   :  { %v13615_v18 = vpop.eup %13614  ;;  %v3603_v10 = vpop.f32.mrb[30].mxu0 }
 0x82c   :  { %v3674_v3 = vpop.f32.mrb[30].mxu1  ;;  %v13617_v57 = vpop.eup %13616  ;;  %v3523_v15 = vmul.f32 %v13615_v18, %v13611_v42  ;;  %v3683_v40 = vrot.slane %v3603_v10, 6  ;;  %v3687_v37 = vrot.slane %v3603_v10, 7  ;;  %v18175_v10 = vld [vmem:[#allocation129_spill] sm:$0xff] }
 0x82d   :  { %v3685_v19 = vrot.slane %v3674_v3, 6  ;;  %v3605_v25 = vpop.f32.mrb[31].mxu0  ;;  %v3676_v58 = vpop.f32.mrb[31].mxu1  ;;  %v3524_v55 = vmul.f32 %v13617_v57, %v13613_v43  ;;  %v3689_v17 = vrot.slane %v3674_v3, 7 }
 0x82e   :  { %v13619_v38 = vpop.eup %13618  ;;  %v3684_v13 = vrot.slane %v3605_v25, 6  ;;  %v3688_v16 = vrot.slane %v3605_v25, 7  ;;  %v3699_v60 = vadd.f32 %v3683_v40, %v15254_v61  ;;  %v3703_v56 = vadd.f32 %v3687_v37, %v15262_v62 }
 0x82f   :  { %v13621_v54 = vpop.eup %13620  ;;  %v3521_v22 = vmul.f32 %v13619_v38, %v3517_v6  ;;  %v3701_v20 = vadd.f32 %v3685_v19, %v15258_v5  ;;  %v3705_v42 = vadd.f32 %v3689_v17, %v18013_v31  ;;  %v3686_v57 = vrot.slane %v3676_v58, 6 }
 0x830   :  { %v3522_v26 = vmul.f32 %v13621_v54, %v3518_v0  ;;  %v3700_v18 = vadd.f32 %v3684_v13, %v18014_v48  ;;  %v3704_v46 = vadd.f32 %v3688_v16, %v18175_v10  ;;  %v3707_v43 = vadd.f32 %v3699_v60, %v18176_v34  ;;  %v13623_v25 = vpop.eup %13622 }
 0x831   :  { %v3711_v3 = vadd.f32 %v3703_v56, %v18176_v34  ;;  %v3690_v37 = vrot.slane %v3676_v58, 7  ;;  %v13625_v38 = vpop.eup %13624  ;;  %v3702_v17 = vadd.f32 %v3686_v57, %v15260_v4  ;;  %v3509_v48 = vadd.f32 1.0, %v13623_v25 }
 0x832   :  { %v3708_v6 = vadd.f32 %v3700_v18, %v15318_v51  ;;  %v3712_v40 = vadd.f32 %v3704_v46, %v15318_v51  ;;  %v9610_v19 = vmul.f32 -1.442695, %v3707_v43  ;;  %v15930_v60 = vadd.f32 %v3523_v15, %v3521_v22 }
 0x833   :  { %v9611_v0 = vmul.f32 -1.442695, %v3711_v3  ;;  %v3706_v16 = vadd.f32 %v3690_v37, %v15268_v47  ;;  %v15932_v56 = vadd.f32 %v3524_v55, %v3522_v26  ;;  %v3510_v5 = vadd.f32 1.0, %v13625_v38 }
 0x834   :  { %v9612_v54 = vmul.f32 -1.442695, %v3708_v6  ;;  %v9613_v13 = vmul.f32 -1.442695, %v3712_v40  ;;  %13626 = vpow2.f32 %v9610_v19  ;;  %v3710_v46 = vadd.f32 %v3702_v17, %v15337_v41 }
 0x835   :  { %13628 = vpow2.f32 %v9611_v0  ;;  %v3714_v58 = vadd.f32 %v3706_v16, %v15337_v41  ;;  %v3709_v18 = vadd.f32 %v3701_v20, %v15340_v32  ;;  %v3713_v43 = vadd.f32 %v3705_v42, %v15340_v32 }
 0x836   :  { %13630 = vpow2.f32 %v9612_v54  ;;  %v9614_v22 = vmul.f32 -1.442695, %v3710_v46 }
 0x837   :  { %13632 = vpow2.f32 %v9613_v13  ;;  %v9615_v26 = vmul.f32 -1.442695, %v3714_v58 }
 0x838   :  { %13634 = vrcp.f32 %v3509_v48 }
 0x839   :  { %13636 = vrcp.f32 %v3510_v5 }
 0x83a   :  { %13638 = vtanh.f32 %v15930_v60 }
 0x83b   :  { %13640 = vtanh.f32 %v15932_v56 }
 0x83c   :  { %13642 = vtanh.f32 %v3709_v18 }
 0x83d   :  { %13644 = vtanh.f32 %v3713_v43 }
 0x83e   :  { %v13627_v15 = vpop.eup %13626  ;;  %13646 = vpow2.f32 %v9614_v22 }
 0x83f   :  { %v13629_v55 = vpop.eup %13628  ;;  %v3721_v3 = vadd.f32 1.0, %v13627_v15  ;;  %13648 = vpow2.f32 %v9615_v26  ;;  %v3755_v26 = vrot.slane %v15833_v1, 1 }
 0x840   :  { %v13631_v48 = vpop.eup %13630  ;;  %v3722_v57 = vadd.f32 1.0, %v13629_v55 }
 0x841   :  { %v13633_v5 = vpop.eup %13632  ;;  %13650 = vrcp.f32 %v3721_v3  ;;  %v3733_v20 = vadd.f32 1.0, %v13631_v48  ;;  %v3756_v48 = vrot.slane %v15837_v14, 1 }
 0x842   :  { %v13635_v25 = vpop.eup %13634  ;;  %13652 = vrcp.f32 %v3722_v57  ;;  %v3734_v42 = vadd.f32 1.0, %v13633_v5 }
 0x843   :  { %v13637_v6 = vpop.eup %13636  ;;  %13654 = vrcp.f32 %v3733_v20 }
 0x844   :  { %v13639_v40 = vpop.eup %13638  ;;  %13656 = vrcp.f32 %v3734_v42 }
 0x845   :  { %v13641_v37 = vpop.eup %13640  ;;  %v3529_v38 = vmul.f32 %v13639_v40, %v13635_v25 }
 0x846   :  { %v3530_v19 = vmul.f32 %v13641_v37, %v13637_v6  ;;  %v13643_v0 = vpop.eup %13642 }
 0x847   :  { %v3771_v17 = vrot.slane %v3529_v38, 5  ;;  %v13645_v54 = vpop.eup %13644 }
 0x848   :  { %v3772_v13 = vrot.slane %v3530_v19, 4  ;;  %v13647_v16 = vpop.eup %13646 }
 0x849   :  { %v13649_v46 = vpop.eup %13648  ;;  %v3747_v15 = vadd.f32 1.0, %v13647_v16  ;;  %v18179_v16 = vld [vmem:[#allocation111_spill] sm:$0xff] }
 0x84a   :  { %v3773_v58 = vsel %vm1397_vm4, %v3772_v13, %v3771_v17  ;;  %v3748_v57 = vadd.f32 1.0, %v13649_v46  ;;  %v18177_v17 = vld [vmem:[#allocation109_spill] sm:$0xff]  ;;  %v18178_v13 = vld [vmem:[#allocation110_spill] sm:$0xff] }
 0x84b   :  { %v13651_v18 = vpop.eup %13650  ;;  %3840 = vmatmul.mubr.f32.vlgmr.msra.gmra.mrb[32].mxu0 %v3773_v58  ;;  %3911 = vmatmul.mubr.f32.vlgmr.msra.gmra.mrb[32].mxu1 %v3773_v58  ;;  %13658 = vrcp.f32 %v3747_v15  ;;  %v18180_v58 = vld [vmem:[#allocation112_spill] sm:$0xff]  ;;  %v18185_v15 = vld [vmem:[#allocation117_spill] sm:$0xff] }
 0x84c   :  { %v13653_v43 = vpop.eup %13652  ;;  %v3761_v22 = vmul.f32 %v13651_v18, %v13643_v0  ;;  %11690 = vmatpush1.bf16.msra.mxu0 %v15051_v21  ;;  %11722 = vmatpush1.bf16.msra.mxu1 %v15055_v23  ;;  %13660 = vrcp.f32 %v3748_v57  ;;  %v18181_v18 = vld [vmem:[#allocation113_spill] sm:$0xff]  ;;  %v18189_v57 = vld [vmem:[#allocation68_spill] sm:$0xff] }
 0x84d   :  { %v13655_v55 = vpop.eup %13654  ;;  %v3762_v3 = vmul.f32 %v13653_v43, %v13645_v54  ;;  %11692 = vmatprep.subr.bf16.mxu0 %v15057_v24  ;;  %11724 = vmatprep.subr.bf16.mxu1 %v15063_v35  ;;  %v18182_v43 = vld [vmem:[#allocation114_spill] sm:$0xff] }
 0x84e   :  { %v13657_v5 = vpop.eup %13656  ;;  %v3759_v20 = vmul.f32 %v13655_v55, %v3755_v26  ;;  %4077 = vmatprep.mubr.f32.mxu0 %v17887_v33  ;;  %4148 = vmatprep.mubr.f32.mxu1 %v17887_v33  ;;  %v18184_v26 = vld [vmem:[#allocation116_spill] sm:$0xff]  ;;  %v18186_v55 = vld [vmem:[#allocation65_spill] sm:$0xff] }
 0x84f   :  { %v3760_v1 = vmul.f32 %v13657_v5, %v3756_v48  ;;  %v18188_v48 = vld [vmem:[#allocation67_spill] sm:$0xff]  ;;  %v18190_v5 = vld [vmem:[#allocation69_spill] sm:$0xff] }
 0x850   :  { %11694 = vmatpush1.bf16.msra.mxu0 %v15073_v44  ;;  %11726 = vmatpush1.bf16.msra.mxu1 %v15077_v49  ;;  %v15951_v25 = vadd.f32 %v3761_v22, %v3759_v20  ;;  %v18183_v22 = vld [vmem:[#allocation115_spill] sm:$0xff]  ;;  %v18191_v20 = vld [vmem:[#allocation70_spill] sm:$0xff] }
 0x851   :  { %11696 = vmatprep.subr.bf16.mxu0 %v15079_v50  ;;  %11728 = vmatprep.subr.bf16.mxu1 %v15085_v59  ;;  %v15955_v14 = vadd.f32 %v3762_v3, %v3760_v1  ;;  %v18187_v3 = vld [vmem:[#allocation66_spill] sm:$0xff]  ;;  %v18192_v1 = vld [vmem:[#allocation71_spill] sm:$0xff] }
 0x852   :  { %13662 = vtanh.f32 %v15951_v25 }
 0x853   :  { %13664 = vtanh.f32 %v15955_v14 }
 0x854   :  { %11698 = vmatpush1.bf16.msra.mxu0 %v15095_v11  ;;  %11730 = vmatpush1.bf16.msra.mxu1 %v15099_v12 }
 0x855   :  { %11700 = vmatprep.subr.bf16.mxu0 %v17913_v30  ;;  %11732 = vmatprep.subr.bf16.mxu1 %v17914_v63  ;;  %v13659_v42 = vpop.eup %13658 }
 0x856   :  { %v13661_v6 = vpop.eup %13660 }
 0x858   :  { %11702 = vmatpush1.bf16.msra.mxu0 %v17915_v29  ;;  %11734 = vmatpush1.bf16.msra.mxu1 %v17916_v52 }
 0x859   :  { %11704 = vmatprep.subr.bf16.mxu0 %v17917_v36  ;;  %11736 = vmatprep.subr.bf16.mxu1 %v17918_v27 }
 0x85c   :  { %v13663_v40 = vpop.eup %13662  ;;  %11706 = vmatpush1.bf16.msra.mxu0 %v17919_v39  ;;  %11738 = vmatpush1.bf16.msra.mxu1 %v17920_v2 }
 0x85d   :  { %v13665_v37 = vpop.eup %13664  ;;  %11708 = vmatprep.subr.bf16.mxu0 %v17921_v7  ;;  %11740 = vmatprep.subr.bf16.mxu1 %v17922_v45  ;;  %v3767_v38 = vmul.f32 %v13663_v40, %v13659_v42  ;;  %v18193_v42 = vld [vmem:[#allocation72_spill] sm:$0xff]  ;;  %v18195_v40 = vld [vmem:[#allocation74_spill] sm:$0xff] }
 0x85e   :  { %v3768_v19 = vmul.f32 %v13665_v37, %v13661_v6  ;;  %v18194_v6 = vld [vmem:[#allocation73_spill] sm:$0xff]  ;;  %v18196_v37 = vld [vmem:[#allocation75_spill] sm:$0xff] }
 0x85f   :  { %v4009_v0 = vrot.slane %v3767_v38, 2  ;;  %v18197_v38 = vld [vmem:[#allocation76_spill] sm:$0xff] }
 0x860   :  { %11710 = vmatpush1.bf16.msra.mxu0 %v15155_v9  ;;  %11742 = vmatpush1.bf16.msra.mxu1 %v18177_v17  ;;  %v4010_v54 = vrot.slane %v3768_v19, 1  ;;  %v18198_v19 = vld [vmem:[#allocation77_spill] sm:$0xff]  ;;  %v18226_v17 = vld [vmem:[#allocation136_spill] sm:$0xff] }
 0x861   :  { %11712 = vmatprep.subr.bf16.mxu0 %v18178_v13  ;;  %11744 = vmatprep.subr.bf16.mxu1 %v18179_v16  ;;  %v18225_v13 = vld [vmem:[#allocation135_spill] sm:$0xff] }
 0x862   :  { %v4011_v46 = vsel %vm1397_vm4, %v4010_v54, %v4009_v0  ;;  %v18199_v0 = vld [vmem:[#allocation78_spill] sm:$0xff]  ;;  %v18200_v54 = vld [vmem:[#allocation79_spill] sm:$0xff] }
 0x864   :  { %11714 = vmatpush1.bf16.msra.mxu0 %v18180_v58  ;;  %11746 = vmatpush1.bf16.msra.mxu1 %v18181_v18  ;;  %v18223_v18 = vld [vmem:[#allocation121_spill] sm:$0xff] }
 0x865   :  { %11716 = vmatprep.subr.bf16.mxu0 %v18182_v43  ;;  %11748 = vmatprep.subr.bf16.mxu1 %v18183_v22  ;;  %v18222_v43 = vld [vmem:[#allocation123_spill] sm:$0xff]  ;;  %v18224_v58 = vld [vmem:[#allocation125_spill] sm:$0xff] }
 0x868   :  { %11718 = vmatpush1.bf16.msra.mxu0 %v18184_v26  ;;  %11750 = vmatpush1.bf16.msra.mxu1 %v18185_v15  ;;  %v18220_v15 = vld [vmem:[#allocation122_spill] sm:$0xff]  ;;  %v18221_v26 = vld [vmem:[#allocation120_spill] sm:$0xff] }
 0x869   :  { %11752 = vmatprep.subr.bf16.mxu0 %v18186_v55  ;;  %11784 = vmatprep.subr.bf16.mxu1 %v18187_v3  ;;  %v18202_v55 = vld [vmem:[#allocation81_spill] sm:$0xff]  ;;  %v18203_v3 = vld [vmem:[#allocation82_spill] sm:$0xff] }
 0x86b   :  { %4078 = vmatmul.mubr.f32.vlgmr.msra.gmra.mrb[34].mxu0 %v4011_v46  ;;  %4149 = vmatmul.mubr.f32.vlgmr.msra.gmra.mrb[34].mxu1 %v4011_v46  ;;  %v18201_v46 = vld [vmem:[#allocation80_spill] sm:$0xff] }
 0x86c   :  { %11754 = vmatpush1.bf16.msra.mxu0 %v18188_v48  ;;  %11786 = vmatpush1.bf16.msra.mxu1 %v18189_v57  ;;  %v18204_v48 = vld [vmem:[#allocation83_spill] sm:$0xff]  ;;  %v18205_v57 = vld [vmem:[#allocation84_spill] sm:$0xff] }
 0x86d   :  { %11756 = vmatprep.subr.bf16.mxu0 %v18190_v5  ;;  %11788 = vmatprep.subr.bf16.mxu1 %v18191_v20  ;;  %v18206_v5 = vld [vmem:[#allocation85_spill] sm:$0xff]  ;;  %v18207_v20 = vld [vmem:[#allocation86_spill] sm:$0xff] }
 0x86e   :  { %4311 = vmatprep.mubr.f32.mxu0 %v17887_v33  ;;  %4382 = vmatprep.mubr.f32.mxu1 %v17887_v33 }
 0x870   :  { %11758 = vmatpush1.bf16.msra.mxu0 %v18192_v1  ;;  %11790 = vmatpush1.bf16.msra.mxu1 %v18193_v42  ;;  %v18208_v1 = vld [vmem:[#allocation87_spill] sm:$0xff]  ;;  %v18209_v42 = vld [vmem:[#allocation88_spill] sm:$0xff] }
 0x871   :  { %11760 = vmatprep.subr.bf16.mxu0 %v18194_v6  ;;  %11792 = vmatprep.subr.bf16.mxu1 %v18195_v40  ;;  %v18210_v6 = vld [vmem:[#allocation89_spill] sm:$0xff]  ;;  %v18211_v40 = vld [vmem:[#allocation90_spill] sm:$0xff] }
 0x874   :  { %11762 = vmatpush1.bf16.msra.mxu0 %v18196_v37  ;;  %11794 = vmatpush1.bf16.msra.mxu1 %v18197_v38  ;;  %v18212_v37 = vld [vmem:[#allocation91_spill] sm:$0xff]  ;;  %v18213_v38 = vld [vmem:[#allocation92_spill] sm:$0xff] }
 0x875   :  { %11764 = vmatprep.subr.bf16.mxu0 %v18198_v19  ;;  %11796 = vmatprep.subr.bf16.mxu1 %v18199_v0  ;;  %v18214_v19 = vld [vmem:[#allocation93_spill] sm:$0xff]  ;;  %v18215_v0 = vld [vmem:[#allocation94_spill] sm:$0xff] }
 0x878   :  { %11766 = vmatpush1.bf16.msra.mxu0 %v18200_v54  ;;  %11798 = vmatpush1.bf16.msra.mxu1 %v18201_v46  ;;  %v18216_v54 = vld [vmem:[#allocation95_spill] sm:$0xff]  ;;  %v18217_v46 = vld [vmem:[#allocation96_spill] sm:$0xff] }
 0x879   :  { %11768 = vmatprep.subr.bf16.mxu0 %v18202_v55  ;;  %11800 = vmatprep.subr.bf16.mxu1 %v18203_v3  ;;  %v18218_v55 = vld [vmem:[#allocation97_spill] sm:$0xff]  ;;  %v18219_v3 = vld [vmem:[#allocation98_spill] sm:$0xff] }
 0x87c   :  { %11770 = vmatpush1.bf16.msra.mxu0 %v18204_v48  ;;  %11802 = vmatpush1.bf16.msra.mxu1 %v18205_v57 }
 0x87d   :  { %11772 = vmatprep.subr.bf16.mxu0 %v18206_v5  ;;  %11804 = vmatprep.subr.bf16.mxu1 %v18207_v20 }
 0x880   :  { %11774 = vmatpush1.bf16.msra.mxu0 %v18208_v1  ;;  %11806 = vmatpush1.bf16.msra.mxu1 %v18209_v42 }
 0x881   :  { %11776 = vmatprep.subr.bf16.mxu0 %v18210_v6  ;;  %11808 = vmatprep.subr.bf16.mxu1 %v18211_v40 }
 0x884   :  { %11778 = vmatpush1.bf16.msra.mxu0 %v18212_v37  ;;  %11810 = vmatpush1.bf16.msra.mxu1 %v18213_v38 }
 0x885   :  { %11780 = vmatprep.subr.bf16.mxu0 %v18214_v19  ;;  %11812 = vmatprep.subr.bf16.mxu1 %v18215_v0 }
 0x888   :  { %11782 = vmatpush1.bf16.msra.mxu0 %v18216_v54  ;;  %11814 = vmatpush1.bf16.msra.mxu1 %v18217_v46 }
 0x889   :  { %11816 = vmatprep.subr.bf16.mxu0 %v18218_v55  ;;  %11848 = vmatprep.subr.bf16.mxu1 %v18219_v3 }
 0x91e   :  { %v3841_v48 = vpop.f32.mrb[32].mxu0  ;;  %v3912_v57 = vpop.f32.mrb[32].mxu1 }
 0x91f   :  { %v3921_v5 = vrot.slane %v3841_v48, 2  ;;  %v3925_v20 = vrot.slane %v3841_v48, 3  ;;  %v3923_v1 = vrot.slane %v3912_v57, 2  ;;  %v3927_v42 = vrot.slane %v3912_v57, 3  ;;  %v3843_v6 = vpop.f32.mrb[33].mxu0  ;;  %v3914_v40 = vpop.f32.mrb[33].mxu1 }
 0x920   :  { %v3922_v37 = vrot.slane %v3843_v6, 2  ;;  %v3926_v38 = vrot.slane %v3843_v6, 3  ;;  %v3924_v19 = vrot.slane %v3914_v40, 2  ;;  %v3928_v0 = vrot.slane %v3914_v40, 3 }
 0x921   :  { %v3937_v54 = vadd.f32 %v3921_v5, %v17955_v8  ;;  %v3941_v46 = vadd.f32 %v3925_v20, %v18220_v15  ;;  %v3939_v55 = vadd.f32 %v3923_v1, %v18221_v26  ;;  %v3943_v3 = vadd.f32 %v3927_v42, %v18006_v28 }
 0x922   :  { %v3938_v22 = vadd.f32 %v3922_v37, %v18007_v53  ;;  %v3942_v48 = vadd.f32 %v3926_v38, %v18222_v43  ;;  %v3940_v57 = vadd.f32 %v3924_v19, %v18223_v18  ;;  %v3944_v16 = vadd.f32 %v3928_v0, %v18224_v58  ;;  %v18227_v37 = vld [vmem:[#allocation139_spill] sm:$0xff] }
 0x923   :  { %v3945_v6 = vadd.f32 %v3937_v54, %v18225_v13  ;;  %v3949_v40 = vadd.f32 %v3941_v46, %v18225_v13  ;;  %v3947_v38 = vadd.f32 %v3939_v55, %v18227_v37  ;;  %v3951_v19 = vadd.f32 %v3943_v3, %v18227_v37  ;;  %v18228_v54 = vld [vmem:[#allocation137_spill] sm:$0xff] }
 0x924   :  { %v3946_v5 = vadd.f32 %v3938_v22, %v18226_v17  ;;  %v3950_v20 = vadd.f32 %v3942_v48, %v18226_v17  ;;  %v3948_v58 = vadd.f32 %v3940_v57, %v18228_v54  ;;  %v3952_v22 = vadd.f32 %v3944_v16, %v18228_v54 }
 0x925   :  { %v9616_v15 = vmul.f32 -1.442695, %v3945_v6  ;;  %v9617_v1 = vmul.f32 -1.442695, %v3949_v40  ;;  %v3994_v16 = vrot.slane %v15932_v56, 7 }
 0x926   :  { %v9618_v26 = vmul.f32 -1.442695, %v3946_v5  ;;  %v9619_v42 = vmul.f32 -1.442695, %v3950_v20  ;;  %v9620_v5 = vmul.f32 -1.442695, %v3948_v58 }
 0x927   :  { %13666 = vpow2.f32 %v9616_v15  ;;  %v9621_v55 = vmul.f32 -1.442695, %v3952_v22 }
 0x928   :  { %13668 = vpow2.f32 %v9617_v1  ;;  %v3993_v1 = vrot.slane %v15930_v60, 7 }
 0x929   :  { %13670 = vpow2.f32 %v9618_v26 }
 0x92a   :  { %13672 = vpow2.f32 %v9619_v42 }
 0x92b   :  { %13674 = vtanh.f32 %v3947_v38 }
 0x92c   :  { %13676 = vtanh.f32 %v3951_v19 }
 0x931   :  { %v13667_v0 = vpop.eup %13666 }
 0x932   :  { %v13669_v46 = vpop.eup %13668  ;;  %v3959_v13 = vadd.f32 1.0, %v13667_v0 }
 0x933   :  { %v13671_v48 = vpop.eup %13670  ;;  %v3960_v6 = vadd.f32 1.0, %v13669_v46 }
 0x934   :  { %v13673_v40 = vpop.eup %13672  ;;  %13678 = vrcp.f32 %v3959_v13  ;;  %v3971_v15 = vadd.f32 1.0, %v13671_v48 }
 0x935   :  { %13680 = vrcp.f32 %v3960_v6  ;;  %v3972_v26 = vadd.f32 1.0, %v13673_v40  ;;  %v13675_v3 = vpop.eup %13674 }
 0x936   :  { %13682 = vrcp.f32 %v3971_v15  ;;  %v13677_v57 = vpop.eup %13676 }
 0x937   :  { %13684 = vrcp.f32 %v3972_v26 }
 0x938   :  { %13686 = vpow2.f32 %v9620_v5 }
 0x939   :  { %13688 = vpow2.f32 %v9621_v55 }
 0x93e   :  { %v13679_v20 = vpop.eup %13678  ;;  %v4079_v42 = vpop.f32.mrb[34].mxu0 }
 0x93f   :  { %v4150_v38 = vpop.f32.mrb[34].mxu1  ;;  %v13681_v19 = vpop.eup %13680  ;;  %v3999_v13 = vmul.f32 %v13679_v20, %v13675_v3  ;;  %v4159_v0 = vrot.slane %v4079_v42, 7  ;;  %v4175_v46 = vadd.f32 %v4079_v42, %v15262_v62  ;;  %v18229_v3 = vld [vmem:[#allocation127_spill] sm:$0xff]  ;;  %v18230_v42 = vld [vmem:[#allocation126_spill] sm:$0xff] }
 0x940   :  { %v4161_v58 = vrot.slane %v4150_v38, 7  ;;  %v4081_v48 = vpop.f32.mrb[35].mxu0  ;;  %v4152_v22 = vpop.f32.mrb[35].mxu1  ;;  %v4000_v40 = vmul.f32 %v13681_v19, %v13677_v57  ;;  %v4177_v15 = vadd.f32 %v4150_v38, %v18013_v31 }
 0x941   :  { %v13683_v6 = vpop.eup %13682  ;;  %v4160_v26 = vrot.slane %v4081_v48, 7  ;;  %v4176_v5 = vadd.f32 %v4081_v48, %v18175_v10  ;;  %v4171_v56 = vadd.f32 %v4159_v0, %v15254_v61  ;;  %v4183_v54 = vadd.f32 %v4175_v46, %v18176_v34 }
 0x942   :  { %v13685_v60 = vpop.eup %13684  ;;  %v3997_v55 = vmul.f32 %v13683_v6, %v3993_v1  ;;  %v4173_v20 = vadd.f32 %v4161_v58, %v18229_v3  ;;  %v4162_v19 = vrot.slane %v4152_v22, 7  ;;  %v4178_v0 = vadd.f32 %v4152_v22, %v15268_v47 }
 0x943   :  { %v3998_v37 = vmul.f32 %v13685_v60, %v3994_v16  ;;  %v4172_v62 = vadd.f32 %v4160_v26, %v18230_v42  ;;  %v4184_v17 = vadd.f32 %v4176_v5, %v15318_v51  ;;  %v13687_v18 = vpop.eup %13686  ;;  %v4179_v57 = vadd.f32 %v4171_v56, %v18176_v34 }
 0x944   :  { %v9623_v38 = vmul.f32 -1.442695, %v4183_v54  ;;  %v13689_v31 = vpop.eup %13688  ;;  %v4174_v46 = vadd.f32 %v4162_v19, %v15260_v4  ;;  %v16048_v16 = vadd.f32 %v3999_v13, %v3997_v55  ;;  %v3985_v58 = vadd.f32 1.0, %v13687_v18 }
 0x945   :  { %v4180_v48 = vadd.f32 %v4172_v62, %v15318_v51  ;;  %v9625_v1 = vmul.f32 -1.442695, %v4184_v17  ;;  %v9622_v6 = vmul.f32 -1.442695, %v4179_v57  ;;  %v16050_v5 = vadd.f32 %v4000_v40, %v3998_v37 }
 0x946   :  { %13690 = vpow2.f32 %v9623_v38  ;;  %v3986_v60 = vadd.f32 1.0, %v13689_v31  ;;  %v4186_v54 = vadd.f32 %v4178_v0, %v15337_v41  ;;  %v4182_v62 = vadd.f32 %v4174_v46, %v15337_v41 }
 0x947   :  { %v9624_v26 = vmul.f32 -1.442695, %v4180_v48  ;;  %13692 = vpow2.f32 %v9622_v6  ;;  %v4185_v17 = vadd.f32 %v4177_v15, %v15340_v32  ;;  %v4181_v31 = vadd.f32 %v4173_v20, %v15340_v32 }
 0x948   :  { %v9627_v22 = vmul.f32 -1.442695, %v4186_v54  ;;  %v9626_v13 = vmul.f32 -1.442695, %v4182_v62 }
 0x949   :  { %13694 = vpow2.f32 %v9624_v26 }
 0x94a   :  { %13696 = vpow2.f32 %v9625_v1 }
 0x94b   :  { %13698 = vrcp.f32 %v3985_v58 }
 0x94c   :  { %13700 = vrcp.f32 %v3986_v60 }
 0x94d   :  { %13702 = vtanh.f32 %v16048_v16 }
 0x94e   :  { %13704 = vtanh.f32 %v16050_v5 }
 0x94f   :  { %13706 = vtanh.f32 %v4185_v17 }
 0x950   :  { %v13691_v18 = vpop.eup %13690  ;;  %13708 = vpow2.f32 %v9627_v22 }
 0x951   :  { %v4194_v37 = vadd.f32 1.0, %v13691_v18  ;;  %v13693_v40 = vpop.eup %13692  ;;  %13710 = vpow2.f32 %v9626_v13 }
 0x952   :  { %v4193_v56 = vadd.f32 1.0, %v13693_v40 }
 0x953   :  { %v13695_v55 = vpop.eup %13694  ;;  %13712 = vrcp.f32 %v4194_v37 }
 0x954   :  { %v13697_v57 = vpop.eup %13696  ;;  %13714 = vtanh.f32 %v4181_v31  ;;  %v4205_v15 = vadd.f32 1.0, %v13695_v55  ;;  %v4227_v31 = vrot.slane %v15951_v25, 1 }
 0x955   :  { %v13699_v38 = vpop.eup %13698  ;;  %13716 = vrcp.f32 %v4193_v56  ;;  %v4206_v19 = vadd.f32 1.0, %v13697_v57  ;;  %v4228_v56 = vrot.slane %v15955_v14, 1 }
 0x956   :  { %v13701_v48 = vpop.eup %13700  ;;  %13718 = vrcp.f32 %v4205_v15 }
 0x957   :  { %v13703_v1 = vpop.eup %13702  ;;  %13720 = vrcp.f32 %v4206_v19  ;;  %v17691_v19 = vmov 0.0|0.0  }
 0x958   :  { %v13705_v0 = vpop.eup %13704  ;;  %v4005_v20 = vmul.f32 %v13703_v1, %v13699_v38  ;;  %v4731_v1 = vld [vmem:[%s18231_s0 + $0x18] sm:$0xff] }
 0x959   :  { %v4006_v6 = vmul.f32 %v13705_v0, %v13701_v48  ;;  %v13707_v46 = vpop.eup %13706  ;;  %v4730_v48 = vld [vmem:[%s18231_s0 + $0x10] sm:$0xff] }
 0x95a   :  { %v4243_v58 = vrot.slane %v4005_v20, 6  ;;  %v13709_v26 = vpop.eup %13708  ;;  %v11883_v0 = vpack.c.bf16 %v4731_v1, %v4730_v48  ;;  %v4732_v20 = vld [vmem:[%s18231_s0 + $0x20] sm:$0xff]  ;;  %v4727_v48 = vld [vmem:[%s18241_s4 + $0x78] sm:$0xff] }
 0x95b   :  { %v4244_v60 = vrot.slane %v4006_v6, 5  ;;  %v13711_v54 = vpop.eup %13710  ;;  %v4220_v37 = vadd.f32 1.0, %v13709_v26  ;;  %v4733_v6 = vld [vmem:[%s18231_s0 + $0x28] sm:$0xff]  ;;  %v4735_v26 = vld [vmem:[%s18231_s0 + $0x38] sm:$0xff] }
 0x95c   :  { %v4219_v57 = vadd.f32 1.0, %v13711_v54  ;;  %v4736_v54 = vld [vmem:[%s18231_s0 + $0x40] sm:$0xff] }
 0x95d   :  { %v13713_v62 = vpop.eup %13712  ;;  %v4245_v17 = vsel %vm1397_vm4, %v4244_v60, %v4243_v58  ;;  %13722 = vrcp.f32 %v4220_v37  ;;  %v4734_v58 = vld [vmem:[%s18231_s0 + $0x30] sm:$0xff]  ;;  %v4741_v37 = vld [vmem:[%s18231_s0 + $0x68] sm:$0xff] }
 0x95e   :  { %v13715_v22 = vpop.eup %13714  ;;  %v4234_v13 = vmul.f32 %v13713_v62, %v13707_v46  ;;  %4312 = vmatmul.mubr.f32.vlgmr.msra.gmra.mrb[36].mxu0 %v4245_v17  ;;  %4383 = vmatmul.mubr.f32.vlgmr.msra.gmra.mrb[36].mxu1 %v4245_v17  ;;  %13724 = vrcp.f32 %v4219_v57  ;;  %v11886_v46 = vpack.c.bf16 %v4733_v6, %v4732_v20  ;;  %v11889_v60 = vpack.c.bf16 %v4735_v26, %v4734_v58  ;;  %v4737_v62 = vld [vmem:[%s18231_s0 + $0x48] sm:$0xff]  ;;  %v4899_v20 = vld [vmem:[#allocation8 + $0x8] sm:$0xff] }
 0x95f   :  { %v13717_v18 = vpop.eup %13716  ;;  %11818 = vmatpush1.bf16.msra.mxu0 %v15051_v21  ;;  %11850 = vmatpush1.bf16.msra.mxu1 %v15055_v23  ;;  %v11892_v17 = vpack.c.bf16 %v4737_v62, %v4736_v54  ;;  %v4900_v6 = vld [vmem:[#allocation8 + $0x10] sm:$0xff]  ;;  %v4901_v58 = vld [vmem:[#allocation8 + $0x18] sm:$0xff]  ;;  %v4903_v54 = vld [vmem:[#allocation8 + $0x28] sm:$0xff] }
 0x960   :  { %v13719_v40 = vpop.eup %13718  ;;  %v4233_v55 = vmul.f32 %v13717_v18, %v13715_v22  ;;  %11820 = vmatprep.subr.bf16.mxu0 %v15057_v24  ;;  %11852 = vmatprep.subr.bf16.mxu1 %v15063_v35  ;;  %v4738_v22 = vld [vmem:[%s18231_s0 + $0x50] sm:$0xff]  ;;  %v11931_v26 = vpack.c.bf16 %v4901_v58, %v4900_v6 }
 0x961   :  { %v13721_v15 = vpop.eup %13720  ;;  %v4231_v38 = vmul.f32 %v13719_v40, %v4227_v31  ;;  %4548 = vmatprep.mubr.f32.mxu0 %v17887_v33  ;;  %4619 = vmatprep.mubr.f32.mxu1 %v17887_v33  ;;  %v4740_v31 = vld [vmem:[%s18231_s0 + $0x60] sm:$0xff] }
 0x962   :  { %v4232_v25 = vmul.f32 %v13721_v15, %v4228_v56  ;;  %v11898_v40 = vpack.c.bf16 %v4741_v37, %v4740_v31  ;;  %v4743_v56 = vld [vmem:[%s18231_s0 + $0x78] sm:$0xff] }
 0x963   :  { %11822 = vmatpush1.bf16.msra.mxu0 %v15073_v44  ;;  %11854 = vmatpush1.bf16.msra.mxu1 %v15077_v49  ;;  %v16069_v21 = vadd.f32 %v4233_v55, %v4231_v38  ;;  %v4742_v55 = vld [vmem:[%s18231_s0 + $0x70] sm:$0xff]  ;;  %v18242_v15 = vld [vmem:[#allocation99_spill] sm:$0xff]  ;;  %v4712_v38 = vld [vmem:[%s18241_s4] sm:$0xff] }
 0x964   :  { %11824 = vmatprep.subr.bf16.mxu0 %v15079_v50  ;;  %11856 = vmatprep.subr.bf16.mxu1 %v15085_v59  ;;  %v16073_v23 = vadd.f32 %v4234_v13, %v4232_v25  ;;  %v4739_v13 = vld [vmem:[%s18231_s0 + $0x58] sm:$0xff]  ;;  %v11901_v57 = vpack.c.bf16 %v4743_v56, %v4742_v55  ;;  %v4713_v25 = vld [vmem:[%s18241_s4 + $0x8] sm:$0xff] }
 0x965   :  { %13726 = vtanh.f32 %v16069_v21  ;;  %v11895_v18 = vpack.c.bf16 %v4739_v13, %v4738_v22 }
 0x966   :  { %13728 = vtanh.f32 %v16073_v23 }
 0x967   :  { %11826 = vmatpush1.bf16.msra.mxu0 %v15095_v11  ;;  %11858 = vmatpush1.bf16.msra.mxu1 %v15099_v12  ;;  %v13723_v24 = vpop.eup %13722  ;;  %v18232_v12 = vld [vmem:[#allocation109_spill] sm:$0xff] }
 0x968   :  { %11828 = vmatprep.subr.bf16.mxu0 %v17913_v30  ;;  %11860 = vmatprep.subr.bf16.mxu1 %v17914_v63  ;;  %v13725_v35 = vpop.eup %13724  ;;  %v18233_v30 = vld [vmem:[#allocation110_spill] sm:$0xff]  ;;  %v18234_v63 = vld [vmem:[#allocation111_spill] sm:$0xff] }
 0x96b   :  { %11830 = vmatpush1.bf16.msra.mxu0 %v17915_v29  ;;  %11862 = vmatpush1.bf16.msra.mxu1 %v17916_v52  ;;  %v18235_v52 = vld [vmem:[#allocation112_spill] sm:$0xff] }
 0x96c   :  { %11832 = vmatprep.subr.bf16.mxu0 %v17917_v36  ;;  %11864 = vmatprep.subr.bf16.mxu1 %v17918_v27  ;;  %v18236_v36 = vld [vmem:[#allocation113_spill] sm:$0xff]  ;;  %v18237_v27 = vld [vmem:[#allocation114_spill] sm:$0xff] }
 0x96f   :  { %v13727_v44 = vpop.eup %13726  ;;  %11834 = vmatpush1.bf16.msra.mxu0 %v17919_v39  ;;  %11866 = vmatpush1.bf16.msra.mxu1 %v17920_v2  ;;  %v18238_v39 = vld [vmem:[#allocation115_spill] sm:$0xff]  ;;  %v4728_v2 = vld [vmem:[%s18231_s0] sm:$0xff] }
 0x970   :  { %v13729_v49 = vpop.eup %13728  ;;  %11836 = vmatprep.subr.bf16.mxu0 %v17921_v7  ;;  %11868 = vmatprep.subr.bf16.mxu1 %v17922_v45  ;;  %v4239_v50 = vmul.f32 %v13727_v44, %v13725_v35  ;;  %v18239_v7 = vld [vmem:[#allocation116_spill] sm:$0xff]  ;;  %v18240_v45 = vld [vmem:[#allocation117_spill] sm:$0xff]  ;;  %v4714_v35 = vld [vmem:[%s18241_s4 + $0x10] sm:$0xff] }
 0x971   :  { %v4240_v59 = vmul.f32 %v13729_v49, %v13723_v24  ;;  %v11904_v24 = vpack.c.bf16 %v4713_v25, %v4712_v38  ;;  %v4715_v44 = vld [vmem:[%s18241_s4 + $0x18] sm:$0xff] }
 0x972   :  { %v4481_v11 = vrot.slane %v4239_v50, 1  ;;  %v11907_v49 = vpack.c.bf16 %v4715_v44, %v4714_v35  ;;  %v4716_v50 = vld [vmem:[%s18241_s4 + $0x20] sm:$0xff] }
 0x973   :  { %11838 = vmatpush1.bf16.msra.mxu0 %v15155_v9  ;;  %11870 = vmatpush1.bf16.msra.mxu1 %v18232_v12  ;;  %v4729_v9 = vld [vmem:[%s18231_s0 + $0x8] sm:$0xff]  ;;  %v4718_v12 = vld [vmem:[%s18241_s4 + $0x30] sm:$0xff]  ;;  %v18244_v44 = vld [vmem:[#allocation120_spill] sm:$0xff] }
 0x974   :  { %11840 = vmatprep.subr.bf16.mxu0 %v18233_v30  ;;  %11872 = vmatprep.subr.bf16.mxu1 %v18234_v63  ;;  %v4482_v29 = vsel %vm1397_vm4, %v4240_v59, %v4481_v11  ;;  %v11880_v14 = vpack.c.bf16 %v4729_v9, %v4728_v2  ;;  %v4717_v59 = vld [vmem:[%s18241_s4 + $0x28] sm:$0xff]  ;;  %v4719_v30 = vld [vmem:[%s18241_s4 + $0x38] sm:$0xff]  ;;  %v4724_v9 = vld [vmem:[%s18241_s4 + $0x60] sm:$0xff] }
 0x975   :  { %v11910_v11 = vpack.c.bf16 %v4717_v59, %v4716_v50  ;;  %v11913_v63 = vpack.c.bf16 %v4719_v30, %v4718_v12  ;;  %v18245_v12 = vld [vmem:[#allocation121_spill] sm:$0xff] }
 0x977   :  { %11842 = vmatpush1.bf16.msra.mxu0 %v18235_v52  ;;  %11874 = vmatpush1.bf16.msra.mxu1 %v18236_v36  ;;  %v4721_v52 = vld [vmem:[%s18241_s4 + $0x48] sm:$0xff] }
 0x978   :  { %11844 = vmatprep.subr.bf16.mxu0 %v18237_v27  ;;  %11876 = vmatprep.subr.bf16.mxu1 %v18238_v39  ;;  %v4722_v27 = vld [vmem:[%s18241_s4 + $0x50] sm:$0xff]  ;;  %v4723_v39 = vld [vmem:[%s18241_s4 + $0x58] sm:$0xff] }
 0x979   :  { %v11919_v2 = vpack.c.bf16 %v4723_v39, %v4722_v27  ;;  %v18248_v39 = vld [vmem:[#allocation136_spill] sm:$0xff] }
 0x97b   :  { %11846 = vmatpush1.bf16.msra.mxu0 %v18239_v7  ;;  %11878 = vmatpush1.bf16.msra.mxu1 %v18240_v45  ;;  %v4725_v7 = vld [vmem:[%s18241_s4 + $0x68] sm:$0xff] }
 0x97c   :  { %11879 = vmatprep.subr.bf16.mxu0 %v17691_v19  ;;  %11903 = vmatprep.subr.bf16.mxu1 %v17691_v19  ;;  %v11922_v45 = vpack.c.bf16 %v4725_v7, %v4724_v9 }
 0x97e   :  { %4549 = vmatmul.mubr.f32.vlgmr.msra.gmra.mrb[38].mxu0 %v4482_v29  ;;  %4620 = vmatmul.mubr.f32.vlgmr.msra.gmra.mrb[38].mxu1 %v4482_v29  ;;  %v4720_v29 = vld [vmem:[%s18241_s4 + $0x40] sm:$0xff] }
 0x97f   :  { %11881 = vmatpush3.bf16.msra.mxu0 %v11880_v14  ;;  %10087 = vmatprep.mubr.msk.f32.mxu0 %vm14537_vm5, %v17887_v33  ;;  %v11916_v36 = vpack.c.bf16 %v4721_v52, %v4720_v29  ;;  %v4726_v14 = vld [vmem:[%s18241_s4 + $0x70] sm:$0xff]  ;;  %v18247_v52 = vld [vmem:[#allocation135_spill] sm:$0xff] }
 0x980   :  { %11882 = vmatprep.subr.bf16.mxu0 %v17691_v19  ;;  %10122 = vmatprep.mubr.msk.f32.mxu1 %vm14537_vm5, %v17887_v33  ;;  %v11925_v1 = vpack.c.bf16 %v4727_v48, %v4726_v14 }
 0x981   :  { %11905 = vmatpush3.bf16.msra.mxu1 %v11904_v24  ;;  %v18243_v24 = vld [vmem:[#allocation122_spill] sm:$0xff] }
 0x982   :  { %11906 = vmatprep.subr.bf16.mxu1 %v17691_v19 }
 0x983   :  { %11884 = vmatpush3.bf16.msra.mxu0 %v11883_v0  ;;  %v4898_v0 = vld [vmem:[#allocation8] sm:$0xff] }
 0x984   :  { %11885 = vmatprep.subr.bf16.mxu0 %v17691_v19 }
 0x985   :  { %11908 = vmatpush3.bf16.msra.mxu1 %v11907_v49 }
 0x986   :  { %11909 = vmatprep.subr.bf16.mxu1 %v17691_v19 }
 0x987   :  { %11887 = vmatpush3.bf16.msra.mxu0 %v11886_v46  ;;  %v11928_v46 = vpack.c.bf16 %v4899_v20, %v4898_v0 }
 0x988   :  { %11888 = vmatprep.subr.bf16.mxu0 %v17691_v19 }
 0x989   :  { %11911 = vmatpush3.bf16.msra.mxu1 %v11910_v11 }
 0x98a   :  { %11912 = vmatprep.subr.bf16.mxu1 %v17691_v19 }
 0x98b   :  { %11890 = vmatpush3.bf16.msra.mxu0 %v11889_v60  ;;  %v4902_v60 = vld [vmem:[#allocation8 + $0x20] sm:$0xff] }
 0x98c   :  { %11891 = vmatprep.subr.bf16.mxu0 %v17691_v19  ;;  %v11934_v62 = vpack.c.bf16 %v4903_v54, %v4902_v60 }
 0x98d   :  { %11914 = vmatpush3.bf16.msra.mxu1 %v11913_v63  ;;  %v18246_v63 = vld [vmem:[#allocation125_spill] sm:$0xff] }
 0x98e   :  { %11915 = vmatprep.subr.bf16.mxu1 %v17691_v19 }
 0x98f   :  { %11893 = vmatpush3.bf16.msra.mxu0 %v11892_v17 }
 0x990   :  { %11894 = vmatprep.subr.bf16.mxu0 %v17691_v19 }
 0x991   :  { %11917 = vmatpush3.bf16.msra.mxu1 %v11916_v36 }
 0x992   :  { %11918 = vmatprep.subr.bf16.mxu1 %v17691_v19 }
 0x993   :  { %11896 = vmatpush3.bf16.msra.mxu0 %v11895_v18 }
 0x994   :  { %11897 = vmatprep.subr.bf16.mxu0 %v17691_v19 }
 0x995   :  { %11920 = vmatpush3.bf16.msra.mxu1 %v11919_v2 }
 0x996   :  { %11921 = vmatprep.subr.bf16.mxu1 %v17691_v19 }
 0x997   :  { %11899 = vmatpush3.bf16.msra.mxu0 %v11898_v40 }
 0x998   :  { %11900 = vmatprep.subr.bf16.mxu0 %v17691_v19 }
 0x999   :  { %11923 = vmatpush3.bf16.msra.mxu1 %v11922_v45 }
 0x99a   :  { %11924 = vmatprep.subr.bf16.mxu1 %v17691_v19 }
 0x99b   :  { %11902 = vmatpush3.bf16.msra.mxu0 %v11901_v57 }
 0x99c   :  { %11927 = vmatprep.subr.bf16.mxu0 %v17691_v19 }
 0x99d   :  { %11926 = vmatpush3.bf16.msra.mxu1 %v11925_v1  ;;  %v18250_v1 = vld [vmem:[#allocation137_spill] sm:$0xff] }
 0x99e   :  { %10088 = vmatmul.mubr.f32.vlgmr.msra.gmra.mrb[40].mxu0 %v18242_v15  ;;  %11939 = vmatprep.subr.bf16.mxu1 %v17691_v19 }
 0x99f   :  { %10141 = vmatprep.mubr.msk.f32.mxu0 %vm14537_vm5, %v17887_v33  ;;  %11929 = vmatpush3.bf16.msra.mxu0 %v11928_v46 }
 0x9a0   :  { %11930 = vmatprep.subr.bf16.mxu0 %v17691_v19 }
 0x9a3   :  { %11932 = vmatpush3.bf16.msra.mxu0 %v11931_v26 }
 0x9a4   :  { %11933 = vmatprep.subr.bf16.mxu0 %v17691_v19 }
 0x9a7   :  { %11935 = vmatpush3.bf16.msra.mxu0 %v11934_v62 }
 0x9a8   :  { %11936 = vmatprep.subr.bf16.mxu0 %v17691_v19 }
 0xa31   :  { %v4313_v17 = vpop.f32.mrb[36].mxu0  ;;  %v4384_v22 = vpop.f32.mrb[36].mxu1 }
 0xa32   :  { %v4393_v13 = vrot.slane %v4313_v17, 1  ;;  %v4397_v18 = vrot.slane %v4313_v17, 2  ;;  %v4395_v31 = vrot.slane %v4384_v22, 1  ;;  %v4399_v37 = vrot.slane %v4384_v22, 2  ;;  %v4315_v40 = vpop.f32.mrb[37].mxu0  ;;  %v4386_v55 = vpop.f32.mrb[37].mxu1 }
 0xa33   :  { %v4394_v56 = vrot.slane %v4315_v40, 1  ;;  %v4398_v57 = vrot.slane %v4315_v40, 2  ;;  %v4396_v15 = vrot.slane %v4386_v55, 1  ;;  %v4400_v38 = vrot.slane %v4386_v55, 2 }
 0xa34   :  { %v4409_v25 = vadd.f32 %v4393_v13, %v17955_v8  ;;  %v4413_v35 = vadd.f32 %v4397_v18, %v18243_v24  ;;  %v4411_v49 = vadd.f32 %v4395_v31, %v18244_v44  ;;  %v4415_v50 = vadd.f32 %v4399_v37, %v18006_v28 }
 0xa35   :  { %v4410_v59 = vadd.f32 %v4394_v56, %v18007_v53  ;;  %v4414_v11 = vadd.f32 %v4398_v57, %v18222_v43  ;;  %v4412_v30 = vadd.f32 %v4396_v15, %v18245_v12  ;;  %v4416_v29 = vadd.f32 %v4400_v38, %v18246_v63  ;;  %v18249_v53 = vld [vmem:[#allocation139_spill] sm:$0xff] }
 0xa36   :  { %v4417_v36 = vadd.f32 %v4409_v25, %v18247_v52  ;;  %v4421_v27 = vadd.f32 %v4413_v35, %v18247_v52  ;;  %v4419_v43 = vadd.f32 %v4411_v49, %v18249_v53  ;;  %v4423_v14 = vadd.f32 %v4415_v50, %v18249_v53  ;;  %v18252_v52 = vld [vmem:[#allocation130_spill] sm:$0xff] }
 0xa37   :  { %v4418_v8 = vadd.f32 %v4410_v59, %v18248_v39  ;;  %v4422_v2 = vadd.f32 %v4414_v11, %v18248_v39  ;;  %v4420_v0 = vadd.f32 %v4412_v30, %v18250_v1  ;;  %v4424_v46 = vadd.f32 %v4416_v29, %v18250_v1 }
 0xa38   :  { %v9628_v9 = vmul.f32 -1.442695, %v4417_v36  ;;  %v9629_v7 = vmul.f32 -1.442695, %v4421_v27  ;;  %v4465_v37 = vrot.slane %v16048_v16, 7  ;;  %v4466_v40 = vrot.slane %v16050_v5, 7 }
 0xa39   :  { %v9630_v45 = vmul.f32 -1.442695, %v4418_v8  ;;  %v9631_v28 = vmul.f32 -1.442695, %v4422_v2  ;;  %v9632_v17 = vmul.f32 -1.442695, %v4420_v0 }
 0xa3a   :  { %13730 = vpow2.f32 %v9628_v9  ;;  %v9633_v22 = vmul.f32 -1.442695, %v4424_v46  ;;  %v18251_v5 = vld [vmem:[#allocation128_spill] sm:$0xff] }
 0xa3b   :  { %13732 = vpow2.f32 %v9629_v7 }
 0xa3c   :  { %13734 = vpow2.f32 %v9630_v45 }
 0xa3d   :  { %13736 = vpow2.f32 %v9631_v28 }
 0xa3e   :  { %13738 = vtanh.f32 %v4419_v43 }
 0xa3f   :  { %13740 = vtanh.f32 %v4423_v14 }
 0xa44   :  { %v13731_v48 = vpop.eup %13730 }
 0xa45   :  { %v13733_v20 = vpop.eup %13732  ;;  %v4431_v6 = vadd.f32 1.0, %v13731_v48 }
 0xa46   :  { %v13735_v58 = vpop.eup %13734  ;;  %v4432_v26 = vadd.f32 1.0, %v13733_v20 }
 0xa47   :  { %v13737_v60 = vpop.eup %13736  ;;  %13742 = vrcp.f32 %v4431_v6  ;;  %v4443_v54 = vadd.f32 1.0, %v13735_v58 }
 0xa48   :  { %13744 = vrcp.f32 %v4432_v26  ;;  %v4444_v62 = vadd.f32 1.0, %v13737_v60  ;;  %v13739_v13 = vpop.eup %13738 }
 0xa49   :  { %13746 = vrcp.f32 %v4443_v54  ;;  %v13741_v18 = vpop.eup %13740 }
 0xa4a   :  { %13748 = vrcp.f32 %v4444_v62 }
 0xa4b   :  { %13750 = vpow2.f32 %v9632_v17 }
 0xa4c   :  { %13752 = vpow2.f32 %v9633_v22 }
 0xa51   :  { %v13743_v31 = vpop.eup %13742  ;;  %v4550_v55 = vpop.f32.mrb[38].mxu0 }
 0xa52   :  { %v4621_v56 = vpop.f32.mrb[38].mxu1  ;;  %v13745_v57 = vpop.eup %13744  ;;  %v4471_v15 = vmul.f32 %v13743_v31, %v13739_v13  ;;  %v4630_v38 = vrot.slane %v4550_v55, 1  ;;  %v4642_v25 = vadd.f32 %v4550_v55, %v15254_v61 }
 0xa53   :  { %v4632_v24 = vrot.slane %v4621_v56, 1  ;;  %v4552_v35 = vpop.f32.mrb[39].mxu0  ;;  %v4623_v44 = vpop.f32.mrb[39].mxu1  ;;  %v4472_v50 = vmul.f32 %v13745_v57, %v13741_v18  ;;  %v4644_v59 = vadd.f32 %v4621_v56, %v18229_v3 }
 0xa54   :  { %v13747_v49 = vpop.eup %13746  ;;  %v4631_v11 = vrot.slane %v4552_v35, 1  ;;  %v4643_v12 = vadd.f32 %v4552_v35, %v18230_v42  ;;  %v4646_v63 = vadd.f32 %v4630_v38, %v18251_v5  ;;  %v4650_v29 = vadd.f32 %v4642_v25, %v18176_v34 }
 0xa55   :  { %v13749_v16 = vpop.eup %13748  ;;  %v4469_v30 = vmul.f32 %v13747_v49, %v4465_v37  ;;  %v4648_v36 = vadd.f32 %v4632_v24, %v18252_v52  ;;  %v4633_v9 = vrot.slane %v4623_v44, 1  ;;  %v4645_v28 = vadd.f32 %v4623_v44, %v15260_v4 }
 0xa56   :  { %v4470_v27 = vmul.f32 %v13749_v16, %v4466_v40  ;;  %v4647_v61 = vadd.f32 %v4631_v11, %v18175_v10  ;;  %v4651_v39 = vadd.f32 %v4643_v12, %v15318_v51  ;;  %v13751_v8 = vpop.eup %13750  ;;  %v4654_v2 = vadd.f32 %v4646_v63, %v18176_v34 }
 0xa57   :  { %v9634_v3 = vmul.f32 -1.442695, %v4650_v29  ;;  %v13753_v7 = vpop.eup %13752  ;;  %v4649_v43 = vadd.f32 %v4633_v9, %v15268_v47  ;;  %v4473_v14 = vadd.f32 %v4471_v15, %v4469_v30  ;;  %v4457_v48 = vadd.f32 1.0, %v13751_v8 }
 0xa58   :  { %v4655_v42 = vadd.f32 %v4647_v61, %v15318_v51  ;;  %v9636_v45 = vmul.f32 -1.442695, %v4651_v39  ;;  %v9635_v53 = vmul.f32 -1.442695, %v4654_v2  ;;  %v4474_v1 = vadd.f32 %v4472_v50, %v4470_v27 }
 0xa59   :  { %13754 = vpow2.f32 %v9634_v3  ;;  %v4458_v0 = vadd.f32 1.0, %v13753_v7  ;;  %v6449_v20 = vrot.slane %v4473_v14, 7  ;;  %v4653_v34 = vadd.f32 %v4645_v28, %v15337_v41 }
 0xa5a   :  { %v9637_v10 = vmul.f32 -1.442695, %v4655_v42  ;;  %13756 = vpow2.f32 %v9635_v53  ;;  %v6450_v6 = vrot.slane %v4474_v1, 6  ;;  %v4657_v51 = vadd.f32 %v4649_v43, %v15337_v41  ;;  %v4904_v43 = vld [vmem:[#allocation8 + $0x30] sm:$0xff] }
 0xa5b   :  { %13758 = vpow2.f32 %v9636_v45  ;;  %v4652_v47 = vadd.f32 %v4644_v59, %v15340_v32  ;;  %v9638_v46 = vmul.f32 -1.442695, %v4653_v34  ;;  %v4656_v60 = vadd.f32 %v4648_v36, %v15340_v32  ;;  %v4991_v34 = vld [vmem:[%s18253_s19 + $0x18] sm:$0xff] }
 0xa5c   :  { %13760 = vpow2.f32 %v9637_v10  ;;  %v16193_v4 = vsel %vm1397_vm4, %v6450_v6, %v6449_v20  ;;  %v9639_v58 = vmul.f32 -1.442695, %v4657_v51  ;;  %v4698_v11 = vrot.slane %v16069_v21, 1  ;;  %v4988_v10 = vld [vmem:[%s18253_s19] sm:$0xff] }
 0xa5d   :  { %13762 = vrcp.f32 %v4457_v48  ;;  %v4699_v63 = vrot.slane %v16073_v23, 1  ;;  %v4992_v51 = vld [vmem:[%s18253_s19 + $0x20] sm:$0xff] }
 0xa5e   :  { %13764 = vrcp.f32 %v4458_v0  ;;  %v4990_v0 = vld [vmem:[%s18253_s19 + $0x10] sm:$0xff] }
 0xa5f   :  { %13766 = vtanh.f32 %v4473_v14  ;;  %v4905_v14 = vld [vmem:[#allocation8 + $0x38] sm:$0xff]  ;;  %v11943_v6 = vpack.c.bf16 %v4991_v34, %v4990_v0  ;;  %v5180_v34 = vld [vmem:[%s18255_s17 + $0x18] sm:$0xff] }
 0xa60   :  { %13768 = vtanh.f32 %v4474_v1  ;;  %v11937_v48 = vpack.c.bf16 %v4905_v14, %v4904_v43  ;;  %v4989_v1 = vld [vmem:[%s18253_s19 + $0x8] sm:$0xff] }
 0xa61   :  { %13770 = vtanh.f32 %v4652_v47  ;;  %v11940_v20 = vpack.c.bf16 %v4989_v1, %v4988_v10  ;;  %v4993_v47 = vld [vmem:[%s18253_s19 + $0x28] sm:$0xff]  ;;  %v5177_v10 = vld [vmem:[%s18255_s17] sm:$0xff] }
 0xa62   :  { %13772 = vpow2.f32 %v9638_v46  ;;  %11938 = vmatpush3.bf16.msra.mxu0 %v11937_v48  ;;  %v11946_v46 = vpack.c.bf16 %v4993_v47, %v4992_v51  ;;  %v5096_v43 = vld [vmem:[#allocation13 + $0x70] sm:$0xff]  ;;  %v5097_v14 = vld [vmem:[#allocation13 + $0x78] sm:$0xff] }
 0xa63   :  { %v13755_v26 = vpop.eup %13754  ;;  %13774 = vpow2.f32 %v9639_v58  ;;  %11963 = vmatprep.subr.bf16.mxu0 %v17691_v19  ;;  %v4994_v58 = vld [vmem:[%s18253_s19 + $0x30] sm:$0xff]  ;;  %v11985_v48 = vpack.c.bf16 %v5097_v14, %v5096_v43  ;;  %v5178_v1 = vld [vmem:[%s18255_s17 + $0x8] sm:$0xff]  ;;  %v5181_v51 = vld [vmem:[%s18255_s17 + $0x20] sm:$0xff] }
 0xa64   :  { %v4664_v54 = vadd.f32 1.0, %v13755_v26  ;;  %v13757_v62 = vpop.eup %13756  ;;  %v4995_v26 = vld [vmem:[%s18253_s19 + $0x38] sm:$0xff]  ;;  %v11988_v0 = vpack.c.bf16 %v5178_v1, %v5177_v10  ;;  %v5182_v47 = vld [vmem:[%s18255_s17 + $0x28] sm:$0xff]  ;;  %v9644_v14 = vld [vmem:[#allocation14] ss:$0 sm:$0xff] }
 0xa65   :  { %v13759_v41 = vpop.eup %13758  ;;  %v4665_v17 = vadd.f32 1.0, %v13757_v62  ;;  %v4997_v62 = vld [vmem:[%s18253_s19 + $0x48] sm:$0xff] }
 0xa66   :  { %13776 = vrcp.f32 %v4664_v54  ;;  %v13761_v22 = vpop.eup %13760  ;;  %v4676_v13 = vadd.f32 1.0, %v13759_v41  ;;  %v4996_v54 = vld [vmem:[%s18253_s19 + $0x40] sm:$0xff] }
 0xa67   :  { %13778 = vtanh.f32 %v4656_v60  ;;  %v13763_v18 = vpop.eup %13762  ;;  %v4677_v31 = vadd.f32 1.0, %v13761_v22  ;;  %v11949_v60 = vpack.c.bf16 %v4995_v26, %v4994_v58  ;;  %v11952_v41 = vpack.c.bf16 %v4997_v62, %v4996_v54  ;;  %v4999_v22 = vld [vmem:[%s18253_s19 + $0x58] sm:$0xff]  ;;  %v5183_v58 = vld [vmem:[%s18255_s17 + $0x30] sm:$0xff]  ;;  %v5185_v54 = vld [vmem:[%s18255_s17 + $0x40] sm:$0xff] }
 0xa68   :  { %13780 = vrcp.f32 %v4665_v17  ;;  %v13765_v37 = vpop.eup %13764  ;;  %v4998_v17 = vld [vmem:[%s18253_s19 + $0x50] sm:$0xff]  ;;  %v5184_v26 = vld [vmem:[%s18255_s17 + $0x38] sm:$0xff]  ;;  %v5186_v62 = vld [vmem:[%s18255_s17 + $0x48] sm:$0xff] }
 0xa69   :  { %13782 = vrcp.f32 %v4676_v13  ;;  %v13767_v40 = vpop.eup %13766  ;;  %v11955_v13 = vpack.c.bf16 %v4999_v22, %v4998_v17  ;;  %v5187_v17 = vld [vmem:[%s18255_s17 + $0x50] sm:$0xff]  ;;  %v5188_v22 = vld [vmem:[%s18255_s17 + $0x58] sm:$0xff] }
 0xa6a   :  { %13784 = vrcp.f32 %v4677_v31  ;;  %v13769_v55 = vpop.eup %13768  ;;  %v4477_v32 = vmul.f32 %v13767_v40, %v13763_v18  ;;  %v5000_v18 = vld [vmem:[%s18253_s19 + $0x60] sm:$0xff]  ;;  %v5001_v31 = vld [vmem:[%s18253_s19 + $0x68] sm:$0xff] }
 0xa6b   :  { %v4478_v56 = vmul.f32 %v13769_v55, %v13765_v37  ;;  %v13771_v57 = vpop.eup %13770  ;;  %v11958_v37 = vpack.c.bf16 %v5001_v31, %v5000_v18  ;;  %v9640_v55 = vld [vmem:[#allocation7] ss:$0 sm:$0xff]  ;;  %v9643_v18 = vld [vmem:[#allocation11] ss:$0 sm:$0xff]  ;;  %v5270_v31 = vld [vmem:[%s18256_s26] sm:$0xff] }
 0xa6c   :  { %v4816_v15 = vrot.slane %v4477_v32, 7  ;;  %v13773_v38 = vpop.eup %13772 }
 0xa6d   :  { %v4817_v25 = vrot.slane %v4478_v56, 6  ;;  %v13775_v24 = vpop.eup %13774  ;;  %v4690_v12 = vadd.f32 1.0, %v13773_v38  ;;  %v5003_v38 = vld [vmem:[%s18253_s19 + $0x78] sm:$0xff] }
 0xa6e   :  { %v4691_v29 = vadd.f32 1.0, %v13775_v24  ;;  %v5082_v24 = vld [vmem:[#allocation13] sm:$0xff] }
 0xa6f   :  { %v16198_v44 = vsel %vm1397_vm4, %v4817_v25, %v4816_v15  ;;  %13786 = vrcp.f32 %v4690_v12  ;;  %v5002_v15 = vld [vmem:[%s18253_s19 + $0x70] sm:$0xff] }
 0xa70   :  { %v13777_v35 = vpop.eup %13776  ;;  %10123 = vmatmul.mubr.f32.vlgmr.msra.gmra.mrb[40].mxu1 %v16198_v44  ;;  %13788 = vrcp.f32 %v4691_v29  ;;  %v11961_v25 = vpack.c.bf16 %v5003_v38, %v5002_v15  ;;  %v5086_v12 = vld [vmem:[#allocation13 + $0x20] sm:$0xff] }
 0xa71   :  { %v13779_v49 = vpop.eup %13778  ;;  %v4704_v50 = vmul.f32 %v13777_v35, %v13771_v57  ;;  %v16202_v16 = vpop.f32.mrb[40].mxu0  ;;  %10176 = vmatprep.mubr.msk.f32.mxu1 %vm14537_vm5, %v17887_v33  ;;  %11941 = vmatpush3.bf16.msra.mxu1 %v11940_v20  ;;  %v5083_v35 = vld [vmem:[#allocation13 + $0x8] sm:$0xff]  ;;  %v5179_v20 = vld [vmem:[%s18255_s17 + $0x10] sm:$0xff] }
 0xa72   :  { %v13781_v59 = vpop.eup %13780  ;;  %v10089_v52 = vpop.f32.mrb[41].mxu0  ;;  %11942 = vmatprep.subr.bf16.mxu1 %v17691_v19  ;;  %v5272_v38 = vld [vmem:[%s18256_s26 + $0x10] sm:$0xff] }
 0xa73   :  { %v13783_v30 = vpop.eup %13782  ;;  %v4705_v5 = vmul.f32 %v13781_v59, %v13779_v49  ;;  %v5084_v49 = vld [vmem:[#allocation13 + $0x10] sm:$0xff]  ;;  %v5085_v59 = vld [vmem:[#allocation13 + $0x18] sm:$0xff]  ;;  %v5090_v52 = vld [vmem:[#allocation13 + $0x40] sm:$0xff] }
 0xa74   :  { %v13785_v36 = vpop.eup %13784  ;;  %v4702_v27 = vmul.f32 %v13783_v30, %v4698_v11  ;;  %v11967_v11 = vpack.c.bf16 %v5085_v59, %v5084_v49  ;;  %v5275_v49 = vld [vmem:[%s18256_s26 + $0x28] sm:$0xff]  ;;  %v5276_v59 = vld [vmem:[%s18256_s26 + $0x30] sm:$0xff] }
 0xa75   :  { %v4703_v61 = vmul.f32 %v13785_v36, %v4699_v63  ;;  %11944 = vmatpush3.bf16.msra.mxu1 %v11943_v6  ;;  %v5089_v63 = vld [vmem:[#allocation13 + $0x38] sm:$0xff]  ;;  %v5091_v36 = vld [vmem:[#allocation13 + $0x48] sm:$0xff]  ;;  %v11991_v6 = vpack.c.bf16 %v5180_v34, %v5179_v20 }
 0xa76   :  { %v4706_v39 = vadd.f32 %v4704_v50, %v4702_v27  ;;  %11945 = vmatprep.subr.bf16.mxu1 %v17691_v19  ;;  %v11964_v50 = vpack.c.bf16 %v5083_v35, %v5082_v24  ;;  %v11976_v27 = vpack.c.bf16 %v5091_v36, %v5090_v52  ;;  %v5274_v35 = vld [vmem:[%s18256_s26 + $0x20] sm:$0xff] }
 0xa77   :  { %v4707_v8 = vadd.f32 %v4705_v5, %v4703_v61  ;;  %v5088_v5 = vld [vmem:[#allocation13 + $0x30] sm:$0xff]  ;;  %v5372_v34 = vld [vmem:[#allocation19] sm:$0xff] }
 0xa78   :  { %13790 = vtanh.f32 %v4706_v39  ;;  %v11973_v29 = vpack.c.bf16 %v5089_v63, %v5088_v5  ;;  %v5092_v61 = vld [vmem:[#allocation13 + $0x50] sm:$0xff]  ;;  %v5280_v63 = vld [vmem:[%s18256_s26 + $0x50] sm:$0xff] }
 0xa79   :  { %13792 = vtanh.f32 %v4707_v8  ;;  %v6655_v21 = vrot.slane %v4707_v8, 7  ;;  %v13787_v3 = vpop.eup %13786  ;;  %11947 = vmatpush3.bf16.msra.mxu1 %v11946_v46  ;;  %v11994_v46 = vpack.c.bf16 %v5182_v47, %v5181_v51  ;;  %v5189_v36 = vld [vmem:[%s18255_s17 + $0x60] sm:$0xff]  ;;  %v5374_v47 = vld [vmem:[#allocation19 + $0x10] sm:$0xff] }
 0xa7a   :  { %v13789_v23 = vpop.eup %13788  ;;  %11948 = vmatprep.subr.bf16.mxu1 %v17691_v19 }
 0xa7b   :  { %v16208_v2 = vsel %vm1397_vm4, %v6655_v21, %v4706_v39  ;;  %v5093_v39 = vld [vmem:[#allocation13 + $0x58] sm:$0xff]  ;;  %v5094_v21 = vld [vmem:[#allocation13 + $0x60] sm:$0xff] }
 0xa7c   :  { %18254 = vst [vmem:[#allocation100_spill] sm:$0xff] %v16208_v2  ;;  %v11979_v8 = vpack.c.bf16 %v5093_v39, %v5092_v61  ;;  %v5282_v61 = vld [vmem:[%s18256_s26 + $0x60] sm:$0xff] }
 0xa7d   :  { %11950 = vmatpush3.bf16.msra.mxu1 %v11949_v60  ;;  %v11997_v60 = vpack.c.bf16 %v5184_v26, %v5183_v58  ;;  %v6226_v2 = vld [vmem:[#allocation31 + $0x118] sm:$0xff] }
 0xa7e   :  { %11951 = vmatprep.subr.bf16.mxu1 %v17691_v19 }
 0xa81   :  { %11953 = vmatpush3.bf16.msra.mxu1 %v11952_v41  ;;  %v12000_v41 = vpack.c.bf16 %v5186_v62, %v5185_v54  ;;  %v5379_v54 = vld [vmem:[#allocation19 + $0x38] sm:$0xff] }
 0xa82   :  { %v13791_v9 = vpop.eup %13790  ;;  %11954 = vmatprep.subr.bf16.mxu1 %v17691_v19 }
 0xa83   :  { %v13793_v7 = vpop.eup %13792  ;;  %v4710_v42 = vmul.f32 %v13791_v9, %v13787_v3  ;;  %v5095_v3 = vld [vmem:[#allocation13 + $0x68] sm:$0xff]  ;;  %v9641_v9 = vld [vmem:[#allocation10] ss:$0 sm:$0xff] }
 0xa84   :  { %v4711_v45 = vmul.f32 %v13793_v7, %v13789_v23  ;;  %v11982_v23 = vpack.c.bf16 %v5095_v3, %v5094_v21  ;;  %v5191_v3 = vld [vmem:[%s18255_s17 + $0x70] sm:$0xff] }
 0xa85   :  { %11956 = vmatpush3.bf16.msra.mxu1 %v11955_v13  ;;  %v12003_v13 = vpack.c.bf16 %v5188_v22, %v5187_v17  ;;  %v9646_v17 = vld [vmem:[#allocation17] ss:$0 sm:$0xff] }
 0xa86   :  { %v6460_v28 = vrot.slane %v4711_v45, 7  ;;  %11957 = vmatprep.subr.bf16.mxu1 %v17691_v19 }
 0xa88   :  { %v16211_v53 = vsel %vm1397_vm4, %v6460_v28, %v4710_v42 }
 0xa89   :  { %11959 = vmatpush3.bf16.msra.mxu1 %v11958_v37  ;;  %v5271_v37 = vld [vmem:[%s18256_s26 + $0x8] sm:$0xff] }
 0xa8a   :  { %11960 = vmatprep.subr.bf16.mxu1 %v17691_v19 }
 0xa8d   :  { %11962 = vmatpush3.bf16.msra.mxu1 %v11961_v25  ;;  %v5273_v25 = vld [vmem:[%s18256_s26 + $0x18] sm:$0xff] }
 0xa8e   :  { %11987 = vmatprep.subr.bf16.mxu1 %v17691_v19  ;;  %v12015_v24 = vpack.c.bf16 %v5273_v25, %v5272_v38 }
 0xb43   :  { %v4886_v40 = vpop.f32.mrb[40].mxu1 }
 0xb44   :  { %v4887_v32 = vadd.f32 %v4886_v40, %v16202_v16  ;;  %v10124_v56 = vpop.f32.mrb[41].mxu1  ;;  %v5087_v16 = vld [vmem:[#allocation13 + $0x28] sm:$0xff] }
 0xb45   :  { %v11970_v30 = vpack.c.bf16 %v5087_v16, %v5086_v12  ;;  %v12012_v56 = vpack.c.bf16 %v5271_v37, %v5270_v31  ;;  %v5278_v16 = vld [vmem:[%s18256_s26 + $0x40] sm:$0xff] }
 0xb46   :  { %v16236_v57 = vadd.f32 %v9640_v55, %v4887_v32 }
 0xb48   :  { %10142 = vmatmul.mubr.msk.f32.vlgmr.msra.gmra.mrb[42].mxu0 %vm4913_vm6, %v16236_v57 }
 0xb49   :  { %10211 = vmatprep.mubr.msk.f32.mxu0 %vm14537_vm5, %v17887_v33  ;;  %11965 = vmatpush3.bf16.msra.mxu0 %v11964_v50  ;;  %v12018_v50 = vpack.c.bf16 %v5275_v49, %v5274_v35 }
 0xb4a   :  { %11966 = vmatprep.subr.bf16.mxu0 %v17691_v19 }
 0xb4d   :  { %11968 = vmatpush3.bf16.msra.mxu0 %v11967_v11  ;;  %v5277_v11 = vld [vmem:[%s18256_s26 + $0x38] sm:$0xff] }
 0xb4e   :  { %11969 = vmatprep.subr.bf16.mxu0 %v17691_v19  ;;  %v12021_v12 = vpack.c.bf16 %v5277_v11, %v5276_v59  ;;  %v5617_v11 = vld [vmem:[#allocation23] sm:$0xff] }
 0xb51   :  { %11971 = vmatpush3.bf16.msra.mxu0 %v11970_v30  ;;  %v5279_v30 = vld [vmem:[%s18256_s26 + $0x48] sm:$0xff] }
 0xb52   :  { %11972 = vmatprep.subr.bf16.mxu0 %v17691_v19  ;;  %v12024_v5 = vpack.c.bf16 %v5279_v30, %v5278_v16  ;;  %v5619_v16 = vld [vmem:[#allocation23 + $0x10] sm:$0xff] }
 0xb55   :  { %11974 = vmatpush3.bf16.msra.mxu0 %v11973_v29  ;;  %v5281_v29 = vld [vmem:[%s18256_s26 + $0x58] sm:$0xff] }
 0xb56   :  { %11975 = vmatprep.subr.bf16.mxu0 %v17691_v19  ;;  %v12027_v52 = vpack.c.bf16 %v5281_v29, %v5280_v63  ;;  %v5621_v29 = vld [vmem:[#allocation23 + $0x20] sm:$0xff] }
 0xb59   :  { %11977 = vmatpush3.bf16.msra.mxu0 %v11976_v27  ;;  %v5190_v27 = vld [vmem:[%s18255_s17 + $0x68] sm:$0xff] }
 0xb5a   :  { %11978 = vmatprep.subr.bf16.mxu0 %v17691_v19  ;;  %v12006_v39 = vpack.c.bf16 %v5190_v27, %v5189_v36  ;;  %v5609_v27 = vld [vmem:[#allocation22] sm:$0xff] }
 0xb5d   :  { %11980 = vmatpush3.bf16.msra.mxu0 %v11979_v8  ;;  %v5283_v8 = vld [vmem:[%s18256_s26 + $0x68] sm:$0xff] }
 0xb5e   :  { %11981 = vmatprep.subr.bf16.mxu0 %v17691_v19  ;;  %v12030_v21 = vpack.c.bf16 %v5283_v8, %v5282_v61  ;;  %v5610_v61 = vld [vmem:[#allocation22 + $0x8] sm:$0xff] }
 0xb61   :  { %11983 = vmatpush3.bf16.msra.mxu0 %v11982_v23  ;;  %v5192_v23 = vld [vmem:[%s18255_s17 + $0x78] sm:$0xff] }
 0xb62   :  { %11984 = vmatprep.subr.bf16.mxu0 %v17691_v19 }
 0xb65   :  { %11986 = vmatpush3.bf16.msra.mxu0 %v11985_v48 }
 0xb66   :  { %12011 = vmatprep.subr.bf16.mxu0 %v17691_v19 }
 0xc1b   :  { %v4983_v7 = vpop.f32.mrb[42].mxu0 }
 0xc1c   :  { %v16252_v42 = vadd.f32 %v9641_v9, %v4983_v7  ;;  %v10143_v45 = vpop.f32.mrb[43].mxu0  ;;  %v5284_v9 = vld [vmem:[%s18256_s26 + $0x70] sm:$0xff]  ;;  %v12009_v7 = vpack.c.bf16 %v5192_v23, %v5191_v3  ;;  %v12084_v3 = vpack.c.bf16 %v5610_v61, %v5609_v27  ;;  %v5816_v27 = vld [vmem:[#allocation26 + $0x140] sm:$0xff] }
 0xc1d   :  { %v5285_v45 = vld [vmem:[%s18256_s26 + $0x78] sm:$0xff] }
 0xc1e   :  { %v4987_v28 = vmax.f32 %v16252_v42, 0.0  ;;  %v12033_v43 = vpack.c.bf16 %v5285_v45, %v5284_v9  ;;  %v5376_v42 = vld [vmem:[#allocation19 + $0x20] sm:$0xff]  ;;  %v5611_v9 = vld [vmem:[#allocation22 + $0x10] sm:$0xff] }
 0xc20   :  { %10177 = vmatmul.mubr.f32.vlgmr.msra.gmra.mrb[42].mxu1 %v4987_v28 }
 0xc21   :  { %10246 = vmatprep.mubr.msk.f32.mxu1 %vm14537_vm5, %v17887_v33  ;;  %11989 = vmatpush3.bf16.msra.mxu1 %v11988_v0 }
 0xc22   :  { %11990 = vmatprep.subr.bf16.mxu1 %v17691_v19 }
 0xc25   :  { %11992 = vmatpush3.bf16.msra.mxu1 %v11991_v6  ;;  %v5373_v6 = vld [vmem:[#allocation19 + $0x8] sm:$0xff] }
 0xc26   :  { %11993 = vmatprep.subr.bf16.mxu1 %v17691_v19  ;;  %v12036_v51 = vpack.c.bf16 %v5373_v6, %v5372_v34  ;;  %v5624_v34 = vld [vmem:[#allocation23 + $0x38] sm:$0xff] }
 0xc29   :  { %11995 = vmatpush3.bf16.msra.mxu1 %v11994_v46  ;;  %v5375_v46 = vld [vmem:[#allocation19 + $0x18] sm:$0xff] }
 0xc2a   :  { %11996 = vmatprep.subr.bf16.mxu1 %v17691_v19  ;;  %v12039_v58 = vpack.c.bf16 %v5375_v46, %v5374_v47  ;;  %v5785_v47 = vld [vmem:[#allocation26 + $0x48] sm:$0xff]  ;;  %v5779_v46 = vld [vmem:[#allocation26 + $0x18] sm:$0xff] }
 0xc2d   :  { %11998 = vmatpush3.bf16.msra.mxu1 %v11997_v60  ;;  %v5378_v60 = vld [vmem:[#allocation19 + $0x30] sm:$0xff] }
 0xc2e   :  { %11999 = vmatprep.subr.bf16.mxu1 %v17691_v19  ;;  %v12045_v62 = vpack.c.bf16 %v5379_v54, %v5378_v60  ;;  %v5786_v60 = vld [vmem:[#allocation26 + $0x50] sm:$0xff] }
 0xc31   :  { %12001 = vmatpush3.bf16.msra.mxu1 %v12000_v41  ;;  %v9645_v41 = vld [vmem:[#allocation16] ss:$0 sm:$0xff] }
 0xc32   :  { %12002 = vmatprep.subr.bf16.mxu1 %v17691_v19 }
 0xc35   :  { %12004 = vmatpush3.bf16.msra.mxu1 %v12003_v13 }
 0xc36   :  { %12005 = vmatprep.subr.bf16.mxu1 %v17691_v19 }
 0xc39   :  { %12007 = vmatpush3.bf16.msra.mxu1 %v12006_v39 }
 0xc3a   :  { %12008 = vmatprep.subr.bf16.mxu1 %v17691_v19 }
 0xc3d   :  { %12010 = vmatpush3.bf16.msra.mxu1 %v12009_v7  ;;  %v5612_v7 = vld [vmem:[#allocation22 + $0x18] sm:$0xff] }
 0xc3e   :  { %12035 = vmatprep.subr.bf16.mxu1 %v17691_v19  ;;  %v12087_v45 = vpack.c.bf16 %v5612_v7, %v5611_v9  ;;  %v5835_v9 = vld [vmem:[#allocation26 + $0x1d8] sm:$0xff]  ;;  %v5824_v7 = vld [vmem:[#allocation26 + $0x180] sm:$0xff] }
 0xcf3   :  { %v5077_v40 = vpop.f32.mrb[42].mxu1 }
 0xcf4   :  { %v5078_v55 = vadd.f32 %v9643_v18, %v5077_v40  ;;  %v10178_v32 = vpop.f32.mrb[43].mxu1 }
 0xcf6   :  { %v5081_v15 = vmax.f32 %v5078_v55, 0.0 }
 0xcf8   :  { %10212 = vmatmul.mubr.f32.vlgmr.msra.gmra.mrb[44].mxu0 %v5081_v15 }
 0xcf9   :  { %12013 = vmatpush3.bf16.msra.mxu0 %v12012_v56  ;;  %10281 = vmatprep.mubr.msk.f32.mxu0 %vm14537_vm5, %v17887_v33  ;;  %v5366_v56 = vld [vmem:[%s18257_s2] sm:$0x3] }
 0xcfa   :  { %12014 = vmatprep.subr.bf16.mxu0 %v17691_v19 }
 0xcfd   :  { %12016 = vmatpush3.bf16.msra.mxu0 %v12015_v24  ;;  %v16332_v24 = vld [vmem:[#allocation20] ss:$0 sm:$0xff] }
 0xcfe   :  { %12017 = vmatprep.subr.bf16.mxu0 %v17691_v19 }
 0xd01   :  { %12019 = vmatpush3.bf16.msra.mxu0 %v12018_v50 }
 0xd02   :  { %12020 = vmatprep.subr.bf16.mxu0 %v17691_v19 }
 0xd05   :  { %12022 = vmatpush3.bf16.msra.mxu0 %v12021_v12  ;;  %v5618_v12 = vld [vmem:[#allocation23 + $0x8] sm:$0xff] }
 0xd06   :  { %12023 = vmatprep.subr.bf16.mxu0 %v17691_v19  ;;  %v12072_v30 = vpack.c.bf16 %v5618_v12, %v5617_v11 }
 0xd09   :  { %12025 = vmatpush3.bf16.msra.mxu0 %v12024_v5  ;;  %v5620_v5 = vld [vmem:[#allocation23 + $0x18] sm:$0xff] }
 0xd0a   :  { %12026 = vmatprep.subr.bf16.mxu0 %v17691_v19  ;;  %v12075_v63 = vpack.c.bf16 %v5620_v5, %v5619_v16  ;;  %v5792_v16 = vld [vmem:[#allocation26 + $0x80] sm:$0xff]  ;;  %v5809_v5 = vld [vmem:[#allocation26 + $0x108] sm:$0xff] }
 0xd0d   :  { %12028 = vmatpush3.bf16.msra.mxu0 %v12027_v52  ;;  %v5622_v52 = vld [vmem:[#allocation23 + $0x28] sm:$0xff] }
 0xd0e   :  { %12029 = vmatprep.subr.bf16.mxu0 %v17691_v19  ;;  %v12078_v36 = vpack.c.bf16 %v5622_v52, %v5621_v29 }
 0xd11   :  { %12031 = vmatpush3.bf16.msra.mxu0 %v12030_v21 }
 0xd12   :  { %12032 = vmatprep.subr.bf16.mxu0 %v17691_v19 }
 0xd15   :  { %12034 = vmatpush3.bf16.msra.mxu0 %v12033_v43  ;;  %v5613_v43 = vld [vmem:[#allocation22 + $0x20] sm:$0xff] }
 0xd16   :  { %12047 = vmatprep.subr.bf16.mxu0 %v17691_v19 }
 0xdcb   :  { %v5171_v48 = vpop.f32.mrb[44].mxu0 }
 0xdcc   :  { %v5172_v10 = vadd.f32 %v9644_v14, %v5171_v48  ;;  %v10213_v1 = vpop.f32.mrb[45].mxu0  ;;  %v5614_v14 = vld [vmem:[#allocation22 + $0x28] sm:$0xff] }
 0xdcd   :  { %v12090_v48 = vpack.c.bf16 %v5614_v14, %v5613_v43  ;;  %v5616_v1 = vld [vmem:[#allocation22 + $0x38] sm:$0xff] }
 0xdce   :  { %v5175_v0 = vmax.f32 %v5172_v10, 0.0  ;;  %v5615_v10 = vld [vmem:[#allocation22 + $0x30] sm:$0xff] }
 0xdd0   :  { %v5176_v20 = vadd.f32 %v5175_v0, %v4987_v28  ;;  %v5377_v28 = vld [vmem:[#allocation19 + $0x28] sm:$0xff]  ;;  %v12093_v0 = vpack.c.bf16 %v5616_v1, %v5615_v10  ;;  %v5834_v10 = vld [vmem:[#allocation26 + $0x1d0] sm:$0xff] }
 0xdd1   :  { %v12042_v26 = vpack.c.bf16 %v5377_v28, %v5376_v42  ;;  %v5787_v42 = vld [vmem:[#allocation26 + $0x58] sm:$0xff] }
 0xdd2   :  { %10247 = vmatmul.mubr.f32.vlgmr.msra.gmra.mrb[44].mxu1 %v5176_v20  ;;  %10282 = vmatmul.mubr.f32.vlgmr.msra.gmra.mrb[46].mxu0 %v5176_v20  ;;  %v5623_v20 = vld [vmem:[#allocation23 + $0x30] sm:$0xff]  ;;  %v12111_v28 = vpack.c.bf16 %v5787_v42, %v5779_v46  ;;  %v9653_v46 = vld [vmem:[#allocation25] ss:$0 sm:$0xff]  ;;  %v5788_v42 = vld [vmem:[#allocation26 + $0x60] sm:$0xff] }
 0xdd3   :  { %10300 = vmatprep.mubr.msk.f32.mxu1 %vm14537_vm5, %v17887_v33  ;;  %10319 = vmatprep.mubr.msk.f32.mxu0 %vm14537_vm5, %v17887_v33  ;;  %v12081_v6 = vpack.c.bf16 %v5624_v34, %v5623_v20  ;;  %v5789_v20 = vld [vmem:[#allocation26 + $0x68] sm:$0xff]  ;;  %v5783_v34 = vld [vmem:[#allocation26 + $0x38] sm:$0xff] }
 0xdd4   :  { %12037 = vmatpush3.bf16.msra.mxu1 %v12036_v51  ;;  %12049 = vmatpush3.bf16.msra.mxu0 %v12036_v51 }
 0xdd5   :  { %12038 = vmatprep.subr.bf16.mxu1 %v17691_v19  ;;  %12050 = vmatprep.subr.bf16.mxu0 %v17691_v19 }
 0xdd8   :  { %12040 = vmatpush3.bf16.msra.mxu1 %v12039_v58  ;;  %12052 = vmatpush3.bf16.msra.mxu0 %v12039_v58 }
 0xdd9   :  { %12041 = vmatprep.subr.bf16.mxu1 %v17691_v19  ;;  %12053 = vmatprep.subr.bf16.mxu0 %v17691_v19 }
 0xddc   :  { %12043 = vmatpush3.bf16.msra.mxu1 %v12042_v26  ;;  %12055 = vmatpush3.bf16.msra.mxu0 %v12042_v26 }
 0xddd   :  { %12044 = vmatprep.subr.bf16.mxu1 %v17691_v19  ;;  %12056 = vmatprep.subr.bf16.mxu0 %v17691_v19 }
 0xde0   :  { %12046 = vmatpush3.bf16.msra.mxu1 %v12045_v62  ;;  %12058 = vmatpush3.bf16.msra.mxu0 %v12045_v62 }
 0xde1   :  { %12059 = vmatprep.subr.bf16.mxu1 %v17691_v19  ;;  %12071 = vmatprep.subr.bf16.mxu0 %v17691_v19 }
 0xea5   :  { %v5266_v22 = vpop.f32.mrb[44].mxu1  ;;  %v5359_v13 = vpop.f32.mrb[46].mxu0 }
 0xea6   :  { %v5267_v18 = vadd.f32 %v9645_v41, %v5266_v22  ;;  %v5360_v31 = vadd.f32 %v9646_v17, %v5359_v13  ;;  %v10248_v37 = vpop.f32.mrb[45].mxu1  ;;  %v10283_v40 = vpop.f32.mrb[47].mxu0  ;;  %v5803_v41 = vld [vmem:[#allocation26 + $0xd8] sm:$0xff]  ;;  %v5794_v17 = vld [vmem:[#allocation26 + $0x90] sm:$0xff] }
 0xea7   :  { %v5802_v22 = vld [vmem:[#allocation26 + $0xd0] sm:$0xff] }
 0xea8   :  { %v5363_v55 = vmul.f32 0.5, %v5360_v31  ;;  %5370 = vst.msk [vmem:[#allocation32] sm:$0x3] %vm5369_vm7, %v5267_v18  ;;  %5371 = vst.msk [vmem:[#allocation33] sm:$0x3] %vm5369_vm7, %v5360_v31  ;;  %v12117_v13 = vpack.c.bf16 %v5802_v22, %v5794_v17  ;;  %v5819_v31 = vld [vmem:[#allocation26 + $0x158] sm:$0xff] }
 0xea9   :  { %v5810_v40 = vld [vmem:[#allocation26 + $0x110] sm:$0xff] }
 0xeaa   :  { %v5364_v32 = vmul.f32 1.442695, %v5363_v55  ;;  %v5818_v55 = vld [vmem:[#allocation26 + $0x150] sm:$0xff] }
 0xeac   :  { %13794 = vpow2.f32 %v5364_v32  ;;  %v12121_v32 = vpack.c.bf16 %v5818_v55, %v5810_v40 }
 0xeb6   :  { %v13795_v15 = vpop.eup %13794 }
 0xeb7   :  { %v5367_v38 = vmul.f32 %v13795_v15, %v5366_v56  ;;  %v5776_v56 = vld [vmem:[#allocation26] sm:$0xff] }
 0xeb8   :  { %v5784_v15 = vld [vmem:[#allocation26 + $0x40] sm:$0xff] }
 0xeb9   :  { %v5368_v25 = vadd.f32 %v5367_v38, %v5267_v18  ;;  %v5811_v18 = vld [vmem:[#allocation26 + $0x118] sm:$0xff] }
 0xeba   :  { %v12119_v37 = vpack.c.bf16 %v5819_v31, %v5811_v18  ;;  %v5796_v31 = vld [vmem:[#allocation26 + $0xa0] sm:$0xff] }
 0xebb   :  { %10301 = vmatmul.mubr.msk.f32.vlgmr.msra.gmra.mrb[46].mxu1 %vm4913_vm6, %v5368_v25  ;;  %v5793_v25 = vld [vmem:[#allocation26 + $0x88] sm:$0xff] }
 0xebc   :  { %12061 = vmatpush3.bf16.msra.mxu1 %v12036_v51  ;;  %10338 = vmatprep.mubr.msk.f32.mxu1 %vm14537_vm5, %v17887_v33  ;;  %v5777_v51 = vld [vmem:[#allocation26 + $0x8] sm:$0xff] }
 0xebd   :  { %12062 = vmatprep.subr.bf16.mxu1 %v17691_v19 }
 0xec0   :  { %12064 = vmatpush3.bf16.msra.mxu1 %v12039_v58  ;;  %v12095_v58 = vpack.c.bf16 %v5785_v47, %v5777_v51  ;;  %v5791_v51 = vld [vmem:[#allocation26 + $0x78] sm:$0xff] }
 0xec1   :  { %12065 = vmatprep.subr.bf16.mxu1 %v17691_v19  ;;  %v12143_v47 = vpack.c.bf16 %v5791_v51, %v5783_v34  ;;  %v6133_v51 = vld [vmem:[#allocation28 + $0x30] sm:$0xff] }
 0xec4   :  { %12067 = vmatpush3.bf16.msra.mxu1 %v12042_v26  ;;  %v5778_v26 = vld [vmem:[#allocation26 + $0x10] sm:$0xff] }
 0xec5   :  { %12068 = vmatprep.subr.bf16.mxu1 %v17691_v19  ;;  %v12113_v54 = vpack.c.bf16 %v5786_v60, %v5778_v26  ;;  %v5790_v26 = vld [vmem:[#allocation26 + $0x70] sm:$0xff]  ;;  %v5797_v60 = vld [vmem:[#allocation26 + $0xa8] sm:$0xff] }
 0xec8   :  { %12070 = vmatpush3.bf16.msra.mxu1 %v12045_v62  ;;  %v5795_v62 = vld [vmem:[#allocation26 + $0x98] sm:$0xff] }
 0xec9   :  { %12083 = vmatprep.subr.bf16.mxu1 %v17691_v19 }
 0xf8e   :  { %v5456_v35 = vpop.f32.mrb[46].mxu1 }
 0xf8f   :  { %v5457_v49 = vadd.f32 %v16332_v24, %v5456_v35  ;;  %v10302_v50 = vpop.f32.mrb[47].mxu1  ;;  %v5801_v35 = vld [vmem:[#allocation26 + $0xc8] sm:$0xff] }
 0xf90   :  { %v12099_v12 = vpack.c.bf16 %v5801_v35, %v5793_v25  ;;  %v5821_v25 = vld [vmem:[#allocation26 + $0x168] sm:$0xff]  ;;  %v5815_v35 = vld [vmem:[#allocation26 + $0x138] sm:$0xff] }
 0xf91   :  { %v5460_v59 = vmax.f32 %v5457_v49, 0.0 }
 0xf93   :  { %10320 = vmatmul.mubr.msk.f32.vlgmr.msra.gmra.mrb[48].mxu0 %vm4913_vm6, %v5460_v59  ;;  %v12097_v59 = vpack.c.bf16 %v5784_v15, %v5776_v56  ;;  %v5798_v56 = vld [vmem:[#allocation26 + $0xb0] sm:$0xff] }
 0xf94   :  { %10357 = vmatprep.mubr.msk.f32.mxu0 %vm14537_vm5, %v17887_v33  ;;  %12073 = vmatpush3.bf16.msra.mxu0 %v12072_v30  ;;  %v5800_v30 = vld [vmem:[#allocation26 + $0xc0] sm:$0xff]  ;;  %v5806_v15 = vld [vmem:[#allocation26 + $0xf0] sm:$0xff] }
 0xf95   :  { %12074 = vmatprep.subr.bf16.mxu0 %v17691_v19  ;;  %v12101_v29 = vpack.c.bf16 %v5800_v30, %v5792_v16 }
 0xf98   :  { %12076 = vmatpush3.bf16.msra.mxu0 %v12075_v63  ;;  %v5817_v63 = vld [vmem:[#allocation26 + $0x148] sm:$0xff] }
 0xf99   :  { %12077 = vmatprep.subr.bf16.mxu0 %v17691_v19  ;;  %v12103_v52 = vpack.c.bf16 %v5817_v63, %v5809_v5  ;;  %v5814_v5 = vld [vmem:[#allocation26 + $0x130] sm:$0xff] }
 0xf9a   :  { %v5822_v63 = vld [vmem:[#allocation26 + $0x170] sm:$0xff] }
 0xf9c   :  { %12079 = vmatpush3.bf16.msra.mxu0 %v12078_v36  ;;  %v5808_v36 = vld [vmem:[#allocation26 + $0x100] sm:$0xff] }
 0xf9d   :  { %12080 = vmatprep.subr.bf16.mxu0 %v17691_v19 }
 0xfa0   :  { %12082 = vmatpush3.bf16.msra.mxu0 %v12081_v6 }
 0xfa1   :  { %12096 = vmatprep.subr.bf16.mxu0 %v12095_v58  ;;  %v5780_v58 = vld [vmem:[#allocation26 + $0x20] sm:$0xff] }
0x1066   :  { %v5530_v39 = vpop.f32.mrb[48].mxu0 }
0x1067   :  { %v5531_v8 = vadd.f32 %v16332_v24, %v5530_v39  ;;  %v10321_v21 = vpop.f32.mrb[49].mxu0 }
0x1068   :  { %v5833_v21 = vld [vmem:[#allocation26 + $0x1c8] sm:$0xff] }
0x1069   :  { %v5534_v23 = vmax.f32 %v5531_v8, 0.0  ;;  %v5825_v8 = vld [vmem:[#allocation26 + $0x188] sm:$0xff] }
0x106b   :  { %10339 = vmatmul.mubr.msk.f32.vlgmr.msra.gmra.mrb[48].mxu1 %vm4913_vm6, %v5534_v23  ;;  %v12107_v23 = vpack.c.bf16 %v5833_v21, %v5825_v8  ;;  %v5836_v8 = vld [vmem:[#allocation26 + $0x1e0] sm:$0xff] }
0x106c   :  { %12085 = vmatpush3.bf16.msra.mxu1 %v12084_v3  ;;  %10376 = vmatprep.mubr.msk.f32.mxu1 %vm14537_vm5, %v17887_v33  ;;  %v5827_v3 = vld [vmem:[#allocation26 + $0x198] sm:$0xff] }
0x106d   :  { %12086 = vmatprep.subr.bf16.mxu1 %v17691_v19  ;;  %v12123_v43 = vpack.c.bf16 %v5835_v9, %v5827_v3  ;;  %v5838_v9 = vld [vmem:[#allocation26 + $0x1f0] sm:$0xff] }
0x1070   :  { %12088 = vmatpush3.bf16.msra.mxu1 %v12087_v45  ;;  %v5832_v45 = vld [vmem:[#allocation26 + $0x1c0] sm:$0xff] }
0x1071   :  { %12089 = vmatprep.subr.bf16.mxu1 %v17691_v19  ;;  %v12109_v14 = vpack.c.bf16 %v5832_v45, %v5824_v7  ;;  %v6128_v7 = vld [vmem:[#allocation28 + $0x8] sm:$0xff] }
0x1072   :  { %v6132_v45 = vld [vmem:[#allocation28 + $0x28] sm:$0xff] }
0x1074   :  { %12091 = vmatpush3.bf16.msra.mxu1 %v12090_v48  ;;  %v5826_v48 = vld [vmem:[#allocation26 + $0x190] sm:$0xff] }
0x1075   :  { %12092 = vmatprep.subr.bf16.mxu1 %v17691_v19  ;;  %v12125_v1 = vpack.c.bf16 %v5834_v10, %v5826_v48  ;;  %v6228_v19 = vld [vmem:[#allocation31 + $0x128] sm:$0xff] }
0x1078   :  { %12094 = vmatpush3.bf16.msra.mxu1 %v12093_v0  ;;  %v5781_v0 = vld [vmem:[#allocation26 + $0x28] sm:$0xff] }
0x1079   :  { %12112 = vmatprep.subr.bf16.mxu1 %v12111_v28  ;;  %v12127_v6 = vpack.c.bf16 %v5789_v20, %v5781_v0  ;;  %v5782_v28 = vld [vmem:[#allocation26 + $0x30] sm:$0xff]  ;;  %v6131_v0 = vld [vmem:[#allocation28 + $0x20] sm:$0xff]  ;;  %v16362_v20 = vpack.c.bf16 %v6132_v45, %v6128_v7 }
0x107a   :  { %v12145_v18 = vpack.c.bf16 %v5790_v26, %v5782_v28  ;;  %v6161_v7 = vld [vmem:[#allocation28 + $0x110] sm:$0xff] }
0x107b   :  { %10377 = vmatmul.mubr.msk.f32.vlgmr.msra.gmra.mrb[50].mxu1 %vm4913_vm6, %v16236_v57  ;;  %v12115_v57 = vpack.c.bf16 %v5803_v41, %v5795_v62  ;;  %v5805_v62 = vld [vmem:[#allocation26 + $0xe8] sm:$0xff]  ;;  %v5799_v41 = vld [vmem:[#allocation26 + $0xb8] sm:$0xff]  ;;  %18258 = vst [vmem:[#allocation101_spill] sm:$0xff] %v16362_v20  ;;  %v6165_v45 = vld [vmem:[#allocation28 + $0x130] sm:$0xff] }
0x107c   :  { %5978 = vmatprep.mubr.f32.mxu1 %v17887_v33  ;;  %12114 = vmatpush1.bf16.msra.mxu1 %v12113_v54  ;;  %v12131_v55 = vpack.c.bf16 %v5805_v62, %v5797_v60  ;;  %v6135_v60 = vld [vmem:[#allocation28 + $0x40] sm:$0xff] }
0x107d   :  { %12116 = vmatprep.subr.bf16.mxu1 %v12115_v57  ;;  %v5807_v57 = vld [vmem:[#allocation26 + $0xf8] sm:$0xff] }
0x1080   :  { %12118 = vmatpush1.bf16.msra.mxu1 %v12117_v13  ;;  %v12129_v13 = vpack.c.bf16 %v5788_v42, %v5780_v58  ;;  %v6138_v58 = vld [vmem:[#allocation28 + $0x58] sm:$0xff] }
0x1081   :  { %12120 = vmatprep.subr.bf16.mxu1 %v12119_v37  ;;  %v5804_v37 = vld [vmem:[#allocation26 + $0xe0] sm:$0xff]  ;;  %v6142_v42 = vld [vmem:[#allocation28 + $0x78] sm:$0xff] }
0x1084   :  { %12122 = vmatpush1.bf16.msra.mxu1 %v12121_v32  ;;  %v12147_v32 = vpack.c.bf16 %v5807_v57, %v5799_v41  ;;  %v16374_v41 = vpack.c.bf16 %v6142_v42, %v6138_v58  ;;  %v6137_v57 = vld [vmem:[#allocation28 + $0x50] sm:$0xff] }
0x1085   :  { %12124 = vmatprep.subr.bf16.mxu1 %v12123_v43  ;;  %v6130_v43 = vld [vmem:[#allocation28 + $0x18] sm:$0xff]  ;;  %v6169_v58 = vld [vmem:[#allocation28 + $0x150] sm:$0xff] }
0x1086   :  { %18263 = vst [vmem:[#allocation106_spill] sm:$0xff] %v16374_v41  ;;  %v6173_v42 = vld [vmem:[#allocation28 + $0x170] sm:$0xff] }
0x1088   :  { %12126 = vmatpush1.bf16.msra.mxu1 %v12125_v1  ;;  %v6127_v1 = vld [vmem:[#allocation28] sm:$0xff] }
0x1089   :  { %12144 = vmatprep.subr.bf16.mxu1 %v12143_v47  ;;  %v6136_v47 = vld [vmem:[#allocation28 + $0x48] sm:$0xff]  ;;  %v16366_v28 = vpack.c.bf16 %v6131_v0, %v6127_v1  ;;  %v16422_v0 = vpack.c.bf16 %v6165_v45, %v6161_v7  ;;  %v6194_v7 = vld [vmem:[#allocation31 + $0x18] sm:$0xff] }
0x108a   :  { %v6198_v45 = vld [vmem:[#allocation31 + $0x38] sm:$0xff] }
0x108b   :  { %18260 = vst [vmem:[#allocation103_spill] sm:$0xff] %v16366_v28  ;;  %18277 = vst [vmem:[#allocation71_spill] sm:$0xff] %v16422_v0 }
0x113e   :  { %v5604_v38 = vpop.f32.mrb[48].mxu1 }
0x113f   :  { %v5605_v49 = vadd.f32 %v16332_v24, %v5604_v38  ;;  %v10340_v50 = vpop.f32.mrb[49].mxu1  ;;  %v12105_v24 = vpack.c.bf16 %v5816_v27, %v5808_v36  ;;  %v5813_v38 = vld [vmem:[#allocation26 + $0x128] sm:$0xff]  ;;  %v5831_v36 = vld [vmem:[#allocation26 + $0x1b8] sm:$0xff] }
0x1140   :  { %v12133_v50 = vpack.c.bf16 %v5804_v37, %v5796_v31  ;;  %v12135_v16 = vpack.c.bf16 %v5821_v25, %v5813_v38  ;;  %v5839_v27 = vld [vmem:[#allocation26 + $0x1f8] sm:$0xff]  ;;  %v6145_v25 = vld [vmem:[#allocation28 + $0x90] sm:$0xff] }
0x1141   :  { %v5608_v11 = vmax.f32 %v5605_v49, 0.0  ;;  %v5823_v49 = vld [vmem:[#allocation26 + $0x178] sm:$0xff]  ;;  %v12155_v3 = vpack.c.bf16 %v5839_v27, %v5831_v36  ;;  %v6160_v36 = vld [vmem:[#allocation28 + $0x108] sm:$0xff] }
0x1142   :  { %v12151_v30 = vpack.c.bf16 %v5823_v49, %v5815_v35  ;;  %v6150_v31 = vld [vmem:[#allocation28 + $0xb8] sm:$0xff]  ;;  %v6152_v35 = vld [vmem:[#allocation28 + $0xc8] sm:$0xff] }
0x1143   :  { %10358 = vmatmul.mubr.msk.f32.vlgmr.msra.gmra.mrb[50].mxu0 %vm4913_vm6, %v5608_v11  ;;  %v5812_v11 = vld [vmem:[#allocation26 + $0x120] sm:$0xff]  ;;  %v6156_v49 = vld [vmem:[#allocation28 + $0xe8] sm:$0xff] }
0x1144   :  { %12098 = vmatpush1.bf16.msra.mxu0 %v12097_v59  ;;  %5907 = vmatprep.mubr.f32.mxu0 %v17887_v33  ;;  %v12149_v59 = vpack.c.bf16 %v5806_v15, %v5798_v56  ;;  %v6147_v56 = vld [vmem:[#allocation28 + $0xa0] sm:$0xff]  ;;  %v6164_v27 = vld [vmem:[#allocation28 + $0x128] sm:$0xff] }
0x1145   :  { %12100 = vmatprep.subr.bf16.mxu0 %v12099_v12  ;;  %v5820_v12 = vld [vmem:[#allocation26 + $0x160] sm:$0xff] }
0x1148   :  { %12102 = vmatpush1.bf16.msra.mxu0 %v12101_v29  ;;  %v5829_v29 = vld [vmem:[#allocation26 + $0x1a8] sm:$0xff] }
0x1149   :  { %12104 = vmatprep.subr.bf16.mxu0 %v12103_v52  ;;  %v5837_v52 = vld [vmem:[#allocation26 + $0x1e8] sm:$0xff] }
0x114a   :  { %v12139_v21 = vpack.c.bf16 %v5837_v52, %v5829_v29  ;;  %v6153_v29 = vld [vmem:[#allocation28 + $0xd0] sm:$0xff] }
0x114b   :  { %v6157_v52 = vld [vmem:[#allocation28 + $0xf0] sm:$0xff] }
0x114c   :  { %12106 = vmatpush1.bf16.msra.mxu0 %v12105_v24  ;;  %v12137_v24 = vpack.c.bf16 %v5820_v12, %v5812_v11 }
0x114d   :  { %12108 = vmatprep.subr.bf16.mxu0 %v12107_v23  ;;  %v5830_v23 = vld [vmem:[#allocation26 + $0x1b0] sm:$0xff] }
0x114e   :  { %v5764_v61 = vpop.f32.mrb[50].mxu1  ;;  %v12157_v10 = vpack.c.bf16 %v5838_v9, %v5830_v23  ;;  %v16414_v23 = vpack.c.bf16 %v6164_v27, %v6160_v36 }
0x114f   :  { %v10378_v39 = vpop.f32.mrb[51].mxu1 }
0x1150   :  { %12110 = vmatpush1.bf16.msra.mxu0 %v12109_v14  ;;  %v5828_v39 = vld [vmem:[#allocation26 + $0x1a0] sm:$0xff]  ;;  %v6134_v14 = vld [vmem:[#allocation28 + $0x38] sm:$0xff]  ;;  %18274 = vst [vmem:[#allocation68_spill] sm:$0xff] %v16414_v23 }
0x1151   :  { %12128 = vmatprep.subr.bf16.mxu0 %v12127_v6  ;;  %v12141_v48 = vpack.c.bf16 %v5836_v8, %v5828_v39  ;;  %v16364_v34 = vpack.c.bf16 %v6134_v14, %v6130_v43  ;;  %v6129_v6 = vld [vmem:[#allocation28 + $0x10] sm:$0xff]  ;;  %v16410_v8 = vpack.c.bf16 %v6157_v52, %v6153_v29  ;;  %v6168_v43 = vld [vmem:[#allocation28 + $0x148] sm:$0xff]  ;;  %v6183_v29 = vld [vmem:[#allocation28 + $0x1c0] sm:$0xff] }
0x1152   :  { %v16368_v26 = vpack.c.bf16 %v6133_v51, %v6129_v6  ;;  %v6172_v14 = vld [vmem:[#allocation28 + $0x168] sm:$0xff]  ;;  %v6167_v6 = vld [vmem:[#allocation28 + $0x140] sm:$0xff] }
0x1153   :  { %18259 = vst [vmem:[#allocation102_spill] sm:$0xff] %v16364_v34  ;;  %18273 = vst [vmem:[#allocation67_spill] sm:$0xff] %v16410_v8  ;;  %v6171_v51 = vld [vmem:[#allocation28 + $0x160] sm:$0xff] }
0x1154   :  { %18261 = vst [vmem:[#allocation104_spill] sm:$0xff] %v16368_v26  ;;  %v6187_v52 = vld [vmem:[#allocation28 + $0x1e0] sm:$0xff] }
0x1216   :  { %v5694_v54 = vpop.f32.mrb[50].mxu0 }
0x1217   :  { %v5765_v17 = vadd.f32 %v5764_v61, %v5694_v54  ;;  %v10359_v22 = vpop.f32.mrb[51].mxu0  ;;  %v12153_v61 = vpack.c.bf16 %v5822_v63, %v5814_v5  ;;  %v6139_v54 = vld [vmem:[#allocation28 + $0x60] sm:$0xff]  ;;  %v16402_v5 = vpack.c.bf16 %v6156_v49, %v6152_v35  ;;  %v6184_v35 = vld [vmem:[#allocation28 + $0x1c8] sm:$0xff] }
0x1218   :  { %v6144_v22 = vld [vmem:[#allocation28 + $0x88] sm:$0xff]  ;;  %v16382_v37 = vpack.c.bf16 %v6139_v54, %v6135_v60 }
0x1219   :  { %v16354_v40 = vadd.f32 %v9653_v46, %v5765_v17  ;;  %v6140_v46 = vld [vmem:[#allocation28 + $0x68] sm:$0xff]  ;;  %v6141_v17 = vld [vmem:[#allocation28 + $0x70] sm:$0xff]  ;;  %18270 = vst [vmem:[#allocation140_spill] sm:$0xff] %v16402_v5 }
0x121a   :  { %v16372_v62 = vpack.c.bf16 %v6140_v46, %v6136_v47  ;;  %18264 = vst [vmem:[#allocation107_spill] sm:$0xff] %v16382_v37  ;;  %v16426_v47 = vpack.c.bf16 %v6172_v14, %v6168_v43  ;;  %v6176_v60 = vld [vmem:[#allocation28 + $0x188] sm:$0xff]  ;;  %v16456_v43 = vpack.c.bf16 %v6187_v52, %v6183_v29 }
0x121b   :  { %9654 = vmatmul.mubr.msk.f32.vlgmr.msra.gmra.mrb[52].mxu0 %vm4913_vm6, %v16354_v40  ;;  %9655 = vmatmul.mubr.msk.f32.vlgmr.msra.gmra.mrb[52].mxu1 %vm4913_vm6, %v16354_v40  ;;  %v6180_v54 = vld [vmem:[#allocation28 + $0x1a8] sm:$0xff] }
0x121c   :  { %12130 = vmatpush1.bf16.msra.mxu0 %v12129_v13  ;;  %12146 = vmatpush1.bf16.msra.mxu1 %v12145_v18  ;;  %18262 = vst [vmem:[#allocation105_spill] sm:$0xff] %v16372_v62  ;;  %v6148_v13 = vld [vmem:[#allocation28 + $0xa8] sm:$0xff]  ;;  %v6146_v18 = vld [vmem:[#allocation28 + $0x98] sm:$0xff]  ;;  %18278 = vst [vmem:[#allocation72_spill] sm:$0xff] %v16426_v47 }
0x121d   :  { %12132 = vmatprep.subr.bf16.mxu0 %v12131_v55  ;;  %12148 = vmatprep.subr.bf16.mxu1 %v12147_v32  ;;  %v16384_v55 = vpack.c.bf16 %v6141_v17, %v6137_v57  ;;  %v6143_v32 = vld [vmem:[#allocation28 + $0x80] sm:$0xff]  ;;  %v16388_v15 = vpack.c.bf16 %v6148_v13, %v6144_v22  ;;  %v16390_v38 = vpack.c.bf16 %v6150_v31, %v6146_v18  ;;  %v6178_v57 = vld [vmem:[#allocation28 + $0x198] sm:$0xff]  ;;  %v6188_v49 = vld [vmem:[#allocation28 + $0x1e8] sm:$0xff] }
0x121e   :  { %6049 = vmatprep.mubr.f32.mxu0 %v17887_v33  ;;  %6120 = vmatprep.mubr.f32.mxu1 %v17887_v33  ;;  %v16396_v11 = vpack.c.bf16 %v6147_v56, %v6143_v32  ;;  %v6182_v17 = vld [vmem:[#allocation28 + $0x1b8] sm:$0xff]  ;;  %v16432_v22 = vpack.c.bf16 %v6171_v51, %v6167_v6  ;;  %v16434_v13 = vpack.c.bf16 %v6173_v42, %v6169_v58  ;;  %v6175_v18 = vld [vmem:[#allocation28 + $0x180] sm:$0xff]  ;;  %v6208_v29 = vld [vmem:[#allocation31 + $0x88] sm:$0xff] }
0x121f   :  { %18265 = vst [vmem:[#allocation108_spill] sm:$0xff] %v16384_v55  ;;  %18266 = vst [vmem:[#allocation118_spill] sm:$0xff] %v16388_v15  ;;  %v6179_v31 = vld [vmem:[#allocation28 + $0x1a0] sm:$0xff]  ;;  %v16438_v32 = vpack.c.bf16 %v6180_v54, %v6176_v60  ;;  %v16440_v56 = vpack.c.bf16 %v6182_v17, %v6178_v57  ;;  %v16450_v36 = vpack.c.bf16 %v6188_v49, %v6184_v35  ;;  %v6193_v58 = vld [vmem:[#allocation31 + $0x10] sm:$0xff] }
0x1220   :  { %12134 = vmatpush1.bf16.msra.mxu0 %v12133_v50  ;;  %12150 = vmatpush1.bf16.msra.mxu1 %v12149_v59  ;;  %18267 = vst [vmem:[#allocation124_spill] sm:$0xff] %v16390_v38  ;;  %v6154_v50 = vld [vmem:[#allocation28 + $0xd8] sm:$0xff]  ;;  %18268 = vst [vmem:[#allocation119_spill] sm:$0xff] %v16396_v11  ;;  %v16464_v51 = vpack.c.bf16 %v6198_v45, %v6194_v7  ;;  %v6200_v60 = vld [vmem:[#allocation31 + $0x48] sm:$0xff] }
0x1221   :  { %12136 = vmatprep.subr.bf16.mxu0 %v12135_v16  ;;  %12152 = vmatprep.subr.bf16.mxu1 %v12151_v30  ;;  %v6158_v59 = vld [vmem:[#allocation28 + $0xf8] sm:$0xff]  ;;  %v6151_v16 = vld [vmem:[#allocation28 + $0xc0] sm:$0xff]  ;;  %18280 = vst [vmem:[#allocation74_spill] sm:$0xff] %v16432_v22  ;;  %18281 = vst [vmem:[#allocation75_spill] sm:$0xff] %v16434_v13 }
0x1222   :  { %v6155_v30 = vld [vmem:[#allocation28 + $0xe0] sm:$0xff]  ;;  %v16404_v63 = vpack.c.bf16 %v6158_v59, %v6154_v50  ;;  %18282 = vst [vmem:[#allocation76_spill] sm:$0xff] %v16438_v32  ;;  %18283 = vst [vmem:[#allocation77_spill] sm:$0xff] %v16440_v56  ;;  %v6186_v50 = vld [vmem:[#allocation28 + $0x1d8] sm:$0xff] }
0x1223   :  { %v16408_v39 = vpack.c.bf16 %v6155_v30, %v6151_v16  ;;  %v6190_v59 = vld [vmem:[#allocation28 + $0x1f8] sm:$0xff]  ;;  %v16444_v16 = vpack.c.bf16 %v6179_v31, %v6175_v18  ;;  %18286 = vst [vmem:[#allocation80_spill] sm:$0xff] %v16450_v36  ;;  %18288 = vst [vmem:[#allocation82_spill] sm:$0xff] %v16456_v43  ;;  %v6204_v54 = vld [vmem:[#allocation31 + $0x68] sm:$0xff] }
0x1224   :  { %12138 = vmatpush1.bf16.msra.mxu0 %v12137_v24  ;;  %12154 = vmatpush1.bf16.msra.mxu1 %v12153_v61  ;;  %18271 = vst [vmem:[#allocation65_spill] sm:$0xff] %v16404_v63  ;;  %v6162_v24 = vld [vmem:[#allocation28 + $0x118] sm:$0xff]  ;;  %v16452_v27 = vpack.c.bf16 %v6190_v59, %v6186_v50  ;;  %18291 = vst [vmem:[#allocation85_spill] sm:$0xff] %v16464_v51  ;;  %v16474_v35 = vpack.c.bf16 %v6204_v54, %v6200_v60  ;;  %v6212_v52 = vld [vmem:[#allocation31 + $0xa8] sm:$0xff] }
0x1225   :  { %12140 = vmatprep.subr.bf16.mxu0 %v12139_v21  ;;  %12156 = vmatprep.subr.bf16.mxu1 %v12155_v3  ;;  %v6166_v61 = vld [vmem:[#allocation28 + $0x138] sm:$0xff]  ;;  %18272 = vst [vmem:[#allocation66_spill] sm:$0xff] %v16408_v39  ;;  %v6159_v21 = vld [vmem:[#allocation28 + $0x100] sm:$0xff]  ;;  %18284 = vst [vmem:[#allocation78_spill] sm:$0xff] %v16444_v16 }
0x1226   :  { %v6163_v3 = vld [vmem:[#allocation28 + $0x120] sm:$0xff]  ;;  %v16416_v9 = vpack.c.bf16 %v6166_v61, %v6162_v24  ;;  %18287 = vst [vmem:[#allocation81_spill] sm:$0xff] %v16452_v27  ;;  %v6185_v24 = vld [vmem:[#allocation28 + $0x1d0] sm:$0xff] }
0x1227   :  { %v16420_v1 = vpack.c.bf16 %v6163_v3, %v6159_v21  ;;  %v6189_v61 = vld [vmem:[#allocation28 + $0x1f0] sm:$0xff]  ;;  %v6202_v57 = vld [vmem:[#allocation31 + $0x58] sm:$0xff]  ;;  %v6207_v7 = vld [vmem:[#allocation31 + $0x80] sm:$0xff] }
0x1228   :  { %12142 = vmatpush1.bf16.msra.mxu0 %v12141_v48  ;;  %12158 = vmatpush1.bf16.msra.mxu1 %v12157_v10  ;;  %18275 = vst [vmem:[#allocation69_spill] sm:$0xff] %v16416_v9  ;;  %v6170_v48 = vld [vmem:[#allocation28 + $0x158] sm:$0xff]  ;;  %v6192_v21 = vld [vmem:[#allocation31 + $0x8] sm:$0xff]  ;;  %v16458_v14 = vpack.c.bf16 %v6189_v61, %v6185_v24  ;;  %v6211_v45 = vld [vmem:[#allocation31 + $0xa0] sm:$0xff] }
0x1229   :  { %12160 = vmatprep.subr.bf16.mxu0 %v16362_v20  ;;  %12192 = vmatprep.subr.bf16.mxu1 %v16364_v34  ;;  %v6174_v10 = vld [vmem:[#allocation28 + $0x178] sm:$0xff]  ;;  %18276 = vst [vmem:[#allocation70_spill] sm:$0xff] %v16420_v1  ;;  %v6196_v3 = vld [vmem:[#allocation31 + $0x28] sm:$0xff] }
0x122a   :  { %v16428_v46 = vpack.c.bf16 %v6174_v10, %v6170_v48  ;;  %18289 = vst [vmem:[#allocation83_spill] sm:$0xff] %v16458_v14  ;;  %v6191_v48 = vld [vmem:[#allocation31] sm:$0xff]  ;;  %v16462_v6 = vpack.c.bf16 %v6196_v3, %v6192_v21  ;;  %v6197_v42 = vld [vmem:[#allocation31 + $0x30] sm:$0xff]  ;;  %v6206_v17 = vld [vmem:[#allocation31 + $0x78] sm:$0xff] }
0x122b   :  { %9656 = vmatmul.mubr.msk.f32.vlgmr.msra.gmra.mrb[54].mxu0 %vm4913_vm6, %v16354_v40  ;;  %9657 = vmatmul.mubr.msk.f32.vlgmr.msra.gmra.mrb[54].mxu1 %vm4913_vm6, %v16354_v40  ;;  %v6149_v40 = vld [vmem:[#allocation28 + $0xb0] sm:$0xff]  ;;  %v6195_v10 = vld [vmem:[#allocation31 + $0x20] sm:$0xff]  ;;  %v16470_v31 = vpack.c.bf16 %v6197_v42, %v6193_v58  ;;  %v16476_v49 = vpack.c.bf16 %v6206_v17, %v6202_v57  ;;  %v6210_v24 = vld [vmem:[#allocation31 + $0x98] sm:$0xff]  ;;  %v16496_v17 = vpack.c.bf16 %v6211_v45, %v6207_v7 }
0x122c   :  { %12162 = vmatpush1.bf16.msra.mxu0 %v16366_v28  ;;  %12194 = vmatpush1.bf16.msra.mxu1 %v16368_v26  ;;  %v16398_v12 = vpack.c.bf16 %v6149_v40, %v6145_v25  ;;  %18279 = vst [vmem:[#allocation73_spill] sm:$0xff] %v16428_v46  ;;  %v6177_v25 = vld [vmem:[#allocation28 + $0x190] sm:$0xff]  ;;  %18290 = vst [vmem:[#allocation84_spill] sm:$0xff] %v16462_v6  ;;  %v16468_v18 = vpack.c.bf16 %v6195_v10, %v6191_v48  ;;  %v6214_v61 = vld [vmem:[#allocation31 + $0xb8] sm:$0xff] }
0x122d   :  { %12164 = vmatprep.subr.bf16.mxu0 %v16372_v62  ;;  %12196 = vmatprep.subr.bf16.mxu1 %v16374_v41  ;;  %v6181_v40 = vld [vmem:[#allocation28 + $0x1b0] sm:$0xff]  ;;  %v16488_v48 = vpack.c.bf16 %v6212_v52, %v6208_v29  ;;  %v16490_v10 = vpack.c.bf16 %v6214_v61, %v6210_v24  ;;  %v6218_v54 = vld [vmem:[#allocation31 + $0xd8] sm:$0xff]  ;;  %18295 = vst [vmem:[#allocation89_spill] sm:$0xff] %v16496_v17 }
0x122e   :  { %6321 = vmatprep.mubr.f32.mxu0 %v17887_v33  ;;  %6392 = vmatprep.mubr.f32.mxu1 %v17887_v33  ;;  %18269 = vst [vmem:[#allocation129_spill] sm:$0xff] %v16398_v12  ;;  %v16446_v30 = vpack.c.bf16 %v6181_v40, %v6177_v25  ;;  %v6199_v25 = vld [vmem:[#allocation31 + $0x40] sm:$0xff]  ;;  %v6201_v50 = vld [vmem:[#allocation31 + $0x50] sm:$0xff]  ;;  %v6216_v42 = vld [vmem:[#allocation31 + $0xc8] sm:$0xff] }
0x122f   :  { %v6203_v40 = vld [vmem:[#allocation31 + $0x60] sm:$0xff]  ;;  %v6205_v59 = vld [vmem:[#allocation31 + $0x70] sm:$0xff]  ;;  %18293 = vst [vmem:[#allocation87_spill] sm:$0xff] %v16488_v48  ;;  %18294 = vst [vmem:[#allocation88_spill] sm:$0xff] %v16490_v10 }
0x1230   :  { %12166 = vmatpush1.bf16.msra.mxu0 %v16382_v37  ;;  %12198 = vmatpush1.bf16.msra.mxu1 %v16384_v55  ;;  %18285 = vst [vmem:[#allocation79_spill] sm:$0xff] %v16446_v30  ;;  %v16482_v21 = vpack.c.bf16 %v6203_v40, %v6199_v25  ;;  %v16484_v3 = vpack.c.bf16 %v6205_v59, %v6201_v50  ;;  %v6209_v58 = vld [vmem:[#allocation31 + $0x90] sm:$0xff]  ;;  %v6220_v60 = vld [vmem:[#allocation31 + $0xe8] sm:$0xff]  ;;  %v6222_v57 = vld [vmem:[#allocation31 + $0xf8] sm:$0xff] }
0x1231   :  { %12168 = vmatprep.subr.bf16.mxu0 %v16388_v15  ;;  %12200 = vmatprep.subr.bf16.mxu1 %v16390_v38  ;;  %v6215_v40 = vld [vmem:[#allocation31 + $0xc0] sm:$0xff]  ;;  %v16502_v59 = vpack.c.bf16 %v6220_v60, %v6216_v42  ;;  %v16504_v29 = vpack.c.bf16 %v6222_v57, %v6218_v54  ;;  %v6217_v52 = vld [vmem:[#allocation31 + $0xd0] sm:$0xff]  ;;  %v6224_v61 = vld [vmem:[#allocation31 + $0x108] sm:$0xff] }
0x1232   :  { %18292 = vst [vmem:[#allocation86_spill] sm:$0xff] %v16484_v3  ;;  %v6219_v50 = vld [vmem:[#allocation31 + $0xe0] sm:$0xff]  ;;  %v6221_v24 = vld [vmem:[#allocation31 + $0xf0] sm:$0xff]  ;;  %v16514_v42 = vpack.c.bf16 %v6228_v19, %v6224_v61 }
0x1233   :  { %18297 = vst [vmem:[#allocation91_spill] sm:$0xff] %v16502_v59  ;;  %18298 = vst [vmem:[#allocation92_spill] sm:$0xff] %v16504_v29  ;;  %v16508_v7 = vpack.c.bf16 %v6219_v50, %v6215_v40  ;;  %v16510_v45 = vpack.c.bf16 %v6221_v24, %v6217_v52  ;;  %v6225_v54 = vld [vmem:[#allocation31 + $0x110] sm:$0xff]  ;;  %v6231_v52 = vld [vmem:[#allocation31 + $0x140] sm:$0xff] }
0x1234   :  { %12170 = vmatpush1.bf16.msra.mxu0 %v16396_v11  ;;  %12202 = vmatpush1.bf16.msra.mxu1 %v16398_v12  ;;  %18301 = vst [vmem:[#allocation95_spill] sm:$0xff] %v16514_v42  ;;  %v6229_v57 = vld [vmem:[#allocation31 + $0x130] sm:$0xff]  ;;  %v6235_v24 = vld [vmem:[#allocation31 + $0x160] sm:$0xff] }
0x1235   :  { %12172 = vmatprep.subr.bf16.mxu0 %v16402_v5  ;;  %12204 = vmatprep.subr.bf16.mxu1 %v16404_v63  ;;  %18299 = vst [vmem:[#allocation93_spill] sm:$0xff] %v16508_v7  ;;  %18300 = vst [vmem:[#allocation94_spill] sm:$0xff] %v16510_v45  ;;  %v16522_v50 = vpack.c.bf16 %v6229_v57, %v6225_v54  ;;  %v6237_v61 = vld [vmem:[#allocation31 + $0x170] sm:$0xff]  ;;  %v6239_v54 = vld [vmem:[#allocation31 + $0x180] sm:$0xff] }
0x1236   :  { %v6243_v57 = vld [vmem:[#allocation31 + $0x1a0] sm:$0xff] }
0x1237   :  { %18304 = vst [vmem:[#allocation98_spill] sm:$0xff] %v16522_v50 }
0x1238   :  { %12174 = vmatpush1.bf16.msra.mxu0 %v16408_v39  ;;  %12206 = vmatpush1.bf16.msra.mxu1 %v16410_v8 }
0x1239   :  { %12176 = vmatprep.subr.bf16.mxu0 %v16414_v23  ;;  %12208 = vmatprep.subr.bf16.mxu1 %v16416_v9 }
0x123c   :  { %12178 = vmatpush1.bf16.msra.mxu0 %v16420_v1  ;;  %12210 = vmatpush1.bf16.msra.mxu1 %v16422_v0 }
0x123d   :  { %12180 = vmatprep.subr.bf16.mxu0 %v16426_v47  ;;  %12212 = vmatprep.subr.bf16.mxu1 %v16428_v46 }
0x1240   :  { %12182 = vmatpush1.bf16.msra.mxu0 %v16432_v22  ;;  %12214 = vmatpush1.bf16.msra.mxu1 %v16434_v13 }
0x1241   :  { %12184 = vmatprep.subr.bf16.mxu0 %v16438_v32  ;;  %12216 = vmatprep.subr.bf16.mxu1 %v16440_v56 }
0x1244   :  { %12186 = vmatpush1.bf16.msra.mxu0 %v16444_v16  ;;  %12218 = vmatpush1.bf16.msra.mxu1 %v16446_v30 }
0x1245   :  { %12188 = vmatprep.subr.bf16.mxu0 %v16450_v36  ;;  %12220 = vmatprep.subr.bf16.mxu1 %v16452_v27 }
0x1248   :  { %12190 = vmatpush1.bf16.msra.mxu0 %v16456_v43  ;;  %12222 = vmatpush1.bf16.msra.mxu1 %v16458_v14 }
0x1249   :  { %12224 = vmatprep.subr.bf16.mxu0 %v16462_v6  ;;  %12256 = vmatprep.subr.bf16.mxu1 %v16464_v51 }
0x124b   :  { %6322 = vmatmul.mubr.f32.vlgmr.msra.gmra.mrb[56].mxu0 %v16198_v44  ;;  %6393 = vmatmul.mubr.f32.vlgmr.msra.gmra.mrb[56].mxu1 %v16198_v44  ;;  %v6213_v44 = vld [vmem:[#allocation31 + $0xb0] sm:$0xff] }
0x124c   :  { %12226 = vmatpush1.bf16.msra.mxu0 %v16468_v18  ;;  %12258 = vmatpush1.bf16.msra.mxu1 %v16470_v31  ;;  %v16498_v25 = vpack.c.bf16 %v6213_v44, %v6209_v58  ;;  %v6223_v58 = vld [vmem:[#allocation31 + $0x100] sm:$0xff] }
0x124d   :  { %12228 = vmatprep.subr.bf16.mxu0 %v16474_v35  ;;  %12260 = vmatprep.subr.bf16.mxu1 %v16476_v49  ;;  %v6227_v44 = vld [vmem:[#allocation31 + $0x120] sm:$0xff] }
0x124e   :  { %6527 = vmatprep.mubr.f32.mxu0 %v17887_v33  ;;  %6598 = vmatprep.mubr.f32.mxu1 %v17887_v33  ;;  %18296 = vst [vmem:[#allocation90_spill] sm:$0xff] %v16498_v25  ;;  %v16520_v40 = vpack.c.bf16 %v6227_v44, %v6223_v58  ;;  %v16532_v58 = vpack.c.bf16 %v6235_v24, %v6231_v52 }
0x124f   :  { %v16544_v52 = vpack.c.bf16 %v6243_v57, %v6239_v54 }
0x1250   :  { %12230 = vmatpush1.bf16.msra.mxu0 %v16482_v21  ;;  %12262 = vmatpush1.bf16.msra.mxu1 %v16484_v3  ;;  %v6230_v3 = vld [vmem:[#allocation31 + $0x138] sm:$0xff]  ;;  %18303 = vst [vmem:[#allocation97_spill] sm:$0xff] %v16520_v40 }
0x1251   :  { %12232 = vmatprep.subr.bf16.mxu0 %v16488_v48  ;;  %12264 = vmatprep.subr.bf16.mxu1 %v16490_v10  ;;  %v16516_v60 = vpack.c.bf16 %v6230_v3, %v6226_v2  ;;  %v6232_v10 = vld [vmem:[#allocation31 + $0x148] sm:$0xff]  ;;  %v6234_v48 = vld [vmem:[#allocation31 + $0x158] sm:$0xff]  ;;  %v6233_v3 = vld [vmem:[#allocation31 + $0x150] sm:$0xff] }
0x1252   :  { %v16534_v44 = vpack.c.bf16 %v6237_v61, %v6233_v3  ;;  %v6247_v3 = vld [vmem:[#allocation31 + $0x1c0] sm:$0xff]  ;;  %v6253_v61 = vld [vmem:[#allocation31 + $0x1f0] sm:$0xff] }
0x1253   :  { %18302 = vst [vmem:[#allocation96_spill] sm:$0xff] %v16516_v60 }
0x1254   :  { %12234 = vmatpush1.bf16.msra.mxu0 %v16496_v17  ;;  %12266 = vmatpush1.bf16.msra.mxu1 %v16498_v25  ;;  %v6236_v17 = vld [vmem:[#allocation31 + $0x168] sm:$0xff]  ;;  %v6238_v25 = vld [vmem:[#allocation31 + $0x178] sm:$0xff] }
0x1255   :  { %12236 = vmatprep.subr.bf16.mxu0 %v16502_v59  ;;  %12268 = vmatprep.subr.bf16.mxu1 %v16504_v29  ;;  %v16526_v19 = vpack.c.bf16 %v6236_v17, %v6232_v10  ;;  %v16528_v2 = vpack.c.bf16 %v6238_v25, %v6234_v48  ;;  %v6240_v29 = vld [vmem:[#allocation31 + $0x188] sm:$0xff]  ;;  %v6242_v59 = vld [vmem:[#allocation31 + $0x198] sm:$0xff]  ;;  %v6241_v17 = vld [vmem:[#allocation31 + $0x190] sm:$0xff] }
0x1256   :  { %v6245_v25 = vld [vmem:[#allocation31 + $0x1b0] sm:$0xff] }
0x1257   :  { %v16546_v24 = vpack.c.bf16 %v6245_v25, %v6241_v17 }
0x1258   :  { %12238 = vmatpush1.bf16.msra.mxu0 %v16508_v7  ;;  %12270 = vmatpush1.bf16.msra.mxu1 %v16510_v45  ;;  %v6244_v7 = vld [vmem:[#allocation31 + $0x1a8] sm:$0xff]  ;;  %v6246_v45 = vld [vmem:[#allocation31 + $0x1b8] sm:$0xff] }
0x1259   :  { %12240 = vmatprep.subr.bf16.mxu0 %v16514_v42  ;;  %12272 = vmatprep.subr.bf16.mxu1 %v16516_v60  ;;  %v16538_v48 = vpack.c.bf16 %v6244_v7, %v6240_v29  ;;  %v16540_v10 = vpack.c.bf16 %v6246_v45, %v6242_v59  ;;  %v6248_v60 = vld [vmem:[#allocation31 + $0x1c8] sm:$0xff]  ;;  %v6250_v42 = vld [vmem:[#allocation31 + $0x1d8] sm:$0xff]  ;;  %v6251_v7 = vld [vmem:[#allocation31 + $0x1e0] sm:$0xff] }
0x125a   :  { %v6249_v45 = vld [vmem:[#allocation31 + $0x1d0] sm:$0xff]  ;;  %v16556_v54 = vpack.c.bf16 %v6251_v7, %v6247_v3  ;;  %v6255_v7 = vld [vmem:[#allocation29] sm:$0xf] }
0x125b   :  { %v16558_v57 = vpack.c.bf16 %v6253_v61, %v6249_v45  ;;  %v18308_v45 = vld [vmem:[#allocation132_spill] sm:$0xff] }
0x125c   :  { %12242 = vmatpush1.bf16.msra.mxu0 %v16520_v40  ;;  %12274 = vmatpush1.bf16.msra.mxu1 %v16522_v50  ;;  %v6252_v40 = vld [vmem:[#allocation31 + $0x1e8] sm:$0xff]  ;;  %v6254_v50 = vld [vmem:[#allocation31 + $0x1f8] sm:$0xff]  ;;  %v16619_v61 = vrot.slane %v6255_v7, %v18308_v45 }
0x125d   :  { %12244 = vmatprep.subr.bf16.mxu0 %v16526_v19  ;;  %12276 = vmatprep.subr.bf16.mxu1 %v16528_v2  ;;  %v16550_v59 = vpack.c.bf16 %v6252_v40, %v6248_v60  ;;  %v16552_v29 = vpack.c.bf16 %v6254_v50, %v6250_v42 }
0x125e   :  { %18309 = vst [vmem:[#allocation109_spill] sm:$0xff] %v16619_v61 }
0x1260   :  { %12246 = vmatpush1.bf16.msra.mxu0 %v16532_v58  ;;  %12278 = vmatpush1.bf16.msra.mxu1 %v16534_v44 }
0x1261   :  { %12248 = vmatprep.subr.bf16.mxu0 %v16538_v48  ;;  %12280 = vmatprep.subr.bf16.mxu1 %v16540_v10 }
0x1264   :  { %12250 = vmatpush1.bf16.msra.mxu0 %v16544_v52  ;;  %12282 = vmatpush1.bf16.msra.mxu1 %v16546_v24 }
0x1265   :  { %12252 = vmatprep.subr.bf16.mxu0 %v16550_v59  ;;  %12284 = vmatprep.subr.bf16.mxu1 %v16552_v29 }
0x1268   :  { %12254 = vmatpush1.bf16.msra.mxu0 %v16556_v54  ;;  %12286 = vmatpush1.bf16.msra.mxu1 %v16558_v57 }
0x1269   :  { %12288 = vmatprep.subr.bf16.mxu0 %v16362_v20  ;;  %12320 = vmatprep.subr.bf16.mxu1 %v16364_v34 }
0x126b   :  { %6528 = vmatmul.mubr.f32.vlgmr.msra.gmra.mrb[58].mxu0 %v16211_v53  ;;  %6599 = vmatmul.mubr.f32.vlgmr.msra.gmra.mrb[58].mxu1 %v16211_v53 }
0x126c   :  { %12290 = vmatpush1.bf16.msra.mxu0 %v16366_v28  ;;  %12322 = vmatpush1.bf16.msra.mxu1 %v16368_v26 }
0x126d   :  { %12292 = vmatprep.subr.bf16.mxu0 %v16372_v62  ;;  %12324 = vmatprep.subr.bf16.mxu1 %v16374_v41 }
0x126e   :  { %6727 = vmatprep.mubr.f32.mxu0 %v17887_v33  ;;  %6798 = vmatprep.mubr.f32.mxu1 %v17887_v33 }
0x1270   :  { %12294 = vmatpush1.bf16.msra.mxu0 %v16382_v37  ;;  %12326 = vmatpush1.bf16.msra.mxu1 %v16384_v55 }
0x1271   :  { %12296 = vmatprep.subr.bf16.mxu0 %v16388_v15  ;;  %12328 = vmatprep.subr.bf16.mxu1 %v16390_v38 }
0x1274   :  { %12298 = vmatpush1.bf16.msra.mxu0 %v16396_v11  ;;  %12330 = vmatpush1.bf16.msra.mxu1 %v16398_v12 }
0x1275   :  { %12300 = vmatprep.subr.bf16.mxu0 %v16402_v5  ;;  %12332 = vmatprep.subr.bf16.mxu1 %v16404_v63 }
0x1278   :  { %12302 = vmatpush1.bf16.msra.mxu0 %v16408_v39  ;;  %12334 = vmatpush1.bf16.msra.mxu1 %v16410_v8 }
0x1279   :  { %12304 = vmatprep.subr.bf16.mxu0 %v16414_v23  ;;  %12336 = vmatprep.subr.bf16.mxu1 %v16416_v9 }
0x127c   :  { %12306 = vmatpush1.bf16.msra.mxu0 %v16420_v1  ;;  %12338 = vmatpush1.bf16.msra.mxu1 %v16422_v0  ;;  %v18312_v0 = vld [vmem:[#allocation134_spill] sm:$0xff] }
0x127d   :  { %12308 = vmatprep.subr.bf16.mxu0 %v16426_v47  ;;  %12340 = vmatprep.subr.bf16.mxu1 %v16428_v46  ;;  %v16631_v1 = vrot.slane %v6255_v7, %v18312_v0 }
0x127f   :  { %18313 = vst [vmem:[#allocation111_spill] sm:$0xff] %v16631_v1 }
0x1280   :  { %12310 = vmatpush1.bf16.msra.mxu0 %v16432_v22  ;;  %12342 = vmatpush1.bf16.msra.mxu1 %v16434_v13 }
0x1281   :  { %12312 = vmatprep.subr.bf16.mxu0 %v16438_v32  ;;  %12344 = vmatprep.subr.bf16.mxu1 %v16440_v56 }
0x1284   :  { %12314 = vmatpush1.bf16.msra.mxu0 %v16444_v16  ;;  %12346 = vmatpush1.bf16.msra.mxu1 %v16446_v30 }
0x1285   :  { %12316 = vmatprep.subr.bf16.mxu0 %v16450_v36  ;;  %12348 = vmatprep.subr.bf16.mxu1 %v16452_v27 }
0x1288   :  { %12318 = vmatpush1.bf16.msra.mxu0 %v16456_v43  ;;  %12350 = vmatpush1.bf16.msra.mxu1 %v16458_v14  ;;  %v18310_v14 = vld [vmem:[#allocation133_spill] sm:$0xff] }
0x1289   :  { %12352 = vmatprep.subr.bf16.mxu0 %v16462_v6  ;;  %12384 = vmatprep.subr.bf16.mxu1 %v16464_v51  ;;  %v16622_v43 = vrot.slane %v6255_v7, %v18310_v14 }
0x128b   :  { %18311 = vst [vmem:[#allocation110_spill] sm:$0xff] %v16622_v43 }
0x12ee   :  { %v16602_v53 = vpop.f32.mrb[52].mxu0  ;;  %v16604_v42 = vpop.f32.mrb[52].mxu1 }
0x12ef   :  { %18305 = vst [vmem:[#allocation123_spill] sm:$0xff] %v16602_v53  ;;  %18306 = vst [vmem:[#allocation127_spill] sm:$0xff] %v16604_v42  ;;  %v16606_v60 = vpop.f32.mrb[53].mxu0  ;;  %v16608_v40 = vpop.f32.mrb[53].mxu1 }
0x12f0   :  { %18307 = vst [vmem:[#allocation126_spill] sm:$0xff] %v16608_v40 }
0x12fe   :  { %v16610_v50 = vpop.f32.mrb[54].mxu0  ;;  %v16612_v17 = vpop.f32.mrb[54].mxu1 }
0x12ff   :  { %v16614_v25 = vpop.f32.mrb[55].mxu0  ;;  %v16616_v3 = vpop.f32.mrb[55].mxu1 }
0x131e   :  { %v6323_v51 = vpop.f32.mrb[56].mxu0  ;;  %v6394_v6 = vpop.f32.mrb[56].mxu1 }
0x131f   :  { %v6399_v27 = vadd.f32 %v6323_v51, %v16602_v53  ;;  %v6401_v36 = vadd.f32 %v6394_v6, %v16604_v42  ;;  %v6325_v30 = vpop.f32.mrb[57].mxu0  ;;  %v6396_v16 = vpop.f32.mrb[57].mxu1  ;;  %v18315_v51 = vld [vmem:[#allocation138_spill] sm:$0xff] }
0x1320   :  { %v6400_v56 = vadd.f32 %v6325_v30, %v16606_v60  ;;  %v6402_v32 = vadd.f32 %v6396_v16, %v16608_v40  ;;  %v16635_v42 = vrot.slane %v6255_v7, %v18315_v51 }
0x1321   :  { %v6424_v13 = vadd.f32 %v16619_v61, %v6399_v27 }
0x1322   :  { %v6425_v22 = vadd.f32 %v16622_v43, %v6400_v56  ;;  %v6427_v6 = vadd.f32 %v16631_v1, %v6402_v32  ;;  %18316 = vst [vmem:[#allocation112_spill] sm:$0xff] %v16635_v42  ;;  %v6426_v16 = vadd.f32 %v16635_v42, %v6401_v36  ;;  %v6256_v56 = vld [vmem:[%s18314_s5] sm:$0xf] }
0x1323   :  { %v9658_v46 = vmul.f32 -1.442695, %v6424_v13  ;;  %v16640_v7 = vrot.slane %v6256_v56, %v18308_v45 }
0x1324   :  { %v9659_v47 = vmul.f32 -1.442695, %v6425_v22  ;;  %v9660_v30 = vmul.f32 -1.442695, %v6427_v6 }
0x1325   :  { %13796 = vpow2.f32 %v9658_v46 }
0x1326   :  { %13798 = vpow2.f32 %v9659_v47 }
0x1327   :  { %13800 = vpow2.f32 %v9660_v30 }
0x1328   :  { %13802 = vtanh.f32 %v6426_v16 }
0x132f   :  { %v13797_v40 = vpop.eup %13796 }
0x1330   :  { %v13799_v27 = vpop.eup %13798  ;;  %v6431_v61 = vadd.f32 1.0, %v13797_v40  ;;  %v16644_v40 = vrot.slane %v6256_v56, %v18310_v14 }
0x1331   :  { %v6437_v22 = vadd.f32 1.0, %v13799_v27  ;;  %v13801_v13 = vpop.eup %13800 }
0x1332   :  { %13804 = vrcp.f32 %v6431_v61  ;;  %v13803_v46 = vpop.eup %13802  ;;  %v6444_v1 = vadd.f32 1.0, %v13801_v13 }
0x1333   :  { %13806 = vrcp.f32 %v6437_v22 }
0x1334   :  { %13808 = vrcp.f32 %v6444_v1 }
0x133c   :  { %v13805_v47 = vpop.eup %13804 }
0x133d   :  { %v13807_v43 = vpop.eup %13806  ;;  %v6454_v32 = vmul.f32 %v13805_v47, %v13803_v46  ;;  %v16656_v47 = vrot.slane %v6256_v56, %v18312_v0 }
0x133e   :  { %v6453_v36 = vmul.f32 %v13807_v43, %v16193_v4  ;;  %v6529_v6 = vpop.f32.mrb[58].mxu0  ;;  %v6600_v42 = vpop.f32.mrb[58].mxu1 }
0x133f   :  { %v6605_v61 = vadd.f32 %v6529_v6, %v16610_v50  ;;  %v6607_v30 = vadd.f32 %v6600_v42, %v16612_v17  ;;  %v6531_v16 = vpop.f32.mrb[59].mxu0  ;;  %v6602_v27 = vpop.f32.mrb[59].mxu1 }
0x1340   :  { %v16648_v22 = vadd.f32 %v6454_v32, %v6453_v36  ;;  %v6606_v13 = vadd.f32 %v6531_v16, %v16614_v25  ;;  %v6608_v45 = vadd.f32 %v6602_v27, %v16616_v3  ;;  %v16660_v32 = vrot.slane %v6256_v56, %v18315_v51  ;;  %v13809_v36 = vpop.eup %13808  ;;  %v18318_v56 = vld [vmem:[#allocation86_spill] sm:$0xff] }
0x1341   :  { %v6630_v4 = vadd.f32 %v16640_v7, %v6605_v61 }
0x1342   :  { %v6631_v43 = vadd.f32 %v16644_v40, %v6606_v13  ;;  %13810 = vtanh.f32 %v16648_v22  ;;  %v6633_v42 = vadd.f32 %v16656_v47, %v6608_v45  ;;  %v6632_v61 = vadd.f32 %v16660_v32, %v6607_v30  ;;  %v18319_v30 = vld [vmem:[#allocation87_spill] sm:$0xff]  ;;  %v18320_v45 = vld [vmem:[#allocation88_spill] sm:$0xff] }
0x1343   :  { %v9661_v14 = vmul.f32 -1.442695, %v6630_v4  ;;  %v18321_v4 = vld [vmem:[#allocation89_spill] sm:$0xff] }
0x1344   :  { %v9662_v46 = vmul.f32 -1.442695, %v6631_v43  ;;  %v9663_v6 = vmul.f32 -1.442695, %v6633_v42  ;;  %v18322_v43 = vld [vmem:[#allocation90_spill] sm:$0xff] }
0x1345   :  { %13812 = vpow2.f32 %v9661_v14  ;;  %v18323_v14 = vld [vmem:[#allocation91_spill] sm:$0xff] }
0x1346   :  { %13814 = vpow2.f32 %v9662_v46  ;;  %v18324_v46 = vld [vmem:[#allocation92_spill] sm:$0xff] }
0x1347   :  { %13816 = vpow2.f32 %v9663_v6  ;;  %v18325_v6 = vld [vmem:[#allocation93_spill] sm:$0xff] }
0x1348   :  { %13818 = vtanh.f32 %v6632_v61  ;;  %v18326_v61 = vld [vmem:[#allocation94_spill] sm:$0xff] }
0x134c   :  { %v13811_v1 = vpop.eup %13810 }
0x134d   :  { %v16663_v16 = vmul.f32 %v13811_v1, %v13809_v36 }
0x134f   :  { %18317 = vst [vmem:[#allocation113_spill] sm:$0xff] %v16663_v16  ;;  %v13813_v27 = vpop.eup %13812  ;;  %6728 = vmatmul.mubr.f32.vlgmr.msra.gmra.mrb[60].mxu0 %v16663_v16  ;;  %6799 = vmatmul.mubr.f32.vlgmr.msra.gmra.mrb[60].mxu1 %v16663_v16  ;;  %v18328_v16 = vld [vmem:[#allocation96_spill] sm:$0xff] }
0x1350   :  { %v13815_v0 = vpop.eup %13814  ;;  %v6637_v13 = vadd.f32 1.0, %v13813_v27  ;;  %12354 = vmatpush1.bf16.msra.mxu0 %v16468_v18  ;;  %12386 = vmatpush1.bf16.msra.mxu1 %v16470_v31 }
0x1351   :  { %v6643_v51 = vadd.f32 1.0, %v13815_v0  ;;  %12356 = vmatprep.subr.bf16.mxu0 %v16474_v35  ;;  %12388 = vmatprep.subr.bf16.mxu1 %v16476_v49  ;;  %v13817_v42 = vpop.eup %13816 }
0x1352   :  { %13820 = vrcp.f32 %v6637_v13  ;;  %6901 = vmatprep.mubr.f32.mxu0 %v17887_v33  ;;  %6972 = vmatprep.mubr.f32.mxu1 %v17887_v33  ;;  %v13819_v36 = vpop.eup %13818  ;;  %v6650_v13 = vadd.f32 1.0, %v13817_v42 }
0x1353   :  { %13822 = vrcp.f32 %v6643_v51  ;;  %v18327_v51 = vld [vmem:[#allocation95_spill] sm:$0xff] }
0x1354   :  { %12358 = vmatpush1.bf16.msra.mxu0 %v16482_v21  ;;  %12390 = vmatpush1.bf16.msra.mxu1 %v18318_v56  ;;  %13824 = vrcp.f32 %v6650_v13  ;;  %v18337_v13 = vld [vmem:[#allocation74_spill] sm:$0xff] }
0x1355   :  { %12360 = vmatprep.subr.bf16.mxu0 %v18319_v30  ;;  %12392 = vmatprep.subr.bf16.mxu1 %v18320_v45 }
0x1358   :  { %12362 = vmatpush1.bf16.msra.mxu0 %v18321_v4  ;;  %12394 = vmatpush1.bf16.msra.mxu1 %v18322_v43  ;;  %v18329_v4 = vld [vmem:[#allocation100_spill] sm:$0xff] }
0x1359   :  { %12364 = vmatprep.subr.bf16.mxu0 %v18323_v14  ;;  %12396 = vmatprep.subr.bf16.mxu1 %v18324_v46  ;;  %v18330_v14 = vld [vmem:[#allocation97_spill] sm:$0xff]  ;;  %v18331_v46 = vld [vmem:[#allocation98_spill] sm:$0xff] }
0x135c   :  { %v13821_v1 = vpop.eup %13820  ;;  %12366 = vmatpush1.bf16.msra.mxu0 %v18325_v6  ;;  %12398 = vmatpush1.bf16.msra.mxu1 %v18326_v61 }
0x135d   :  { %v13823_v27 = vpop.eup %13822  ;;  %v6659_v0 = vmul.f32 %v13821_v1, %v13819_v36  ;;  %12368 = vmatprep.subr.bf16.mxu0 %v18327_v51  ;;  %12400 = vmatprep.subr.bf16.mxu1 %v18328_v16  ;;  %v18333_v36 = vld [vmem:[#allocation70_spill] sm:$0xff]  ;;  %v18334_v1 = vld [vmem:[#allocation71_spill] sm:$0xff] }
0x135e   :  { %v6658_v43 = vmul.f32 %v13823_v27, %v18329_v4  ;;  %v13825_v4 = vpop.eup %13824  ;;  %v18335_v27 = vld [vmem:[#allocation72_spill] sm:$0xff] }
0x1360   :  { %v16686_v45 = vadd.f32 %v6659_v0, %v6658_v43  ;;  %12370 = vmatpush1.bf16.msra.mxu0 %v18330_v14  ;;  %12402 = vmatpush1.bf16.msra.mxu1 %v18331_v46  ;;  %v18336_v0 = vld [vmem:[#allocation73_spill] sm:$0xff] }
0x1361   :  { %12372 = vmatprep.subr.bf16.mxu0 %v16526_v19  ;;  %12404 = vmatprep.subr.bf16.mxu1 %v16528_v2 }
0x1362   :  { %13826 = vtanh.f32 %v16686_v45 }
0x1364   :  { %12374 = vmatpush1.bf16.msra.mxu0 %v16532_v58  ;;  %12406 = vmatpush1.bf16.msra.mxu1 %v16534_v44 }
0x1365   :  { %12376 = vmatprep.subr.bf16.mxu0 %v16538_v48  ;;  %12408 = vmatprep.subr.bf16.mxu1 %v16540_v10 }
0x1368   :  { %12378 = vmatpush1.bf16.msra.mxu0 %v16544_v52  ;;  %12410 = vmatpush1.bf16.msra.mxu1 %v16546_v24 }
0x1369   :  { %12380 = vmatprep.subr.bf16.mxu0 %v16550_v59  ;;  %12412 = vmatprep.subr.bf16.mxu1 %v16552_v29 }
0x136c   :  { %v13827_v43 = vpop.eup %13826  ;;  %12382 = vmatpush1.bf16.msra.mxu0 %v16556_v54  ;;  %12414 = vmatpush1.bf16.msra.mxu1 %v16558_v57 }
0x136d   :  { %v16703_v42 = vmul.f32 %v13827_v43, %v13825_v4  ;;  %12416 = vmatprep.subr.bf16.mxu0 %v16362_v20  ;;  %12448 = vmatprep.subr.bf16.mxu1 %v16364_v34  ;;  %v18338_v4 = vld [vmem:[#allocation75_spill] sm:$0xff]  ;;  %v18339_v43 = vld [vmem:[#allocation76_spill] sm:$0xff] }
0x136f   :  { %18332 = vst [vmem:[#allocation114_spill] sm:$0xff] %v16703_v42  ;;  %6902 = vmatmul.mubr.f32.vlgmr.msra.gmra.mrb[62].mxu0 %v16703_v42  ;;  %6973 = vmatmul.mubr.f32.vlgmr.msra.gmra.mrb[62].mxu1 %v16703_v42  ;;  %v18340_v42 = vld [vmem:[#allocation77_spill] sm:$0xff] }
0x1370   :  { %12418 = vmatpush1.bf16.msra.mxu0 %v16366_v28  ;;  %12450 = vmatpush1.bf16.msra.mxu1 %v16368_v26 }
0x1371   :  { %12420 = vmatprep.subr.bf16.mxu0 %v16372_v62  ;;  %12452 = vmatprep.subr.bf16.mxu1 %v16374_v41 }
0x1372   :  { %7075 = vmatprep.mubr.f32.mxu0 %v17887_v33  ;;  %7146 = vmatprep.mubr.f32.mxu1 %v17887_v33 }
0x1374   :  { %12422 = vmatpush1.bf16.msra.mxu0 %v16382_v37  ;;  %12454 = vmatpush1.bf16.msra.mxu1 %v16384_v55 }
0x1375   :  { %12424 = vmatprep.subr.bf16.mxu0 %v16388_v15  ;;  %12456 = vmatprep.subr.bf16.mxu1 %v16390_v38 }
0x1378   :  { %12426 = vmatpush1.bf16.msra.mxu0 %v16396_v11  ;;  %12458 = vmatpush1.bf16.msra.mxu1 %v16398_v12  ;;  %v18351_v12 = vld [vmem:[#allocation109_spill] sm:$0xff]  ;;  %v18352_v11 = vld [vmem:[#allocation110_spill] sm:$0xff] }
0x1379   :  { %12428 = vmatprep.subr.bf16.mxu0 %v16402_v5  ;;  %12460 = vmatprep.subr.bf16.mxu1 %v16404_v63  ;;  %v18350_v5 = vld [vmem:[#allocation126_spill] sm:$0xff] }
0x137c   :  { %12430 = vmatpush1.bf16.msra.mxu0 %v16408_v39  ;;  %12462 = vmatpush1.bf16.msra.mxu1 %v16410_v8  ;;  %v18341_v8 = vld [vmem:[#allocation78_spill] sm:$0xff]  ;;  %v18349_v39 = vld [vmem:[#allocation127_spill] sm:$0xff] }
0x137d   :  { %12432 = vmatprep.subr.bf16.mxu0 %v16414_v23  ;;  %12464 = vmatprep.subr.bf16.mxu1 %v16416_v9  ;;  %v18342_v23 = vld [vmem:[#allocation79_spill] sm:$0xff]  ;;  %v18343_v9 = vld [vmem:[#allocation80_spill] sm:$0xff] }
0x1380   :  { %12434 = vmatpush1.bf16.msra.mxu0 %v18333_v36  ;;  %12466 = vmatpush1.bf16.msra.mxu1 %v18334_v1  ;;  %v18344_v36 = vld [vmem:[#allocation81_spill] sm:$0xff]  ;;  %v18345_v1 = vld [vmem:[#allocation82_spill] sm:$0xff] }
0x1381   :  { %12436 = vmatprep.subr.bf16.mxu0 %v18335_v27  ;;  %12468 = vmatprep.subr.bf16.mxu1 %v18336_v0  ;;  %v18346_v27 = vld [vmem:[#allocation83_spill] sm:$0xff]  ;;  %v18347_v0 = vld [vmem:[#allocation84_spill] sm:$0xff] }
0x1384   :  { %12438 = vmatpush1.bf16.msra.mxu0 %v18337_v13  ;;  %12470 = vmatpush1.bf16.msra.mxu1 %v18338_v4  ;;  %v18348_v13 = vld [vmem:[#allocation85_spill] sm:$0xff] }
0x1385   :  { %12440 = vmatprep.subr.bf16.mxu0 %v18339_v43  ;;  %12472 = vmatprep.subr.bf16.mxu1 %v18340_v42 }
0x1388   :  { %12442 = vmatpush1.bf16.msra.mxu0 %v18341_v8  ;;  %12474 = vmatpush1.bf16.msra.mxu1 %v18342_v23 }
0x1389   :  { %12444 = vmatprep.subr.bf16.mxu0 %v18343_v9  ;;  %12476 = vmatprep.subr.bf16.mxu1 %v18344_v36 }
0x138c   :  { %12446 = vmatpush1.bf16.msra.mxu0 %v18345_v1  ;;  %12478 = vmatpush1.bf16.msra.mxu1 %v18346_v27 }
0x138d   :  { %12480 = vmatprep.subr.bf16.mxu0 %v18347_v0  ;;  %12512 = vmatprep.subr.bf16.mxu1 %v18348_v13  ;;  %v18353_v13 = vld [vmem:[#allocation111_spill] sm:$0xff] }
0x1422   :  { %v6729_v4 = vpop.f32.mrb[60].mxu0  ;;  %v6800_v43 = vpop.f32.mrb[60].mxu1 }
0x1423   :  { %v6805_v42 = vadd.f32 %v6729_v4, %v16602_v53  ;;  %v6807_v8 = vadd.f32 %v6800_v43, %v18349_v39  ;;  %v6731_v63 = vpop.f32.mrb[61].mxu0  ;;  %v6802_v23 = vpop.f32.mrb[61].mxu1  ;;  %v18354_v4 = vld [vmem:[#allocation112_spill] sm:$0xff] }
0x1424   :  { %v6806_v9 = vadd.f32 %v6731_v63, %v16606_v60  ;;  %v6808_v36 = vadd.f32 %v6802_v23, %v18350_v5 }
0x1425   :  { %v6809_v1 = vadd.f32 %v6805_v42, %v18351_v12  ;;  %v6811_v53 = vadd.f32 %v6807_v8, %v18354_v4 }
0x1426   :  { %v6810_v27 = vadd.f32 %v6806_v9, %v18352_v11  ;;  %v6812_v15 = vadd.f32 %v6808_v36, %v18353_v13 }
0x1427   :  { %v9664_v38 = vmul.f32 -1.442695, %v6809_v1 }
0x1428   :  { %v9665_v0 = vmul.f32 -1.442695, %v6810_v27  ;;  %v9666_v55 = vmul.f32 -1.442695, %v6812_v15 }
0x1429   :  { %13828 = vpow2.f32 %v9664_v38 }
0x142a   :  { %13830 = vpow2.f32 %v9665_v0 }
0x142b   :  { %13832 = vpow2.f32 %v9666_v55 }
0x142c   :  { %13834 = vtanh.f32 %v6811_v53 }
0x1433   :  { %v13829_v43 = vpop.eup %13828 }
0x1434   :  { %v13831_v39 = vpop.eup %13830  ;;  %v6816_v37 = vadd.f32 1.0, %v13829_v43 }
0x1435   :  { %v6822_v63 = vadd.f32 1.0, %v13831_v39  ;;  %v13833_v23 = vpop.eup %13832 }
0x1436   :  { %13836 = vrcp.f32 %v6816_v37  ;;  %v13835_v42 = vpop.eup %13834  ;;  %v6829_v38 = vadd.f32 1.0, %v13833_v23 }
0x1437   :  { %13838 = vrcp.f32 %v6822_v63 }
0x1438   :  { %13840 = vrcp.f32 %v6829_v38 }
0x1440   :  { %v13837_v9 = vpop.eup %13836 }
0x1441   :  { %v13839_v1 = vpop.eup %13838  ;;  %v6833_v27 = vmul.f32 %v13837_v9, %v13835_v42 }
0x1442   :  { %v6832_v0 = vmul.f32 %v13839_v1, %v16648_v22  ;;  %v6903_v36 = vpop.f32.mrb[62].mxu0  ;;  %v6974_v15 = vpop.f32.mrb[62].mxu1 }
0x1443   :  { %v6979_v8 = vadd.f32 %v6903_v36, %v16610_v50  ;;  %v6981_v4 = vadd.f32 %v6974_v15, %v16612_v17  ;;  %v6905_v43 = vpop.f32.mrb[63].mxu0  ;;  %v6976_v55 = vpop.f32.mrb[63].mxu1 }
0x1444   :  { %v16754_v53 = vadd.f32 %v6833_v27, %v6832_v0  ;;  %v6980_v37 = vadd.f32 %v6905_v43, %v16614_v25  ;;  %v6982_v39 = vadd.f32 %v6976_v55, %v16616_v3  ;;  %v13841_v1 = vpop.eup %13840 }
0x1445   :  { %v6983_v63 = vadd.f32 %v6979_v8, %v16640_v7  ;;  %v6985_v36 = vadd.f32 %v6981_v4, %v16660_v32  ;;  %v18356_v4 = vld [vmem:[#allocation88_spill] sm:$0xff] }
0x1446   :  { %v6984_v23 = vadd.f32 %v6980_v37, %v16644_v40  ;;  %13842 = vtanh.f32 %v16754_v53  ;;  %v6986_v9 = vadd.f32 %v6982_v39, %v16656_v47  ;;  %v18357_v37 = vld [vmem:[#allocation89_spill] sm:$0xff]  ;;  %v18358_v39 = vld [vmem:[#allocation90_spill] sm:$0xff] }
0x1447   :  { %v9667_v22 = vmul.f32 -1.442695, %v6983_v63  ;;  %v18359_v63 = vld [vmem:[#allocation91_spill] sm:$0xff] }
0x1448   :  { %v9668_v42 = vmul.f32 -1.442695, %v6984_v23  ;;  %v9669_v0 = vmul.f32 -1.442695, %v6986_v9  ;;  %v18360_v23 = vld [vmem:[#allocation92_spill] sm:$0xff] }
0x1449   :  { %13844 = vpow2.f32 %v9667_v22 }
0x144a   :  { %13846 = vpow2.f32 %v9668_v42 }
0x144b   :  { %13848 = vpow2.f32 %v9669_v0 }
0x144c   :  { %13850 = vtanh.f32 %v6985_v36 }
0x1450   :  { %v13843_v27 = vpop.eup %13842 }
0x1451   :  { %v16763_v15 = vmul.f32 %v13843_v27, %v13841_v1 }
0x1453   :  { %18355 = vst [vmem:[#allocation115_spill] sm:$0xff] %v16763_v15  ;;  %v13845_v38 = vpop.eup %13844  ;;  %7076 = vmatmul.mubr.f32.vlgmr.msra.gmra.mrb[64].mxu0 %v16763_v15  ;;  %7147 = vmatmul.mubr.f32.vlgmr.msra.gmra.mrb[64].mxu1 %v16763_v15  ;;  %v18373_v15 = vld [vmem:[#allocation69_spill] sm:$0xff] }
0x1454   :  { %v13847_v8 = vpop.eup %13846  ;;  %v6990_v43 = vadd.f32 1.0, %v13845_v38  ;;  %12482 = vmatpush1.bf16.msra.mxu0 %v16468_v18  ;;  %12514 = vmatpush1.bf16.msra.mxu1 %v16470_v31 }
0x1455   :  { %v6996_v55 = vadd.f32 1.0, %v13847_v8  ;;  %12484 = vmatprep.subr.bf16.mxu0 %v16474_v35  ;;  %12516 = vmatprep.subr.bf16.mxu1 %v16476_v49  ;;  %v13849_v22 = vpop.eup %13848 }
0x1456   :  { %13852 = vrcp.f32 %v6990_v43  ;;  %7249 = vmatprep.mubr.f32.mxu0 %v17887_v33  ;;  %7320 = vmatprep.mubr.f32.mxu1 %v17887_v33  ;;  %v13851_v42 = vpop.eup %13850  ;;  %v7003_v0 = vadd.f32 1.0, %v13849_v22  ;;  %v18363_v22 = vld [vmem:[#allocation108_spill] sm:$0xff] }
0x1457   :  { %13854 = vrcp.f32 %v6996_v55  ;;  %v18362_v55 = vld [vmem:[#allocation107_spill] sm:$0xff] }
0x1458   :  { %12486 = vmatpush1.bf16.msra.mxu0 %v16482_v21  ;;  %12518 = vmatpush1.bf16.msra.mxu1 %v18318_v56  ;;  %13856 = vrcp.f32 %v7003_v0  ;;  %v18368_v0 = vld [vmem:[#allocation140_spill] sm:$0xff] }
0x1459   :  { %12488 = vmatprep.subr.bf16.mxu0 %v18319_v30  ;;  %12520 = vmatprep.subr.bf16.mxu1 %v18356_v4 }
0x145c   :  { %12490 = vmatpush1.bf16.msra.mxu0 %v18357_v37  ;;  %12522 = vmatpush1.bf16.msra.mxu1 %v18358_v39 }
0x145d   :  { %12492 = vmatprep.subr.bf16.mxu0 %v18359_v63  ;;  %12524 = vmatprep.subr.bf16.mxu1 %v18360_v23 }
0x1460   :  { %v13853_v9 = vpop.eup %13852  ;;  %12494 = vmatpush1.bf16.msra.mxu0 %v18325_v6  ;;  %12526 = vmatpush1.bf16.msra.mxu1 %v18326_v61 }
0x1461   :  { %v13855_v1 = vpop.eup %13854  ;;  %v7007_v27 = vmul.f32 %v13853_v9, %v13851_v42  ;;  %12496 = vmatprep.subr.bf16.mxu0 %v18327_v51  ;;  %12528 = vmatprep.subr.bf16.mxu1 %v18328_v16  ;;  %v18364_v42 = vld [vmem:[#allocation118_spill] sm:$0xff]  ;;  %v18365_v9 = vld [vmem:[#allocation124_spill] sm:$0xff] }
0x1462   :  { %v7006_v36 = vmul.f32 %v13855_v1, %v16686_v45  ;;  %v13857_v45 = vpop.eup %13856  ;;  %v18366_v1 = vld [vmem:[#allocation119_spill] sm:$0xff] }
0x1464   :  { %v16786_v38 = vadd.f32 %v7007_v27, %v7006_v36  ;;  %12498 = vmatpush1.bf16.msra.mxu0 %v18330_v14  ;;  %12530 = vmatpush1.bf16.msra.mxu1 %v18331_v46  ;;  %v18367_v27 = vld [vmem:[#allocation129_spill] sm:$0xff] }
0x1465   :  { %12500 = vmatprep.subr.bf16.mxu0 %v16526_v19  ;;  %12532 = vmatprep.subr.bf16.mxu1 %v16528_v2  ;;  %v18369_v36 = vld [vmem:[#allocation65_spill] sm:$0xff] }
0x1466   :  { %13858 = vtanh.f32 %v16786_v38 }
0x1468   :  { %12502 = vmatpush1.bf16.msra.mxu0 %v16532_v58  ;;  %12534 = vmatpush1.bf16.msra.mxu1 %v16534_v44 }
0x1469   :  { %12504 = vmatprep.subr.bf16.mxu0 %v16538_v48  ;;  %12536 = vmatprep.subr.bf16.mxu1 %v16540_v10 }
0x146c   :  { %12506 = vmatpush1.bf16.msra.mxu0 %v16544_v52  ;;  %12538 = vmatpush1.bf16.msra.mxu1 %v16546_v24 }
0x146d   :  { %12508 = vmatprep.subr.bf16.mxu0 %v16550_v59  ;;  %12540 = vmatprep.subr.bf16.mxu1 %v16552_v29 }
0x1470   :  { %v13859_v8 = vpop.eup %13858  ;;  %12510 = vmatpush1.bf16.msra.mxu0 %v16556_v54  ;;  %12542 = vmatpush1.bf16.msra.mxu1 %v16558_v57 }
0x1471   :  { %v16803_v43 = vmul.f32 %v13859_v8, %v13857_v45  ;;  %12544 = vmatprep.subr.bf16.mxu0 %v16362_v20  ;;  %12576 = vmatprep.subr.bf16.mxu1 %v16364_v34  ;;  %v18370_v45 = vld [vmem:[#allocation66_spill] sm:$0xff]  ;;  %v18371_v8 = vld [vmem:[#allocation67_spill] sm:$0xff] }
0x1473   :  { %18361 = vst [vmem:[#allocation116_spill] sm:$0xff] %v16803_v43  ;;  %7250 = vmatmul.mubr.f32.vlgmr.msra.gmra.mrb[66].mxu0 %v16803_v43  ;;  %7321 = vmatmul.mubr.f32.vlgmr.msra.gmra.mrb[66].mxu1 %v16803_v43  ;;  %v18372_v43 = vld [vmem:[#allocation68_spill] sm:$0xff] }
0x1474   :  { %12546 = vmatpush1.bf16.msra.mxu0 %v16366_v28  ;;  %12578 = vmatpush1.bf16.msra.mxu1 %v16368_v26 }
0x1475   :  { %12548 = vmatprep.subr.bf16.mxu0 %v16372_v62  ;;  %12580 = vmatprep.subr.bf16.mxu1 %v16374_v41  ;;  %v18391_v41 = vld [vmem:[#allocation127_spill] sm:$0xff] }
0x1476   :  { %7423 = vmatprep.mubr.f32.mxu0 %v17887_v33  ;;  %7494 = vmatprep.mubr.f32.mxu1 %v17887_v33 }
0x1478   :  { %12550 = vmatpush1.bf16.msra.mxu0 %v18362_v55  ;;  %12582 = vmatpush1.bf16.msra.mxu1 %v18363_v22  ;;  %v18374_v22 = vld [vmem:[#allocation70_spill] sm:$0xff]  ;;  %v18390_v55 = vld [vmem:[#allocation123_spill] sm:$0xff] }
0x1479   :  { %12552 = vmatprep.subr.bf16.mxu0 %v18364_v42  ;;  %12584 = vmatprep.subr.bf16.mxu1 %v18365_v9  ;;  %v18375_v42 = vld [vmem:[#allocation71_spill] sm:$0xff]  ;;  %v18376_v9 = vld [vmem:[#allocation72_spill] sm:$0xff] }
0x147c   :  { %12554 = vmatpush1.bf16.msra.mxu0 %v18366_v1  ;;  %12586 = vmatpush1.bf16.msra.mxu1 %v18367_v27  ;;  %v18377_v1 = vld [vmem:[#allocation73_spill] sm:$0xff]  ;;  %v18378_v27 = vld [vmem:[#allocation74_spill] sm:$0xff] }
0x147d   :  { %12556 = vmatprep.subr.bf16.mxu0 %v18368_v0  ;;  %12588 = vmatprep.subr.bf16.mxu1 %v18369_v36  ;;  %v18379_v0 = vld [vmem:[#allocation75_spill] sm:$0xff]  ;;  %v18380_v36 = vld [vmem:[#allocation76_spill] sm:$0xff] }
0x1480   :  { %12558 = vmatpush1.bf16.msra.mxu0 %v18370_v45  ;;  %12590 = vmatpush1.bf16.msra.mxu1 %v18371_v8  ;;  %v18381_v45 = vld [vmem:[#allocation77_spill] sm:$0xff]  ;;  %v18382_v8 = vld [vmem:[#allocation78_spill] sm:$0xff] }
0x1481   :  { %12560 = vmatprep.subr.bf16.mxu0 %v18372_v43  ;;  %12592 = vmatprep.subr.bf16.mxu1 %v18373_v15  ;;  %v18383_v43 = vld [vmem:[#allocation79_spill] sm:$0xff]  ;;  %v18384_v15 = vld [vmem:[#allocation80_spill] sm:$0xff] }
0x1484   :  { %12562 = vmatpush1.bf16.msra.mxu0 %v18374_v22  ;;  %12594 = vmatpush1.bf16.msra.mxu1 %v18375_v42  ;;  %v18385_v22 = vld [vmem:[#allocation81_spill] sm:$0xff]  ;;  %v18386_v42 = vld [vmem:[#allocation82_spill] sm:$0xff] }
0x1485   :  { %12564 = vmatprep.subr.bf16.mxu0 %v18376_v9  ;;  %12596 = vmatprep.subr.bf16.mxu1 %v18377_v1  ;;  %v18387_v9 = vld [vmem:[#allocation83_spill] sm:$0xff]  ;;  %v18388_v1 = vld [vmem:[#allocation84_spill] sm:$0xff] }
0x1488   :  { %12566 = vmatpush1.bf16.msra.mxu0 %v18378_v27  ;;  %12598 = vmatpush1.bf16.msra.mxu1 %v18379_v0  ;;  %v18389_v27 = vld [vmem:[#allocation85_spill] sm:$0xff] }
0x1489   :  { %12568 = vmatprep.subr.bf16.mxu0 %v18380_v36  ;;  %12600 = vmatprep.subr.bf16.mxu1 %v18381_v45 }
0x148c   :  { %12570 = vmatpush1.bf16.msra.mxu0 %v18382_v8  ;;  %12602 = vmatpush1.bf16.msra.mxu1 %v18383_v43 }
0x148d   :  { %12572 = vmatprep.subr.bf16.mxu0 %v18384_v15  ;;  %12604 = vmatprep.subr.bf16.mxu1 %v18385_v22 }
0x1490   :  { %12574 = vmatpush1.bf16.msra.mxu0 %v18386_v42  ;;  %12606 = vmatpush1.bf16.msra.mxu1 %v18387_v9 }
0x1491   :  { %12608 = vmatprep.subr.bf16.mxu0 %v18388_v1  ;;  %12640 = vmatprep.subr.bf16.mxu1 %v18389_v27 }
0x1526   :  { %v7077_v0 = vpop.f32.mrb[64].mxu0  ;;  %v7148_v36 = vpop.f32.mrb[64].mxu1 }
0x1527   :  { %v7153_v45 = vadd.f32 %v7077_v0, %v18390_v55  ;;  %v7155_v8 = vadd.f32 %v7148_v36, %v18391_v41  ;;  %v7079_v62 = vpop.f32.mrb[65].mxu0  ;;  %v7150_v43 = vpop.f32.mrb[65].mxu1  ;;  %v18392_v0 = vld [vmem:[#allocation112_spill] sm:$0xff] }
0x1528   :  { %v7154_v15 = vadd.f32 %v7079_v62, %v16606_v60  ;;  %v7156_v22 = vadd.f32 %v7150_v43, %v18350_v5 }
0x1529   :  { %v7157_v42 = vadd.f32 %v7153_v45, %v18351_v12  ;;  %v7159_v55 = vadd.f32 %v7155_v8, %v18392_v0 }
0x152a   :  { %v7158_v9 = vadd.f32 %v7154_v15, %v18352_v11  ;;  %v7160_v27 = vadd.f32 %v7156_v22, %v18353_v13 }
0x152b   :  { %v9670_v26 = vmul.f32 -1.442695, %v7157_v42 }
0x152c   :  { %v9671_v1 = vmul.f32 -1.442695, %v7158_v9  ;;  %v9672_v28 = vmul.f32 -1.442695, %v7160_v27 }
0x152d   :  { %13860 = vpow2.f32 %v9670_v26 }
0x152e   :  { %13862 = vpow2.f32 %v9671_v1 }
0x152f   :  { %13864 = vpow2.f32 %v9672_v28 }
0x1530   :  { %13866 = vtanh.f32 %v7159_v55 }
0x1537   :  { %v13861_v36 = vpop.eup %13860 }
0x1538   :  { %v13863_v41 = vpop.eup %13862  ;;  %v7164_v34 = vadd.f32 1.0, %v13861_v36 }
0x1539   :  { %v7170_v62 = vadd.f32 1.0, %v13863_v41  ;;  %v13865_v43 = vpop.eup %13864 }
0x153a   :  { %13868 = vrcp.f32 %v7164_v34  ;;  %v13867_v45 = vpop.eup %13866  ;;  %v7177_v26 = vadd.f32 1.0, %v13865_v43 }
0x153b   :  { %13870 = vrcp.f32 %v7170_v62 }
0x153c   :  { %13872 = vrcp.f32 %v7177_v26 }
0x1544   :  { %v13869_v15 = vpop.eup %13868 }
0x1545   :  { %v13871_v42 = vpop.eup %13870  ;;  %v7181_v9 = vmul.f32 %v13869_v15, %v13867_v45 }
0x1546   :  { %v7180_v1 = vmul.f32 %v13871_v42, %v16754_v53  ;;  %v7251_v22 = vpop.f32.mrb[66].mxu0  ;;  %v7322_v27 = vpop.f32.mrb[66].mxu1 }
0x1547   :  { %v7327_v8 = vadd.f32 %v7251_v22, %v16610_v50  ;;  %v7329_v0 = vadd.f32 %v7322_v27, %v16612_v17  ;;  %v7253_v36 = vpop.f32.mrb[67].mxu0  ;;  %v7324_v28 = vpop.f32.mrb[67].mxu1 }
0x1548   :  { %v16854_v55 = vadd.f32 %v7181_v9, %v7180_v1  ;;  %v7328_v34 = vadd.f32 %v7253_v36, %v16614_v25  ;;  %v7330_v41 = vadd.f32 %v7324_v28, %v16616_v3  ;;  %v13873_v42 = vpop.eup %13872 }
0x1549   :  { %v7331_v62 = vadd.f32 %v7327_v8, %v16640_v7  ;;  %v7333_v22 = vadd.f32 %v7329_v0, %v16660_v32 }
0x154a   :  { %v7332_v43 = vadd.f32 %v7328_v34, %v16644_v40  ;;  %13874 = vtanh.f32 %v16854_v55  ;;  %v7334_v15 = vadd.f32 %v7330_v41, %v16656_v47 }
0x154b   :  { %v9673_v53 = vmul.f32 -1.442695, %v7331_v62 }
0x154c   :  { %v9674_v45 = vmul.f32 -1.442695, %v7332_v43  ;;  %v9675_v1 = vmul.f32 -1.442695, %v7334_v15 }
0x154d   :  { %13876 = vpow2.f32 %v9673_v53 }
0x154e   :  { %13878 = vpow2.f32 %v9674_v45 }
0x154f   :  { %13880 = vpow2.f32 %v9675_v1  ;;  %v18395_v1 = vld [vmem:[#allocation102_spill] sm:$0xff] }
0x1550   :  { %13882 = vtanh.f32 %v7333_v22  ;;  %v18396_v22 = vld [vmem:[#allocation103_spill] sm:$0xff] }
0x1554   :  { %v13875_v9 = vpop.eup %13874 }
0x1555   :  { %v16863_v27 = vmul.f32 %v13875_v9, %v13873_v42 }
0x1557   :  { %18393 = vst [vmem:[#allocation117_spill] sm:$0xff] %v16863_v27  ;;  %v13877_v26 = vpop.eup %13876  ;;  %7424 = vmatmul.mubr.f32.vlgmr.msra.gmra.mrb[68].mxu0 %v16863_v27  ;;  %7495 = vmatmul.mubr.f32.vlgmr.msra.gmra.mrb[68].mxu1 %v16863_v27  ;;  %v18411_v27 = vld [vmem:[#allocation69_spill] sm:$0xff] }
0x1558   :  { %v13879_v8 = vpop.eup %13878  ;;  %v7338_v36 = vadd.f32 1.0, %v13877_v26  ;;  %12610 = vmatpush1.bf16.msra.mxu0 %v16468_v18  ;;  %12642 = vmatpush1.bf16.msra.mxu1 %v16470_v31  ;;  %v18397_v26 = vld [vmem:[#allocation104_spill] sm:$0xff] }
0x1559   :  { %v7344_v28 = vadd.f32 1.0, %v13879_v8  ;;  %12612 = vmatprep.subr.bf16.mxu0 %v16474_v35  ;;  %12644 = vmatprep.subr.bf16.mxu1 %v16476_v49  ;;  %v13881_v0 = vpop.eup %13880  ;;  %v18398_v8 = vld [vmem:[#allocation105_spill] sm:$0xff] }
0x155a   :  { %13884 = vrcp.f32 %v7338_v36  ;;  %7597 = vmatprep.mubr.f32.mxu0 %v17887_v33  ;;  %7668 = vmatprep.mubr.f32.mxu1 %v17887_v33  ;;  %v13883_v34 = vpop.eup %13882  ;;  %v7351_v53 = vadd.f32 1.0, %v13881_v0  ;;  %v18399_v36 = vld [vmem:[#allocation106_spill] sm:$0xff]  ;;  %v18401_v0 = vld [vmem:[#allocation108_spill] sm:$0xff] }
0x155b   :  { %13886 = vrcp.f32 %v7344_v28  ;;  %v18400_v28 = vld [vmem:[#allocation107_spill] sm:$0xff] }
0x155c   :  { %12614 = vmatpush1.bf16.msra.mxu0 %v16482_v21  ;;  %12646 = vmatpush1.bf16.msra.mxu1 %v18318_v56  ;;  %13888 = vrcp.f32 %v7351_v53  ;;  %v18406_v53 = vld [vmem:[#allocation140_spill] sm:$0xff] }
0x155d   :  { %12616 = vmatprep.subr.bf16.mxu0 %v18319_v30  ;;  %12648 = vmatprep.subr.bf16.mxu1 %v18356_v4 }
0x1560   :  { %12618 = vmatpush1.bf16.msra.mxu0 %v18357_v37  ;;  %12650 = vmatpush1.bf16.msra.mxu1 %v18358_v39 }
0x1561   :  { %12620 = vmatprep.subr.bf16.mxu0 %v18359_v63  ;;  %12652 = vmatprep.subr.bf16.mxu1 %v18360_v23 }
0x1564   :  { %v13885_v41 = vpop.eup %13884  ;;  %12622 = vmatpush1.bf16.msra.mxu0 %v18325_v6  ;;  %12654 = vmatpush1.bf16.msra.mxu1 %v18326_v61 }
0x1565   :  { %v13887_v62 = vpop.eup %13886  ;;  %v7355_v43 = vmul.f32 %v13885_v41, %v13883_v34  ;;  %12624 = vmatprep.subr.bf16.mxu0 %v18327_v51  ;;  %12656 = vmatprep.subr.bf16.mxu1 %v18328_v16  ;;  %v18402_v34 = vld [vmem:[#allocation118_spill] sm:$0xff]  ;;  %v18403_v41 = vld [vmem:[#allocation124_spill] sm:$0xff] }
0x1566   :  { %v7354_v45 = vmul.f32 %v13887_v62, %v16786_v38  ;;  %v13889_v38 = vpop.eup %13888  ;;  %v18404_v62 = vld [vmem:[#allocation119_spill] sm:$0xff] }
0x1568   :  { %v16886_v15 = vadd.f32 %v7355_v43, %v7354_v45  ;;  %12626 = vmatpush1.bf16.msra.mxu0 %v18330_v14  ;;  %12658 = vmatpush1.bf16.msra.mxu1 %v18331_v46  ;;  %v18405_v43 = vld [vmem:[#allocation129_spill] sm:$0xff] }
0x1569   :  { %12628 = vmatprep.subr.bf16.mxu0 %v16526_v19  ;;  %12660 = vmatprep.subr.bf16.mxu1 %v16528_v2  ;;  %v18407_v45 = vld [vmem:[#allocation65_spill] sm:$0xff] }
0x156a   :  { %13890 = vtanh.f32 %v16886_v15 }
0x156c   :  { %12630 = vmatpush1.bf16.msra.mxu0 %v16532_v58  ;;  %12662 = vmatpush1.bf16.msra.mxu1 %v16534_v44 }
0x156d   :  { %12632 = vmatprep.subr.bf16.mxu0 %v16538_v48  ;;  %12664 = vmatprep.subr.bf16.mxu1 %v16540_v10 }
0x1570   :  { %12634 = vmatpush1.bf16.msra.mxu0 %v16544_v52  ;;  %12666 = vmatpush1.bf16.msra.mxu1 %v16546_v24 }
0x1571   :  { %12636 = vmatprep.subr.bf16.mxu0 %v16550_v59  ;;  %12668 = vmatprep.subr.bf16.mxu1 %v16552_v29 }
0x1574   :  { %v13891_v42 = vpop.eup %13890  ;;  %12638 = vmatpush1.bf16.msra.mxu0 %v16556_v54  ;;  %12670 = vmatpush1.bf16.msra.mxu1 %v16558_v57 }
0x1575   :  { %v16903_v9 = vmul.f32 %v13891_v42, %v13889_v38  ;;  %12672 = vmatprep.subr.bf16.mxu0 %v16362_v20  ;;  %12704 = vmatprep.subr.bf16.mxu1 %v18395_v1  ;;  %v18408_v38 = vld [vmem:[#allocation66_spill] sm:$0xff]  ;;  %v18409_v42 = vld [vmem:[#allocation67_spill] sm:$0xff] }
0x1577   :  { %18394 = vst [vmem:[#allocation99_spill] sm:$0xff] %v16903_v9  ;;  %7598 = vmatmul.mubr.f32.vlgmr.msra.gmra.mrb[70].mxu0 %v16903_v9  ;;  %7669 = vmatmul.mubr.f32.vlgmr.msra.gmra.mrb[70].mxu1 %v16903_v9  ;;  %v18410_v9 = vld [vmem:[#allocation68_spill] sm:$0xff] }
0x1578   :  { %12674 = vmatpush1.bf16.msra.mxu0 %v18396_v22  ;;  %12706 = vmatpush1.bf16.msra.mxu1 %v18397_v26 }
0x1579   :  { %12676 = vmatprep.subr.bf16.mxu0 %v18398_v8  ;;  %12708 = vmatprep.subr.bf16.mxu1 %v18399_v36  ;;  %v18429_v8 = vld [vmem:[#allocation127_spill] sm:$0xff] }
0x157a   :  { %7771 = vmatprep.mubr.f32.mxu0 %v17887_v33  ;;  %7842 = vmatprep.mubr.f32.mxu1 %v17887_v33 }
0x157c   :  { %12678 = vmatpush1.bf16.msra.mxu0 %v18400_v28  ;;  %12710 = vmatpush1.bf16.msra.mxu1 %v18401_v0  ;;  %v18412_v28 = vld [vmem:[#allocation70_spill] sm:$0xff]  ;;  %v18428_v0 = vld [vmem:[#allocation123_spill] sm:$0xff] }
0x157d   :  { %12680 = vmatprep.subr.bf16.mxu0 %v18402_v34  ;;  %12712 = vmatprep.subr.bf16.mxu1 %v18403_v41  ;;  %v18413_v34 = vld [vmem:[#allocation71_spill] sm:$0xff]  ;;  %v18414_v41 = vld [vmem:[#allocation72_spill] sm:$0xff] }
0x1580   :  { %12682 = vmatpush1.bf16.msra.mxu0 %v18404_v62  ;;  %12714 = vmatpush1.bf16.msra.mxu1 %v18405_v43  ;;  %v18415_v62 = vld [vmem:[#allocation73_spill] sm:$0xff]  ;;  %v18416_v43 = vld [vmem:[#allocation74_spill] sm:$0xff] }
0x1581   :  { %12684 = vmatprep.subr.bf16.mxu0 %v18406_v53  ;;  %12716 = vmatprep.subr.bf16.mxu1 %v18407_v45  ;;  %v18417_v53 = vld [vmem:[#allocation75_spill] sm:$0xff]  ;;  %v18418_v45 = vld [vmem:[#allocation76_spill] sm:$0xff] }
0x1584   :  { %12686 = vmatpush1.bf16.msra.mxu0 %v18408_v38  ;;  %12718 = vmatpush1.bf16.msra.mxu1 %v18409_v42  ;;  %v18419_v38 = vld [vmem:[#allocation77_spill] sm:$0xff]  ;;  %v18420_v42 = vld [vmem:[#allocation78_spill] sm:$0xff] }
0x1585   :  { %12688 = vmatprep.subr.bf16.mxu0 %v18410_v9  ;;  %12720 = vmatprep.subr.bf16.mxu1 %v18411_v27  ;;  %v18421_v9 = vld [vmem:[#allocation79_spill] sm:$0xff]  ;;  %v18422_v27 = vld [vmem:[#allocation80_spill] sm:$0xff] }
0x1588   :  { %12690 = vmatpush1.bf16.msra.mxu0 %v18412_v28  ;;  %12722 = vmatpush1.bf16.msra.mxu1 %v18413_v34  ;;  %v18423_v28 = vld [vmem:[#allocation81_spill] sm:$0xff]  ;;  %v18424_v34 = vld [vmem:[#allocation82_spill] sm:$0xff] }
0x1589   :  { %12692 = vmatprep.subr.bf16.mxu0 %v18414_v41  ;;  %12724 = vmatprep.subr.bf16.mxu1 %v18415_v62  ;;  %v18425_v41 = vld [vmem:[#allocation83_spill] sm:$0xff]  ;;  %v18426_v62 = vld [vmem:[#allocation84_spill] sm:$0xff] }
0x158c   :  { %12694 = vmatpush1.bf16.msra.mxu0 %v18416_v43  ;;  %12726 = vmatpush1.bf16.msra.mxu1 %v18417_v53  ;;  %v18427_v43 = vld [vmem:[#allocation85_spill] sm:$0xff] }
0x158d   :  { %12696 = vmatprep.subr.bf16.mxu0 %v18418_v45  ;;  %12728 = vmatprep.subr.bf16.mxu1 %v18419_v38 }
0x1590   :  { %12698 = vmatpush1.bf16.msra.mxu0 %v18420_v42  ;;  %12730 = vmatpush1.bf16.msra.mxu1 %v18421_v9 }
0x1591   :  { %12700 = vmatprep.subr.bf16.mxu0 %v18422_v27  ;;  %12732 = vmatprep.subr.bf16.mxu1 %v18423_v28 }
0x1594   :  { %12702 = vmatpush1.bf16.msra.mxu0 %v18424_v34  ;;  %12734 = vmatpush1.bf16.msra.mxu1 %v18425_v41 }
0x1595   :  { %12736 = vmatprep.subr.bf16.mxu0 %v18426_v62  ;;  %12768 = vmatprep.subr.bf16.mxu1 %v18427_v43 }
0x162a   :  { %v7425_v53 = vpop.f32.mrb[68].mxu0  ;;  %v7496_v45 = vpop.f32.mrb[68].mxu1 }
0x162b   :  { %v7501_v38 = vadd.f32 %v7425_v53, %v18428_v0  ;;  %v7503_v42 = vadd.f32 %v7496_v45, %v18429_v8  ;;  %v7427_v36 = vpop.f32.mrb[69].mxu0  ;;  %v7498_v9 = vpop.f32.mrb[69].mxu1  ;;  %v18430_v53 = vld [vmem:[#allocation112_spill] sm:$0xff] }
0x162c   :  { %v7502_v27 = vadd.f32 %v7427_v36, %v16606_v60  ;;  %v7504_v28 = vadd.f32 %v7498_v9, %v18350_v5 }
0x162d   :  { %v7505_v34 = vadd.f32 %v7501_v38, %v18351_v12  ;;  %v7507_v0 = vadd.f32 %v7503_v42, %v18430_v53 }
0x162e   :  { %v7506_v41 = vadd.f32 %v7502_v27, %v18352_v11  ;;  %v7508_v43 = vadd.f32 %v7504_v28, %v18353_v13 }
0x162f   :  { %v9676_v22 = vmul.f32 -1.442695, %v7505_v34 }
0x1630   :  { %v9677_v62 = vmul.f32 -1.442695, %v7506_v41  ;;  %v9678_v26 = vmul.f32 -1.442695, %v7508_v43 }
0x1631   :  { %13892 = vpow2.f32 %v9676_v22 }
0x1632   :  { %13894 = vpow2.f32 %v9677_v62 }
0x1633   :  { %13896 = vpow2.f32 %v9678_v26 }
0x1634   :  { %13898 = vtanh.f32 %v7507_v0 }
0x163b   :  { %v13893_v45 = vpop.eup %13892 }
0x163c   :  { %v13895_v8 = vpop.eup %13894  ;;  %v7512_v20 = vadd.f32 1.0, %v13893_v45 }
0x163d   :  { %v7518_v36 = vadd.f32 1.0, %v13895_v8  ;;  %v13897_v9 = vpop.eup %13896 }
0x163e   :  { %13900 = vrcp.f32 %v7512_v20  ;;  %v13899_v38 = vpop.eup %13898  ;;  %v7525_v22 = vadd.f32 1.0, %v13897_v9 }
0x163f   :  { %13902 = vrcp.f32 %v7518_v36 }
0x1640   :  { %13904 = vrcp.f32 %v7525_v22 }
0x1648   :  { %v13901_v27 = vpop.eup %13900 }
0x1649   :  { %v13903_v34 = vpop.eup %13902  ;;  %v7529_v41 = vmul.f32 %v13901_v27, %v13899_v38 }
0x164a   :  { %v7528_v62 = vmul.f32 %v13903_v34, %v16854_v55  ;;  %v7599_v28 = vpop.f32.mrb[70].mxu0  ;;  %v7670_v43 = vpop.f32.mrb[70].mxu1 }
0x164b   :  { %v7675_v42 = vadd.f32 %v7599_v28, %v16610_v50  ;;  %v7677_v53 = vadd.f32 %v7670_v43, %v16612_v17  ;;  %v7601_v45 = vpop.f32.mrb[71].mxu0  ;;  %v7672_v26 = vpop.f32.mrb[71].mxu1 }
0x164c   :  { %v16954_v0 = vadd.f32 %v7529_v41, %v7528_v62  ;;  %v7676_v20 = vadd.f32 %v7601_v45, %v16614_v25  ;;  %v7678_v8 = vadd.f32 %v7672_v26, %v16616_v3  ;;  %v13905_v34 = vpop.eup %13904 }
0x164d   :  { %v7679_v36 = vadd.f32 %v7675_v42, %v16640_v7  ;;  %v7681_v28 = vadd.f32 %v7677_v53, %v16660_v32 }
0x164e   :  { %v7680_v9 = vadd.f32 %v7676_v20, %v16644_v40  ;;  %13906 = vtanh.f32 %v16954_v0  ;;  %v7682_v27 = vadd.f32 %v7678_v8, %v16656_v47 }
0x164f   :  { %v9679_v55 = vmul.f32 -1.442695, %v7679_v36 }
0x1650   :  { %v9680_v38 = vmul.f32 -1.442695, %v7680_v9  ;;  %v9681_v62 = vmul.f32 -1.442695, %v7682_v27 }
0x1651   :  { %13908 = vpow2.f32 %v9679_v55 }
0x1652   :  { %13910 = vpow2.f32 %v9680_v38 }
0x1653   :  { %13912 = vpow2.f32 %v9681_v62  ;;  %v18432_v62 = vld [vmem:[#allocation101_spill] sm:$0xff] }
0x1654   :  { %13914 = vtanh.f32 %v7681_v28  ;;  %v18433_v28 = vld [vmem:[#allocation104_spill] sm:$0xff] }
0x1658   :  { %v13907_v41 = vpop.eup %13906 }
0x1659   :  { %v16963_v43 = vmul.f32 %v13907_v41, %v13905_v34 }
0x165b   :  { %v13909_v22 = vpop.eup %13908  ;;  %7772 = vmatmul.mubr.f32.vlgmr.msra.gmra.mrb[72].mxu0 %v16963_v43  ;;  %7843 = vmatmul.mubr.f32.vlgmr.msra.gmra.mrb[72].mxu1 %v16963_v43 }
0x165c   :  { %v13911_v42 = vpop.eup %13910  ;;  %v7686_v45 = vadd.f32 1.0, %v13909_v22  ;;  %12738 = vmatpush1.bf16.msra.mxu0 %v16468_v18  ;;  %12770 = vmatpush1.bf16.msra.mxu1 %v16470_v31  ;;  %v18434_v22 = vld [vmem:[#allocation103_spill] sm:$0xff] }
0x165d   :  { %v7692_v26 = vadd.f32 1.0, %v13911_v42  ;;  %12740 = vmatprep.subr.bf16.mxu0 %v16474_v35  ;;  %12772 = vmatprep.subr.bf16.mxu1 %v16476_v49  ;;  %v13913_v53 = vpop.eup %13912  ;;  %v18435_v42 = vld [vmem:[#allocation106_spill] sm:$0xff] }
0x165e   :  { %13916 = vrcp.f32 %v7686_v45  ;;  %7945 = vmatprep.mubr.f32.mxu0 %v17887_v33  ;;  %8016 = vmatprep.mubr.f32.mxu1 %v17887_v33  ;;  %v13915_v20 = vpop.eup %13914  ;;  %v7699_v55 = vadd.f32 1.0, %v13913_v53  ;;  %v18436_v45 = vld [vmem:[#allocation105_spill] sm:$0xff]  ;;  %v18439_v53 = vld [vmem:[#allocation124_spill] sm:$0xff] }
0x165f   :  { %13918 = vrcp.f32 %v7692_v26  ;;  %v18437_v26 = vld [vmem:[#allocation108_spill] sm:$0xff] }
0x1660   :  { %12742 = vmatpush1.bf16.msra.mxu0 %v16482_v21  ;;  %12774 = vmatpush1.bf16.msra.mxu1 %v18318_v56  ;;  %13920 = vrcp.f32 %v7699_v55  ;;  %v18444_v55 = vld [vmem:[#allocation140_spill] sm:$0xff] }
0x1661   :  { %12744 = vmatprep.subr.bf16.mxu0 %v18319_v30  ;;  %12776 = vmatprep.subr.bf16.mxu1 %v18356_v4 }
0x1664   :  { %12746 = vmatpush1.bf16.msra.mxu0 %v18357_v37  ;;  %12778 = vmatpush1.bf16.msra.mxu1 %v18358_v39 }
0x1665   :  { %12748 = vmatprep.subr.bf16.mxu0 %v18359_v63  ;;  %12780 = vmatprep.subr.bf16.mxu1 %v18360_v23 }
0x1668   :  { %v13917_v8 = vpop.eup %13916  ;;  %12750 = vmatpush1.bf16.msra.mxu0 %v18325_v6  ;;  %12782 = vmatpush1.bf16.msra.mxu1 %v18326_v61 }
0x1669   :  { %v13919_v36 = vpop.eup %13918  ;;  %v7703_v9 = vmul.f32 %v13917_v8, %v13915_v20  ;;  %12752 = vmatprep.subr.bf16.mxu0 %v18327_v51  ;;  %12784 = vmatprep.subr.bf16.mxu1 %v18328_v16  ;;  %v18440_v20 = vld [vmem:[#allocation118_spill] sm:$0xff]  ;;  %v18441_v8 = vld [vmem:[#allocation129_spill] sm:$0xff] }
0x166a   :  { %v7702_v38 = vmul.f32 %v13919_v36, %v16886_v15  ;;  %v13921_v15 = vpop.eup %13920  ;;  %v18442_v36 = vld [vmem:[#allocation119_spill] sm:$0xff] }
0x166c   :  { %v16986_v27 = vadd.f32 %v7703_v9, %v7702_v38  ;;  %12754 = vmatpush1.bf16.msra.mxu0 %v18330_v14  ;;  %12786 = vmatpush1.bf16.msra.mxu1 %v18331_v46  ;;  %v18443_v9 = vld [vmem:[#allocation65_spill] sm:$0xff]  ;;  %v18445_v38 = vld [vmem:[#allocation67_spill] sm:$0xff] }
0x166d   :  { %12756 = vmatprep.subr.bf16.mxu0 %v16526_v19  ;;  %12788 = vmatprep.subr.bf16.mxu1 %v16528_v2 }
0x166e   :  { %13922 = vtanh.f32 %v16986_v27 }
0x1670   :  { %12758 = vmatpush1.bf16.msra.mxu0 %v16532_v58  ;;  %12790 = vmatpush1.bf16.msra.mxu1 %v16534_v44 }
0x1671   :  { %12760 = vmatprep.subr.bf16.mxu0 %v16538_v48  ;;  %12792 = vmatprep.subr.bf16.mxu1 %v16540_v10 }
0x1674   :  { %12762 = vmatpush1.bf16.msra.mxu0 %v16544_v52  ;;  %12794 = vmatpush1.bf16.msra.mxu1 %v16546_v24 }
0x1675   :  { %12764 = vmatprep.subr.bf16.mxu0 %v16550_v59  ;;  %12796 = vmatprep.subr.bf16.mxu1 %v16552_v29 }
0x1678   :  { %v13923_v34 = vpop.eup %13922  ;;  %12766 = vmatpush1.bf16.msra.mxu0 %v16556_v54  ;;  %12798 = vmatpush1.bf16.msra.mxu1 %v16558_v57 }
0x1679   :  { %v17003_v41 = vmul.f32 %v13923_v34, %v13921_v15  ;;  %12832 = vmatprep.subr.bf16.mxu1 %v18395_v1  ;;  %12800 = vmatprep.subr.bf16.mxu0 %v18432_v62  ;;  %v18438_v1 = vld [vmem:[#allocation107_spill] sm:$0xff]  ;;  %v18446_v15 = vld [vmem:[#allocation66_spill] sm:$0xff]  ;;  %v18447_v34 = vld [vmem:[#allocation69_spill] sm:$0xff] }
0x167a   :  { %v18448_v62 = vld [vmem:[#allocation68_spill] sm:$0xff] }
0x167b   :  { %18431 = vst [vmem:[#allocation122_spill] sm:$0xff] %v17003_v41  ;;  %7946 = vmatmul.mubr.f32.vlgmr.msra.gmra.mrb[74].mxu0 %v17003_v41  ;;  %8017 = vmatmul.mubr.f32.vlgmr.msra.gmra.mrb[74].mxu1 %v17003_v41 }
0x167c   :  { %12834 = vmatpush1.bf16.msra.mxu1 %v18433_v28  ;;  %12802 = vmatpush1.bf16.msra.mxu0 %v18434_v22  ;;  %v18449_v28 = vld [vmem:[#allocation71_spill] sm:$0xff]  ;;  %v18450_v22 = vld [vmem:[#allocation70_spill] sm:$0xff] }
0x167d   :  { %12836 = vmatprep.subr.bf16.mxu1 %v18435_v42  ;;  %12804 = vmatprep.subr.bf16.mxu0 %v18436_v45  ;;  %v18451_v42 = vld [vmem:[#allocation73_spill] sm:$0xff]  ;;  %v18452_v45 = vld [vmem:[#allocation72_spill] sm:$0xff] }
0x167e   :  { %8119 = vmatprep.mubr.f32.mxu0 %v17887_v33  ;;  %8190 = vmatprep.mubr.f32.mxu1 %v17887_v33 }
0x1680   :  { %12838 = vmatpush1.bf16.msra.mxu1 %v18437_v26  ;;  %12806 = vmatpush1.bf16.msra.mxu0 %v18438_v1  ;;  %v18453_v26 = vld [vmem:[#allocation75_spill] sm:$0xff]  ;;  %v18454_v1 = vld [vmem:[#allocation74_spill] sm:$0xff] }
0x1681   :  { %12840 = vmatprep.subr.bf16.mxu1 %v18439_v53  ;;  %12808 = vmatprep.subr.bf16.mxu0 %v18440_v20  ;;  %v18455_v53 = vld [vmem:[#allocation77_spill] sm:$0xff]  ;;  %v18456_v20 = vld [vmem:[#allocation76_spill] sm:$0xff] }
0x1684   :  { %12842 = vmatpush1.bf16.msra.mxu1 %v18441_v8  ;;  %12810 = vmatpush1.bf16.msra.mxu0 %v18442_v36  ;;  %v18457_v8 = vld [vmem:[#allocation79_spill] sm:$0xff]  ;;  %v18458_v36 = vld [vmem:[#allocation78_spill] sm:$0xff] }
0x1685   :  { %12844 = vmatprep.subr.bf16.mxu1 %v18443_v9  ;;  %12812 = vmatprep.subr.bf16.mxu0 %v18444_v55  ;;  %v18459_v9 = vld [vmem:[#allocation81_spill] sm:$0xff]  ;;  %v18460_v55 = vld [vmem:[#allocation80_spill] sm:$0xff] }
0x1688   :  { %12846 = vmatpush1.bf16.msra.mxu1 %v18445_v38  ;;  %12814 = vmatpush1.bf16.msra.mxu0 %v18446_v15  ;;  %v18461_v38 = vld [vmem:[#allocation83_spill] sm:$0xff]  ;;  %v18462_v15 = vld [vmem:[#allocation82_spill] sm:$0xff] }
0x1689   :  { %12848 = vmatprep.subr.bf16.mxu1 %v18447_v34  ;;  %12816 = vmatprep.subr.bf16.mxu0 %v18448_v62  ;;  %v18463_v34 = vld [vmem:[#allocation85_spill] sm:$0xff]  ;;  %v18464_v62 = vld [vmem:[#allocation84_spill] sm:$0xff] }
0x168c   :  { %12850 = vmatpush1.bf16.msra.mxu1 %v18449_v28  ;;  %12818 = vmatpush1.bf16.msra.mxu0 %v18450_v22 }
0x168d   :  { %12852 = vmatprep.subr.bf16.mxu1 %v18451_v42  ;;  %12820 = vmatprep.subr.bf16.mxu0 %v18452_v45  ;;  %v18465_v42 = vld [vmem:[#allocation123_spill] sm:$0xff] }
0x1690   :  { %12854 = vmatpush1.bf16.msra.mxu1 %v18453_v26  ;;  %12822 = vmatpush1.bf16.msra.mxu0 %v18454_v1  ;;  %v18466_v26 = vld [vmem:[#allocation127_spill] sm:$0xff] }
0x1691   :  { %12856 = vmatprep.subr.bf16.mxu1 %v18455_v53  ;;  %12824 = vmatprep.subr.bf16.mxu0 %v18456_v20 }
0x1694   :  { %12858 = vmatpush1.bf16.msra.mxu1 %v18457_v8  ;;  %12826 = vmatpush1.bf16.msra.mxu0 %v18458_v36 }
0x1695   :  { %12860 = vmatprep.subr.bf16.mxu1 %v18459_v9  ;;  %12828 = vmatprep.subr.bf16.mxu0 %v18460_v55 }
0x1698   :  { %12862 = vmatpush1.bf16.msra.mxu1 %v18461_v38  ;;  %12830 = vmatpush1.bf16.msra.mxu0 %v18462_v15 }
0x1699   :  { %12896 = vmatprep.subr.bf16.mxu1 %v18463_v34  ;;  %12864 = vmatprep.subr.bf16.mxu0 %v18464_v62 }
0x172e   :  { %v7773_v28 = vpop.f32.mrb[72].mxu0  ;;  %v7844_v22 = vpop.f32.mrb[72].mxu1 }
0x172f   :  { %v7849_v45 = vadd.f32 %v7773_v28, %v18465_v42  ;;  %v7851_v1 = vadd.f32 %v7844_v22, %v18466_v26  ;;  %v7775_v53 = vpop.f32.mrb[73].mxu0  ;;  %v7846_v20 = vpop.f32.mrb[73].mxu1  ;;  %v18467_v28 = vld [vmem:[#allocation112_spill] sm:$0xff] }
0x1730   :  { %v7850_v8 = vadd.f32 %v7775_v53, %v16606_v60  ;;  %v7852_v36 = vadd.f32 %v7846_v20, %v18350_v5 }
0x1731   :  { %v7853_v9 = vadd.f32 %v7849_v45, %v18351_v12  ;;  %v7855_v41 = vadd.f32 %v7851_v1, %v18467_v28 }
0x1732   :  { %v7854_v55 = vadd.f32 %v7850_v8, %v18352_v11  ;;  %v7856_v34 = vadd.f32 %v7852_v36, %v18353_v13 }
0x1733   :  { %v9682_v38 = vmul.f32 -1.442695, %v7853_v9 }
0x1734   :  { %v9683_v15 = vmul.f32 -1.442695, %v7854_v55  ;;  %v9684_v62 = vmul.f32 -1.442695, %v7856_v34 }
0x1735   :  { %13924 = vpow2.f32 %v9682_v38 }
0x1736   :  { %13926 = vpow2.f32 %v9683_v15 }
0x1737   :  { %13928 = vpow2.f32 %v9684_v62 }
0x1738   :  { %13930 = vtanh.f32 %v7855_v41 }
0x173f   :  { %v13925_v22 = vpop.eup %13924 }
0x1740   :  { %v13927_v26 = vpop.eup %13926  ;;  %v7860_v42 = vadd.f32 1.0, %v13925_v22 }
0x1741   :  { %v7866_v53 = vadd.f32 1.0, %v13927_v26  ;;  %v13929_v45 = vpop.eup %13928 }
0x1742   :  { %13932 = vrcp.f32 %v7860_v42  ;;  %v13931_v20 = vpop.eup %13930  ;;  %v7873_v38 = vadd.f32 1.0, %v13929_v45 }
0x1743   :  { %13934 = vrcp.f32 %v7866_v53 }
0x1744   :  { %13936 = vrcp.f32 %v7873_v38 }
0x174c   :  { %v13933_v8 = vpop.eup %13932 }
0x174d   :  { %v13935_v9 = vpop.eup %13934  ;;  %v7877_v55 = vmul.f32 %v13933_v8, %v13931_v20 }
0x174e   :  { %v7876_v15 = vmul.f32 %v13935_v9, %v16954_v0  ;;  %v7947_v36 = vpop.f32.mrb[74].mxu0  ;;  %v8018_v34 = vpop.f32.mrb[74].mxu1 }
0x174f   :  { %v8023_v1 = vadd.f32 %v7947_v36, %v16610_v50  ;;  %v8025_v28 = vadd.f32 %v8018_v34, %v16612_v17  ;;  %v7949_v22 = vpop.f32.mrb[75].mxu0  ;;  %v8020_v62 = vpop.f32.mrb[75].mxu1 }
0x1750   :  { %v17054_v41 = vadd.f32 %v7877_v55, %v7876_v15  ;;  %v8024_v42 = vadd.f32 %v7949_v22, %v16614_v25  ;;  %v8026_v26 = vadd.f32 %v8020_v62, %v16616_v3  ;;  %v13937_v9 = vpop.eup %13936 }
0x1751   :  { %v8027_v53 = vadd.f32 %v8023_v1, %v16640_v7  ;;  %v8029_v36 = vadd.f32 %v8025_v28, %v16660_v32  ;;  %v8416_v28 = vld [vmem:[%s18468_s10 + $0x68] sm:$0xff] }
0x1752   :  { %v8028_v45 = vadd.f32 %v8024_v42, %v16644_v40  ;;  %13938 = vtanh.f32 %v17054_v41  ;;  %v8030_v8 = vadd.f32 %v8026_v26, %v16656_v47  ;;  %v8417_v26 = vld [vmem:[%s18468_s10 + $0x70] sm:$0xff] }
0x1753   :  { %v9685_v0 = vmul.f32 -1.442695, %v8027_v53  ;;  %v8418_v53 = vld [vmem:[%s18468_s10 + $0x78] sm:$0xff] }
0x1754   :  { %v9686_v20 = vmul.f32 -1.442695, %v8028_v45  ;;  %v9687_v15 = vmul.f32 -1.442695, %v8030_v8  ;;  %v17156_v45 = vpack.c.bf16 %v8418_v53, %v8417_v26  ;;  %v18473_v8 = vld [vmem:[#allocation117_spill] sm:$0xff] }
0x1755   :  { %13940 = vpow2.f32 %v9685_v0  ;;  %v18470_v0 = vld [vmem:[#allocation113_spill] sm:$0xff] }
0x1756   :  { %13942 = vpow2.f32 %v9686_v20  ;;  %v18471_v20 = vld [vmem:[#allocation115_spill] sm:$0xff] }
0x1757   :  { %13944 = vpow2.f32 %v9687_v15 }
0x1758   :  { %13946 = vtanh.f32 %v8029_v36  ;;  %v8421_v36 = vld [vmem:[%s18472_s30 + $0x10] sm:$0xff] }
0x175c   :  { %v13939_v55 = vpop.eup %13938 }
0x175d   :  { %v17063_v34 = vmul.f32 %v13939_v55, %v13937_v9  ;;  %v8419_v9 = vld [vmem:[%s18472_s30] sm:$0xff]  ;;  %v8420_v55 = vld [vmem:[%s18472_s30 + $0x8] sm:$0xff] }
0x175e   :  { %v17206_v15 = vpack.c.bf16 %v8420_v55, %v8419_v9 }
0x175f   :  { %v13941_v38 = vpop.eup %13940  ;;  %8120 = vmatmul.mubr.f32.vlgmr.msra.gmra.mrb[76].mxu0 %v17063_v34  ;;  %8191 = vmatmul.mubr.f32.vlgmr.msra.gmra.mrb[76].mxu1 %v17063_v34 }
0x1760   :  { %v13943_v1 = vpop.eup %13942  ;;  %v8034_v22 = vadd.f32 1.0, %v13941_v38  ;;  %12898 = vmatpush1.bf16.msra.mxu1 %v16470_v31  ;;  %12866 = vmatpush1.bf16.msra.mxu0 %v16468_v18  ;;  %v8422_v38 = vld [vmem:[%s18472_s30 + $0x18] sm:$0xff] }
0x1761   :  { %v8040_v62 = vadd.f32 1.0, %v13943_v1  ;;  %12900 = vmatprep.subr.bf16.mxu1 %v16476_v49  ;;  %12868 = vmatprep.subr.bf16.mxu0 %v16474_v35  ;;  %v13945_v18 = vpop.eup %13944  ;;  %v17214_v1 = vpack.c.bf16 %v8422_v38, %v8421_v36 }
0x1762   :  { %13948 = vrcp.f32 %v8034_v22  ;;  %8293 = vmatprep.mubr.f32.mxu0 %v17887_v33  ;;  %8364 = vmatprep.mubr.f32.mxu1 %v17887_v33  ;;  %v13947_v31 = vpop.eup %13946  ;;  %v8423_v22 = vld [vmem:[%s18472_s30 + $0x20] sm:$0xff] }
0x1763   :  { %13950 = vrcp.f32 %v8040_v62  ;;  %v8424_v62 = vld [vmem:[%s18472_s30 + $0x28] sm:$0xff] }
0x1764   :  { %12902 = vmatpush1.bf16.msra.mxu1 %v18318_v56  ;;  %12870 = vmatpush1.bf16.msra.mxu0 %v16482_v21  ;;  %v8047_v56 = vadd.f32 1.0, %v13945_v18  ;;  %v17222_v18 = vpack.c.bf16 %v8424_v62, %v8423_v22 }
0x1765   :  { %12904 = vmatprep.subr.bf16.mxu1 %v18356_v4  ;;  %12872 = vmatprep.subr.bf16.mxu0 %v18319_v30 }
0x1766   :  { %13952 = vrcp.f32 %v8047_v56  ;;  %v8428_v56 = vld [vmem:[%s18472_s30 + $0x48] sm:$0xff] }
0x1768   :  { %12906 = vmatpush1.bf16.msra.mxu1 %v18358_v39  ;;  %12874 = vmatpush1.bf16.msra.mxu0 %v18357_v37  ;;  %v8413_v39 = vld [vmem:[%s18468_s10 + $0x50] sm:$0xff] }
0x1769   :  { %12908 = vmatprep.subr.bf16.mxu1 %v18360_v23  ;;  %12876 = vmatprep.subr.bf16.mxu0 %v18359_v63  ;;  %v8414_v63 = vld [vmem:[%s18468_s10 + $0x58] sm:$0xff] }
0x176a   :  { %v17144_v23 = vpack.c.bf16 %v8414_v63, %v8413_v39 }
0x176c   :  { %v13949_v35 = vpop.eup %13948  ;;  %12910 = vmatpush1.bf16.msra.mxu1 %v18326_v61  ;;  %12878 = vmatpush1.bf16.msra.mxu0 %v18325_v6  ;;  %v8411_v61 = vld [vmem:[%s18468_s10 + $0x40] sm:$0xff] }
0x176d   :  { %v13951_v49 = vpop.eup %13950  ;;  %v8051_v21 = vmul.f32 %v13949_v35, %v13947_v31  ;;  %12912 = vmatprep.subr.bf16.mxu1 %v18328_v16  ;;  %12880 = vmatprep.subr.bf16.mxu0 %v18327_v51  ;;  %v8412_v51 = vld [vmem:[%s18468_s10 + $0x48] sm:$0xff]  ;;  %v8425_v31 = vld [vmem:[%s18472_s30 + $0x30] sm:$0xff]  ;;  %v8426_v35 = vld [vmem:[%s18472_s30 + $0x38] sm:$0xff] }
0x176e   :  { %v8050_v30 = vmul.f32 %v13951_v49, %v16986_v27  ;;  %v17138_v37 = vpack.c.bf16 %v8412_v51, %v8411_v61  ;;  %v8415_v27 = vld [vmem:[%s18468_s10 + $0x60] sm:$0xff]  ;;  %v17230_v49 = vpack.c.bf16 %v8426_v35, %v8425_v31  ;;  %v18475_v61 = vld [vmem:[#allocation127_spill] sm:$0xff] }
0x176f   :  { %v17150_v42 = vpack.c.bf16 %v8416_v28, %v8415_v27 }
0x1770   :  { %v17086_v4 = vadd.f32 %v8051_v21, %v8050_v30  ;;  %12914 = vmatpush1.bf16.msra.mxu1 %v18331_v46  ;;  %12882 = vmatpush1.bf16.msra.mxu0 %v18330_v14  ;;  %v13953_v16 = vpop.eup %13952  ;;  %v8409_v14 = vld [vmem:[%s18468_s10 + $0x30] sm:$0xff]  ;;  %v8410_v46 = vld [vmem:[%s18468_s10 + $0x38] sm:$0xff]  ;;  %v8427_v21 = vld [vmem:[%s18472_s30 + $0x40] sm:$0xff] }
0x1771   :  { %12916 = vmatprep.subr.bf16.mxu1 %v16528_v2  ;;  %12884 = vmatprep.subr.bf16.mxu0 %v16526_v19  ;;  %v8403_v19 = vld [vmem:[%s18468_s10] sm:$0xff]  ;;  %v8404_v2 = vld [vmem:[%s18468_s10 + $0x8] sm:$0xff]  ;;  %v17132_v6 = vpack.c.bf16 %v8410_v46, %v8409_v14  ;;  %v17238_v30 = vpack.c.bf16 %v8428_v56, %v8427_v21 }
0x1772   :  { %13954 = vtanh.f32 %v17086_v4 }
0x1774   :  { %12918 = vmatpush1.bf16.msra.mxu1 %v16534_v44  ;;  %12886 = vmatpush1.bf16.msra.mxu0 %v16532_v58  ;;  %v17105_v58 = vpack.c.bf16 %v8404_v2, %v8403_v19  ;;  %v8429_v19 = vld [vmem:[%s18472_s30 + $0x50] sm:$0xff]  ;;  %v8430_v2 = vld [vmem:[%s18472_s30 + $0x58] sm:$0xff] }
0x1775   :  { %12920 = vmatprep.subr.bf16.mxu1 %v16540_v10  ;;  %12888 = vmatprep.subr.bf16.mxu0 %v16538_v48  ;;  %v18469_v48 = vmov 0.0|0.0  }
0x1778   :  { %12922 = vmatpush1.bf16.msra.mxu1 %v16546_v24  ;;  %12890 = vmatpush1.bf16.msra.mxu0 %v16544_v52  ;;  %v8405_v52 = vld [vmem:[%s18468_s10 + $0x10] sm:$0xff]  ;;  %v8406_v24 = vld [vmem:[%s18468_s10 + $0x18] sm:$0xff] }
0x1779   :  { %12924 = vmatprep.subr.bf16.mxu1 %v16552_v29  ;;  %12892 = vmatprep.subr.bf16.mxu0 %v16550_v59  ;;  %v17116_v59 = vpack.c.bf16 %v8406_v24, %v8405_v52  ;;  %v8407_v29 = vld [vmem:[%s18468_s10 + $0x20] sm:$0xff]  ;;  %v8432_v52 = vld [vmem:[%s18472_s30 + $0x68] sm:$0xff] }
0x177c   :  { %v13955_v44 = vpop.eup %13954  ;;  %12926 = vmatpush1.bf16.msra.mxu1 %v16558_v57  ;;  %12894 = vmatpush1.bf16.msra.mxu0 %v16556_v54  ;;  %v8408_v54 = vld [vmem:[%s18468_s10 + $0x28] sm:$0xff] }
0x177d   :  { %12951 = vmatprep.subr.bf16.mxu1 %v18469_v48  ;;  %v17108_v10 = vmul.f32 %v13955_v44, %v13953_v16  ;;  %12927 = vmatprep.subr.bf16.mxu0 %v18469_v48  ;;  %v17126_v57 = vpack.c.bf16 %v8408_v54, %v8407_v29  ;;  %v17244_v16 = vpack.c.bf16 %v8430_v2, %v8429_v19  ;;  %v8431_v44 = vld [vmem:[%s18472_s30 + $0x60] sm:$0xff]  ;;  %v8433_v29 = vld [vmem:[%s18472_s30 + $0x70] sm:$0xff]  ;;  %v8434_v54 = vld [vmem:[%s18472_s30 + $0x78] sm:$0xff] }
0x177e   :  { %v17252_v24 = vpack.c.bf16 %v8432_v52, %v8431_v44  ;;  %v17262_v14 = vpack.c.bf16 %v8434_v54, %v8433_v29 }
0x177f   :  { %8294 = vmatmul.mubr.f32.vlgmr.msra.gmra.mrb[78].mxu0 %v17108_v10  ;;  %8365 = vmatmul.mubr.f32.vlgmr.msra.gmra.mrb[78].mxu1 %v17108_v10 }
0x1780   :  { %12953 = vmatpush3.bf16.msra.mxu1 %v17105_v58  ;;  %10446 = vmatprep.mubr.msk.f32.mxu1 %vm14537_vm5, %v17887_v33 }
0x1781   :  { %12954 = vmatprep.subr.bf16.mxu1 %v18469_v48  ;;  %10411 = vmatprep.mubr.msk.f32.mxu0 %vm14537_vm5, %v17887_v33 }
0x1782   :  { %12929 = vmatpush3.bf16.msra.mxu0 %v17206_v15 }
0x1783   :  { %12930 = vmatprep.subr.bf16.mxu0 %v18469_v48 }
0x1784   :  { %12956 = vmatpush3.bf16.msra.mxu1 %v17116_v59 }
0x1785   :  { %12957 = vmatprep.subr.bf16.mxu1 %v18469_v48 }
0x1786   :  { %12932 = vmatpush3.bf16.msra.mxu0 %v17214_v1 }
0x1787   :  { %12933 = vmatprep.subr.bf16.mxu0 %v18469_v48 }
0x1788   :  { %12959 = vmatpush3.bf16.msra.mxu1 %v17126_v57 }
0x1789   :  { %12960 = vmatprep.subr.bf16.mxu1 %v18469_v48 }
0x178a   :  { %12935 = vmatpush3.bf16.msra.mxu0 %v17222_v18 }
0x178b   :  { %12936 = vmatprep.subr.bf16.mxu0 %v18469_v48 }
0x178c   :  { %12962 = vmatpush3.bf16.msra.mxu1 %v17132_v6 }
0x178d   :  { %12963 = vmatprep.subr.bf16.mxu1 %v18469_v48 }
0x178e   :  { %12938 = vmatpush3.bf16.msra.mxu0 %v17230_v49 }
0x178f   :  { %12939 = vmatprep.subr.bf16.mxu0 %v18469_v48 }
0x1790   :  { %12965 = vmatpush3.bf16.msra.mxu1 %v17138_v37 }
0x1791   :  { %12966 = vmatprep.subr.bf16.mxu1 %v18469_v48 }
0x1792   :  { %12941 = vmatpush3.bf16.msra.mxu0 %v17238_v30 }
0x1793   :  { %12942 = vmatprep.subr.bf16.mxu0 %v18469_v48 }
0x1794   :  { %12968 = vmatpush3.bf16.msra.mxu1 %v17144_v23 }
0x1795   :  { %12969 = vmatprep.subr.bf16.mxu1 %v18469_v48 }
0x1796   :  { %12944 = vmatpush3.bf16.msra.mxu0 %v17244_v16 }
0x1797   :  { %12945 = vmatprep.subr.bf16.mxu0 %v18469_v48 }
0x1798   :  { %12971 = vmatpush3.bf16.msra.mxu1 %v17150_v42 }
0x1799   :  { %12972 = vmatprep.subr.bf16.mxu1 %v18469_v48 }
0x179a   :  { %12947 = vmatpush3.bf16.msra.mxu0 %v17252_v24 }
0x179b   :  { %12948 = vmatprep.subr.bf16.mxu0 %v18469_v48 }
0x179c   :  { %12974 = vmatpush3.bf16.msra.mxu1 %v17156_v45 }
0x179d   :  { %12999 = vmatprep.subr.bf16.mxu1 %v18469_v48 }
0x179e   :  { %12950 = vmatpush3.bf16.msra.mxu0 %v17262_v14 }
0x179f   :  { %10447 = vmatmul.mubr.f32.vlgmr.msra.gmra.mrb[80].mxu1 %v18470_v0  ;;  %12975 = vmatprep.subr.bf16.mxu0 %v18469_v48 }
0x17a0   :  { %13001 = vmatpush3.bf16.msra.mxu1 %v17105_v58  ;;  %10516 = vmatprep.mubr.msk.f32.mxu1 %vm14537_vm5, %v17887_v33 }
0x17a1   :  { %13002 = vmatprep.subr.bf16.mxu1 %v18469_v48 }
0x17a4   :  { %13004 = vmatpush3.bf16.msra.mxu1 %v17116_v59 }
0x17a5   :  { %13005 = vmatprep.subr.bf16.mxu1 %v18469_v48 }
0x17a8   :  { %13007 = vmatpush3.bf16.msra.mxu1 %v17126_v57 }
0x17a9   :  { %13008 = vmatprep.subr.bf16.mxu1 %v18469_v48 }
0x17ac   :  { %13010 = vmatpush3.bf16.msra.mxu1 %v17132_v6 }
0x17ad   :  { %13011 = vmatprep.subr.bf16.mxu1 %v18469_v48 }
0x17b0   :  { %13013 = vmatpush3.bf16.msra.mxu1 %v17138_v37 }
0x17b1   :  { %13014 = vmatprep.subr.bf16.mxu1 %v18469_v48 }
0x17b4   :  { %13016 = vmatpush3.bf16.msra.mxu1 %v17144_v23 }
0x17b5   :  { %13017 = vmatprep.subr.bf16.mxu1 %v18469_v48 }
0x17b8   :  { %13019 = vmatpush3.bf16.msra.mxu1 %v17150_v42 }
0x17b9   :  { %13020 = vmatprep.subr.bf16.mxu1 %v18469_v48 }
0x17bc   :  { %13022 = vmatpush3.bf16.msra.mxu1 %v17156_v45 }
0x17bd   :  { %13047 = vmatprep.subr.bf16.mxu1 %v18469_v48 }
0x17bf   :  { %10517 = vmatmul.mubr.f32.vlgmr.msra.gmra.mrb[82].mxu1 %v18471_v20 }
0x17c0   :  { %13049 = vmatpush3.bf16.msra.mxu1 %v17105_v58  ;;  %10586 = vmatprep.mubr.msk.f32.mxu1 %vm14537_vm5, %v17887_v33 }
0x17c1   :  { %13050 = vmatprep.subr.bf16.mxu1 %v18469_v48 }
0x17c4   :  { %13052 = vmatpush3.bf16.msra.mxu1 %v17116_v59 }
0x17c5   :  { %13053 = vmatprep.subr.bf16.mxu1 %v18469_v48 }
0x17c8   :  { %13055 = vmatpush3.bf16.msra.mxu1 %v17126_v57 }
0x17c9   :  { %13056 = vmatprep.subr.bf16.mxu1 %v18469_v48 }
0x17cc   :  { %13058 = vmatpush3.bf16.msra.mxu1 %v17132_v6 }
0x17cd   :  { %13059 = vmatprep.subr.bf16.mxu1 %v18469_v48 }
0x17d0   :  { %13061 = vmatpush3.bf16.msra.mxu1 %v17138_v37 }
0x17d1   :  { %13062 = vmatprep.subr.bf16.mxu1 %v18469_v48 }
0x17d4   :  { %13064 = vmatpush3.bf16.msra.mxu1 %v17144_v23 }
0x17d5   :  { %13065 = vmatprep.subr.bf16.mxu1 %v18469_v48 }
0x17d8   :  { %13067 = vmatpush3.bf16.msra.mxu1 %v17150_v42 }
0x17d9   :  { %13068 = vmatprep.subr.bf16.mxu1 %v18469_v48 }
0x17dc   :  { %13070 = vmatpush3.bf16.msra.mxu1 %v17156_v45 }
0x17dd   :  { %13095 = vmatprep.subr.bf16.mxu1 %v18469_v48 }
0x17df   :  { %10587 = vmatmul.mubr.f32.vlgmr.msra.gmra.mrb[84].mxu1 %v18473_v8 }
0x17e0   :  { %13097 = vmatpush3.bf16.msra.mxu1 %v17105_v58  ;;  %10656 = vmatprep.mubr.msk.f32.mxu1 %vm14537_vm5, %v17887_v33 }
0x17e1   :  { %13098 = vmatprep.subr.bf16.mxu1 %v18469_v48 }
0x17e4   :  { %13100 = vmatpush3.bf16.msra.mxu1 %v17116_v59 }
0x17e5   :  { %13101 = vmatprep.subr.bf16.mxu1 %v18469_v48 }
0x17e8   :  { %13103 = vmatpush3.bf16.msra.mxu1 %v17126_v57 }
0x17e9   :  { %13104 = vmatprep.subr.bf16.mxu1 %v18469_v48 }
0x17ec   :  { %13106 = vmatpush3.bf16.msra.mxu1 %v17132_v6 }
0x17ed   :  { %13107 = vmatprep.subr.bf16.mxu1 %v18469_v48 }
0x17f0   :  { %13109 = vmatpush3.bf16.msra.mxu1 %v17138_v37 }
0x17f1   :  { %13110 = vmatprep.subr.bf16.mxu1 %v18469_v48 }
0x17f4   :  { %13112 = vmatpush3.bf16.msra.mxu1 %v17144_v23 }
0x17f5   :  { %13113 = vmatprep.subr.bf16.mxu1 %v18469_v48 }
0x17f8   :  { %13115 = vmatpush3.bf16.msra.mxu1 %v17150_v42 }
0x17f9   :  { %13116 = vmatprep.subr.bf16.mxu1 %v18469_v48 }
0x17fc   :  { %13118 = vmatpush3.bf16.msra.mxu1 %v17156_v45 }
0x17fd   :  { %13143 = vmatprep.subr.bf16.mxu1 %v18469_v48 }
0x17ff   :  { %10657 = vmatmul.mubr.f32.vlgmr.msra.gmra.mrb[86].mxu1 %v16963_v43 }
0x1800   :  { %13145 = vmatpush3.bf16.msra.mxu1 %v17105_v58  ;;  %10726 = vmatprep.mubr.msk.f32.mxu1 %vm14537_vm5, %v17887_v33 }
0x1801   :  { %13146 = vmatprep.subr.bf16.mxu1 %v18469_v48 }
0x1804   :  { %13148 = vmatpush3.bf16.msra.mxu1 %v17116_v59 }
0x1805   :  { %13149 = vmatprep.subr.bf16.mxu1 %v18469_v48 }
0x1808   :  { %13151 = vmatpush3.bf16.msra.mxu1 %v17126_v57 }
0x1809   :  { %13152 = vmatprep.subr.bf16.mxu1 %v18469_v48 }
0x180c   :  { %13154 = vmatpush3.bf16.msra.mxu1 %v17132_v6 }
0x180d   :  { %13155 = vmatprep.subr.bf16.mxu1 %v18469_v48 }
0x1810   :  { %13157 = vmatpush3.bf16.msra.mxu1 %v17138_v37 }
0x1811   :  { %13158 = vmatprep.subr.bf16.mxu1 %v18469_v48 }
0x1814   :  { %13160 = vmatpush3.bf16.msra.mxu1 %v17144_v23 }
0x1815   :  { %13161 = vmatprep.subr.bf16.mxu1 %v18469_v48 }
0x1818   :  { %13163 = vmatpush3.bf16.msra.mxu1 %v17150_v42 }
0x1819   :  { %13164 = vmatprep.subr.bf16.mxu1 %v18469_v48 }
0x181c   :  { %13166 = vmatpush3.bf16.msra.mxu1 %v17156_v45 }
0x181d   :  { %13191 = vmatprep.subr.bf16.mxu1 %v18469_v48 }
0x181f   :  { %10727 = vmatmul.mubr.f32.vlgmr.msra.gmra.mrb[88].mxu1 %v17063_v34 }
0x1820   :  { %13193 = vmatpush3.bf16.msra.mxu1 %v17105_v58  ;;  %10796 = vmatprep.mubr.msk.f32.mxu1 %vm14537_vm5, %v17887_v33  ;;  %v18474_v58 = vld [vmem:[#allocation123_spill] sm:$0xff] }
0x1821   :  { %13194 = vmatprep.subr.bf16.mxu1 %v18469_v48 }
0x1824   :  { %13196 = vmatpush3.bf16.msra.mxu1 %v17116_v59 }
0x1825   :  { %13197 = vmatprep.subr.bf16.mxu1 %v18469_v48 }
0x1828   :  { %13199 = vmatpush3.bf16.msra.mxu1 %v17126_v57 }
0x1829   :  { %13200 = vmatprep.subr.bf16.mxu1 %v18469_v48 }
0x182c   :  { %13202 = vmatpush3.bf16.msra.mxu1 %v17132_v6 }
0x182d   :  { %13203 = vmatprep.subr.bf16.mxu1 %v18469_v48 }
0x1830   :  { %13205 = vmatpush3.bf16.msra.mxu1 %v17138_v37 }
0x1831   :  { %13206 = vmatprep.subr.bf16.mxu1 %v18469_v48 }
0x1832   :  { %v8121_v43 = vpop.f32.mrb[76].mxu0  ;;  %v8192_v34 = vpop.f32.mrb[76].mxu1 }
0x1833   :  { %v8197_v46 = vadd.f32 %v8121_v43, %v18474_v58  ;;  %v8199_v59 = vadd.f32 %v8192_v34, %v18475_v61  ;;  %v8123_v51 = vpop.f32.mrb[77].mxu0  ;;  %v8194_v39 = vpop.f32.mrb[77].mxu1 }
0x1834   :  { %v8198_v57 = vadd.f32 %v8123_v51, %v16606_v60  ;;  %v8200_v63 = vadd.f32 %v8194_v39, %v18350_v5  ;;  %13208 = vmatpush3.bf16.msra.mxu1 %v17144_v23  ;;  %v18476_v23 = vld [vmem:[#allocation112_spill] sm:$0xff] }
0x1835   :  { %v8201_v6 = vadd.f32 %v8197_v46, %v18351_v12  ;;  %13209 = vmatprep.subr.bf16.mxu1 %v18469_v48  ;;  %v8203_v26 = vadd.f32 %v8199_v59, %v18476_v23 }
0x1836   :  { %v8202_v37 = vadd.f32 %v8198_v57, %v18352_v11  ;;  %v8204_v60 = vadd.f32 %v8200_v63, %v18353_v13 }
0x1837   :  { %v9688_v27 = vmul.f32 -1.442695, %v8201_v6 }
0x1838   :  { %v9689_v28 = vmul.f32 -1.442695, %v8202_v37  ;;  %13211 = vmatpush3.bf16.msra.mxu1 %v17150_v42  ;;  %v9690_v5 = vmul.f32 -1.442695, %v8204_v60 }
0x1839   :  { %13956 = vpow2.f32 %v9688_v27  ;;  %13212 = vmatprep.subr.bf16.mxu1 %v18469_v48 }
0x183a   :  { %13958 = vpow2.f32 %v9689_v28 }
0x183b   :  { %13960 = vpow2.f32 %v9690_v5  ;;  %v18477_v5 = vld [vmem:[#allocation122_spill] sm:$0xff] }
0x183c   :  { %13214 = vmatpush3.bf16.msra.mxu1 %v17156_v45  ;;  %13962 = vtanh.f32 %v8203_v26 }
0x1843   :  { %v13957_v12 = vpop.eup %13956 }
0x1844   :  { %v13959_v53 = vpop.eup %13958  ;;  %v8208_v0 = vadd.f32 1.0, %v13957_v12  ;;  %v18478_v12 = vld [vmem:[#allocation99_spill] sm:$0xff] }
0x1845   :  { %v8214_v11 = vadd.f32 1.0, %v13959_v53  ;;  %v13961_v42 = vpop.eup %13960 }
0x1846   :  { %13964 = vrcp.f32 %v8208_v0  ;;  %v13963_v20 = vpop.eup %13962  ;;  %v8221_v36 = vadd.f32 1.0, %v13961_v42  ;;  %v17428_v42 = vld [vmem:[%s14709_s29] ss:$0 sm:$0xff]  ;;  %s14539_s29 = smov [#allocation32]  }
0x1847   :  { %13966 = vrcp.f32 %v8214_v11  ;;  %v18479_v11 = vld [vmem:[#allocation116_spill] sm:$0xff]  ;;  %s9459_s7 = sshll.u32 %s14539_s29, 4  ;;  %s9460_s7 = int_to_ptr.vmem [resolvable:$true] %s9459_s7 }
0x1848   :  { %13968 = vrcp.f32 %v8221_v36  ;;  %s14406_s18 = scalar_lea.vmem %s9460_s7, 32  ;;  %p14411_p13 = scmp.lt.s32.totalorder %s9460_s7, %s9460_s7 }
0x1849   :  { %p14407_p12 = scmp.ne.s32.totalorder %s9460_s7, %s14406_s18  ;;  %p14412_p0 = scmp.lt.s32.totalorder %s14406_s18, %s14406_s18 }
0x184b   :  { %p14413_p1 = por %p14412_p0, %p14411_p13 }
0x184d   :  { %p14414_p2 = pnand %p14413_p1, %p14407_p12 }
0x1850   :  { %v13965_v8 = vpop.eup %13964 }
0x1851   :  { %v13967_v9 = vpop.eup %13966  ;;  %v8225_v55 = vmul.f32 %v13965_v8, %v13963_v20  ;;  %v18481_v20 = vld [vmem:[#allocation131_spill] sm:$0xff] }
0x1852   :  { %v8224_v13 = vmul.f32 %v13967_v9, %v17054_v41  ;;  %v8295_v45 = vpop.f32.mrb[78].mxu0  ;;  %v8366_v38 = vpop.f32.mrb[78].mxu1 }
0x1853   :  { %v8371_v22 = vadd.f32 %v8295_v45, %v16610_v50  ;;  %v8373_v62 = vadd.f32 %v8366_v38, %v16612_v17  ;;  %v8297_v31 = vpop.f32.mrb[79].mxu0  ;;  %v8368_v35 = vpop.f32.mrb[79].mxu1 }
0x1854   :  { %v8372_v21 = vadd.f32 %v8297_v31, %v16614_v25  ;;  %v8374_v56 = vadd.f32 %v8368_v35, %v16616_v3  ;;  %v8226_v19 = vadd.f32 %v8225_v55, %v8224_v13  ;;  %v13969_v17 = vpop.eup %13968 }
0x1855   :  { %v8375_v2 = vadd.f32 %v8371_v22, %v16640_v7  ;;  %v8377_v25 = vadd.f32 %v8373_v62, %v16660_v32 }
0x1856   :  { %v8376_v44 = vadd.f32 %v8372_v21, %v16644_v40  ;;  %13970 = vtanh.f32 %v8226_v19  ;;  %v8378_v50 = vadd.f32 %v8374_v56, %v16656_v47 }
0x1857   :  { %v9691_v41 = vmul.f32 -1.442695, %v8375_v2 }
0x1858   :  { %v9692_v52 = vmul.f32 -1.442695, %v8376_v44  ;;  %v9693_v54 = vmul.f32 -1.442695, %v8378_v50 }
0x1859   :  { %13972 = vpow2.f32 %v9691_v41 }
0x185a   :  { %13974 = vpow2.f32 %v9692_v52 }
0x185b   :  { %13976 = vpow2.f32 %v9693_v54 }
0x185c   :  { %13978 = vtanh.f32 %v8377_v25 }
0x1860   :  { %v13971_v29 = vpop.eup %13970 }
0x1861   :  { %v8228_v43 = vmul.f32 %v13971_v29, %v13969_v17 }
0x1863   :  { %v13973_v3 = vpop.eup %13972  ;;  %10797 = vmatmul.mubr.f32.vlgmr.msra.gmra.mrb[90].mxu1 %v8228_v43 }
0x1864   :  { %v13975_v34 = vpop.eup %13974  ;;  %v8382_v58 = vadd.f32 1.0, %v13973_v3 }
0x1865   :  { %v8388_v7 = vadd.f32 1.0, %v13975_v34  ;;  %v13977_v40 = vpop.eup %13976 }
0x1866   :  { %13980 = vrcp.f32 %v8382_v58  ;;  %v13979_v46 = vpop.eup %13978  ;;  %v8395_v51 = vadd.f32 1.0, %v13977_v40 }
0x1867   :  { %13982 = vrcp.f32 %v8388_v7 }
0x1868   :  { %13984 = vrcp.f32 %v8395_v51 }
0x1870   :  { %v13981_v61 = vpop.eup %13980 }
0x1871   :  { %v13983_v59 = vpop.eup %13982  ;;  %v8399_v47 = vmul.f32 %v13981_v61, %v13979_v46 }
0x1872   :  { %v8398_v39 = vmul.f32 %v13983_v59, %v17086_v4  ;;  %v17321_v57 = vpop.f32.mrb[80].mxu1  ;;  %v13985_v6 = vpop.eup %13984 }
0x1873   :  { %v10448_v32 = vpop.f32.mrb[81].mxu1 }
0x1874   :  { %v8400_v63 = vadd.f32 %v8399_v47, %v8398_v39 }
0x1876   :  { %13986 = vtanh.f32 %v8400_v63 }
0x1880   :  { %v13987_v37 = vpop.eup %13986 }
0x1881   :  { %v8402_v27 = vmul.f32 %v13987_v37, %v13985_v6 }
0x1883   :  { %10412 = vmatmul.mubr.f32.vlgmr.msra.gmra.mrb[80].mxu0 %v8402_v27 }
0x1884   :  { %12977 = vmatpush3.bf16.msra.mxu0 %v17206_v15  ;;  %10481 = vmatprep.mubr.msk.f32.mxu0 %vm14537_vm5, %v17887_v33 }
0x1885   :  { %12978 = vmatprep.subr.bf16.mxu0 %v18469_v48 }
0x1888   :  { %12980 = vmatpush3.bf16.msra.mxu0 %v17214_v1 }
0x1889   :  { %12981 = vmatprep.subr.bf16.mxu0 %v18469_v48 }
0x188c   :  { %12983 = vmatpush3.bf16.msra.mxu0 %v17222_v18 }
0x188d   :  { %12984 = vmatprep.subr.bf16.mxu0 %v18469_v48 }
0x1890   :  { %12986 = vmatpush3.bf16.msra.mxu0 %v17230_v49 }
0x1891   :  { %12987 = vmatprep.subr.bf16.mxu0 %v18469_v48 }
0x1892   :  { %v17333_v4 = vpop.f32.mrb[82].mxu1 }
0x1893   :  { %v10518_v28 = vpop.f32.mrb[83].mxu1 }
0x1894   :  { %12989 = vmatpush3.bf16.msra.mxu0 %v17238_v30 }
0x1895   :  { %12990 = vmatprep.subr.bf16.mxu0 %v18469_v48 }
0x1898   :  { %12992 = vmatpush3.bf16.msra.mxu0 %v17244_v16 }
0x1899   :  { %12993 = vmatprep.subr.bf16.mxu0 %v18469_v48 }
0x189c   :  { %12995 = vmatpush3.bf16.msra.mxu0 %v17252_v24 }
0x189d   :  { %12996 = vmatprep.subr.bf16.mxu0 %v18469_v48 }
0x18a0   :  { %12998 = vmatpush3.bf16.msra.mxu0 %v17262_v14 }
0x18a1   :  { %13023 = vmatprep.subr.bf16.mxu0 %v18469_v48 }
0x18a3   :  { %10482 = vmatmul.mubr.f32.vlgmr.msra.gmra.mrb[82].mxu0 %v17108_v10 }
0x18a4   :  { %13025 = vmatpush3.bf16.msra.mxu0 %v17206_v15  ;;  %10551 = vmatprep.mubr.msk.f32.mxu0 %vm14537_vm5, %v17887_v33 }
0x18a5   :  { %13026 = vmatprep.subr.bf16.mxu0 %v18469_v48 }
0x18a8   :  { %13028 = vmatpush3.bf16.msra.mxu0 %v17214_v1 }
0x18a9   :  { %13029 = vmatprep.subr.bf16.mxu0 %v18469_v48 }
0x18ac   :  { %13031 = vmatpush3.bf16.msra.mxu0 %v17222_v18 }
0x18ad   :  { %13032 = vmatprep.subr.bf16.mxu0 %v18469_v48 }
0x18b0   :  { %13034 = vmatpush3.bf16.msra.mxu0 %v17230_v49 }
0x18b1   :  { %13035 = vmatprep.subr.bf16.mxu0 %v18469_v48 }
0x18b2   :  { %v17354_v10 = vpop.f32.mrb[84].mxu1 }
0x18b3   :  { %v10588_v60 = vpop.f32.mrb[85].mxu1 }
0x18b4   :  { %13037 = vmatpush3.bf16.msra.mxu0 %v17238_v30 }
0x18b5   :  { %13038 = vmatprep.subr.bf16.mxu0 %v18469_v48 }
0x18b8   :  { %13040 = vmatpush3.bf16.msra.mxu0 %v17244_v16 }
0x18b9   :  { %13041 = vmatprep.subr.bf16.mxu0 %v18469_v48 }
0x18bc   :  { %13043 = vmatpush3.bf16.msra.mxu0 %v17252_v24 }
0x18bd   :  { %13044 = vmatprep.subr.bf16.mxu0 %v18469_v48 }
0x18c0   :  { %13046 = vmatpush3.bf16.msra.mxu0 %v17262_v14 }
0x18c1   :  { %13071 = vmatprep.subr.bf16.mxu0 %v18469_v48 }
0x18c3   :  { %10552 = vmatmul.mubr.f32.vlgmr.msra.gmra.mrb[84].mxu0 %v18477_v5 }
0x18c4   :  { %13073 = vmatpush3.bf16.msra.mxu0 %v17206_v15  ;;  %10621 = vmatprep.mubr.msk.f32.mxu0 %vm14537_vm5, %v17887_v33 }
0x18c5   :  { %13074 = vmatprep.subr.bf16.mxu0 %v18469_v48 }
0x18c8   :  { %13076 = vmatpush3.bf16.msra.mxu0 %v17214_v1 }
0x18c9   :  { %13077 = vmatprep.subr.bf16.mxu0 %v18469_v48 }
0x18cc   :  { %13079 = vmatpush3.bf16.msra.mxu0 %v17222_v18 }
0x18cd   :  { %13080 = vmatprep.subr.bf16.mxu0 %v18469_v48 }
0x18d0   :  { %13082 = vmatpush3.bf16.msra.mxu0 %v17230_v49 }
0x18d1   :  { %13083 = vmatprep.subr.bf16.mxu0 %v18469_v48 }
0x18d2   :  { %v17375_v23 = vpop.f32.mrb[86].mxu1 }
0x18d3   :  { %v10658_v26 = vpop.f32.mrb[87].mxu1 }
0x18d4   :  { %13085 = vmatpush3.bf16.msra.mxu0 %v17238_v30 }
0x18d5   :  { %13086 = vmatprep.subr.bf16.mxu0 %v18469_v48 }
0x18d8   :  { %13088 = vmatpush3.bf16.msra.mxu0 %v17244_v16 }
0x18d9   :  { %13089 = vmatprep.subr.bf16.mxu0 %v18469_v48 }
0x18dc   :  { %13091 = vmatpush3.bf16.msra.mxu0 %v17252_v24 }
0x18dd   :  { %13092 = vmatprep.subr.bf16.mxu0 %v18469_v48 }
0x18e0   :  { %13094 = vmatpush3.bf16.msra.mxu0 %v17262_v14 }
0x18e1   :  { %13119 = vmatprep.subr.bf16.mxu0 %v18469_v48 }
0x18e3   :  { %10622 = vmatmul.mubr.f32.vlgmr.msra.gmra.mrb[86].mxu0 %v18478_v12 }
0x18e4   :  { %13121 = vmatpush3.bf16.msra.mxu0 %v17206_v15  ;;  %10691 = vmatprep.mubr.msk.f32.mxu0 %vm14537_vm5, %v17887_v33 }
0x18e5   :  { %13122 = vmatprep.subr.bf16.mxu0 %v18469_v48 }
0x18e8   :  { %13124 = vmatpush3.bf16.msra.mxu0 %v17214_v1 }
0x18e9   :  { %13125 = vmatprep.subr.bf16.mxu0 %v18469_v48 }
0x18ec   :  { %13127 = vmatpush3.bf16.msra.mxu0 %v17222_v18 }
0x18ed   :  { %13128 = vmatprep.subr.bf16.mxu0 %v18469_v48 }
0x18f0   :  { %13130 = vmatpush3.bf16.msra.mxu0 %v17230_v49 }
0x18f1   :  { %13131 = vmatprep.subr.bf16.mxu0 %v18469_v48 }
0x18f2   :  { %v17396_v53 = vpop.f32.mrb[88].mxu1 }
0x18f3   :  { %v10728_v0 = vpop.f32.mrb[89].mxu1 }
0x18f4   :  { %13133 = vmatpush3.bf16.msra.mxu0 %v17238_v30 }
0x18f5   :  { %13134 = vmatprep.subr.bf16.mxu0 %v18469_v48 }
0x18f8   :  { %13136 = vmatpush3.bf16.msra.mxu0 %v17244_v16 }
0x18f9   :  { %13137 = vmatprep.subr.bf16.mxu0 %v18469_v48 }
0x18fc   :  { %13139 = vmatpush3.bf16.msra.mxu0 %v17252_v24 }
0x18fd   :  { %13140 = vmatprep.subr.bf16.mxu0 %v18469_v48 }
0x1900   :  { %13142 = vmatpush3.bf16.msra.mxu0 %v17262_v14 }
0x1901   :  { %13167 = vmatprep.subr.bf16.mxu0 %v18469_v48 }
0x1903   :  { %10692 = vmatmul.mubr.f32.vlgmr.msra.gmra.mrb[88].mxu0 %v18479_v11 }
0x1904   :  { %13169 = vmatpush3.bf16.msra.mxu0 %v17206_v15  ;;  %10761 = vmatprep.mubr.msk.f32.mxu0 %vm14537_vm5, %v17887_v33  ;;  %v18480_v33 = vld [vmem:[#allocation114_spill] sm:$0xff] }
0x1905   :  { %13170 = vmatprep.subr.bf16.mxu0 %v18469_v48 }
0x1908   :  { %13172 = vmatpush3.bf16.msra.mxu0 %v17214_v1 }
0x1909   :  { %13173 = vmatprep.subr.bf16.mxu0 %v18469_v48 }
0x190c   :  { %13175 = vmatpush3.bf16.msra.mxu0 %v17222_v18  ;;  %v14538_v18 = vmov 1966171168  }
0x190d   :  { %13176 = vmatprep.subr.bf16.mxu0 %v18469_v48 }
0x1910   :  { %13178 = vmatpush3.bf16.msra.mxu0 %v17230_v49  ;;  %v8585_v49 = vunpack.c.l.s4 %v14538_v18 }
0x1911   :  { %13179 = vmatprep.subr.bf16.mxu0 %v18469_v48 }
0x1914   :  { %13181 = vmatpush3.bf16.msra.mxu0 %v17238_v30  ;;  %v8586_v30 = vunpack.c.0.s8 %v8585_v49 }
0x1915   :  { %13182 = vmatprep.subr.bf16.mxu0 %v18469_v48 }
0x1916   :  { %v17431_v8 = vsub.s32 %v8586_v30, %v18481_v20 }
0x1918   :  { %13184 = vmatpush3.bf16.msra.mxu0 %v17244_v16 }
0x1919   :  { %13185 = vmatprep.subr.bf16.mxu0 %v18469_v48 }
0x191c   :  { %13187 = vmatpush3.bf16.msra.mxu0 %v17252_v24 }
0x191d   :  { %13188 = vmatprep.subr.bf16.mxu0 %v18469_v48 }
0x1920   :  { %13190 = vmatpush3.bf16.msra.mxu0 %v17262_v14 }
0x1923   :  { %10762 = vmatmul.mubr.f32.vlgmr.msra.gmra.mrb[90].mxu0 %v18480_v33 }
0x1936   :  { %v17425_v15 = vpop.f32.mrb[90].mxu1 }
0x1937   :  { %v10798_v1 = vpop.f32.mrb[91].mxu1 }
0x1956   :  { %v8502_v16 = vpop.f32.mrb[80].mxu0 }
0x1957   :  { %v8573_v48 = vadd.f32 %v17321_v57, %v8502_v16  ;;  %v10413_v24 = vpop.f32.mrb[81].mxu0 }
0x1959   :  { %v8582_v14 = vadd.f32 %v17428_v42, %v8573_v48 }
0x195b   :  { %v8590_v9 = vrot.slane %v8582_v14, %v17431_v8 }
0x195d   :  { %v8591_v55 = vcombine.high %v8590_v9, %v8590_v9  ;;  %v8598_v36 = vrot.slane %v8590_v9, %v17431_v8 }
0x195f   :  { %v8605_v13 = vrot.slane %v8591_v55, %v17431_v8  ;;  %8609 = vst.msk [vmem:[%s14714_s9] sm:$0x1] %vm8608_vm8, %v8598_v36 }
0x1961   :  { %8610 = vst.msk [vmem:[%s14714_s9 + $0x8] sm:$0x1] %vm8608_vm8, %v8605_v13 }
0x1976   :  { %v8677_v45 = vpop.f32.mrb[82].mxu0 }
0x1977   :  { %v8748_v38 = vadd.f32 %v17333_v4, %v8677_v45  ;;  %v10483_v22 = vpop.f32.mrb[83].mxu0 }
0x1979   :  { %v8751_v62 = vadd.f32 %v17428_v42, %v8748_v38 }
0x197b   :  { %v8759_v31 = vrot.slane %v8751_v62, %v17431_v8 }
0x197d   :  { %v8760_v35 = vcombine.high %v8759_v31, %v8759_v31  ;;  %v8767_v21 = vrot.slane %v8759_v31, %v17431_v8 }
0x197f   :  { %v8774_v56 = vrot.slane %v8760_v35, %v17431_v8  ;;  %8777 = vst.msk [vmem:[%s14714_s9 + $0x1] sm:$0x1] %vm8608_vm8, %v8767_v21 }
0x1981   :  { %8778 = vst.msk [vmem:[%s14714_s9 + $0x9] sm:$0x1] %vm8608_vm8, %v8774_v56 }
0x1982   :  { %14417 = shalt.err (!%p14414_p2)
}
0x1983   :  { %s14418_s13 = scalar_lea.hbm %s14719_s25, 32 }
0x1984   :  { %p14419_p3 = scmp.ne.s32.totalorder %s14719_s25, %s14418_s13  ;;  %p14422_p4 = scmp.lt.u32.totalorder %s14418_s13, %s14719_s25 }
0x1986   :  { %p14424_p5 = pnand %p14422_p4, %p14419_p3 }
0x1988   :  { %14427 = shalt.err (!%p14424_p5)
}
0x1989   :  { %9462 = dma.vmem_to_hbm [thread:$0]  %s9460_s7, 32, %s14719_s25, [#allocation4]  }
0x198a   :  { %s14428_s16 = scalar_lea.vmem %s9470_s15, 32  ;;  %p14433_p7 = scmp.lt.s32.totalorder %s9470_s15, %s9470_s15 }
0x198b   :  { %p14429_p6 = scmp.ne.s32.totalorder %s9470_s15, %s14428_s16  ;;  %p14434_p8 = scmp.lt.s32.totalorder %s14428_s16, %s14428_s16 }
0x198d   :  { %p14435_p9 = por %p14434_p8, %p14433_p7 }
0x198f   :  { %p14436_p10 = pnand %p14435_p9, %p14429_p6 }
0x1991   :  { %14439 = shalt.err (!%p14436_p10)
}
0x1992   :  { %s14440_s14 = scalar_lea.hbm %s14724_s27, 32 }
0x1993   :  { %p14441_p11 = scmp.ne.s32.totalorder %s14724_s27, %s14440_s14  ;;  %p14444_p12 = scmp.lt.u32.totalorder %s14440_s14, %s14724_s27 }
0x1995   :  { %p14446_p13 = pnand %p14444_p12, %p14441_p11 }
0x1997   :  { %14449 = shalt.err (!%p14446_p13)
}
0x1998   :  { %9472 = dma.vmem_to_hbm [thread:$0]  %s9470_s15, 32, %s14724_s27, [#allocation34]   ;;  %v8845_v19 = vpop.f32.mrb[84].mxu0 }
0x1999   :  { %v8916_v2 = vadd.f32 %v17354_v10, %v8845_v19  ;;  %v10553_v44 = vpop.f32.mrb[85].mxu0 }
0x199b   :  { %v8919_v41 = vadd.f32 %v17428_v42, %v8916_v2 }
0x199d   :  { %v8927_v52 = vrot.slane %v8919_v41, %v17431_v8 }
0x199f   :  { %v8928_v50 = vcombine.high %v8927_v52, %v8927_v52  ;;  %v8935_v17 = vrot.slane %v8927_v52, %v17431_v8 }
0x19a1   :  { %v8942_v29 = vrot.slane %v8928_v50, %v17431_v8  ;;  %8945 = vst.msk [vmem:[%s14714_s9 + $0x2] sm:$0x1] %vm8608_vm8, %v8935_v17 }
0x19a3   :  { %8946 = vst.msk [vmem:[%s14714_s9 + $0xa] sm:$0x1] %vm8608_vm8, %v8942_v29 }
0x19b6   :  { %v9013_v54 = vpop.f32.mrb[86].mxu0 }
0x19b7   :  { %v9084_v25 = vadd.f32 %v17375_v23, %v9013_v54  ;;  %v10623_v43 = vpop.f32.mrb[87].mxu0 }
0x19b9   :  { %v9087_v3 = vadd.f32 %v17428_v42, %v9084_v25 }
0x19bb   :  { %v9095_v34 = vrot.slane %v9087_v3, %v17431_v8 }
0x19bd   :  { %v9096_v58 = vcombine.high %v9095_v34, %v9095_v34  ;;  %v9103_v7 = vrot.slane %v9095_v34, %v17431_v8 }
0x19bf   :  { %v9110_v40 = vrot.slane %v9096_v58, %v17431_v8  ;;  %9113 = vst.msk [vmem:[%s14714_s9 + $0x3] sm:$0x1] %vm8608_vm8, %v9103_v7 }
0x19c1   :  { %9114 = vst.msk [vmem:[%s14714_s9 + $0xb] sm:$0x1] %vm8608_vm8, %v9110_v40 }
0x19d6   :  { %v9181_v46 = vpop.f32.mrb[88].mxu0 }
0x19d7   :  { %v9252_v61 = vadd.f32 %v17396_v53, %v9181_v46  ;;  %v10693_v59 = vpop.f32.mrb[89].mxu0 }
0x19d9   :  { %v9255_v47 = vadd.f32 %v17428_v42, %v9252_v61 }
0x19db   :  { %v9263_v51 = vrot.slane %v9255_v47, %v17431_v8 }
0x19dd   :  { %v9264_v39 = vcombine.high %v9263_v51, %v9263_v51  ;;  %v9271_v57 = vrot.slane %v9263_v51, %v17431_v8 }
0x19df   :  { %v9278_v32 = vrot.slane %v9264_v39, %v17431_v8  ;;  %9281 = vst.msk [vmem:[%s14714_s9 + $0x4] sm:$0x1] %vm8608_vm8, %v9271_v57 }
0x19e1   :  { %9282 = vst.msk [vmem:[%s14714_s9 + $0xc] sm:$0x1] %vm8608_vm8, %v9278_v32 }
0x19f6   :  { %v9349_v63 = vpop.f32.mrb[90].mxu0 }
0x19f7   :  { %v9420_v6 = vadd.f32 %v17425_v15, %v9349_v63  ;;  %v10763_v37 = vpop.f32.mrb[91].mxu0 }
0x19f9   :  { %v9423_v27 = vadd.f32 %v17428_v42, %v9420_v6 }
0x19fb   :  { %v9431_v4 = vrot.slane %v9423_v27, %v17431_v8 }
0x19fd   :  { %v9432_v28 = vcombine.high %v9431_v4, %v9431_v4  ;;  %v9439_v10 = vrot.slane %v9431_v4, %v17431_v8 }
0x19ff   :  { %v9446_v60 = vrot.slane %v9432_v28, %v17431_v8  ;;  %9449 = vst.msk [vmem:[%s14714_s9 + $0x5] sm:$0x1] %vm8608_vm8, %v9439_v10 }
0x1a01   :  { %9450 = vst.msk [vmem:[%s14714_s9 + $0xd] sm:$0x1] %vm8608_vm8, %v9446_v60 }
0x1a02   :  { %14470 = dma.done.wait [#allocation4], 32  }
0x1a03   :  { %14471 = vsyncadd [#allocation4], 4294967264 }
0x1a04   :  { %14472 = dma.done.wait [#allocation34], 32  }
0x1a05   :  { %14473 = vsyncadd [#allocation34], 4294967264 }
0x1a06   :  { %9481 = vsyncpa [#allocation3], 1 }
0x1a07   :  { %9482 = vsyncpa [#allocation6], 1 }
0x1a08   :  { %9483 = vsyncpa [#allocation9], 1 }
0x1a09   :  { %9484 = vsyncpa [#allocation12], 1 }
0x1a0a   :  { %9485 = vsyncpa [#allocation15], 1 }
0x1a0b   :  { %9486 = vsyncpa [#allocation18], 1 }
0x1a0c   :  { %9487 = vsyncpa [#allocation21], 1 }
0x1a0d   :  { %9488 = vsyncpa [#allocation24], 1 }
0x1a0e   :  { %9489 = vsyncpa [#allocation27], 1 }
0x1a0f   :  { %9490 = vsyncpa [#allocation30], 1 }
0x1a10   :  { %9491 = vsyncpa [#allocation4], 1 }
0x1a11   :  { %9492 = vsyncpa [#allocation34], 1 }

</bundles_post_ra>
